<compile_context>
chip_gen: v7x
topology: tpu7x:2x2x1
jax: 0.10.0
libtpu: 0.0.40
codegen_flags: <defaults>
</compile_context>

<pallas_src>
import jax
import jax.numpy as jnp
from jax.experimental import pallas as pl
from jax.experimental.pallas import tpu as pltpu

_LANE = 128
_SUBLANE = 8


def _round_up(x, m):
    return ((x + m - 1) // m) * m


# ----------------------------- Pallas kernels ------------------------------
# bf16 operands feed the MXU; accumulate + epilogue in f32; bf16 store.

def _mm_bias_relu_kernel(x_ref, w_ref, b_ref, o_ref):
    acc = jnp.dot(x_ref[...], w_ref[...], preferred_element_type=jnp.float32)
    o_ref[...] = jnp.maximum(acc + b_ref[...], 0.0).astype(o_ref.dtype)


def _mm_bias_kernel(x_ref, w_ref, b_ref, o_ref):
    acc = jnp.dot(x_ref[...], w_ref[...], preferred_element_type=jnp.float32)
    o_ref[...] = (acc + b_ref[...]).astype(o_ref.dtype)


def _mm_bias_add_relu_kernel(x_ref, w_ref, b_ref, r_ref, o_ref):
    # fused conv + folded-BN shift + residual add + ReLU (bottleneck c3 epilogue).
    # NOTE: always applies ReLU — only used for the bottleneck c3 path.
    acc = jnp.dot(x_ref[...], w_ref[...], preferred_element_type=jnp.float32)
    acc = acc + b_ref[...] + r_ref[...].astype(jnp.float32)
    o_ref[...] = jnp.maximum(acc, 0.0).astype(o_ref.dtype)


# ------------------------------ fused matmul wrapper ------------------------

def _choose_bm(m):
    """M tile: <=512 rows, multiple of 8, and >=2 blocks when possible (v7x 2 TCs)."""
    if m <= _SUBLANE:
        return _SUBLANE
    return min(512, _round_up(pl.cdiv(m, 2), _SUBLANE))


def _matmul_epilogue(x2d_bf16, w2d_bf16, shift_f32, residual2d_bf16, relu):
    """y_bf16 = epilogue(x2d @ w2d); grid tiled over M only, weight block resident."""
    m, k = x2d_bf16.shape
    cout = w2d_bf16.shape[1]
    bm = _choose_bm(m)
    gm = pl.cdiv(m, bm)
    m_pad = gm * bm
    if m_pad != m:
        x2d_bf16 = jnp.pad(x2d_bf16, ((0, m_pad - m), (0, 0)))
        if residual2d_bf16 is not None:
            residual2d_bf16 = jnp.pad(residual2d_bf16, ((0, m_pad - m), (0, 0)))

    in_specs = [
        pl.BlockSpec((bm, k), lambda i: (i, 0)),        # activation rows (bf16)
        pl.BlockSpec((k, cout), lambda i: (0, 0)),      # weights: fetched once, VMEM-resident
        pl.BlockSpec((1, cout), lambda i: (0, 0)),      # folded-BN shift (f32)
    ]
    args = [x2d_bf16, w2d_bf16, shift_f32.reshape(1, cout)]

    bytes_accessed = 2 * (m_pad * k + k * cout + m_pad * cout) + 4 * cout
    if residual2d_bf16 is not None:
        kernel = _mm_bias_add_relu_kernel
        in_specs.append(pl.BlockSpec((bm, cout), lambda i: (i, 0)))
        args.append(residual2d_bf16)
        bytes_accessed += 2 * m_pad * cout
    else:
        kernel = _mm_bias_relu_kernel if relu else _mm_bias_kernel

    y = pl.pallas_call(
        kernel,
        out_shape=jax.ShapeDtypeStruct((m_pad, cout), jnp.bfloat16),
        grid=(gm,),
        in_specs=in_specs,
        out_specs=pl.BlockSpec((bm, cout), lambda i: (i, 0)),
        compiler_params=pltpu.CompilerParams(
            dimension_semantics=("parallel",),
            vmem_limit_bytes=32 * 1024 * 1024),  # sized for v7x's 64 MiB/TC
        cost_estimate=pl.CostEstimate(
            flops=2 * m_pad * k * cout,
            transcendentals=0,
            bytes_accessed=bytes_accessed),
    )(*args)
    return y[:m] if m_pad != m else y


# ------------------------------ conv building block ------------------------

def _extract_patches(x, kh, kw, stride, dilation, padding):
    """im2col glue (NHWC, bf16). Returns [N, OH, OW, KH*KW*C], OH, OW."""
    n, h, w, c = x.shape
    xp = jnp.pad(x, ((0, 0), (padding, padding), (padding, padding), (0, 0)))
    hp, wp = h + 2 * padding, w + 2 * padding
    oh = (hp - dilation * (kh - 1) - 1) // stride + 1
    ow = (wp - dilation * (kw - 1) - 1) // stride + 1
    cols = []
    for i in range(kh):
        for j in range(kw):
            cols.append(
                xp[:, i * dilation: i * dilation + (oh - 1) * stride + 1: stride,
                      j * dilation: j * dilation + (ow - 1) * stride + 1: stride, :])
    return jnp.concatenate(cols, axis=-1), oh, ow


def conv_bn(x, w_bf16, shift, *, stride=1, dilation=1, padding=0, relu=True,
            residual=None):
    """Conv2d (no bias) + folded BatchNorm (+ optional residual add) (+ ReLU).

    NHWC bf16 in/out.  w_bf16: [KH,KW,Cin,Cout] (BN scale folded, lane-padded),
    shift: [Cout] f32.  If `residual` is given, computes relu(conv + shift + residual).
    """
    kh, kw, cin_w, cout = w_bf16.shape
    n = x.shape[0]
    if kh == 1 and kw == 1 and padding == 0:
        # 1x1 conv: no im2col, just (optionally strided) reshape; weight cin is
        # already padded to match the (possibly lane-padded) activation channels.
        xs = x[:, ::stride, ::stride, :] if stride > 1 else x
        oh, ow = xs.shape[1], xs.shape[2]
        x2d = xs.reshape(n * oh * ow, xs.shape[3])
    else:
        # 3x3 conv: drop any zero lane-padding channels BEFORE im2col so the HBM
        # patch tensor keeps the real K (padded channels are exactly zero).
        xs = x[..., :cin_w] if x.shape[-1] != cin_w else x
        patches, oh, ow = _extract_patches(xs, kh, kw, stride, dilation, padding)
        x2d = patches.reshape(n * oh * ow, kh * kw * cin_w)
    w2d = w_bf16.reshape(w_bf16.shape[0] * w_bf16.shape[1] * cin_w, cout)
    r2d = None
    if residual is not None:
        r2d = residual.reshape(n * oh * ow, residual.shape[-1])
    y2d = _matmul_epilogue(x2d, w2d, shift, r2d, relu)
    return y2d.reshape(n, oh, ow, cout)


def maxpool_3x3_s2p1(x):
    """MaxPool2d(kernel_size=3, stride=2, padding=1), NHWC bf16.  Pure XLA max
    tree (no 9x stacked HBM tensor, no extra kernel launch)."""
    n, h, w, c = x.shape
    xp = jnp.pad(x, ((0, 0), (1, 1), (1, 1), (0, 0)), constant_values=-jnp.inf)
    oh = (h + 2 - 3) // 2 + 1
    ow = (w + 2 - 3) // 2 + 1
    out = None
    for i in range(3):
        for j in range(3):
            sl = xp[:, i: i + (oh - 1) * 2 + 1: 2,
                       j: j + (ow - 1) * 2 + 1: 2, :]
            out = sl if out is None else jnp.maximum(out, sl)
    return out


# ------------------------------ ResNet structure ---------------------------

def bottleneck(x, bp, *, stride, dilation):
    """ResNet Bottleneck (expansion=4); stride/dilation on conv2 (torchvision style).
    Residual add + ReLU is fused into the c3 matmul kernel."""
    out = conv_bn(x, *bp["c1"], stride=1, dilation=1, padding=0, relu=True)
    out = conv_bn(out, *bp["c2"], stride=stride, dilation=dilation,
                  padding=dilation, relu=True)
    if "down" in bp:
        identity = conv_bn(x, *bp["down"], stride=stride, dilation=1, padding=0,
                           relu=False)
    else:
        identity = x
    return conv_bn(out, *bp["c3"], stride=1, dilation=1, padding=0, relu=True,
                   residual=identity)


def run_layer(x, blocks, *, first_stride, dilation):
    for i, bp in enumerate(blocks):
        stride = first_stride if i == 0 else 1
        x = bottleneck(x, bp, stride=stride, dilation=dilation)
    return x


@jax.jit
def encoder_forward(x_nchw, params):
    """Mirrors Encoder.forward: returns (l3, l3, l2, l1), all NCHW f32."""
    x = jnp.transpose(x_nchw, (0, 2, 3, 1)).astype(jnp.bfloat16)  # -> NHWC bf16
    # layer0: deep stem (conv1/bn1/relu, conv2/bn2/relu, conv3/bn3/relu, maxpool)
    for i, (w, b) in enumerate(params["stem"]):
        x = conv_bn(x, w, b, stride=(2 if i == 0 else 1), dilation=1, padding=1,
                    relu=True)
    x = maxpool_3x3_s2p1(x)
    l1 = run_layer(x, params["layer1"], first_stride=1, dilation=1)
    l2 = run_layer(l1, params["layer2"], first_stride=2, dilation=1)
    # layer3 modification: conv2 -> dilation 2, padding 2, stride 1; downsample stride 1
    l3 = run_layer(l2, params["layer3"], first_stride=1, dilation=2)
    to_nchw = lambda t: jnp.transpose(t, (0, 3, 1, 2)).astype(jnp.float32)
    return to_nchw(l3), to_nchw(l3), to_nchw(l2), to_nchw(l1)


# ------------------------------ deterministic init -------------------------

def _init_conv_bn(key, kh, kw, cin, cout):
    kw_, ks_, kb_ = jax.random.split(key, 3)
    fan_in = kh * kw * cin
    w = jax.random.normal(kw_, (kh, kw, cin, cout), jnp.float32) * jnp.sqrt(2.0 / fan_in)
    scale = 0.3 + 0.4 * jax.random.uniform(ks_, (cout,), jnp.float32)   # folded gamma/sqrt(var+eps)
    shift = 0.01 * jax.random.normal(kb_, (cout,), jnp.float32)         # folded beta - mean*scale
    return (w, scale, shift)


def _init_bottleneck(key, inplanes, planes, has_down):
    k1, k2, k3, k4 = jax.random.split(key, 4)
    bp = {
        "c1": _init_conv_bn(k1, 1, 1, inplanes, planes),
        "c2": _init_conv_bn(k2, 3, 3, planes, planes),
        "c3": _init_conv_bn(k3, 1, 1, planes, planes * 4),
    }
    if has_down:
        bp["down"] = _init_conv_bn(k4, 1, 1, inplanes, planes * 4)
    return bp


def _init_layer(key, inplanes, planes, num_blocks):
    keys = jax.random.split(key, num_blocks)
    blocks = []
    for i in range(num_blocks):
        inpl = inplanes if i == 0 else planes * 4
        blocks.append(_init_bottleneck(keys[i], inpl, planes, has_down=(i == 0)))
    return blocks


def init_encoder_params(key):
    k0, k1, k2, k3, k4, k5 = jax.random.split(key, 6)
    stem = [
        _init_conv_bn(k0, 3, 3, 3, 32),    # conv1: 3x3 stride 2
        _init_conv_bn(k1, 3, 3, 32, 32),   # conv2: 3x3 stride 1
        _init_conv_bn(k2, 3, 3, 32, 64),   # conv3: 3x3 stride 1
    ]
    return {
        "stem": stem,
        "layer1": _init_layer(k3, 64, 64, 3),     # -> 256 channels
        "layer2": _init_layer(k4, 256, 128, 4),   # -> 512 channels, /2 spatial
        "layer3": _init_layer(k5, 512, 256, 6),   # -> 1024 channels, dilated (no /2)
    }


def _fold_one(cb, in_ch_actual):
    """Fold BN scale into weight (bf16); lane-pad Cout<128 with zero columns/shift;
    for 1x1 convs also pad Cin with zero rows to match the producer's padded width."""
    w, scale, shift = cb
    kh, kw, cin, cout = w.shape
    w = w * scale.reshape(1, 1, 1, cout)
    cout_p = cout if cout >= _LANE else _LANE
    if cout_p > cout:
        w = jnp.pad(w, ((0, 0), (0, 0), (0, 0), (0, cout_p - cout)))
        shift = jnp.pad(shift, (0, cout_p - cout))
    if kh == 1 and kw == 1 and in_ch_actual > cin:
        w = jnp.pad(w, ((0, 0), (0, 0), (0, in_ch_actual - cin), (0, 0)))
    return (w.astype(jnp.bfloat16), shift.astype(jnp.float32))


def fold_bn_params(params):
    """One-time transform: fold BN + lane-pad, tracking actual channel widths."""
    out = {}
    ch = 3  # network input channels (image)
    stem = []
    for cb in params["stem"]:
        f = _fold_one(cb, ch)
        stem.append(f)
        ch = f[0].shape[-1]
    out["stem"] = stem
    for name in ("layer1", "layer2", "layer3"):
        blocks = []
        for bp in params[name]:
            in_ch = ch
            c1 = _fold_one(bp["c1"], in_ch)
            c2 = _fold_one(bp["c2"], c1[0].shape[-1])
            c3 = _fold_one(bp["c3"], c2[0].shape[-1])
            nb = {"c1": c1, "c2": c2, "c3": c3}
            if "down" in bp:
                nb["down"] = _fold_one(bp["down"], in_ch)
            blocks.append(nb)
            ch = c3[0].shape[-1]
        out[name] = blocks
    return out


# ------------------------------ main ---------------------------------------

if __name__ == "__main__":
    key = jax.random.PRNGKey(0)
    pkey, xkey = jax.random.split(key)
    params = fold_bn_params(init_encoder_params(pkey))

    # small NCHW image input (batch=2, 3 channels, 32x32)
    x = jax.random.normal(xkey, (2, 3, 32, 32), jnp.float32)

    l3a, l3b, l2, l1 = encoder_forward(x, params)
    jax.block_until_ready((l3a, l3b, l2, l1))

    assert l1.shape == (2, 256, 8, 8), l1.shape
    assert l2.shape == (2, 512, 4, 4), l2.shape
    assert l3a.shape == (2, 1024, 4, 4) and l3b.shape == (2, 1024, 4, 4), l3a.shape
    assert bool(jnp.isfinite(l3a).all()) and bool(jnp.isfinite(l1).all())

    print("KERNEL_OK")
</pallas_src>

<mosaic_0001>
module attributes {stable_mosaic.version = 11 : i64} {
  func.func @_mm_bias_relu_kernel(%arg0: i32, %arg1: memref<256x27xbf16, #tpu.memory_space<vmem>>, %arg2: memref<27x128xbf16, #tpu.memory_space<vmem>>, %arg3: memref<1x128xf32, #tpu.memory_space<vmem>>, %arg4: memref<256x128xbf16, #tpu.memory_space<vmem>>) attributes {dimension_semantics = [#tpu.dimension_semantics<parallel>], iteration_bounds = array<i64: 2>, scalar_prefetch = 0 : i64, scratch_operands = 0 : i64, tpu.core_type = #tpu.core_type<tc>, window_params = [{transform_indices = @transform_0, window_bounds = array<i64: 256, 27>}, {pipeline_mode = #tpu.pipeline_mode<synchronous>, transform_indices = @transform_1, window_bounds = array<i64: 27, 128>}, {pipeline_mode = #tpu.pipeline_mode<synchronous>, transform_indices = @transform_2, window_bounds = array<i64: 1, 128>}, {transform_indices = @transform_3, window_bounds = array<i64: 256, 128>}]} {
    %c0 = arith.constant 0 : index
    %c0_0 = arith.constant 0 : index
    %0 = vector.load %arg1[%c0, %c0_0] : memref<256x27xbf16, #tpu.memory_space<vmem>>, vector<256x27xbf16>
    %c0_1 = arith.constant 0 : index
    %c0_2 = arith.constant 0 : index
    %1 = vector.load %arg2[%c0_1, %c0_2] : memref<27x128xbf16, #tpu.memory_space<vmem>>, vector<27x128xbf16>
    %cst = arith.constant dense<0.000000e+00> : vector<256x128xf32>
    %2 = tpu.matmul %0, %1, %cst {dimension_numbers = #tpu.dot_dimension_numbers<[1], [0], [0], [1], [0, 0, 1, 1], [], []>} : vector<256x27xbf16>, vector<27x128xbf16>, vector<256x128xf32> -> vector<256x128xf32>
    %c0_3 = arith.constant 0 : index
    %c0_4 = arith.constant 0 : index
    %3 = vector.load %arg3[%c0_3, %c0_4] : memref<1x128xf32, #tpu.memory_space<vmem>>, vector<1x128xf32>
    %4 = vector.broadcast %3 : vector<1x128xf32> to vector<256x128xf32>
    %5 = arith.addf %2, %4 : vector<256x128xf32>
    %cst_5 = arith.constant 0.000000e+00 : f32
    %6 = vector.broadcast %cst_5 : f32 to vector<256x128xf32>
    %7 = arith.maximumf %5, %6 : vector<256x128xf32>
    %8 = arith.truncf %7 : vector<256x128xf32> to vector<256x128xbf16>
    %c0_6 = arith.constant 0 : index
    %c0_7 = arith.constant 0 : index
    %9 = vector.load %arg4[%c0_6, %c0_7] : memref<256x128xbf16, #tpu.memory_space<vmem>>, vector<256x128xbf16>
    tpu.vector_store %arg4[%c0_6, %c0_7], %8 {strides = array<i32>} : memref<256x128xbf16, #tpu.memory_space<vmem>>, vector<256x128xbf16>,
    return
  }
  func.func @transform_0(%arg0: i32) -> (i32, i32) {
    %c0_i32 = arith.constant 0 : i32
    %c0_i32_0 = arith.constant 0 : i32
    return %arg0, %c0_i32 : i32, i32
  }
  func.func @transform_1(%arg0: i32) -> (i32, i32) {
    %c0_i32 = arith.constant 0 : i32
    %c0_i32_0 = arith.constant 0 : i32
    %c0_i32_1 = arith.constant 0 : i32
    return %c0_i32, %c0_i32_0 : i32, i32
  }
  func.func @transform_2(%arg0: i32) -> (i32, i32) {
    %c0_i32 = arith.constant 0 : i32
    %c0_i32_0 = arith.constant 0 : i32
    %c0_i32_1 = arith.constant 0 : i32
    return %c0_i32, %c0_i32_0 : i32, i32
  }
  func.func @transform_3(%arg0: i32) -> (i32, i32) {
    %c0_i32 = arith.constant 0 : i32
    %c0_i32_0 = arith.constant 0 : i32
    return %arg0, %c0_i32 : i32, i32
  }
}

module attributes {stable_mosaic.version = 11 : i64} {
  func.func @_mm_bias_relu_kernel(%arg0: i32, %arg1: memref<256x288xbf16, #tpu.memory_space<vmem>>, %arg2: memref<288x128xbf16, #tpu.memory_space<vmem>>, %arg3: memref<1x128xf32, #tpu.memory_space<vmem>>, %arg4: memref<256x128xbf16, #tpu.memory_space<vmem>>) attributes {dimension_semantics = [#tpu.dimension_semantics<parallel>], iteration_bounds = array<i64: 2>, scalar_prefetch = 0 : i64, scratch_operands = 0 : i64, tpu.core_type = #tpu.core_type<tc>, window_params = [{transform_indices = @transform_0, window_bounds = array<i64: 256, 288>}, {pipeline_mode = #tpu.pipeline_mode<synchronous>, transform_indices = @transform_1, window_bounds = array<i64: 288, 128>}, {pipeline_mode = #tpu.pipeline_mode<synchronous>, transform_indices = @transform_2, window_bounds = array<i64: 1, 128>}, {transform_indices = @transform_3, window_bounds = array<i64: 256, 128>}]} {
    %c0 = arith.constant 0 : index
    %c0_0 = arith.constant 0 : index
    %0 = vector.load %arg1[%c0, %c0_0] : memref<256x288xbf16, #tpu.memory_space<vmem>>, vector<256x288xbf16>
    %c0_1 = arith.constant 0 : index
    %c0_2 = arith.constant 0 : index
    %1 = vector.load %arg2[%c0_1, %c0_2] : memref<288x128xbf16, #tpu.memory_space<vmem>>, vector<288x128xbf16>
    %cst = arith.constant dense<0.000000e+00> : vector<256x128xf32>
    %2 = tpu.matmul %0, %1, %cst {dimension_numbers = #tpu.dot_dimension_numbers<[1], [0], [0], [1], [0, 0, 1, 1], [], []>} : vector<256x288xbf16>, vector<288x128xbf16>, vector<256x128xf32> -> vector<256x128xf32>
    %c0_3 = arith.constant 0 : index
    %c0_4 = arith.constant 0 : index
    %3 = vector.load %arg3[%c0_3, %c0_4] : memref<1x128xf32, #tpu.memory_space<vmem>>, vector<1x128xf32>
    %4 = vector.broadcast %3 : vector<1x128xf32> to vector<256x128xf32>
    %5 = arith.addf %2, %4 : vector<256x128xf32>
    %cst_5 = arith.constant 0.000000e+00 : f32
    %6 = vector.broadcast %cst_5 : f32 to vector<256x128xf32>
    %7 = arith.maximumf %5, %6 : vector<256x128xf32>
    %8 = arith.truncf %7 : vector<256x128xf32> to vector<256x128xbf16>
    %c0_6 = arith.constant 0 : index
    %c0_7 = arith.constant 0 : index
    %9 = vector.load %arg4[%c0_6, %c0_7] : memref<256x128xbf16, #tpu.memory_space<vmem>>, vector<256x128xbf16>
    tpu.vector_store %arg4[%c0_6, %c0_7], %8 {strides = array<i32>} : memref<256x128xbf16, #tpu.memory_space<vmem>>, vector<256x128xbf16>,
    return
  }
  func.func @transform_0(%arg0: i32) -> (i32, i32) {
    %c0_i32 = arith.constant 0 : i32
    %c0_i32_0 = arith.constant 0 : i32
    return %arg0, %c0_i32 : i32, i32
  }
  func.func @transform_1(%arg0: i32) -> (i32, i32) {
    %c0_i32 = arith.constant 0 : i32
    %c0_i32_0 = arith.constant 0 : i32
    %c0_i32_1 = arith.constant 0 : i32
    return %c0_i32, %c0_i32_0 : i32, i32
  }
  func.func @transform_2(%arg0: i32) -> (i32, i32) {
    %c0_i32 = arith.constant 0 : i32
    %c0_i32_0 = arith.constant 0 : i32
    %c0_i32_1 = arith.constant 0 : i32
    return %c0_i32, %c0_i32_0 : i32, i32
  }
  func.func @transform_3(%arg0: i32) -> (i32, i32) {
    %c0_i32 = arith.constant 0 : i32
    %c0_i32_0 = arith.constant 0 : i32
    return %arg0, %c0_i32 : i32, i32
  }
}

module attributes {stable_mosaic.version = 11 : i64} {
  func.func @_mm_bias_relu_kernel(%arg0: i32, %arg1: memref<64x128xbf16, #tpu.memory_space<vmem>>, %arg2: memref<128x128xbf16, #tpu.memory_space<vmem>>, %arg3: memref<1x128xf32, #tpu.memory_space<vmem>>, %arg4: memref<64x128xbf16, #tpu.memory_space<vmem>>) attributes {dimension_semantics = [#tpu.dimension_semantics<parallel>], iteration_bounds = array<i64: 2>, scalar_prefetch = 0 : i64, scratch_operands = 0 : i64, tpu.core_type = #tpu.core_type<tc>, window_params = [{transform_indices = @transform_0, window_bounds = array<i64: 64, 128>}, {pipeline_mode = #tpu.pipeline_mode<synchronous>, transform_indices = @transform_1, window_bounds = array<i64: 128, 128>}, {pipeline_mode = #tpu.pipeline_mode<synchronous>, transform_indices = @transform_2, window_bounds = array<i64: 1, 128>}, {transform_indices = @transform_3, window_bounds = array<i64: 64, 128>}]} {
    %c0 = arith.constant 0 : index
    %c0_0 = arith.constant 0 : index
    %0 = vector.load %arg1[%c0, %c0_0] : memref<64x128xbf16, #tpu.memory_space<vmem>>, vector<64x128xbf16>
    %c0_1 = arith.constant 0 : index
    %c0_2 = arith.constant 0 : index
    %1 = vector.load %arg2[%c0_1, %c0_2] : memref<128x128xbf16, #tpu.memory_space<vmem>>, vector<128x128xbf16>
    %cst = arith.constant dense<0.000000e+00> : vector<64x128xf32>
    %2 = tpu.matmul %0, %1, %cst {dimension_numbers = #tpu.dot_dimension_numbers<[1], [0], [0], [1], [0, 0, 1, 1], [], []>} : vector<64x128xbf16>, vector<128x128xbf16>, vector<64x128xf32> -> vector<64x128xf32>
    %c0_3 = arith.constant 0 : index
    %c0_4 = arith.constant 0 : index
    %3 = vector.load %arg3[%c0_3, %c0_4] : memref<1x128xf32, #tpu.memory_space<vmem>>, vector<1x128xf32>
    %4 = vector.broadcast %3 : vector<1x128xf32> to vector<64x128xf32>
    %5 = arith.addf %2, %4 : vector<64x128xf32>
    %cst_5 = arith.constant 0.000000e+00 : f32
    %6 = vector.broadcast %cst_5 : f32 to vector<64x128xf32>
    %7 = arith.maximumf %5, %6 : vector<64x128xf32>
    %8 = arith.truncf %7 : vector<64x128xf32> to vector<64x128xbf16>
    %c0_6 = arith.constant 0 : index
    %c0_7 = arith.constant 0 : index
    %9 = vector.load %arg4[%c0_6, %c0_7] : memref<64x128xbf16, #tpu.memory_space<vmem>>, vector<64x128xbf16>
    tpu.vector_store %arg4[%c0_6, %c0_7], %8 {strides = array<i32>} : memref<64x128xbf16, #tpu.memory_space<vmem>>, vector<64x128xbf16>,
    return
  }
  func.func @transform_0(%arg0: i32) -> (i32, i32) {
    %c0_i32 = arith.constant 0 : i32
    %c0_i32_0 = arith.constant 0 : i32
    return %arg0, %c0_i32 : i32, i32
  }
  func.func @transform_1(%arg0: i32) -> (i32, i32) {
    %c0_i32 = arith.constant 0 : i32
    %c0_i32_0 = arith.constant 0 : i32
    %c0_i32_1 = arith.constant 0 : i32
    return %c0_i32, %c0_i32_0 : i32, i32
  }
  func.func @transform_2(%arg0: i32) -> (i32, i32) {
    %c0_i32 = arith.constant 0 : i32
    %c0_i32_0 = arith.constant 0 : i32
    %c0_i32_1 = arith.constant 0 : i32
    return %c0_i32, %c0_i32_0 : i32, i32
  }
  func.func @transform_3(%arg0: i32) -> (i32, i32) {
    %c0_i32 = arith.constant 0 : i32
    %c0_i32_0 = arith.constant 0 : i32
    return %arg0, %c0_i32 : i32, i32
  }
}

module attributes {stable_mosaic.version = 11 : i64} {
  func.func @_mm_bias_kernel(%arg0: i32, %arg1: memref<64x128xbf16, #tpu.memory_space<vmem>>, %arg2: memref<128x256xbf16, #tpu.memory_space<vmem>>, %arg3: memref<1x256xf32, #tpu.memory_space<vmem>>, %arg4: memref<64x256xbf16, #tpu.memory_space<vmem>>) attributes {dimension_semantics = [#tpu.dimension_semantics<parallel>], iteration_bounds = array<i64: 2>, scalar_prefetch = 0 : i64, scratch_operands = 0 : i64, tpu.core_type = #tpu.core_type<tc>, window_params = [{transform_indices = @transform_0, window_bounds = array<i64: 64, 128>}, {pipeline_mode = #tpu.pipeline_mode<synchronous>, transform_indices = @transform_1, window_bounds = array<i64: 128, 256>}, {pipeline_mode = #tpu.pipeline_mode<synchronous>, transform_indices = @transform_2, window_bounds = array<i64: 1, 256>}, {transform_indices = @transform_3, window_bounds = array<i64: 64, 256>}]} {
    %c0 = arith.constant 0 : index
    %c0_0 = arith.constant 0 : index
    %0 = vector.load %arg1[%c0, %c0_0] : memref<64x128xbf16, #tpu.memory_space<vmem>>, vector<64x128xbf16>
    %c0_1 = arith.constant 0 : index
    %c0_2 = arith.constant 0 : index
    %1 = vector.load %arg2[%c0_1, %c0_2] : memref<128x256xbf16, #tpu.memory_space<vmem>>, vector<128x256xbf16>
    %cst = arith.constant dense<0.000000e+00> : vector<64x256xf32>
    %2 = tpu.matmul %0, %1, %cst {dimension_numbers = #tpu.dot_dimension_numbers<[1], [0], [0], [1], [0, 0, 1, 1], [], []>} : vector<64x128xbf16>, vector<128x256xbf16>, vector<64x256xf32> -> vector<64x256xf32>
    %c0_3 = arith.constant 0 : index
    %c0_4 = arith.constant 0 : index
    %3 = vector.load %arg3[%c0_3, %c0_4] : memref<1x256xf32, #tpu.memory_space<vmem>>, vector<1x256xf32>
    %4 = vector.broadcast %3 : vector<1x256xf32> to vector<64x256xf32>
    %5 = arith.addf %2, %4 : vector<64x256xf32>
    %6 = arith.truncf %5 : vector<64x256xf32> to vector<64x256xbf16>
    %c0_5 = arith.constant 0 : index
    %c0_6 = arith.constant 0 : index
    %7 = vector.load %arg4[%c0_5, %c0_6] : memref<64x256xbf16, #tpu.memory_space<vmem>>, vector<64x256xbf16>
    tpu.vector_store %arg4[%c0_5, %c0_6], %6 {strides = array<i32>} : memref<64x256xbf16, #tpu.memory_space<vmem>>, vector<64x256xbf16>,
    return
  }
  func.func @transform_0(%arg0: i32) -> (i32, i32) {
    %c0_i32 = arith.constant 0 : i32
    %c0_i32_0 = arith.constant 0 : i32
    return %arg0, %c0_i32 : i32, i32
  }
  func.func @transform_1(%arg0: i32) -> (i32, i32) {
    %c0_i32 = arith.constant 0 : i32
    %c0_i32_0 = arith.constant 0 : i32
    %c0_i32_1 = arith.constant 0 : i32
    return %c0_i32, %c0_i32_0 : i32, i32
  }
  func.func @transform_2(%arg0: i32) -> (i32, i32) {
    %c0_i32 = arith.constant 0 : i32
    %c0_i32_0 = arith.constant 0 : i32
    %c0_i32_1 = arith.constant 0 : i32
    return %c0_i32, %c0_i32_0 : i32, i32
  }
  func.func @transform_3(%arg0: i32) -> (i32, i32) {
    %c0_i32 = arith.constant 0 : i32
    %c0_i32_0 = arith.constant 0 : i32
    return %arg0, %c0_i32 : i32, i32
  }
}

module attributes {stable_mosaic.version = 11 : i64} {
  func.func @_mm_bias_relu_kernel(%arg0: i32, %arg1: memref<64x576xbf16, #tpu.memory_space<vmem>>, %arg2: memref<576x128xbf16, #tpu.memory_space<vmem>>, %arg3: memref<1x128xf32, #tpu.memory_space<vmem>>, %arg4: memref<64x128xbf16, #tpu.memory_space<vmem>>) attributes {dimension_semantics = [#tpu.dimension_semantics<parallel>], iteration_bounds = array<i64: 2>, scalar_prefetch = 0 : i64, scratch_operands = 0 : i64, tpu.core_type = #tpu.core_type<tc>, window_params = [{transform_indices = @transform_0, window_bounds = array<i64: 64, 576>}, {pipeline_mode = #tpu.pipeline_mode<synchronous>, transform_indices = @transform_1, window_bounds = array<i64: 576, 128>}, {pipeline_mode = #tpu.pipeline_mode<synchronous>, transform_indices = @transform_2, window_bounds = array<i64: 1, 128>}, {transform_indices = @transform_3, window_bounds = array<i64: 64, 128>}]} {
    %c0 = arith.constant 0 : index
    %c0_0 = arith.constant 0 : index
    %0 = vector.load %arg1[%c0, %c0_0] : memref<64x576xbf16, #tpu.memory_space<vmem>>, vector<64x576xbf16>
    %c0_1 = arith.constant 0 : index
    %c0_2 = arith.constant 0 : index
    %1 = vector.load %arg2[%c0_1, %c0_2] : memref<576x128xbf16, #tpu.memory_space<vmem>>, vector<576x128xbf16>
    %cst = arith.constant dense<0.000000e+00> : vector<64x128xf32>
    %2 = tpu.matmul %0, %1, %cst {dimension_numbers = #tpu.dot_dimension_numbers<[1], [0], [0], [1], [0, 0, 1, 1], [], []>} : vector<64x576xbf16>, vector<576x128xbf16>, vector<64x128xf32> -> vector<64x128xf32>
    %c0_3 = arith.constant 0 : index
    %c0_4 = arith.constant 0 : index
    %3 = vector.load %arg3[%c0_3, %c0_4] : memref<1x128xf32, #tpu.memory_space<vmem>>, vector<1x128xf32>
    %4 = vector.broadcast %3 : vector<1x128xf32> to vector<64x128xf32>
    %5 = arith.addf %2, %4 : vector<64x128xf32>
    %cst_5 = arith.constant 0.000000e+00 : f32
    %6 = vector.broadcast %cst_5 : f32 to vector<64x128xf32>
    %7 = arith.maximumf %5, %6 : vector<64x128xf32>
    %8 = arith.truncf %7 : vector<64x128xf32> to vector<64x128xbf16>
    %c0_6 = arith.constant 0 : index
    %c0_7 = arith.constant 0 : index
    %9 = vector.load %arg4[%c0_6, %c0_7] : memref<64x128xbf16, #tpu.memory_space<vmem>>, vector<64x128xbf16>
    tpu.vector_store %arg4[%c0_6, %c0_7], %8 {strides = array<i32>} : memref<64x128xbf16, #tpu.memory_space<vmem>>, vector<64x128xbf16>,
    return
  }
  func.func @transform_0(%arg0: i32) -> (i32, i32) {
    %c0_i32 = arith.constant 0 : i32
    %c0_i32_0 = arith.constant 0 : i32
    return %arg0, %c0_i32 : i32, i32
  }
  func.func @transform_1(%arg0: i32) -> (i32, i32) {
    %c0_i32 = arith.constant 0 : i32
    %c0_i32_0 = arith.constant 0 : i32
    %c0_i32_1 = arith.constant 0 : i32
    return %c0_i32, %c0_i32_0 : i32, i32
  }
  func.func @transform_2(%arg0: i32) -> (i32, i32) {
    %c0_i32 = arith.constant 0 : i32
    %c0_i32_0 = arith.constant 0 : i32
    %c0_i32_1 = arith.constant 0 : i32
    return %c0_i32, %c0_i32_0 : i32, i32
  }
  func.func @transform_3(%arg0: i32) -> (i32, i32) {
    %c0_i32 = arith.constant 0 : i32
    %c0_i32_0 = arith.constant 0 : i32
    return %arg0, %c0_i32 : i32, i32
  }
}

module attributes {stable_mosaic.version = 11 : i64} {
  func.func @_mm_bias_add_relu_kernel(%arg0: i32, %arg1: memref<64x128xbf16, #tpu.memory_space<vmem>>, %arg2: memref<128x256xbf16, #tpu.memory_space<vmem>>, %arg3: memref<1x256xf32, #tpu.memory_space<vmem>>, %arg4: memref<64x256xbf16, #tpu.memory_space<vmem>>, %arg5: memref<64x256xbf16, #tpu.memory_space<vmem>>) attributes {dimension_semantics = [#tpu.dimension_semantics<parallel>], iteration_bounds = array<i64: 2>, scalar_prefetch = 0 : i64, scratch_operands = 0 : i64, tpu.core_type = #tpu.core_type<tc>, window_params = [{transform_indices = @transform_0, window_bounds = array<i64: 64, 128>}, {pipeline_mode = #tpu.pipeline_mode<synchronous>, transform_indices = @transform_1, window_bounds = array<i64: 128, 256>}, {pipeline_mode = #tpu.pipeline_mode<synchronous>, transform_indices = @transform_2, window_bounds = array<i64: 1, 256>}, {transform_indices = @transform_3, window_bounds = array<i64: 64, 256>}, {transform_indices = @transform_4, window_bounds = array<i64: 64, 256>}]} {
    %c0 = arith.constant 0 : index
    %c0_0 = arith.constant 0 : index
    %0 = vector.load %arg1[%c0, %c0_0] : memref<64x128xbf16, #tpu.memory_space<vmem>>, vector<64x128xbf16>
    %c0_1 = arith.constant 0 : index
    %c0_2 = arith.constant 0 : index
    %1 = vector.load %arg2[%c0_1, %c0_2] : memref<128x256xbf16, #tpu.memory_space<vmem>>, vector<128x256xbf16>
    %cst = arith.constant dense<0.000000e+00> : vector<64x256xf32>
    %2 = tpu.matmul %0, %1, %cst {dimension_numbers = #tpu.dot_dimension_numbers<[1], [0], [0], [1], [0, 0, 1, 1], [], []>} : vector<64x128xbf16>, vector<128x256xbf16>, vector<64x256xf32> -> vector<64x256xf32>
    %c0_3 = arith.constant 0 : index
    %c0_4 = arith.constant 0 : index
    %3 = vector.load %arg3[%c0_3, %c0_4] : memref<1x256xf32, #tpu.memory_space<vmem>>, vector<1x256xf32>
    %4 = vector.broadcast %3 : vector<1x256xf32> to vector<64x256xf32>
    %5 = arith.addf %2, %4 : vector<64x256xf32>
    %c0_5 = arith.constant 0 : index
    %c0_6 = arith.constant 0 : index
    %6 = vector.load %arg4[%c0_5, %c0_6] : memref<64x256xbf16, #tpu.memory_space<vmem>>, vector<64x256xbf16>
    %7 = arith.extf %6 : vector<64x256xbf16> to vector<64x256xf32>
    %8 = arith.addf %5, %7 : vector<64x256xf32>
    %cst_7 = arith.constant 0.000000e+00 : f32
    %9 = vector.broadcast %cst_7 : f32 to vector<64x256xf32>
    %10 = arith.maximumf %8, %9 : vector<64x256xf32>
    %11 = arith.truncf %10 : vector<64x256xf32> to vector<64x256xbf16>
    %c0_8 = arith.constant 0 : index
    %c0_9 = arith.constant 0 : index
    %12 = vector.load %arg5[%c0_8, %c0_9] : memref<64x256xbf16, #tpu.memory_space<vmem>>, vector<64x256xbf16>
    tpu.vector_store %arg5[%c0_8, %c0_9], %11 {strides = array<i32>} : memref<64x256xbf16, #tpu.memory_space<vmem>>, vector<64x256xbf16>,
    return
  }
  func.func @transform_0(%arg0: i32) -> (i32, i32) {
    %c0_i32 = arith.constant 0 : i32
    %c0_i32_0 = arith.constant 0 : i32
    return %arg0, %c0_i32 : i32, i32
  }
  func.func @transform_1(%arg0: i32) -> (i32, i32) {
    %c0_i32 = arith.constant 0 : i32
    %c0_i32_0 = arith.constant 0 : i32
    %c0_i32_1 = arith.constant 0 : i32
    return %c0_i32, %c0_i32_0 : i32, i32
  }
  func.func @transform_2(%arg0: i32) -> (i32, i32) {
    %c0_i32 = arith.constant 0 : i32
    %c0_i32_0 = arith.constant 0 : i32
    %c0_i32_1 = arith.constant 0 : i32
    return %c0_i32, %c0_i32_0 : i32, i32
  }
  func.func @transform_3(%arg0: i32) -> (i32, i32) {
    %c0_i32 = arith.constant 0 : i32
    %c0_i32_0 = arith.constant 0 : i32
    return %arg0, %c0_i32 : i32, i32
  }
  func.func @transform_4(%arg0: i32) -> (i32, i32) {
    %c0_i32 = arith.constant 0 : i32
    %c0_i32_0 = arith.constant 0 : i32
    return %arg0, %c0_i32 : i32, i32
  }
}

module attributes {stable_mosaic.version = 11 : i64} {
  func.func @_mm_bias_relu_kernel(%arg0: i32, %arg1: memref<64x256xbf16, #tpu.memory_space<vmem>>, %arg2: memref<256x128xbf16, #tpu.memory_space<vmem>>, %arg3: memref<1x128xf32, #tpu.memory_space<vmem>>, %arg4: memref<64x128xbf16, #tpu.memory_space<vmem>>) attributes {dimension_semantics = [#tpu.dimension_semantics<parallel>], iteration_bounds = array<i64: 2>, scalar_prefetch = 0 : i64, scratch_operands = 0 : i64, tpu.core_type = #tpu.core_type<tc>, window_params = [{transform_indices = @transform_0, window_bounds = array<i64: 64, 256>}, {pipeline_mode = #tpu.pipeline_mode<synchronous>, transform_indices = @transform_1, window_bounds = array<i64: 256, 128>}, {pipeline_mode = #tpu.pipeline_mode<synchronous>, transform_indices = @transform_2, window_bounds = array<i64: 1, 128>}, {transform_indices = @transform_3, window_bounds = array<i64: 64, 128>}]} {
    %c0 = arith.constant 0 : index
    %c0_0 = arith.constant 0 : index
    %0 = vector.load %arg1[%c0, %c0_0] : memref<64x256xbf16, #tpu.memory_space<vmem>>, vector<64x256xbf16>
    %c0_1 = arith.constant 0 : index
    %c0_2 = arith.constant 0 : index
    %1 = vector.load %arg2[%c0_1, %c0_2] : memref<256x128xbf16, #tpu.memory_space<vmem>>, vector<256x128xbf16>
    %cst = arith.constant dense<0.000000e+00> : vector<64x128xf32>
    %2 = tpu.matmul %0, %1, %cst {dimension_numbers = #tpu.dot_dimension_numbers<[1], [0], [0], [1], [0, 0, 1, 1], [], []>} : vector<64x256xbf16>, vector<256x128xbf16>, vector<64x128xf32> -> vector<64x128xf32>
    %c0_3 = arith.constant 0 : index
    %c0_4 = arith.constant 0 : index
    %3 = vector.load %arg3[%c0_3, %c0_4] : memref<1x128xf32, #tpu.memory_space<vmem>>, vector<1x128xf32>
    %4 = vector.broadcast %3 : vector<1x128xf32> to vector<64x128xf32>
    %5 = arith.addf %2, %4 : vector<64x128xf32>
    %cst_5 = arith.constant 0.000000e+00 : f32
    %6 = vector.broadcast %cst_5 : f32 to vector<64x128xf32>
    %7 = arith.maximumf %5, %6 : vector<64x128xf32>
    %8 = arith.truncf %7 : vector<64x128xf32> to vector<64x128xbf16>
    %c0_6 = arith.constant 0 : index
    %c0_7 = arith.constant 0 : index
    %9 = vector.load %arg4[%c0_6, %c0_7] : memref<64x128xbf16, #tpu.memory_space<vmem>>, vector<64x128xbf16>
    tpu.vector_store %arg4[%c0_6, %c0_7], %8 {strides = array<i32>} : memref<64x128xbf16, #tpu.memory_space<vmem>>, vector<64x128xbf16>,
    return
  }
  func.func @transform_0(%arg0: i32) -> (i32, i32) {
    %c0_i32 = arith.constant 0 : i32
    %c0_i32_0 = arith.constant 0 : i32
    return %arg0, %c0_i32 : i32, i32
  }
  func.func @transform_1(%arg0: i32) -> (i32, i32) {
    %c0_i32 = arith.constant 0 : i32
    %c0_i32_0 = arith.constant 0 : i32
    %c0_i32_1 = arith.constant 0 : i32
    return %c0_i32, %c0_i32_0 : i32, i32
  }
  func.func @transform_2(%arg0: i32) -> (i32, i32) {
    %c0_i32 = arith.constant 0 : i32
    %c0_i32_0 = arith.constant 0 : i32
    %c0_i32_1 = arith.constant 0 : i32
    return %c0_i32, %c0_i32_0 : i32, i32
  }
  func.func @transform_3(%arg0: i32) -> (i32, i32) {
    %c0_i32 = arith.constant 0 : i32
    %c0_i32_0 = arith.constant 0 : i32
    return %arg0, %c0_i32 : i32, i32
  }
}

module attributes {stable_mosaic.version = 11 : i64} {
  func.func @_mm_bias_kernel(%arg0: i32, %arg1: memref<16x256xbf16, #tpu.memory_space<vmem>>, %arg2: memref<256x512xbf16, #tpu.memory_space<vmem>>, %arg3: memref<1x512xf32, #tpu.memory_space<vmem>>, %arg4: memref<16x512xbf16, #tpu.memory_space<vmem>>) attributes {dimension_semantics = [#tpu.dimension_semantics<parallel>], iteration_bounds = array<i64: 2>, scalar_prefetch = 0 : i64, scratch_operands = 0 : i64, tpu.core_type = #tpu.core_type<tc>, window_params = [{transform_indices = @transform_0, window_bounds = array<i64: 16, 256>}, {pipeline_mode = #tpu.pipeline_mode<synchronous>, transform_indices = @transform_1, window_bounds = array<i64: 256, 512>}, {pipeline_mode = #tpu.pipeline_mode<synchronous>, transform_indices = @transform_2, window_bounds = array<i64: 1, 512>}, {transform_indices = @transform_3, window_bounds = array<i64: 16, 512>}]} {
    %c0 = arith.constant 0 : index
    %c0_0 = arith.constant 0 : index
    %0 = vector.load %arg1[%c0, %c0_0] : memref<16x256xbf16, #tpu.memory_space<vmem>>, vector<16x256xbf16>
    %c0_1 = arith.constant 0 : index
    %c0_2 = arith.constant 0 : index
    %1 = vector.load %arg2[%c0_1, %c0_2] : memref<256x512xbf16, #tpu.memory_space<vmem>>, vector<256x512xbf16>
    %cst = arith.constant dense<0.000000e+00> : vector<16x512xf32>
    %2 = tpu.matmul %0, %1, %cst {dimension_numbers = #tpu.dot_dimension_numbers<[1], [0], [0], [1], [0, 0, 1, 1], [], []>} : vector<16x256xbf16>, vector<256x512xbf16>, vector<16x512xf32> -> vector<16x512xf32>
    %c0_3 = arith.constant 0 : index
    %c0_4 = arith.constant 0 : index
    %3 = vector.load %arg3[%c0_3, %c0_4] : memref<1x512xf32, #tpu.memory_space<vmem>>, vector<1x512xf32>
    %4 = vector.broadcast %3 : vector<1x512xf32> to vector<16x512xf32>
    %5 = arith.addf %2, %4 : vector<16x512xf32>
    %6 = arith.truncf %5 : vector<16x512xf32> to vector<16x512xbf16>
    %c0_5 = arith.constant 0 : index
    %c0_6 = arith.constant 0 : index
    %7 = vector.load %arg4[%c0_5, %c0_6] : memref<16x512xbf16, #tpu.memory_space<vmem>>, vector<16x512xbf16>
    tpu.vector_store %arg4[%c0_5, %c0_6], %6 {strides = array<i32>} : memref<16x512xbf16, #tpu.memory_space<vmem>>, vector<16x512xbf16>,
    return
  }
  func.func @transform_0(%arg0: i32) -> (i32, i32) {
    %c0_i32 = arith.constant 0 : i32
    %c0_i32_0 = arith.constant 0 : i32
    return %arg0, %c0_i32 : i32, i32
  }
  func.func @transform_1(%arg0: i32) -> (i32, i32) {
    %c0_i32 = arith.constant 0 : i32
    %c0_i32_0 = arith.constant 0 : i32
    %c0_i32_1 = arith.constant 0 : i32
    return %c0_i32, %c0_i32_0 : i32, i32
  }
  func.func @transform_2(%arg0: i32) -> (i32, i32) {
    %c0_i32 = arith.constant 0 : i32
    %c0_i32_0 = arith.constant 0 : i32
    %c0_i32_1 = arith.constant 0 : i32
    return %c0_i32, %c0_i32_0 : i32, i32
  }
  func.func @transform_3(%arg0: i32) -> (i32, i32) {
    %c0_i32 = arith.constant 0 : i32
    %c0_i32_0 = arith.constant 0 : i32
    return %arg0, %c0_i32 : i32, i32
  }
}

module attributes {stable_mosaic.version = 11 : i64} {
  func.func @_mm_bias_relu_kernel(%arg0: i32, %arg1: memref<16x1152xbf16, #tpu.memory_space<vmem>>, %arg2: memref<1152x128xbf16, #tpu.memory_space<vmem>>, %arg3: memref<1x128xf32, #tpu.memory_space<vmem>>, %arg4: memref<16x128xbf16, #tpu.memory_space<vmem>>) attributes {dimension_semantics = [#tpu.dimension_semantics<parallel>], iteration_bounds = array<i64: 2>, scalar_prefetch = 0 : i64, scratch_operands = 0 : i64, tpu.core_type = #tpu.core_type<tc>, window_params = [{transform_indices = @transform_0, window_bounds = array<i64: 16, 1152>}, {pipeline_mode = #tpu.pipeline_mode<synchronous>, transform_indices = @transform_1, window_bounds = array<i64: 1152, 128>}, {pipeline_mode = #tpu.pipeline_mode<synchronous>, transform_indices = @transform_2, window_bounds = array<i64: 1, 128>}, {transform_indices = @transform_3, window_bounds = array<i64: 16, 128>}]} {
    %c0 = arith.constant 0 : index
    %c0_0 = arith.constant 0 : index
    %0 = vector.load %arg1[%c0, %c0_0] : memref<16x1152xbf16, #tpu.memory_space<vmem>>, vector<16x1152xbf16>
    %c0_1 = arith.constant 0 : index
    %c0_2 = arith.constant 0 : index
    %1 = vector.load %arg2[%c0_1, %c0_2] : memref<1152x128xbf16, #tpu.memory_space<vmem>>, vector<1152x128xbf16>
    %cst = arith.constant dense<0.000000e+00> : vector<16x128xf32>
    %2 = tpu.matmul %0, %1, %cst {dimension_numbers = #tpu.dot_dimension_numbers<[1], [0], [0], [1], [0, 0, 1, 1], [], []>} : vector<16x1152xbf16>, vector<1152x128xbf16>, vector<16x128xf32> -> vector<16x128xf32>
    %c0_3 = arith.constant 0 : index
    %c0_4 = arith.constant 0 : index
    %3 = vector.load %arg3[%c0_3, %c0_4] : memref<1x128xf32, #tpu.memory_space<vmem>>, vector<1x128xf32>
    %4 = vector.broadcast %3 : vector<1x128xf32> to vector<16x128xf32>
    %5 = arith.addf %2, %4 : vector<16x128xf32>
    %cst_5 = arith.constant 0.000000e+00 : f32
    %6 = vector.broadcast %cst_5 : f32 to vector<16x128xf32>
    %7 = arith.maximumf %5, %6 : vector<16x128xf32>
    %8 = arith.truncf %7 : vector<16x128xf32> to vector<16x128xbf16>
    %c0_6 = arith.constant 0 : index
    %c0_7 = arith.constant 0 : index
    %9 = vector.load %arg4[%c0_6, %c0_7] : memref<16x128xbf16, #tpu.memory_space<vmem>>, vector<16x128xbf16>
    tpu.vector_store %arg4[%c0_6, %c0_7], %8 {strides = array<i32>} : memref<16x128xbf16, #tpu.memory_space<vmem>>, vector<16x128xbf16>,
    return
  }
  func.func @transform_0(%arg0: i32) -> (i32, i32) {
    %c0_i32 = arith.constant 0 : i32
    %c0_i32_0 = arith.constant 0 : i32
    return %arg0, %c0_i32 : i32, i32
  }
  func.func @transform_1(%arg0: i32) -> (i32, i32) {
    %c0_i32 = arith.constant 0 : i32
    %c0_i32_0 = arith.constant 0 : i32
    %c0_i32_1 = arith.constant 0 : i32
    return %c0_i32, %c0_i32_0 : i32, i32
  }
  func.func @transform_2(%arg0: i32) -> (i32, i32) {
    %c0_i32 = arith.constant 0 : i32
    %c0_i32_0 = arith.constant 0 : i32
    %c0_i32_1 = arith.constant 0 : i32
    return %c0_i32, %c0_i32_0 : i32, i32
  }
  func.func @transform_3(%arg0: i32) -> (i32, i32) {
    %c0_i32 = arith.constant 0 : i32
    %c0_i32_0 = arith.constant 0 : i32
    return %arg0, %c0_i32 : i32, i32
  }
}

module attributes {stable_mosaic.version = 11 : i64} {
  func.func @_mm_bias_add_relu_kernel(%arg0: i32, %arg1: memref<16x128xbf16, #tpu.memory_space<vmem>>, %arg2: memref<128x512xbf16, #tpu.memory_space<vmem>>, %arg3: memref<1x512xf32, #tpu.memory_space<vmem>>, %arg4: memref<16x512xbf16, #tpu.memory_space<vmem>>, %arg5: memref<16x512xbf16, #tpu.memory_space<vmem>>) attributes {dimension_semantics = [#tpu.dimension_semantics<parallel>], iteration_bounds = array<i64: 2>, scalar_prefetch = 0 : i64, scratch_operands = 0 : i64, tpu.core_type = #tpu.core_type<tc>, window_params = [{transform_indices = @transform_0, window_bounds = array<i64: 16, 128>}, {pipeline_mode = #tpu.pipeline_mode<synchronous>, transform_indices = @transform_1, window_bounds = array<i64: 128, 512>}, {pipeline_mode = #tpu.pipeline_mode<synchronous>, transform_indices = @transform_2, window_bounds = array<i64: 1, 512>}, {transform_indices = @transform_3, window_bounds = array<i64: 16, 512>}, {transform_indices = @transform_4, window_bounds = array<i64: 16, 512>}]} {
    %c0 = arith.constant 0 : index
    %c0_0 = arith.constant 0 : index
    %0 = vector.load %arg1[%c0, %c0_0] : memref<16x128xbf16, #tpu.memory_space<vmem>>, vector<16x128xbf16>
    %c0_1 = arith.constant 0 : index
    %c0_2 = arith.constant 0 : index
    %1 = vector.load %arg2[%c0_1, %c0_2] : memref<128x512xbf16, #tpu.memory_space<vmem>>, vector<128x512xbf16>
    %cst = arith.constant dense<0.000000e+00> : vector<16x512xf32>
    %2 = tpu.matmul %0, %1, %cst {dimension_numbers = #tpu.dot_dimension_numbers<[1], [0], [0], [1], [0, 0, 1, 1], [], []>} : vector<16x128xbf16>, vector<128x512xbf16>, vector<16x512xf32> -> vector<16x512xf32>
    %c0_3 = arith.constant 0 : index
    %c0_4 = arith.constant 0 : index
    %3 = vector.load %arg3[%c0_3, %c0_4] : memref<1x512xf32, #tpu.memory_space<vmem>>, vector<1x512xf32>
    %4 = vector.broadcast %3 : vector<1x512xf32> to vector<16x512xf32>
    %5 = arith.addf %2, %4 : vector<16x512xf32>
    %c0_5 = arith.constant 0 : index
    %c0_6 = arith.constant 0 : index
    %6 = vector.load %arg4[%c0_5, %c0_6] : memref<16x512xbf16, #tpu.memory_space<vmem>>, vector<16x512xbf16>
    %7 = arith.extf %6 : vector<16x512xbf16> to vector<16x512xf32>
    %8 = arith.addf %5, %7 : vector<16x512xf32>
    %cst_7 = arith.constant 0.000000e+00 : f32
    %9 = vector.broadcast %cst_7 : f32 to vector<16x512xf32>
    %10 = arith.maximumf %8, %9 : vector<16x512xf32>
    %11 = arith.truncf %10 : vector<16x512xf32> to vector<16x512xbf16>
    %c0_8 = arith.constant 0 : index
    %c0_9 = arith.constant 0 : index
    %12 = vector.load %arg5[%c0_8, %c0_9] : memref<16x512xbf16, #tpu.memory_space<vmem>>, vector<16x512xbf16>
    tpu.vector_store %arg5[%c0_8, %c0_9], %11 {strides = array<i32>} : memref<16x512xbf16, #tpu.memory_space<vmem>>, vector<16x512xbf16>,
    return
  }
  func.func @transform_0(%arg0: i32) -> (i32, i32) {
    %c0_i32 = arith.constant 0 : i32
    %c0_i32_0 = arith.constant 0 : i32
    return %arg0, %c0_i32 : i32, i32
  }
  func.func @transform_1(%arg0: i32) -> (i32, i32) {
    %c0_i32 = arith.constant 0 : i32
    %c0_i32_0 = arith.constant 0 : i32
    %c0_i32_1 = arith.constant 0 : i32
    return %c0_i32, %c0_i32_0 : i32, i32
  }
  func.func @transform_2(%arg0: i32) -> (i32, i32) {
    %c0_i32 = arith.constant 0 : i32
    %c0_i32_0 = arith.constant 0 : i32
    %c0_i32_1 = arith.constant 0 : i32
    return %c0_i32, %c0_i32_0 : i32, i32
  }
  func.func @transform_3(%arg0: i32) -> (i32, i32) {
    %c0_i32 = arith.constant 0 : i32
    %c0_i32_0 = arith.constant 0 : i32
    return %arg0, %c0_i32 : i32, i32
  }
  func.func @transform_4(%arg0: i32) -> (i32, i32) {
    %c0_i32 = arith.constant 0 : i32
    %c0_i32_0 = arith.constant 0 : i32
    return %arg0, %c0_i32 : i32, i32
  }
}

module attributes {stable_mosaic.version = 11 : i64} {
  func.func @_mm_bias_relu_kernel(%arg0: i32, %arg1: memref<16x512xbf16, #tpu.memory_space<vmem>>, %arg2: memref<512x128xbf16, #tpu.memory_space<vmem>>, %arg3: memref<1x128xf32, #tpu.memory_space<vmem>>, %arg4: memref<16x128xbf16, #tpu.memory_space<vmem>>) attributes {dimension_semantics = [#tpu.dimension_semantics<parallel>], iteration_bounds = array<i64: 2>, scalar_prefetch = 0 : i64, scratch_operands = 0 : i64, tpu.core_type = #tpu.core_type<tc>, window_params = [{transform_indices = @transform_0, window_bounds = array<i64: 16, 512>}, {pipeline_mode = #tpu.pipeline_mode<synchronous>, transform_indices = @transform_1, window_bounds = array<i64: 512, 128>}, {pipeline_mode = #tpu.pipeline_mode<synchronous>, transform_indices = @transform_2, window_bounds = array<i64: 1, 128>}, {transform_indices = @transform_3, window_bounds = array<i64: 16, 128>}]} {
    %c0 = arith.constant 0 : index
    %c0_0 = arith.constant 0 : index
    %0 = vector.load %arg1[%c0, %c0_0] : memref<16x512xbf16, #tpu.memory_space<vmem>>, vector<16x512xbf16>
    %c0_1 = arith.constant 0 : index
    %c0_2 = arith.constant 0 : index
    %1 = vector.load %arg2[%c0_1, %c0_2] : memref<512x128xbf16, #tpu.memory_space<vmem>>, vector<512x128xbf16>
    %cst = arith.constant dense<0.000000e+00> : vector<16x128xf32>
    %2 = tpu.matmul %0, %1, %cst {dimension_numbers = #tpu.dot_dimension_numbers<[1], [0], [0], [1], [0, 0, 1, 1], [], []>} : vector<16x512xbf16>, vector<512x128xbf16>, vector<16x128xf32> -> vector<16x128xf32>
    %c0_3 = arith.constant 0 : index
    %c0_4 = arith.constant 0 : index
    %3 = vector.load %arg3[%c0_3, %c0_4] : memref<1x128xf32, #tpu.memory_space<vmem>>, vector<1x128xf32>
    %4 = vector.broadcast %3 : vector<1x128xf32> to vector<16x128xf32>
    %5 = arith.addf %2, %4 : vector<16x128xf32>
    %cst_5 = arith.constant 0.000000e+00 : f32
    %6 = vector.broadcast %cst_5 : f32 to vector<16x128xf32>
    %7 = arith.maximumf %5, %6 : vector<16x128xf32>
    %8 = arith.truncf %7 : vector<16x128xf32> to vector<16x128xbf16>
    %c0_6 = arith.constant 0 : index
    %c0_7 = arith.constant 0 : index
    %9 = vector.load %arg4[%c0_6, %c0_7] : memref<16x128xbf16, #tpu.memory_space<vmem>>, vector<16x128xbf16>
    tpu.vector_store %arg4[%c0_6, %c0_7], %8 {strides = array<i32>} : memref<16x128xbf16, #tpu.memory_space<vmem>>, vector<16x128xbf16>,
    return
  }
  func.func @transform_0(%arg0: i32) -> (i32, i32) {
    %c0_i32 = arith.constant 0 : i32
    %c0_i32_0 = arith.constant 0 : i32
    return %arg0, %c0_i32 : i32, i32
  }
  func.func @transform_1(%arg0: i32) -> (i32, i32) {
    %c0_i32 = arith.constant 0 : i32
    %c0_i32_0 = arith.constant 0 : i32
    %c0_i32_1 = arith.constant 0 : i32
    return %c0_i32, %c0_i32_0 : i32, i32
  }
  func.func @transform_2(%arg0: i32) -> (i32, i32) {
    %c0_i32 = arith.constant 0 : i32
    %c0_i32_0 = arith.constant 0 : i32
    %c0_i32_1 = arith.constant 0 : i32
    return %c0_i32, %c0_i32_0 : i32, i32
  }
  func.func @transform_3(%arg0: i32) -> (i32, i32) {
    %c0_i32 = arith.constant 0 : i32
    %c0_i32_0 = arith.constant 0 : i32
    return %arg0, %c0_i32 : i32, i32
  }
}

module attributes {stable_mosaic.version = 11 : i64} {
  func.func @_mm_bias_relu_kernel(%arg0: i32, %arg1: memref<16x512xbf16, #tpu.memory_space<vmem>>, %arg2: memref<512x256xbf16, #tpu.memory_space<vmem>>, %arg3: memref<1x256xf32, #tpu.memory_space<vmem>>, %arg4: memref<16x256xbf16, #tpu.memory_space<vmem>>) attributes {dimension_semantics = [#tpu.dimension_semantics<parallel>], iteration_bounds = array<i64: 2>, scalar_prefetch = 0 : i64, scratch_operands = 0 : i64, tpu.core_type = #tpu.core_type<tc>, window_params = [{transform_indices = @transform_0, window_bounds = array<i64: 16, 512>}, {pipeline_mode = #tpu.pipeline_mode<synchronous>, transform_indices = @transform_1, window_bounds = array<i64: 512, 256>}, {pipeline_mode = #tpu.pipeline_mode<synchronous>, transform_indices = @transform_2, window_bounds = array<i64: 1, 256>}, {transform_indices = @transform_3, window_bounds = array<i64: 16, 256>}]} {
    %c0 = arith.constant 0 : index
    %c0_0 = arith.constant 0 : index
    %0 = vector.load %arg1[%c0, %c0_0] : memref<16x512xbf16, #tpu.memory_space<vmem>>, vector<16x512xbf16>
    %c0_1 = arith.constant 0 : index
    %c0_2 = arith.constant 0 : index
    %1 = vector.load %arg2[%c0_1, %c0_2] : memref<512x256xbf16, #tpu.memory_space<vmem>>, vector<512x256xbf16>
    %cst = arith.constant dense<0.000000e+00> : vector<16x256xf32>
    %2 = tpu.matmul %0, %1, %cst {dimension_numbers = #tpu.dot_dimension_numbers<[1], [0], [0], [1], [0, 0, 1, 1], [], []>} : vector<16x512xbf16>, vector<512x256xbf16>, vector<16x256xf32> -> vector<16x256xf32>
    %c0_3 = arith.constant 0 : index
    %c0_4 = arith.constant 0 : index
    %3 = vector.load %arg3[%c0_3, %c0_4] : memref<1x256xf32, #tpu.memory_space<vmem>>, vector<1x256xf32>
    %4 = vector.broadcast %3 : vector<1x256xf32> to vector<16x256xf32>
    %5 = arith.addf %2, %4 : vector<16x256xf32>
    %cst_5 = arith.constant 0.000000e+00 : f32
    %6 = vector.broadcast %cst_5 : f32 to vector<16x256xf32>
    %7 = arith.maximumf %5, %6 : vector<16x256xf32>
    %8 = arith.truncf %7 : vector<16x256xf32> to vector<16x256xbf16>
    %c0_6 = arith.constant 0 : index
    %c0_7 = arith.constant 0 : index
    %9 = vector.load %arg4[%c0_6, %c0_7] : memref<16x256xbf16, #tpu.memory_space<vmem>>, vector<16x256xbf16>
    tpu.vector_store %arg4[%c0_6, %c0_7], %8 {strides = array<i32>} : memref<16x256xbf16, #tpu.memory_space<vmem>>, vector<16x256xbf16>,
    return
  }
  func.func @transform_0(%arg0: i32) -> (i32, i32) {
    %c0_i32 = arith.constant 0 : i32
    %c0_i32_0 = arith.constant 0 : i32
    return %arg0, %c0_i32 : i32, i32
  }
  func.func @transform_1(%arg0: i32) -> (i32, i32) {
    %c0_i32 = arith.constant 0 : i32
    %c0_i32_0 = arith.constant 0 : i32
    %c0_i32_1 = arith.constant 0 : i32
    return %c0_i32, %c0_i32_0 : i32, i32
  }
  func.func @transform_2(%arg0: i32) -> (i32, i32) {
    %c0_i32 = arith.constant 0 : i32
    %c0_i32_0 = arith.constant 0 : i32
    %c0_i32_1 = arith.constant 0 : i32
    return %c0_i32, %c0_i32_0 : i32, i32
  }
  func.func @transform_3(%arg0: i32) -> (i32, i32) {
    %c0_i32 = arith.constant 0 : i32
    %c0_i32_0 = arith.constant 0 : i32
    return %arg0, %c0_i32 : i32, i32
  }
}

module attributes {stable_mosaic.version = 11 : i64} {
  func.func @_mm_bias_kernel(%arg0: i32, %arg1: memref<16x512xbf16, #tpu.memory_space<vmem>>, %arg2: memref<512x1024xbf16, #tpu.memory_space<vmem>>, %arg3: memref<1x1024xf32, #tpu.memory_space<vmem>>, %arg4: memref<16x1024xbf16, #tpu.memory_space<vmem>>) attributes {dimension_semantics = [#tpu.dimension_semantics<parallel>], iteration_bounds = array<i64: 2>, scalar_prefetch = 0 : i64, scratch_operands = 0 : i64, tpu.core_type = #tpu.core_type<tc>, window_params = [{transform_indices = @transform_0, window_bounds = array<i64: 16, 512>}, {pipeline_mode = #tpu.pipeline_mode<synchronous>, transform_indices = @transform_1, window_bounds = array<i64: 512, 1024>}, {pipeline_mode = #tpu.pipeline_mode<synchronous>, transform_indices = @transform_2, window_bounds = array<i64: 1, 1024>}, {transform_indices = @transform_3, window_bounds = array<i64: 16, 1024>}]} {
    %c0 = arith.constant 0 : index
    %c0_0 = arith.constant 0 : index
    %0 = vector.load %arg1[%c0, %c0_0] : memref<16x512xbf16, #tpu.memory_space<vmem>>, vector<16x512xbf16>
    %c0_1 = arith.constant 0 : index
    %c0_2 = arith.constant 0 : index
    %1 = vector.load %arg2[%c0_1, %c0_2] : memref<512x1024xbf16, #tpu.memory_space<vmem>>, vector<512x1024xbf16>
    %cst = arith.constant dense<0.000000e+00> : vector<16x1024xf32>
    %2 = tpu.matmul %0, %1, %cst {dimension_numbers = #tpu.dot_dimension_numbers<[1], [0], [0], [1], [0, 0, 1, 1], [], []>} : vector<16x512xbf16>, vector<512x1024xbf16>, vector<16x1024xf32> -> vector<16x1024xf32>
    %c0_3 = arith.constant 0 : index
    %c0_4 = arith.constant 0 : index
    %3 = vector.load %arg3[%c0_3, %c0_4] : memref<1x1024xf32, #tpu.memory_space<vmem>>, vector<1x1024xf32>
    %4 = vector.broadcast %3 : vector<1x1024xf32> to vector<16x1024xf32>
    %5 = arith.addf %2, %4 : vector<16x1024xf32>
    %6 = arith.truncf %5 : vector<16x1024xf32> to vector<16x1024xbf16>
    %c0_5 = arith.constant 0 : index
    %c0_6 = arith.constant 0 : index
    %7 = vector.load %arg4[%c0_5, %c0_6] : memref<16x1024xbf16, #tpu.memory_space<vmem>>, vector<16x1024xbf16>
    tpu.vector_store %arg4[%c0_5, %c0_6], %6 {strides = array<i32>} : memref<16x1024xbf16, #tpu.memory_space<vmem>>, vector<16x1024xbf16>,
    return
  }
  func.func @transform_0(%arg0: i32) -> (i32, i32) {
    %c0_i32 = arith.constant 0 : i32
    %c0_i32_0 = arith.constant 0 : i32
    return %arg0, %c0_i32 : i32, i32
  }
  func.func @transform_1(%arg0: i32) -> (i32, i32) {
    %c0_i32 = arith.constant 0 : i32
    %c0_i32_0 = arith.constant 0 : i32
    %c0_i32_1 = arith.constant 0 : i32
    return %c0_i32, %c0_i32_0 : i32, i32
  }
  func.func @transform_2(%arg0: i32) -> (i32, i32) {
    %c0_i32 = arith.constant 0 : i32
    %c0_i32_0 = arith.constant 0 : i32
    %c0_i32_1 = arith.constant 0 : i32
    return %c0_i32, %c0_i32_0 : i32, i32
  }
  func.func @transform_3(%arg0: i32) -> (i32, i32) {
    %c0_i32 = arith.constant 0 : i32
    %c0_i32_0 = arith.constant 0 : i32
    return %arg0, %c0_i32 : i32, i32
  }
}

module attributes {stable_mosaic.version = 11 : i64} {
  func.func @_mm_bias_add_relu_kernel(%arg0: i32, %arg1: memref<16x256xbf16, #tpu.memory_space<vmem>>, %arg2: memref<256x1024xbf16, #tpu.memory_space<vmem>>, %arg3: memref<1x1024xf32, #tpu.memory_space<vmem>>, %arg4: memref<16x1024xbf16, #tpu.memory_space<vmem>>, %arg5: memref<16x1024xbf16, #tpu.memory_space<vmem>>) attributes {dimension_semantics = [#tpu.dimension_semantics<parallel>], iteration_bounds = array<i64: 2>, scalar_prefetch = 0 : i64, scratch_operands = 0 : i64, tpu.core_type = #tpu.core_type<tc>, window_params = [{transform_indices = @transform_0, window_bounds = array<i64: 16, 256>}, {pipeline_mode = #tpu.pipeline_mode<synchronous>, transform_indices = @transform_1, window_bounds = array<i64: 256, 1024>}, {pipeline_mode = #tpu.pipeline_mode<synchronous>, transform_indices = @transform_2, window_bounds = array<i64: 1, 1024>}, {transform_indices = @transform_3, window_bounds = array<i64: 16, 1024>}, {transform_indices = @transform_4, window_bounds = array<i64: 16, 1024>}]} {
    %c0 = arith.constant 0 : index
    %c0_0 = arith.constant 0 : index
    %0 = vector.load %arg1[%c0, %c0_0] : memref<16x256xbf16, #tpu.memory_space<vmem>>, vector<16x256xbf16>
    %c0_1 = arith.constant 0 : index
    %c0_2 = arith.constant 0 : index
    %1 = vector.load %arg2[%c0_1, %c0_2] : memref<256x1024xbf16, #tpu.memory_space<vmem>>, vector<256x1024xbf16>
    %cst = arith.constant dense<0.000000e+00> : vector<16x1024xf32>
    %2 = tpu.matmul %0, %1, %cst {dimension_numbers = #tpu.dot_dimension_numbers<[1], [0], [0], [1], [0, 0, 1, 1], [], []>} : vector<16x256xbf16>, vector<256x1024xbf16>, vector<16x1024xf32> -> vector<16x1024xf32>
    %c0_3 = arith.constant 0 : index
    %c0_4 = arith.constant 0 : index
    %3 = vector.load %arg3[%c0_3, %c0_4] : memref<1x1024xf32, #tpu.memory_space<vmem>>, vector<1x1024xf32>
    %4 = vector.broadcast %3 : vector<1x1024xf32> to vector<16x1024xf32>
    %5 = arith.addf %2, %4 : vector<16x1024xf32>
    %c0_5 = arith.constant 0 : index
    %c0_6 = arith.constant 0 : index
    %6 = vector.load %arg4[%c0_5, %c0_6] : memref<16x1024xbf16, #tpu.memory_space<vmem>>, vector<16x1024xbf16>
    %7 = arith.extf %6 : vector<16x1024xbf16> to vector<16x1024xf32>
    %8 = arith.addf %5, %7 : vector<16x1024xf32>
    %cst_7 = arith.constant 0.000000e+00 : f32
    %9 = vector.broadcast %cst_7 : f32 to vector<16x1024xf32>
    %10 = arith.maximumf %8, %9 : vector<16x1024xf32>
    %11 = arith.truncf %10 : vector<16x1024xf32> to vector<16x1024xbf16>
    %c0_8 = arith.constant 0 : index
    %c0_9 = arith.constant 0 : index
    %12 = vector.load %arg5[%c0_8, %c0_9] : memref<16x1024xbf16, #tpu.memory_space<vmem>>, vector<16x1024xbf16>
    tpu.vector_store %arg5[%c0_8, %c0_9], %11 {strides = array<i32>} : memref<16x1024xbf16, #tpu.memory_space<vmem>>, vector<16x1024xbf16>,
    return
  }
  func.func @transform_0(%arg0: i32) -> (i32, i32) {
    %c0_i32 = arith.constant 0 : i32
    %c0_i32_0 = arith.constant 0 : i32
    return %arg0, %c0_i32 : i32, i32
  }
  func.func @transform_1(%arg0: i32) -> (i32, i32) {
    %c0_i32 = arith.constant 0 : i32
    %c0_i32_0 = arith.constant 0 : i32
    %c0_i32_1 = arith.constant 0 : i32
    return %c0_i32, %c0_i32_0 : i32, i32
  }
  func.func @transform_2(%arg0: i32) -> (i32, i32) {
    %c0_i32 = arith.constant 0 : i32
    %c0_i32_0 = arith.constant 0 : i32
    %c0_i32_1 = arith.constant 0 : i32
    return %c0_i32, %c0_i32_0 : i32, i32
  }
  func.func @transform_3(%arg0: i32) -> (i32, i32) {
    %c0_i32 = arith.constant 0 : i32
    %c0_i32_0 = arith.constant 0 : i32
    return %arg0, %c0_i32 : i32, i32
  }
  func.func @transform_4(%arg0: i32) -> (i32, i32) {
    %c0_i32 = arith.constant 0 : i32
    %c0_i32_0 = arith.constant 0 : i32
    return %arg0, %c0_i32 : i32, i32
  }
}

module attributes {stable_mosaic.version = 11 : i64} {
  func.func @_mm_bias_relu_kernel(%arg0: i32, %arg1: memref<16x2304xbf16, #tpu.memory_space<vmem>>, %arg2: memref<2304x256xbf16, #tpu.memory_space<vmem>>, %arg3: memref<1x256xf32, #tpu.memory_space<vmem>>, %arg4: memref<16x256xbf16, #tpu.memory_space<vmem>>) attributes {dimension_semantics = [#tpu.dimension_semantics<parallel>], iteration_bounds = array<i64: 2>, scalar_prefetch = 0 : i64, scratch_operands = 0 : i64, tpu.core_type = #tpu.core_type<tc>, window_params = [{transform_indices = @transform_0, window_bounds = array<i64: 16, 2304>}, {pipeline_mode = #tpu.pipeline_mode<synchronous>, transform_indices = @transform_1, window_bounds = array<i64: 2304, 256>}, {pipeline_mode = #tpu.pipeline_mode<synchronous>, transform_indices = @transform_2, window_bounds = array<i64: 1, 256>}, {transform_indices = @transform_3, window_bounds = array<i64: 16, 256>}]} {
    %c0 = arith.constant 0 : index
    %c0_0 = arith.constant 0 : index
    %0 = vector.load %arg1[%c0, %c0_0] : memref<16x2304xbf16, #tpu.memory_space<vmem>>, vector<16x2304xbf16>
    %c0_1 = arith.constant 0 : index
    %c0_2 = arith.constant 0 : index
    %1 = vector.load %arg2[%c0_1, %c0_2] : memref<2304x256xbf16, #tpu.memory_space<vmem>>, vector<2304x256xbf16>
    %cst = arith.constant dense<0.000000e+00> : vector<16x256xf32>
    %2 = tpu.matmul %0, %1, %cst {dimension_numbers = #tpu.dot_dimension_numbers<[1], [0], [0], [1], [0, 0, 1, 1], [], []>} : vector<16x2304xbf16>, vector<2304x256xbf16>, vector<16x256xf32> -> vector<16x256xf32>
    %c0_3 = arith.constant 0 : index
    %c0_4 = arith.constant 0 : index
    %3 = vector.load %arg3[%c0_3, %c0_4] : memref<1x256xf32, #tpu.memory_space<vmem>>, vector<1x256xf32>
    %4 = vector.broadcast %3 : vector<1x256xf32> to vector<16x256xf32>
    %5 = arith.addf %2, %4 : vector<16x256xf32>
    %cst_5 = arith.constant 0.000000e+00 : f32
    %6 = vector.broadcast %cst_5 : f32 to vector<16x256xf32>
    %7 = arith.maximumf %5, %6 : vector<16x256xf32>
    %8 = arith.truncf %7 : vector<16x256xf32> to vector<16x256xbf16>
    %c0_6 = arith.constant 0 : index
    %c0_7 = arith.constant 0 : index
    %9 = vector.load %arg4[%c0_6, %c0_7] : memref<16x256xbf16, #tpu.memory_space<vmem>>, vector<16x256xbf16>
    tpu.vector_store %arg4[%c0_6, %c0_7], %8 {strides = array<i32>} : memref<16x256xbf16, #tpu.memory_space<vmem>>, vector<16x256xbf16>,
    return
  }
  func.func @transform_0(%arg0: i32) -> (i32, i32) {
    %c0_i32 = arith.constant 0 : i32
    %c0_i32_0 = arith.constant 0 : i32
    return %arg0, %c0_i32 : i32, i32
  }
  func.func @transform_1(%arg0: i32) -> (i32, i32) {
    %c0_i32 = arith.constant 0 : i32
    %c0_i32_0 = arith.constant 0 : i32
    %c0_i32_1 = arith.constant 0 : i32
    return %c0_i32, %c0_i32_0 : i32, i32
  }
  func.func @transform_2(%arg0: i32) -> (i32, i32) {
    %c0_i32 = arith.constant 0 : i32
    %c0_i32_0 = arith.constant 0 : i32
    %c0_i32_1 = arith.constant 0 : i32
    return %c0_i32, %c0_i32_0 : i32, i32
  }
  func.func @transform_3(%arg0: i32) -> (i32, i32) {
    %c0_i32 = arith.constant 0 : i32
    %c0_i32_0 = arith.constant 0 : i32
    return %arg0, %c0_i32 : i32, i32
  }
}

module attributes {stable_mosaic.version = 11 : i64} {
  func.func @_mm_bias_relu_kernel(%arg0: i32, %arg1: memref<16x1024xbf16, #tpu.memory_space<vmem>>, %arg2: memref<1024x256xbf16, #tpu.memory_space<vmem>>, %arg3: memref<1x256xf32, #tpu.memory_space<vmem>>, %arg4: memref<16x256xbf16, #tpu.memory_space<vmem>>) attributes {dimension_semantics = [#tpu.dimension_semantics<parallel>], iteration_bounds = array<i64: 2>, scalar_prefetch = 0 : i64, scratch_operands = 0 : i64, tpu.core_type = #tpu.core_type<tc>, window_params = [{transform_indices = @transform_0, window_bounds = array<i64: 16, 1024>}, {pipeline_mode = #tpu.pipeline_mode<synchronous>, transform_indices = @transform_1, window_bounds = array<i64: 1024, 256>}, {pipeline_mode = #tpu.pipeline_mode<synchronous>, transform_indices = @transform_2, window_bounds = array<i64: 1, 256>}, {transform_indices = @transform_3, window_bounds = array<i64: 16, 256>}]} {
    %c0 = arith.constant 0 : index
    %c0_0 = arith.constant 0 : index
    %0 = vector.load %arg1[%c0, %c0_0] : memref<16x1024xbf16, #tpu.memory_space<vmem>>, vector<16x1024xbf16>
    %c0_1 = arith.constant 0 : index
    %c0_2 = arith.constant 0 : index
    %1 = vector.load %arg2[%c0_1, %c0_2] : memref<1024x256xbf16, #tpu.memory_space<vmem>>, vector<1024x256xbf16>
    %cst = arith.constant dense<0.000000e+00> : vector<16x256xf32>
    %2 = tpu.matmul %0, %1, %cst {dimension_numbers = #tpu.dot_dimension_numbers<[1], [0], [0], [1], [0, 0, 1, 1], [], []>} : vector<16x1024xbf16>, vector<1024x256xbf16>, vector<16x256xf32> -> vector<16x256xf32>
    %c0_3 = arith.constant 0 : index
    %c0_4 = arith.constant 0 : index
    %3 = vector.load %arg3[%c0_3, %c0_4] : memref<1x256xf32, #tpu.memory_space<vmem>>, vector<1x256xf32>
    %4 = vector.broadcast %3 : vector<1x256xf32> to vector<16x256xf32>
    %5 = arith.addf %2, %4 : vector<16x256xf32>
    %cst_5 = arith.constant 0.000000e+00 : f32
    %6 = vector.broadcast %cst_5 : f32 to vector<16x256xf32>
    %7 = arith.maximumf %5, %6 : vector<16x256xf32>
    %8 = arith.truncf %7 : vector<16x256xf32> to vector<16x256xbf16>
    %c0_6 = arith.constant 0 : index
    %c0_7 = arith.constant 0 : index
    %9 = vector.load %arg4[%c0_6, %c0_7] : memref<16x256xbf16, #tpu.memory_space<vmem>>, vector<16x256xbf16>
    tpu.vector_store %arg4[%c0_6, %c0_7], %8 {strides = array<i32>} : memref<16x256xbf16, #tpu.memory_space<vmem>>, vector<16x256xbf16>,
    return
  }
  func.func @transform_0(%arg0: i32) -> (i32, i32) {
    %c0_i32 = arith.constant 0 : i32
    %c0_i32_0 = arith.constant 0 : i32
    return %arg0, %c0_i32 : i32, i32
  }
  func.func @transform_1(%arg0: i32) -> (i32, i32) {
    %c0_i32 = arith.constant 0 : i32
    %c0_i32_0 = arith.constant 0 : i32
    %c0_i32_1 = arith.constant 0 : i32
    return %c0_i32, %c0_i32_0 : i32, i32
  }
  func.func @transform_2(%arg0: i32) -> (i32, i32) {
    %c0_i32 = arith.constant 0 : i32
    %c0_i32_0 = arith.constant 0 : i32
    %c0_i32_1 = arith.constant 0 : i32
    return %c0_i32, %c0_i32_0 : i32, i32
  }
  func.func @transform_3(%arg0: i32) -> (i32, i32) {
    %c0_i32 = arith.constant 0 : i32
    %c0_i32_0 = arith.constant 0 : i32
    return %arg0, %c0_i32 : i32, i32
  }
}

</mosaic_0001>

<bundles_post_ra>
// kernel: encoder_forward.45
= control target key start
LH: loop header
LB: loop body
LE: loop exit
PB: predicated region body
PF: predicated region fallthrough
CT: control target
= control target key end

     0   :  { %s1093_s12 = smov 0   ;;  %s1212_s0 = inlined_call_operand.vmem [shape: bf16[512,27], index: 0, kind: input, shape index: {}]   ;;  %s1213_s1 = inlined_call_operand.vmem [shape: bf16[27,128], index: 1, kind: input, shape index: {}]   ;;  %s1214_s2 = inlined_call_operand.vmem [shape: f32[1,128], index: 2, kind: input, shape index: {}]   ;;  %s1215_s3 = inlined_call_operand.vmem [shape: bf16[512,128], index: 3, kind: output, shape index: {}]  }
   0x1 LB: > { %s774_s13 = sadd.s32 4294967295, %s1070_s12   ;;  %p778_p0 = scmp.ge.s32.totalorder %s1070_s12, 1  ;;  %s1070_s12 = sphi %s1093_s12, %s13_s12  }
   0x2   : > { %p138_p1 = scmp.lt.s32.totalorder %s1070_s12, 3 }
   0x4   : > { %p139_p2 = pnand %p778_p0, %p138_p1 }
   0x5   : > { %v1046_v0 = vld [vmem:[%s1213_s1] sm:$0xff] (!%p139_p2)   ;;  %vm358_vm0 = vcmask (!%p139_p2), 1044480   ;;  %v1047_v1 = vld [vmem:[%s1213_s1 + $0x8] sm:$0x3f] (!%p139_p2)   ;;  %vm359_vm1 = vcmask (!%p139_p2), 1045504   ;;  %s779_s18 = sshll.u32 (!%p139_p2), %s774_s13, 5 }
   0x6   : > { %142 = sbr.rel (%p139_p2) target bundleno = 265 (0x109), region = 32  ;;  %997 = vmatprep.subr.bf16.mxu0 (!%p139_p2), %v1046_v0  ;;  %1033 = vmatprep.subr.bf16.mxu1 (!%p139_p2), %v1046_v0  ;;  %v1072_v2 = vmov (!%p139_p2), 65535   ;;  %p163_p3 = scmp.lt.s32.totalorder (!%p139_p2), %s779_s18, 63  ;;  %vm309_vm2 = vcmask (!%p139_p2), 220160   ;;  %v1152_v22 = vld [vmem:[%s1214_s2] ss:$0 sm:$0xff] (!%p139_p2) }
   0x7   : > { %998 = vmatpush3.bf16.msra.mxu0 (!%p139_p2), %v1046_v0  ;;  %1035 = vmatpush3.bf16.msra.mxu1 (!%p139_p2), %v1046_v0  ;;  %v360_v3 = vsel (!%p139_p2), %vm358_vm0, 4294967295, %v1072_v2 }
   0x8   : > { %v361_v4 = vsel (!%p139_p2), %vm359_vm1, %v360_v3, 0 }
   0x9   : > { %v363_v5 = vand.u32 (!%p139_p2), %v1047_v1, %v361_v4 }
   0xb   : > { %999 = vmatprep.subr.bf16.mxu0 (!%p139_p2), %v363_v5  ;;  %1034 = vmatprep.subr.bf16.mxu1 (!%p139_p2), %v363_v5 }
   0xc   : > { %1000 = vmatpush3.bf16.msra.mxu0 (!%p139_p2), %v363_v5  ;;  %1036 = vmatpush3.bf16.msra.mxu1 (!%p139_p2), %v363_v5 }
   0xd   : > { %s1217_s18 = smov (!%p163_p3, %s779_s18), 63 }
   0xe   : > { %s780_s19 = sshll.u32 %s1217_s18, 2 }
   0xf   : > { %s1115_s22 = scalar_lea.vmem %s1212_s0, %s780_s19  ;;  %s1167_s27 = scalar_lea.vmem %s1215_s3, %s780_s19 }
  0x10   : > { %v1048_v6 = vld [vmem:[%s1115_s22] sm:$0xff]   ;;  %v1050_v8 = vld [vmem:[%s1115_s22 + $0x8] sm:$0xff]   ;;  %v1052_v10 = vld [vmem:[%s1115_s22 + $0x10] sm:$0xff]  }
  0x11   : > { %v1049_v7 = vld [vmem:[%s1115_s22 + $0x40] sm:$0xff]   ;;  %1001 = vmatprep.mubr.msk.bf16.mxu0 %vm309_vm2, %v1048_v6  ;;  %v1051_v9 = vld [vmem:[%s1115_s22 + $0x48] sm:$0xff]   ;;  %v1053_v11 = vld [vmem:[%s1115_s22 + $0x50] sm:$0xff]  }
  0x12   : > { %1017 = vmatprep.mubr.msk.bf16.mxu1 %vm309_vm2, %v1049_v7  ;;  %1002 = vmatmul.mubr.msk.bf16.vlgmr.msra.gmra.mrb[0].mxu0 %vm309_vm2, %v1050_v8  ;;  %v1054_v12 = vld [vmem:[%s1115_s22 + $0x18] sm:$0xff]   ;;  %v1056_v14 = vld [vmem:[%s1115_s22 + $0x20] sm:$0xff]   ;;  %v1058_v16 = vld [vmem:[%s1115_s22 + $0x28] sm:$0xff]  }
  0x13   : > { %1018 = vmatmul.mubr.msk.bf16.vlgmr.msra.gmra.mrb[0].mxu1 %vm309_vm2, %v1051_v9  ;;  %1005 = vmatprep.mubr.msk.bf16.mxu0 %vm309_vm2, %v1052_v10  ;;  %v1055_v13 = vld [vmem:[%s1115_s22 + $0x58] sm:$0xff]   ;;  %v1057_v15 = vld [vmem:[%s1115_s22 + $0x60] sm:$0xff]   ;;  %v1059_v17 = vld [vmem:[%s1115_s22 + $0x68] sm:$0xff]  }
  0x14   : > { %1021 = vmatprep.mubr.msk.bf16.mxu1 %vm309_vm2, %v1053_v11  ;;  %v1060_v18 = vld [vmem:[%s1115_s22 + $0x30] sm:$0xff]   ;;  %v1062_v20 = vld [vmem:[%s1115_s22 + $0x38] sm:$0xff]  }
  0x15   : > { %v1061_v19 = vld [vmem:[%s1115_s22 + $0x70] sm:$0xff]   ;;  %v1063_v21 = vld [vmem:[%s1115_s22 + $0x78] sm:$0xff]  }
  0x1a   : > { %1006 = vmatmul.mubr.msk.bf16.gmra.mrb[4].mxu0 %vm309_vm2, %v1054_v12 }
  0x1b   : > { %1022 = vmatmul.mubr.msk.bf16.gmra.mrb[4].mxu1 %vm309_vm2, %v1055_v13  ;;  %1009 = vmatprep.mubr.msk.bf16.mxu0 %vm309_vm2, %v1056_v14 }
  0x1c   : > { %1025 = vmatprep.mubr.msk.bf16.mxu1 %vm309_vm2, %v1057_v15 }
  0x22   : > { %1010 = vmatmul.mubr.msk.bf16.gmra.mrb[8].mxu0 %vm309_vm2, %v1058_v16 }
  0x23   : > { %1026 = vmatmul.mubr.msk.bf16.gmra.mrb[8].mxu1 %vm309_vm2, %v1059_v17  ;;  %1013 = vmatprep.mubr.msk.bf16.mxu0 %vm309_vm2, %v1060_v18 }
  0x24   : > { %1029 = vmatprep.mubr.msk.bf16.mxu1 %vm309_vm2, %v1061_v19 }
  0x2a   : > { %1014 = vmatmul.mubr.msk.bf16.gmra.mrb[12].mxu0 %vm309_vm2, %v1062_v20 }
  0x2b   : > { %1030 = vmatmul.mubr.msk.bf16.gmra.mrb[12].mxu1 %vm309_vm2, %v1063_v21 }
  0xe5   : > { %v1003_v23 = vpop.f32.mrb[0].mxu0 }
  0xe6   : > { %v408_v24 = vadd.f32 %v1003_v23, %v1152_v22  ;;  %v1019_v25 = vpop.f32.mrb[0].mxu1  ;;  %v399_v26 = vpop.f32.mrb[1].mxu0 }
  0xe7   : > { %v472_v27 = vadd.f32 %v1019_v25, %v1152_v22  ;;  %v400_v28 = vadd.f32 %v1152_v22, %v399_v26  ;;  %v463_v29 = vpop.f32.mrb[1].mxu1  ;;  %v1004_v30 = vpop.f32.mrb[2].mxu0 }
  0xe8   : > { %v464_v31 = vadd.f32 %v1152_v22, %v463_v29  ;;  %v411_v32 = vadd.f32 %v1004_v30, %v1152_v22  ;;  %v1020_v33 = vpop.f32.mrb[2].mxu1  ;;  %v402_v34 = vpop.f32.mrb[3].mxu0  ;;  %v528_v38 = vmax.f32 %v408_v24, 0.0 }
  0xe9   : > { %v475_v35 = vadd.f32 %v1020_v33, %v1152_v22  ;;  %v403_v36 = vadd.f32 %v1152_v22, %v402_v34  ;;  %v466_v37 = vpop.f32.mrb[3].mxu1  ;;  %v544_v41 = vmax.f32 %v472_v27, 0.0  ;;  %v526_v42 = vmax.f32 %v400_v28, 0.0 }
  0xea   : > { %v529_v39 = vmax.f32 %v411_v32, 0.0  ;;  %v467_v40 = vadd.f32 %v1152_v22, %v466_v37  ;;  %v542_v45 = vmax.f32 %v464_v31, 0.0 }
  0xeb   : > { %v545_v43 = vmax.f32 %v475_v35, 0.0  ;;  %v527_v44 = vmax.f32 %v403_v36, 0.0 }
  0xec   : > { %v892_v46 = vpack.c.bf16 %v529_v39, %v528_v38  ;;  %v543_v47 = vmax.f32 %v467_v40, 0.0 }
  0xed   : > { %v932_v48 = vpack.c.bf16 %v545_v43, %v544_v41  ;;  %v887_v49 = vpack.c.bf16 %v527_v44, %v526_v42  ;;  %v1007_v50 = vpop.f32.mrb[4].mxu0 }
  0xee   : > { %964 = vst [vmem:[%s1167_s27 + $0x8] sm:$0xff] %v892_v46   ;;  %v927_v51 = vpack.c.bf16 %v543_v47, %v542_v45  ;;  %v424_v52 = vadd.f32 %v1007_v50, %v1152_v22  ;;  %v1023_v53 = vpop.f32.mrb[4].mxu1  ;;  %v415_v54 = vpop.f32.mrb[5].mxu0 }
  0xef   : > { %972 = vst [vmem:[%s1167_s27 + $0x48] sm:$0xff] %v932_v48   ;;  %888 = vst [vmem:[%s1167_s27] sm:$0xff] %v887_v49   ;;  %v488_v55 = vadd.f32 %v1023_v53, %v1152_v22  ;;  %v416_v56 = vadd.f32 %v1152_v22, %v415_v54  ;;  %v479_v57 = vpop.f32.mrb[5].mxu1  ;;  %v1008_v58 = vpop.f32.mrb[6].mxu0 }
  0xf0   : > { %971 = vst [vmem:[%s1167_s27 + $0x40] sm:$0xff] %v927_v51   ;;  %v480_v59 = vadd.f32 %v1152_v22, %v479_v57  ;;  %v427_v60 = vadd.f32 %v1008_v58, %v1152_v22  ;;  %v1024_v61 = vpop.f32.mrb[6].mxu1  ;;  %v418_v62 = vpop.f32.mrb[7].mxu0  ;;  %v532_v2 = vmax.f32 %v424_v52, 0.0 }
  0xf1   : > { %v491_v63 = vadd.f32 %v1024_v61, %v1152_v22  ;;  %v419_v0 = vadd.f32 %v1152_v22, %v418_v62  ;;  %v482_v1 = vpop.f32.mrb[7].mxu1  ;;  %v548_v5 = vmax.f32 %v488_v55, 0.0  ;;  %v530_v6 = vmax.f32 %v416_v56, 0.0 }
  0xf2   : > { %v533_v3 = vmax.f32 %v427_v60, 0.0  ;;  %v483_v4 = vadd.f32 %v1152_v22, %v482_v1  ;;  %v546_v9 = vmax.f32 %v480_v59, 0.0 }
  0xf3   : > { %v549_v7 = vmax.f32 %v491_v63, 0.0  ;;  %v531_v8 = vmax.f32 %v419_v0, 0.0 }
  0xf4   : > { %v902_v10 = vpack.c.bf16 %v533_v3, %v532_v2  ;;  %v547_v11 = vmax.f32 %v483_v4, 0.0 }
  0xf5   : > { %v942_v12 = vpack.c.bf16 %v549_v7, %v548_v5  ;;  %v897_v13 = vpack.c.bf16 %v531_v8, %v530_v6  ;;  %v1011_v14 = vpop.f32.mrb[8].mxu0 }
  0xf6   : > { %966 = vst [vmem:[%s1167_s27 + $0x18] sm:$0xff] %v902_v10   ;;  %v937_v15 = vpack.c.bf16 %v547_v11, %v546_v9  ;;  %v440_v16 = vadd.f32 %v1011_v14, %v1152_v22  ;;  %v1027_v17 = vpop.f32.mrb[8].mxu1  ;;  %v431_v18 = vpop.f32.mrb[9].mxu0 }
  0xf7   : > { %974 = vst [vmem:[%s1167_s27 + $0x58] sm:$0xff] %v942_v12   ;;  %965 = vst [vmem:[%s1167_s27 + $0x10] sm:$0xff] %v897_v13   ;;  %v504_v19 = vadd.f32 %v1027_v17, %v1152_v22  ;;  %v432_v20 = vadd.f32 %v1152_v22, %v431_v18  ;;  %v495_v21 = vpop.f32.mrb[9].mxu1  ;;  %v1012_v23 = vpop.f32.mrb[10].mxu0 }
  0xf8   : > { %973 = vst [vmem:[%s1167_s27 + $0x50] sm:$0xff] %v937_v15   ;;  %v496_v24 = vadd.f32 %v1152_v22, %v495_v21  ;;  %v443_v25 = vadd.f32 %v1012_v23, %v1152_v22  ;;  %v1028_v26 = vpop.f32.mrb[10].mxu1  ;;  %v434_v27 = vpop.f32.mrb[11].mxu0  ;;  %v536_v31 = vmax.f32 %v440_v16, 0.0 }
  0xf9   : > { %v507_v28 = vadd.f32 %v1028_v26, %v1152_v22  ;;  %v435_v29 = vadd.f32 %v1152_v22, %v434_v27  ;;  %v498_v30 = vpop.f32.mrb[11].mxu1  ;;  %v552_v34 = vmax.f32 %v504_v19, 0.0  ;;  %v534_v35 = vmax.f32 %v432_v20, 0.0 }
  0xfa   : > { %v537_v32 = vmax.f32 %v443_v25, 0.0  ;;  %v499_v33 = vadd.f32 %v1152_v22, %v498_v30  ;;  %v550_v38 = vmax.f32 %v496_v24, 0.0 }
  0xfb   : > { %v553_v36 = vmax.f32 %v507_v28, 0.0  ;;  %v535_v37 = vmax.f32 %v435_v29, 0.0 }
  0xfc   : > { %v912_v39 = vpack.c.bf16 %v537_v32, %v536_v31  ;;  %v551_v40 = vmax.f32 %v499_v33, 0.0 }
  0xfd   : > { %v952_v41 = vpack.c.bf16 %v553_v36, %v552_v34  ;;  %v907_v42 = vpack.c.bf16 %v535_v37, %v534_v35  ;;  %v1015_v43 = vpop.f32.mrb[12].mxu0 }
  0xfe   : > { %968 = vst [vmem:[%s1167_s27 + $0x28] sm:$0xff] %v912_v39   ;;  %v947_v44 = vpack.c.bf16 %v551_v40, %v550_v38  ;;  %v456_v45 = vadd.f32 %v1015_v43, %v1152_v22  ;;  %v1031_v46 = vpop.f32.mrb[12].mxu1  ;;  %v447_v47 = vpop.f32.mrb[13].mxu0 }
  0xff   : > { %976 = vst [vmem:[%s1167_s27 + $0x68] sm:$0xff] %v952_v41   ;;  %967 = vst [vmem:[%s1167_s27 + $0x20] sm:$0xff] %v907_v42   ;;  %v520_v48 = vadd.f32 %v1031_v46, %v1152_v22  ;;  %v448_v49 = vadd.f32 %v1152_v22, %v447_v47  ;;  %v511_v50 = vpop.f32.mrb[13].mxu1  ;;  %v1016_v51 = vpop.f32.mrb[14].mxu0 }
 0x100   : > { %975 = vst [vmem:[%s1167_s27 + $0x60] sm:$0xff] %v947_v44   ;;  %v512_v52 = vadd.f32 %v1152_v22, %v511_v50  ;;  %v459_v53 = vadd.f32 %v1016_v51, %v1152_v22  ;;  %v1032_v54 = vpop.f32.mrb[14].mxu1  ;;  %v450_v55 = vpop.f32.mrb[15].mxu0  ;;  %v540_v59 = vmax.f32 %v456_v45, 0.0 }
 0x101   : > { %v523_v56 = vadd.f32 %v1032_v54, %v1152_v22  ;;  %v451_v57 = vadd.f32 %v1152_v22, %v450_v55  ;;  %v514_v58 = vpop.f32.mrb[15].mxu1  ;;  %v556_v62 = vmax.f32 %v520_v48, 0.0  ;;  %v538_v63 = vmax.f32 %v448_v49, 0.0 }
 0x102   : > { %v541_v60 = vmax.f32 %v459_v53, 0.0  ;;  %v515_v61 = vadd.f32 %v1152_v22, %v514_v58  ;;  %v554_v2 = vmax.f32 %v512_v52, 0.0 }
 0x103   : > { %v557_v0 = vmax.f32 %v523_v56, 0.0  ;;  %v539_v1 = vmax.f32 %v451_v57, 0.0 }
 0x104   : > { %v922_v3 = vpack.c.bf16 %v541_v60, %v540_v59  ;;  %v555_v4 = vmax.f32 %v515_v61, 0.0 }
 0x105   : > { %v962_v5 = vpack.c.bf16 %v557_v0, %v556_v62  ;;  %v917_v6 = vpack.c.bf16 %v539_v1, %v538_v63 }
 0x106   : > { %970 = vst [vmem:[%s1167_s27 + $0x38] sm:$0xff] %v922_v3   ;;  %v957_v7 = vpack.c.bf16 %v555_v4, %v554_v2 }
 0x107   : > { %978 = vst [vmem:[%s1167_s27 + $0x78] sm:$0xff] %v962_v5   ;;  %969 = vst [vmem:[%s1167_s27 + $0x30] sm:$0xff] %v917_v6  }
 0x108   : > { %977 = vst [vmem:[%s1167_s27 + $0x70] sm:$0xff] %v957_v7  }
 0x109 PF: > { %s13_s12 = sadd.s32 1, %s1070_s12  }
 0x10a   : > { %p10_p4 = scmp.ge.s32.totalorder %s13_s12, 4  }
 0x10c   :  { %12 = sbr.rel (!%p10_p4) target bundleno = 1 (0x1), region = 62 }

// kernel: encoder_forward.46
= control target key start
LH: loop header
LB: loop body
LE: loop exit
PB: predicated region body
PF: predicated region fallthrough
CT: control target
= control target key end

     0   :  { %s1806_s12 = smov 0   ;;  %s2032_s0 = inlined_call_operand.vmem [shape: bf16[512,288], index: 0, kind: input, shape index: {}]   ;;  %s2033_s1 = inlined_call_operand.vmem [shape: bf16[288,128], index: 1, kind: input, shape index: {}]   ;;  %s2034_s2 = inlined_call_operand.vmem [shape: f32[1,128], index: 2, kind: input, shape index: {}]   ;;  %s2035_s3 = inlined_call_operand.vmem [shape: bf16[512,128], index: 3, kind: output, shape index: {}]  }
   0x1 LB: > { %s1252_s13 = sadd.s32 4294967295, %s1784_s12   ;;  %p1256_p0 = scmp.ge.s32.totalorder %s1784_s12, 1  ;;  %s1784_s12 = sphi %s1806_s12, %s13_s12  }
   0x2   : > { %p139_p1 = scmp.lt.s32.totalorder %s1784_s12, 3 }
   0x4   : > { %p140_p2 = pnand %p1256_p0, %p139_p1 }
   0x5   : > { %v1696_v0 = vld [vmem:[%s2033_s1 + $0x40] sm:$0xff] (!%p140_p2)   ;;  %s1257_s16 = sshll.u32 (!%p140_p2), %s1252_s13, 5  ;;  %v1698_v2 = vld [vmem:[%s2033_s1 + $0x48] sm:$0xff] (!%p140_p2)   ;;  %v1700_v4 = vld [vmem:[%s2033_s1 + $0x50] sm:$0xff] (!%p140_p2)   ;;  %vm633_vm0 = vcmask (!%p140_p2), 261120  }
   0x6   : > { %143 = sbr.rel (%p140_p2) target bundleno = 352 (0x160), region = 32  ;;  %v1697_v1 = vld [vmem:[%s2033_s1] sm:$0xff] (!%p140_p2)   ;;  %1505 = vmatprep.subr.bf16.mxu0 (!%p140_p2), %v1696_v0  ;;  %1671 = vmatprep.subr.bf16.mxu1 (!%p140_p2), %v1696_v0  ;;  %p165_p3 = scmp.lt.s32.totalorder (!%p140_p2), %s1257_s16, 63  ;;  %v1699_v3 = vld [vmem:[%s2033_s1 + $0x8] sm:$0xff] (!%p140_p2)   ;;  %v1701_v5 = vld [vmem:[%s2033_s1 + $0x10] sm:$0xff] (!%p140_p2)  }
   0x7   : > { %1506 = vmatpush3.bf16.msra.mxu0 (!%p140_p2), %v1697_v1  ;;  %1679 = vmatpush3.bf16.msra.mxu1 (!%p140_p2), %v1697_v1  ;;  %v1702_v6 = vld [vmem:[%s2033_s1 + $0x58] sm:$0xff] (!%p140_p2)   ;;  %v1704_v8 = vld [vmem:[%s2033_s1 + $0x60] sm:$0xff] (!%p140_p2)   ;;  %v1706_v10 = vld [vmem:[%s2033_s1 + $0x68] sm:$0xff] (!%p140_p2)  }
   0x8   : > { %1507 = vmatprep.subr.bf16.mxu0 (!%p140_p2), %v1698_v2  ;;  %1672 = vmatprep.subr.bf16.mxu1 (!%p140_p2), %v1698_v2  ;;  %v1703_v7 = vld [vmem:[%s2033_s1 + $0x18] sm:$0xff] (!%p140_p2)   ;;  %v1705_v9 = vld [vmem:[%s2033_s1 + $0x20] sm:$0xff] (!%p140_p2)   ;;  %v1707_v13 = vld [vmem:[%s2033_s1 + $0x28] sm:$0xff] (!%p140_p2)  }
   0x9   : > { %v1708_v14 = vld [vmem:[%s2033_s1 + $0x70] sm:$0xff] (!%p140_p2)   ;;  %v1710_v16 = vld [vmem:[%s2033_s1 + $0x78] sm:$0xff] (!%p140_p2)   ;;  %v1718_v18 = vld [vmem:[%s2033_s1 + $0x80] sm:$0xff] (!%p140_p2)  }
   0xa   : > { %v1709_v15 = vld [vmem:[%s2033_s1 + $0x30] sm:$0xff] (!%p140_p2)   ;;  %v1711_v17 = vld [vmem:[%s2033_s1 + $0x38] sm:$0xff] (!%p140_p2)   ;;  %v1731_v23 = vld [vmem:[%s2033_s1 + $0x88] sm:$0xff] (!%p140_p2)  }
   0xb   : > { %1508 = vmatpush3.bf16.msra.mxu0 (!%p140_p2), %v1699_v3  ;;  %1680 = vmatpush3.bf16.msra.mxu1 (!%p140_p2), %v1699_v3 }
   0xc   : > { %1509 = vmatprep.subr.bf16.mxu0 (!%p140_p2), %v1700_v4  ;;  %1673 = vmatprep.subr.bf16.mxu1 (!%p140_p2), %v1700_v4 }
   0xd   : > { %s2037_s16 = smov (!%p165_p3, %s1257_s16), 63 }
   0xe   : > { %s1687_s29 = smul.u32 12, %s2037_s16  ;;  %s1260_s5 = sshll.u32 %s2037_s16, 2 }
   0xf   : > { %1510 = vmatpush3.bf16.msra.mxu0 %v1701_v5  ;;  %1681 = vmatpush3.bf16.msra.mxu1 %v1701_v5  ;;  %s1969_s8 = scalar_lea.vmem %s2035_s3, %s1260_s5 }
  0x10   : > { %1511 = vmatprep.subr.bf16.mxu0 %v1702_v6  ;;  %1674 = vmatprep.subr.bf16.mxu1 %v1702_v6  ;;  %s1847_s9 = scalar_lea.vmem %s2032_s0, %s1687_s29 }
  0x11   : > { %v1714_v11 = vld [vmem:[%s1847_s9 + $0x4] ss:$12 sps:$4 sm:$0xff]   ;;  %v1712_v19 = vld [vmem:[%s1847_s9] ss:$12 sps:$4 sm:$0xff]   ;;  %v1719_v21 = vld [vmem:[%s1847_s9 + $0x1c] ss:$12 sps:$4 sm:$0xff]  }
  0x12   : > { %v1717_v12 = vld [vmem:[%s1847_s9 + $0x124] ss:$12 sps:$4 sm:$0xff]   ;;  %714 = vmatprep.mubr.bf16.mxu0 %v1714_v11  ;;  %v1715_v20 = vld [vmem:[%s1847_s9 + $0x120] ss:$12 sps:$4 sm:$0xff]   ;;  %v1721_v22 = vld [vmem:[%s1847_s9 + $0x13c] ss:$12 sps:$4 sm:$0xff]  }
  0x13   : > { %1512 = vmatpush3.bf16.msra.mxu0 %v1703_v7  ;;  %1682 = vmatpush3.bf16.msra.mxu1 %v1703_v7  ;;  %v1723_v24 = vld [vmem:[%s1847_s9 + $0x18] ss:$12 sps:$4 sm:$0xff]   ;;  %v1725_v26 = vld [vmem:[%s1847_s9 + $0x34] ss:$12 sps:$4 sm:$0xff]   ;;  %v1729_v28 = vld [vmem:[%s1847_s9 + $0x30] ss:$12 sps:$4 sm:$0xff]  }
  0x14   : > { %1513 = vmatprep.subr.bf16.mxu0 %v1704_v8  ;;  %1675 = vmatprep.subr.bf16.mxu1 %v1704_v8  ;;  %v1724_v25 = vld [vmem:[%s1847_s9 + $0x138] ss:$12 sps:$4 sm:$0xff]   ;;  %v1727_v27 = vld [vmem:[%s1847_s9 + $0x154] ss:$12 sps:$4 sm:$0xff]   ;;  %v1730_v29 = vld [vmem:[%s1847_s9 + $0x150] ss:$12 sps:$4 sm:$0xff]  }
  0x15   : > { %810 = vmatprep.mubr.bf16.mxu1 %v1717_v12  ;;  %v1732_v30 = vld [vmem:[%s1847_s9 + $0x4c] ss:$12 sps:$4 sm:$0xff]   ;;  %v1736_v32 = vld [vmem:[%s1847_s9 + $0x48] ss:$12 sps:$4 sm:$0xff]   ;;  %v1738_v34 = vld [vmem:[%s1847_s9 + $0x64] ss:$12 sps:$4 sm:$0xff]  }
  0x16   : > { %v1734_v31 = vld [vmem:[%s1847_s9 + $0x16c] ss:$12 sps:$4 sm:$0xff]   ;;  %v1737_v33 = vld [vmem:[%s1847_s9 + $0x168] ss:$12 sps:$4 sm:$0xff]   ;;  %v1747_v41 = vld [vmem:[%s1847_s9 + $0x50] ss:$12 sps:$4 sm:$0xff]  }
  0x17   : > { %1514 = vmatpush3.bf16.msra.mxu0 %v1705_v9  ;;  %1683 = vmatpush3.bf16.msra.mxu1 %v1705_v9  ;;  %v1740_v35 = vld [vmem:[%s1847_s9 + $0x8] ss:$12 sps:$4 sm:$0xff]   ;;  %v1741_v36 = vld [vmem:[%s1847_s9 + $0x60] ss:$12 sps:$4 sm:$0xff]   ;;  %v1745_v39 = vld [vmem:[%s1847_s9 + $0x38] ss:$12 sps:$4 sm:$0xff]  }
  0x18   : > { %1515 = vmatprep.subr.bf16.mxu0 %v1706_v10  ;;  %1676 = vmatprep.subr.bf16.mxu1 %v1706_v10  ;;  %v1742_v37 = vld [vmem:[%s1847_s9 + $0x20] ss:$12 sps:$4 sm:$0xff]   ;;  %v1743_v38 = vld [vmem:[%s1847_s9 + $0x7c] ss:$12 sps:$4 sm:$0xff]   ;;  %v1746_v40 = vld [vmem:[%s1847_s9 + $0x78] ss:$12 sps:$4 sm:$0xff]  }
  0x19   : > { %v1748_v42 = vld [vmem:[%s1847_s9 + $0x94] ss:$12 sps:$4 sm:$0xff]   ;;  %v1751_v44 = vld [vmem:[%s1847_s9 + $0x90] ss:$12 sps:$4 sm:$0xff]   ;;  %v1753_v46 = vld [vmem:[%s1847_s9 + $0xac] ss:$12 sps:$4 sm:$0xff]  }
  0x1a   : > { %v1750_v43 = vld [vmem:[%s1847_s9 + $0x68] ss:$12 sps:$4 sm:$0xff]   ;;  %v1752_v45 = vld [vmem:[%s1847_s9 + $0x80] ss:$12 sps:$4 sm:$0xff]   ;;  %v1755_v47 = vld [vmem:[%s1847_s9 + $0x98] ss:$12 sps:$4 sm:$0xff]  }
  0x1b   : > { %1516 = vmatpush3.bf16.msra.mxu0 %v1707_v13  ;;  %1684 = vmatpush3.bf16.msra.mxu1 %v1707_v13  ;;  %v1756_v48 = vld [vmem:[%s1847_s9 + $0xa8] ss:$12 sps:$4 sm:$0xff]   ;;  %v1757_v49 = vld [vmem:[%s1847_s9 + $0xb0] ss:$12 sps:$4 sm:$0xff]   ;;  %v1761_v52 = vld [vmem:[%s1847_s9 + $0xc0] ss:$12 sps:$4 sm:$0xff]  }
  0x1c   : > { %1517 = vmatprep.subr.bf16.mxu0 %v1708_v14  ;;  %1677 = vmatprep.subr.bf16.mxu1 %v1708_v14  ;;  %v1758_v50 = vld [vmem:[%s1847_s9 + $0xc4] ss:$12 sps:$4 sm:$0xff]   ;;  %v1760_v51 = vld [vmem:[%s1847_s9 + $0xc8] ss:$12 sps:$4 sm:$0xff]   ;;  %v1762_v53 = vld [vmem:[%s1847_s9 + $0xe0] ss:$12 sps:$4 sm:$0xff]  }
  0x1d   : > { %v1763_v54 = vld [vmem:[%s1847_s9 + $0xdc] ss:$12 sps:$4 sm:$0xff]   ;;  %v1765_v55 = vld [vmem:[%s1847_s9 + $0xf8] ss:$12 sps:$4 sm:$0xff]   ;;  %v1768_v58 = vld [vmem:[%s1847_s9 + $0xf4] ss:$12 sps:$4 sm:$0xff]  }
  0x1e   : > { %v1766_v56 = vld [vmem:[%s1847_s9 + $0xd8] ss:$12 sps:$4 sm:$0xff]   ;;  %v1767_v57 = vld [vmem:[%s1847_s9 + $0x110] ss:$12 sps:$4 sm:$0xff]   ;;  %v1770_v59 = vld [vmem:[%s1847_s9 + $0x128] ss:$12 sps:$4 sm:$0xff]  }
  0x1f   : > { %1518 = vmatpush3.bf16.msra.mxu0 %v1709_v15  ;;  %1685 = vmatpush3.bf16.msra.mxu1 %v1709_v15  ;;  %v1771_v60 = vld [vmem:[%s1847_s9 + $0xf0] ss:$12 sps:$4 sm:$0xff]   ;;  %v1772_v61 = vld [vmem:[%s1847_s9 + $0x140] ss:$12 sps:$4 sm:$0xff]   ;;  %v1775_v63 = vld [vmem:[%s1847_s9 + $0x158] ss:$12 sps:$4 sm:$0xff]  }
  0x20   : > { %1519 = vmatprep.subr.bf16.mxu0 %v1710_v16  ;;  %1678 = vmatprep.subr.bf16.mxu1 %v1710_v16  ;;  %v1773_v62 = vld [vmem:[%s1847_s9 + $0x10c] ss:$12 sps:$4 sm:$0xff]   ;;  %v1776_v0 = vld [vmem:[%s1847_s9 + $0x108] ss:$12 sps:$4 sm:$0xff]   ;;  %v1777_v1 = vld [vmem:[%s1847_s9 + $0x170] ss:$12 sps:$4 sm:$0xff]  }
  0x23   : > { %1520 = vmatpush3.bf16.msra.mxu0 %v1711_v17  ;;  %1686 = vmatpush3.bf16.msra.mxu1 %v1711_v17 }
  0x24   : > { %1635 = vmatprep.subr.bf16.mxu1 %v1718_v18 }
  0x26   : > { %715 = vmatmul.mubr.bf16.vlgmr.msra.gmra.mrb[0].mxu0 %v1712_v19  ;;  %811 = vmatmul.mubr.bf16.vlgmr.msra.gmra.mrb[0].mxu1 %v1715_v20 }
  0x27   : > { %1636 = vmatpush3.bf16.msra.mxu1 %v1718_v18  ;;  %722 = vmatprep.mubr.bf16.mxu0 %v1719_v21 }
  0x28   : > { %818 = vmatprep.mubr.bf16.mxu1 %v1721_v22  ;;  %1637 = vmatprep.subr.bf16.mxu1 %v1731_v23 }
  0x2b   : > { %1638 = vmatpush3.bf16.msra.mxu1 %v1731_v23 }
  0x2e   : > { %723 = vmatmul.mubr.bf16.gmra.mrb[4].mxu0 %v1723_v24  ;;  %819 = vmatmul.mubr.bf16.gmra.mrb[4].mxu1 %v1724_v25 }
  0x2f   : > { %730 = vmatprep.mubr.bf16.mxu0 %v1725_v26  ;;  %826 = vmatprep.mubr.bf16.mxu1 %v1727_v27 }
  0x36   : > { %731 = vmatmul.mubr.bf16.gmra.mrb[8].mxu0 %v1729_v28  ;;  %827 = vmatmul.mubr.bf16.gmra.mrb[8].mxu1 %v1730_v29 }
  0x37   : > { %738 = vmatprep.mubr.bf16.mxu0 %v1732_v30  ;;  %834 = vmatprep.mubr.bf16.mxu1 %v1734_v31 }
  0x3e   : > { %739 = vmatmul.mubr.bf16.gmra.mrb[12].mxu0 %v1736_v32  ;;  %835 = vmatmul.mubr.bf16.gmra.mrb[12].mxu1 %v1737_v33 }
  0x3f   : > { %746 = vmatprep.mubr.bf16.mxu0 %v1738_v34  ;;  %1639 = vmatprep.mubr.msk.bf16.mxu1 %vm633_vm0, %v1740_v35 }
  0x46   : > { %747 = vmatmul.mubr.bf16.gmra.mrb[16].mxu0 %v1741_v36  ;;  %1640 = vmatmul.mubr.msk.bf16.vlgmr.msra.gmra.mrb[16].mxu1 %vm633_vm0, %v1742_v37 }
  0x47   : > { %754 = vmatprep.mubr.bf16.mxu0 %v1743_v38  ;;  %1643 = vmatprep.mubr.msk.bf16.mxu1 %vm633_vm0, %v1745_v39 }
  0x4e   : > { %755 = vmatmul.mubr.bf16.gmra.mrb[20].mxu0 %v1746_v40  ;;  %1644 = vmatmul.mubr.msk.bf16.gmra.mrb[20].mxu1 %vm633_vm0, %v1747_v41 }
  0x4f   : > { %762 = vmatprep.mubr.bf16.mxu0 %v1748_v42  ;;  %1647 = vmatprep.mubr.msk.bf16.mxu1 %vm633_vm0, %v1750_v43 }
  0x56   : > { %763 = vmatmul.mubr.bf16.gmra.mrb[24].mxu0 %v1751_v44  ;;  %1648 = vmatmul.mubr.msk.bf16.gmra.mrb[24].mxu1 %vm633_vm0, %v1752_v45 }
  0x57   : > { %770 = vmatprep.mubr.bf16.mxu0 %v1753_v46  ;;  %1651 = vmatprep.mubr.msk.bf16.mxu1 %vm633_vm0, %v1755_v47 }
  0x5e   : > { %771 = vmatmul.mubr.bf16.gmra.mrb[28].mxu0 %v1756_v48  ;;  %1652 = vmatmul.mubr.msk.bf16.gmra.mrb[28].mxu1 %vm633_vm0, %v1757_v49 }
  0x5f   : > { %778 = vmatprep.mubr.bf16.mxu0 %v1758_v50  ;;  %1655 = vmatprep.mubr.msk.bf16.mxu1 %vm633_vm0, %v1760_v51  ;;  %v1959_v50 = vld [vmem:[%s2034_s2] ss:$0 sm:$0xff] }
  0x66   : > { %779 = vmatmul.mubr.bf16.gmra.mrb[32].mxu0 %v1761_v52  ;;  %1656 = vmatmul.mubr.msk.bf16.gmra.mrb[32].mxu1 %vm633_vm0, %v1762_v53 }
  0x67   : > { %786 = vmatprep.mubr.bf16.mxu0 %v1763_v54  ;;  %1659 = vmatprep.mubr.msk.bf16.mxu1 %vm633_vm0, %v1765_v55 }
  0x6e   : > { %787 = vmatmul.mubr.bf16.gmra.mrb[36].mxu0 %v1766_v56  ;;  %1660 = vmatmul.mubr.msk.bf16.gmra.mrb[36].mxu1 %vm633_vm0, %v1767_v57 }
  0x6f   : > { %794 = vmatprep.mubr.bf16.mxu0 %v1768_v58  ;;  %1663 = vmatprep.mubr.msk.bf16.mxu1 %vm633_vm0, %v1770_v59 }
  0x76   : > { %795 = vmatmul.mubr.bf16.gmra.mrb[40].mxu0 %v1771_v60  ;;  %1664 = vmatmul.mubr.msk.bf16.gmra.mrb[40].mxu1 %vm633_vm0, %v1772_v61 }
  0x77   : > { %802 = vmatprep.mubr.bf16.mxu0 %v1773_v62  ;;  %1667 = vmatprep.mubr.msk.bf16.mxu1 %vm633_vm0, %v1775_v63 }
  0x7e   : > { %803 = vmatmul.mubr.bf16.gmra.mrb[44].mxu0 %v1776_v0  ;;  %1668 = vmatmul.mubr.msk.bf16.gmra.mrb[44].mxu1 %vm633_vm0, %v1777_v1 }
  0xf9   : > { %v1521_v2 = vpop.f32.mrb[0].mxu0  ;;  %v1593_v3 = vpop.f32.mrb[0].mxu1 }
  0xfa   : > { %v1522_v4 = vpop.f32.mrb[1].mxu0  ;;  %v1594_v5 = vpop.f32.mrb[1].mxu1 }
  0xfb   : > { %v1523_v6 = vadd.f32 %v1522_v4, %v1521_v2  ;;  %v1524_v7 = vpop.f32.mrb[2].mxu0  ;;  %v1940_v8 = vadd.f32 %v1594_v5, %v1593_v3  ;;  %v1596_v9 = vpop.f32.mrb[2].mxu1 }
  0xfc   : > { %v1525_v10 = vpop.f32.mrb[3].mxu0  ;;  %v1597_v11 = vpop.f32.mrb[3].mxu1 }
  0xfd   : > { %v1526_v12 = vadd.f32 %v1525_v10, %v1524_v7  ;;  %v1942_v13 = vadd.f32 %v1597_v11, %v1596_v9  ;;  %v717_v54 = vadd.f32 %v1523_v6, %v1959_v50 }
  0xff   : > { %v720_v63 = vadd.f32 %v1526_v12, %v1959_v50 }
 0x101   : > { %v1527_v14 = vpop.f32.mrb[4].mxu0  ;;  %v1599_v15 = vpop.f32.mrb[4].mxu1 }
 0x102   : > { %v1528_v16 = vpop.f32.mrb[5].mxu0  ;;  %v1600_v17 = vpop.f32.mrb[5].mxu1 }
 0x103   : > { %v1529_v18 = vadd.f32 %v1528_v16, %v1527_v14  ;;  %v1530_v19 = vpop.f32.mrb[6].mxu0  ;;  %v1944_v20 = vadd.f32 %v1600_v17, %v1599_v15  ;;  %v1602_v21 = vpop.f32.mrb[6].mxu1 }
 0x104   : > { %v1531_v22 = vpop.f32.mrb[7].mxu0  ;;  %v1603_v23 = vpop.f32.mrb[7].mxu1 }
 0x105   : > { %v1532_v24 = vadd.f32 %v1531_v22, %v1530_v19  ;;  %v1946_v25 = vadd.f32 %v1603_v23, %v1602_v21  ;;  %v725_v51 = vadd.f32 %v1529_v18, %v1959_v50 }
 0x107   : > { %v728_v58 = vadd.f32 %v1532_v24, %v1959_v50 }
 0x109   : > { %v1533_v26 = vpop.f32.mrb[8].mxu0  ;;  %v1605_v27 = vpop.f32.mrb[8].mxu1 }
 0x10a   : > { %v1534_v28 = vpop.f32.mrb[9].mxu0  ;;  %v1606_v29 = vpop.f32.mrb[9].mxu1 }
 0x10b   : > { %v1535_v30 = vadd.f32 %v1534_v28, %v1533_v26  ;;  %v1536_v31 = vpop.f32.mrb[10].mxu0  ;;  %v1948_v32 = vadd.f32 %v1606_v29, %v1605_v27  ;;  %v1608_v33 = vpop.f32.mrb[10].mxu1 }
 0x10c   : > { %v1537_v34 = vpop.f32.mrb[11].mxu0  ;;  %v1609_v35 = vpop.f32.mrb[11].mxu1 }
 0x10d   : > { %v1538_v36 = vadd.f32 %v1537_v34, %v1536_v31  ;;  %v1950_v37 = vadd.f32 %v1609_v35, %v1608_v33  ;;  %v733_v16 = vadd.f32 %v1535_v30, %v1959_v50 }
 0x10f   : > { %v736_v27 = vadd.f32 %v1538_v36, %v1959_v50 }
 0x111   : > { %v1539_v38 = vpop.f32.mrb[12].mxu0  ;;  %v1611_v39 = vpop.f32.mrb[12].mxu1 }
 0x112   : > { %v1540_v40 = vpop.f32.mrb[13].mxu0  ;;  %v1612_v41 = vpop.f32.mrb[13].mxu1 }
 0x113   : > { %v1541_v42 = vadd.f32 %v1540_v40, %v1539_v38  ;;  %v1542_v43 = vpop.f32.mrb[14].mxu0  ;;  %v1952_v44 = vadd.f32 %v1612_v41, %v1611_v39  ;;  %v1614_v45 = vpop.f32.mrb[14].mxu1 }
 0x114   : > { %v1543_v46 = vpop.f32.mrb[15].mxu0  ;;  %v1615_v47 = vpop.f32.mrb[15].mxu1 }
 0x115   : > { %v1544_v48 = vadd.f32 %v1543_v46, %v1542_v43  ;;  %v1954_v49 = vadd.f32 %v1615_v47, %v1614_v45  ;;  %v741_v11 = vadd.f32 %v1541_v42, %v1959_v50 }
 0x117   : > { %v744_v21 = vadd.f32 %v1544_v48, %v1959_v50 }
 0x119   : > { %v1545_v52 = vpop.f32.mrb[16].mxu0  ;;  %v1641_v53 = vpop.f32.mrb[16].mxu1 }
 0x11a   : > { %v886_v55 = vadd.f32 %v1641_v53, %v725_v51  ;;  %v1546_v56 = vpop.f32.mrb[17].mxu0  ;;  %v877_v57 = vpop.f32.mrb[17].mxu1 }
 0x11b   : > { %v1547_v59 = vadd.f32 %v1546_v56, %v1545_v52  ;;  %v878_v60 = vadd.f32 %v877_v57, %v717_v54  ;;  %v1548_v61 = vpop.f32.mrb[18].mxu0  ;;  %v1642_v62 = vpop.f32.mrb[18].mxu1 }
 0x11c   : > { %v889_v0 = vadd.f32 %v1642_v62, %v728_v58  ;;  %v1549_v1 = vpop.f32.mrb[19].mxu0  ;;  %v880_v2 = vpop.f32.mrb[19].mxu1  ;;  %v1006_v5 = vmax.f32 %v886_v55, 0.0 }
 0x11d   : > { %v1550_v3 = vadd.f32 %v1549_v1, %v1548_v61  ;;  %v881_v4 = vadd.f32 %v880_v2, %v720_v63  ;;  %v1004_v6 = vmax.f32 %v878_v60, 0.0  ;;  %v749_v46 = vadd.f32 %v1547_v59, %v1959_v50 }
 0x11e   : > { %v1007_v7 = vmax.f32 %v889_v0, 0.0 }
 0x11f   : > { %v1005_v9 = vmax.f32 %v881_v4, 0.0  ;;  %v752_v56 = vadd.f32 %v1550_v3, %v1959_v50 }
 0x120   : > { %v1418_v10 = vpack.c.bf16 %v1007_v7, %v1006_v5 }
 0x121   : > { %v1413_v12 = vpack.c.bf16 %v1005_v9, %v1004_v6  ;;  %v1551_v14 = vpop.f32.mrb[20].mxu0  ;;  %v1645_v15 = vpop.f32.mrb[20].mxu1 }
 0x122   : > { %1490 = vst [vmem:[%s1969_s8 + $0x8] sm:$0xff] %v1418_v10   ;;  %v902_v17 = vadd.f32 %v1645_v15, %v741_v11  ;;  %v1552_v18 = vpop.f32.mrb[21].mxu0  ;;  %v893_v19 = vpop.f32.mrb[21].mxu1 }
 0x123   : > { %1414 = vst [vmem:[%s1969_s8] sm:$0xff] %v1413_v12   ;;  %v1553_v22 = vadd.f32 %v1552_v18, %v1551_v14  ;;  %v894_v23 = vadd.f32 %v893_v19, %v733_v16  ;;  %v1554_v24 = vpop.f32.mrb[22].mxu0  ;;  %v1646_v26 = vpop.f32.mrb[22].mxu1 }
 0x124   : > { %v905_v28 = vadd.f32 %v1646_v26, %v744_v21  ;;  %v1555_v29 = vpop.f32.mrb[23].mxu0  ;;  %v896_v31 = vpop.f32.mrb[23].mxu1  ;;  %v1010_v30 = vmax.f32 %v902_v17, 0.0 }
 0x125   : > { %v1556_v33 = vadd.f32 %v1555_v29, %v1554_v24  ;;  %v897_v34 = vadd.f32 %v896_v31, %v736_v27  ;;  %v1008_v38 = vmax.f32 %v894_v23, 0.0  ;;  %v757_v41 = vadd.f32 %v1553_v22, %v1959_v50 }
 0x126   : > { %v1011_v35 = vmax.f32 %v905_v28, 0.0 }
 0x127   : > { %v1009_v39 = vmax.f32 %v897_v34, 0.0  ;;  %v760_v51 = vadd.f32 %v1556_v33, %v1959_v50 }
 0x128   : > { %v1428_v40 = vpack.c.bf16 %v1011_v35, %v1010_v30 }
 0x129   : > { %v1423_v42 = vpack.c.bf16 %v1009_v39, %v1008_v38  ;;  %v1557_v43 = vpop.f32.mrb[24].mxu0  ;;  %v1649_v45 = vpop.f32.mrb[24].mxu1 }
 0x12a   : > { %1492 = vst [vmem:[%s1969_s8 + $0x18] sm:$0xff] %v1428_v40   ;;  %v918_v36 = vadd.f32 %v1649_v45, %v757_v41  ;;  %v1558_v47 = vpop.f32.mrb[25].mxu0  ;;  %v909_v48 = vpop.f32.mrb[25].mxu1 }
 0x12b   : > { %1491 = vst [vmem:[%s1969_s8 + $0x10] sm:$0xff] %v1423_v42   ;;  %v1559_v52 = vadd.f32 %v1558_v47, %v1557_v43  ;;  %v910_v53 = vadd.f32 %v909_v48, %v749_v46  ;;  %v1560_v54 = vpop.f32.mrb[26].mxu0  ;;  %v1650_v55 = vpop.f32.mrb[26].mxu1 }
 0x12c   : > { %v921_v57 = vadd.f32 %v1650_v55, %v760_v51  ;;  %v1561_v58 = vpop.f32.mrb[27].mxu0  ;;  %v912_v60 = vpop.f32.mrb[27].mxu1  ;;  %v1014_v62 = vmax.f32 %v918_v36, 0.0 }
 0x12d   : > { %v1562_v61 = vadd.f32 %v1561_v58, %v1560_v54  ;;  %v913_v59 = vadd.f32 %v912_v60, %v752_v56  ;;  %v1012_v0 = vmax.f32 %v910_v53, 0.0  ;;  %v765_v6 = vadd.f32 %v1559_v52, %v1959_v50 }
 0x12e   : > { %v1015_v63 = vmax.f32 %v921_v57, 0.0 }
 0x12f   : > { %v1013_v1 = vmax.f32 %v913_v59, 0.0  ;;  %v768_v15 = vadd.f32 %v1562_v61, %v1959_v50 }
 0x130   : > { %v1438_v2 = vpack.c.bf16 %v1015_v63, %v1014_v62 }
 0x131   : > { %v1433_v4 = vpack.c.bf16 %v1013_v1, %v1012_v0  ;;  %v1563_v5 = vpop.f32.mrb[28].mxu0  ;;  %v1653_v7 = vpop.f32.mrb[28].mxu1 }
 0x132   : > { %1494 = vst [vmem:[%s1969_s8 + $0x28] sm:$0xff] %v1438_v2   ;;  %v1564_v9 = vpop.f32.mrb[29].mxu0  ;;  %v925_v10 = vpop.f32.mrb[29].mxu1 }
 0x133   : > { %1493 = vst [vmem:[%s1969_s8 + $0x20] sm:$0xff] %v1433_v4   ;;  %v1565_v3 = vadd.f32 %v1564_v9, %v1563_v5  ;;  %v926_v11 = vadd.f32 %v925_v10, %v765_v6  ;;  %v1566_v12 = vpop.f32.mrb[30].mxu0  ;;  %v1654_v14 = vpop.f32.mrb[30].mxu1  ;;  %v821_v4 = vadd.f32 %v1944_v20, %v1959_v50  ;;  %v813_v9 = vadd.f32 %v1940_v8, %v1959_v50 }
 0x134   : > { %v1567_v16 = vpop.f32.mrb[31].mxu0  ;;  %v928_v17 = vpop.f32.mrb[31].mxu1 }
 0x135   : > { %v773_v18 = vadd.f32 %v1565_v3, %v1959_v50  ;;  %v1568_v19 = vadd.f32 %v1567_v16, %v1566_v12  ;;  %v929_v21 = vadd.f32 %v928_v17, %v768_v15  ;;  %v1016_v23 = vmax.f32 %v926_v11, 0.0 }
 0x136   : > { %v824_v12 = vadd.f32 %v1946_v25, %v1959_v50 }
 0x137   : > { %v934_v22 = vadd.f32 %v1653_v7, %v773_v18  ;;  %v776_v24 = vadd.f32 %v1568_v19, %v1959_v50  ;;  %v1017_v26 = vmax.f32 %v929_v21, 0.0 }
 0x139   : > { %v937_v27 = vadd.f32 %v1654_v14, %v776_v24  ;;  %v1443_v28 = vpack.c.bf16 %v1017_v26, %v1016_v23  ;;  %v1569_v29 = vpop.f32.mrb[32].mxu0  ;;  %v1657_v31 = vpop.f32.mrb[32].mxu1  ;;  %v1018_v30 = vmax.f32 %v934_v22, 0.0  ;;  %v816_v22 = vadd.f32 %v1942_v13, %v1959_v50 }
 0x13a   : > { %v1570_v33 = vpop.f32.mrb[33].mxu0  ;;  %v941_v34 = vpop.f32.mrb[33].mxu1 }
 0x13b   : > { %v1019_v35 = vmax.f32 %v937_v27, 0.0  ;;  %1495 = vst [vmem:[%s1969_s8 + $0x30] sm:$0xff] %v1443_v28   ;;  %v1571_v38 = vadd.f32 %v1570_v33, %v1569_v29  ;;  %v1572_v39 = vpop.f32.mrb[34].mxu0  ;;  %v1658_v40 = vpop.f32.mrb[34].mxu1 }
 0x13c   : > { %v1573_v41 = vpop.f32.mrb[35].mxu0  ;;  %v944_v42 = vpop.f32.mrb[35].mxu1 }
 0x13d   : > { %v1448_v43 = vpack.c.bf16 %v1019_v35, %v1018_v30  ;;  %v781_v45 = vadd.f32 %v1571_v38, %v1959_v50  ;;  %v1574_v46 = vadd.f32 %v1573_v41, %v1572_v39  ;;  %v837_v35 = vadd.f32 %v1952_v44, %v1959_v50 }
 0x13f   : > { %1496 = vst [vmem:[%s1969_s8 + $0x38] sm:$0xff] %v1448_v43   ;;  %v942_v36 = vadd.f32 %v941_v34, %v781_v45  ;;  %v784_v47 = vadd.f32 %v1574_v46, %v1959_v50  ;;  %v840_v46 = vadd.f32 %v1954_v49, %v1959_v50 }
 0x141   : > { %v945_v48 = vadd.f32 %v944_v42, %v784_v47  ;;  %v1575_v51 = vpop.f32.mrb[36].mxu0  ;;  %v1993_v52 = vpop.f32.mrb[36].mxu1  ;;  %v1020_v55 = vmax.f32 %v942_v36, 0.0 }
 0x142   : > { %v1576_v53 = vpop.f32.mrb[37].mxu0  ;;  %v957_v54 = vpop.f32.mrb[37].mxu1 }
 0x143   : > { %v1021_v56 = vmax.f32 %v945_v48, 0.0  ;;  %v1577_v57 = vadd.f32 %v1576_v53, %v1575_v51  ;;  %v1578_v58 = vpop.f32.mrb[38].mxu0  ;;  %v1995_v60 = vpop.f32.mrb[38].mxu1 }
 0x144   : > { %v1579_v61 = vpop.f32.mrb[39].mxu0  ;;  %v960_v59 = vpop.f32.mrb[39].mxu1 }
 0x145   : > { %v1453_v62 = vpack.c.bf16 %v1021_v56, %v1020_v55  ;;  %v789_v63 = vadd.f32 %v1577_v57, %v1959_v50  ;;  %v1580_v0 = vadd.f32 %v1579_v61, %v1578_v58 }
 0x147   : > { %1497 = vst [vmem:[%s1969_s8 + $0x40] sm:$0xff] %v1453_v62   ;;  %v950_v1 = vadd.f32 %v1657_v31, %v789_v63  ;;  %v792_v2 = vadd.f32 %v1580_v0, %v1959_v50 }
 0x149   : > { %v953_v5 = vadd.f32 %v1658_v40, %v792_v2  ;;  %v1581_v7 = vpop.f32.mrb[40].mxu0  ;;  %v1665_v6 = vpop.f32.mrb[40].mxu1  ;;  %v1022_v14 = vmax.f32 %v950_v1, 0.0  ;;  %v829_v40 = vadd.f32 %v1948_v32, %v1959_v50  ;;  %v832_v32 = vadd.f32 %v1950_v37, %v1959_v50 }
 0x14a   : > { %v982_v10 = vadd.f32 %v1665_v6, %v821_v4  ;;  %v1582_v3 = vpop.f32.mrb[41].mxu0  ;;  %v973_v11 = vpop.f32.mrb[41].mxu1 }
 0x14b   : > { %v1023_v15 = vmax.f32 %v953_v5, 0.0  ;;  %v1583_v16 = vadd.f32 %v1582_v3, %v1581_v7  ;;  %v974_v17 = vadd.f32 %v973_v11, %v813_v9  ;;  %v1584_v18 = vpop.f32.mrb[42].mxu0  ;;  %v1666_v19 = vpop.f32.mrb[42].mxu1 }
 0x14c   : > { %v985_v20 = vadd.f32 %v1666_v19, %v824_v12  ;;  %v1585_v21 = vpop.f32.mrb[43].mxu0  ;;  %v976_v23 = vpop.f32.mrb[43].mxu1  ;;  %v1030_v27 = vmax.f32 %v982_v10, 0.0 }
 0x14d   : > { %v1458_v8 = vpack.c.bf16 %v1023_v15, %v1022_v14  ;;  %v797_v24 = vadd.f32 %v1583_v16, %v1959_v50  ;;  %v1586_v26 = vadd.f32 %v1585_v21, %v1584_v18  ;;  %v977_v28 = vadd.f32 %v976_v23, %v816_v22 }
 0x14e   : > { %v1031_v25 = vmax.f32 %v985_v20, 0.0  ;;  %v1028_v33 = vmax.f32 %v974_v17, 0.0 }
 0x14f   : > { %1498 = vst [vmem:[%s1969_s8 + $0x48] sm:$0xff] %v1458_v8   ;;  %v958_v29 = vadd.f32 %v957_v54, %v797_v24  ;;  %v800_v31 = vadd.f32 %v1586_v26, %v1959_v50  ;;  %v1029_v30 = vmax.f32 %v977_v28, 0.0 }
 0x150   : > { %v1478_v34 = vpack.c.bf16 %v1031_v25, %v1030_v27 }
 0x151   : > { %v961_v13 = vadd.f32 %v960_v59, %v800_v31  ;;  %v1587_v38 = vpop.f32.mrb[44].mxu0  ;;  %v1669_v39 = vpop.f32.mrb[44].mxu1  ;;  %v1473_v41 = vpack.c.bf16 %v1029_v30, %v1028_v33  ;;  %v1024_v36 = vmax.f32 %v958_v29, 0.0 }
 0x152   : > { %1502 = vst [vmem:[%s1969_s8 + $0x68] sm:$0xff] %v1478_v34   ;;  %v998_v42 = vadd.f32 %v1669_v39, %v837_v35  ;;  %v1588_v43 = vpop.f32.mrb[45].mxu0  ;;  %v989_v45 = vpop.f32.mrb[45].mxu1 }
 0x153   : > { %v1025_v47 = vmax.f32 %v961_v13, 0.0  ;;  %v1589_v48 = vadd.f32 %v1588_v43, %v1587_v38  ;;  %v990_v44 = vadd.f32 %v989_v45, %v829_v40  ;;  %v1590_v51 = vpop.f32.mrb[46].mxu0  ;;  %v1670_v53 = vpop.f32.mrb[46].mxu1  ;;  %1501 = vst [vmem:[%s1969_s8 + $0x60] sm:$0xff] %v1473_v41  }
 0x154   : > { %v1001_v54 = vadd.f32 %v1670_v53, %v840_v46  ;;  %v1591_v55 = vpop.f32.mrb[47].mxu0  ;;  %v992_v56 = vpop.f32.mrb[47].mxu1  ;;  %v1034_v61 = vmax.f32 %v998_v42, 0.0 }
 0x155   : > { %v1463_v57 = vpack.c.bf16 %v1025_v47, %v1024_v36  ;;  %v805_v58 = vadd.f32 %v1589_v48, %v1959_v50  ;;  %v1592_v49 = vadd.f32 %v1591_v55, %v1590_v51  ;;  %v993_v62 = vadd.f32 %v992_v56, %v832_v32 }
 0x156   : > { %v1035_v59 = vmax.f32 %v1001_v54, 0.0  ;;  %v1032_v1 = vmax.f32 %v990_v44, 0.0 }
 0x157   : > { %1499 = vst [vmem:[%s1969_s8 + $0x50] sm:$0xff] %v1463_v57   ;;  %v966_v63 = vadd.f32 %v1993_v52, %v805_v58  ;;  %v808_v0 = vadd.f32 %v1592_v49, %v1959_v50  ;;  %v1033_v4 = vmax.f32 %v993_v62, 0.0 }
 0x158   : > { %v1488_v2 = vpack.c.bf16 %v1035_v59, %v1034_v61 }
 0x159   : > { %v969_v37 = vadd.f32 %v1995_v60, %v808_v0  ;;  %v1483_v5 = vpack.c.bf16 %v1033_v4, %v1032_v1  ;;  %v1026_v7 = vmax.f32 %v966_v63, 0.0 }
 0x15a   : > { %1504 = vst [vmem:[%s1969_s8 + $0x78] sm:$0xff] %v1488_v2  }
 0x15b   : > { %v1027_v6 = vmax.f32 %v969_v37, 0.0  ;;  %1503 = vst [vmem:[%s1969_s8 + $0x70] sm:$0xff] %v1483_v5  }
 0x15d   : > { %v1468_v9 = vpack.c.bf16 %v1027_v6, %v1026_v7 }
 0x15f   : > { %1500 = vst [vmem:[%s1969_s8 + $0x58] sm:$0xff] %v1468_v9  }
 0x160 PF: > { %s13_s12 = sadd.s32 1, %s1784_s12  }
 0x161   : > { %p10_p4 = scmp.ge.s32.totalorder %s13_s12, 4  }
 0x163   :  { %12 = sbr.rel (!%p10_p4) target bundleno = 1 (0x1), region = 62 }

// kernel: encoder_forward.48
= control target key start
LH: loop header
LB: loop body
LE: loop exit
PB: predicated region body
PF: predicated region fallthrough
CT: control target
= control target key end

     0   :  { %s610_s12 = smov 0   ;;  %s667_s0 = inlined_call_operand.vmem [shape: bf16[128,128], index: 0, kind: input, shape index: {}]   ;;  %s668_s1 = inlined_call_operand.vmem [shape: bf16[128,128], index: 1, kind: input, shape index: {}]   ;;  %s669_s2 = inlined_call_operand.vmem [shape: f32[1,128], index: 2, kind: input, shape index: {}]   ;;  %s670_s3 = inlined_call_operand.vmem [shape: bf16[128,128], index: 3, kind: output, shape index: {}]  }
   0x1 LB: > { %s447_s13 = sadd.s32 4294967295, %s588_s12   ;;  %p451_p0 = scmp.ge.s32.totalorder %s588_s12, 1  ;;  %s588_s12 = sphi %s610_s12, %s13_s12  }
   0x2   : > { %p138_p1 = scmp.lt.s32.totalorder %s588_s12, 3 }
   0x4   : > { %p139_p2 = pnand %p451_p0, %p138_p1 }
   0x5   : > { %v570_v0 = vld [vmem:[%s668_s1] sm:$0xff] (!%p139_p2)   ;;  %s452_s16 = sshll.u32 (!%p139_p2), %s447_s13, 3  ;;  %v571_v1 = vld [vmem:[%s668_s1 + $0x8] sm:$0xff] (!%p139_p2)   ;;  %v572_v2 = vld [vmem:[%s668_s1 + $0x10] sm:$0xff] (!%p139_p2)  }
   0x6   : > { %142 = sbr.rel (%p139_p2) target bundleno = 260 (0x104), region = 32  ;;  %p163_p3 = scmp.lt.s32.totalorder (!%p139_p2), %s452_s16, 15  ;;  %522 = vmatprep.subr.bf16.mxu0 (!%p139_p2), %v570_v0  ;;  %546 = vmatprep.subr.bf16.mxu1 (!%p139_p2), %v570_v0  ;;  %v573_v3 = vld [vmem:[%s668_s1 + $0x18] sm:$0xff] (!%p139_p2)   ;;  %v574_v6 = vld [vmem:[%s668_s1 + $0x20] sm:$0xff] (!%p139_p2)   ;;  %v575_v7 = vld [vmem:[%s668_s1 + $0x28] sm:$0xff] (!%p139_p2)  }
   0x7   : > { %523 = vmatpush3.bf16.msra.mxu0 (!%p139_p2), %v570_v0  ;;  %554 = vmatpush3.bf16.msra.mxu1 (!%p139_p2), %v570_v0  ;;  %v576_v8 = vld [vmem:[%s668_s1 + $0x30] sm:$0xff] (!%p139_p2)   ;;  %v577_v9 = vld [vmem:[%s668_s1 + $0x38] sm:$0xff] (!%p139_p2)   ;;  %v456_v12 = vld [vmem:[%s669_s2] ss:$0 sm:$0xff] (!%p139_p2) }
   0x8   : > { %524 = vmatprep.subr.bf16.mxu0 (!%p139_p2), %v571_v1  ;;  %547 = vmatprep.subr.bf16.mxu1 (!%p139_p2), %v571_v1 }
   0xb   : > { %525 = vmatpush3.bf16.msra.mxu0 (!%p139_p2), %v571_v1  ;;  %555 = vmatpush3.bf16.msra.mxu1 (!%p139_p2), %v571_v1 }
   0xc   : > { %526 = vmatprep.subr.bf16.mxu0 (!%p139_p2), %v572_v2  ;;  %548 = vmatprep.subr.bf16.mxu1 (!%p139_p2), %v572_v2 }
   0xd   : > { %s672_s16 = smov (!%p163_p3, %s452_s16), 15 }
   0xe   : > { %s453_s21 = sshll.u32 %s672_s16, 2 }
   0xf   : > { %s635_s24 = scalar_lea.vmem %s667_s0, %s453_s21  ;;  %527 = vmatpush3.bf16.msra.mxu0 %v572_v2  ;;  %556 = vmatpush3.bf16.msra.mxu1 %v572_v2  ;;  %s172_s13 = scalar_lea.vmem %s670_s3, %s453_s21 }
  0x10   : > { %v578_v4 = vld [vmem:[%s635_s24] sm:$0xff]   ;;  %v579_v5 = vld [vmem:[%s635_s24 + $0x10] sm:$0xff]   ;;  %528 = vmatprep.subr.bf16.mxu0 %v573_v3  ;;  %549 = vmatprep.subr.bf16.mxu1 %v573_v3  ;;  %v580_v10 = vld [vmem:[%s635_s24 + $0x8] sm:$0xff]  }
  0x11   : > { %538 = vmatprep.mubr.bf16.mxu0 %v578_v4  ;;  %542 = vmatprep.mubr.bf16.mxu1 %v579_v5  ;;  %v581_v11 = vld [vmem:[%s635_s24 + $0x18] sm:$0xff]  }
  0x13   : > { %529 = vmatpush3.bf16.msra.mxu0 %v573_v3  ;;  %557 = vmatpush3.bf16.msra.mxu1 %v573_v3 }
  0x14   : > { %530 = vmatprep.subr.bf16.mxu0 %v574_v6  ;;  %550 = vmatprep.subr.bf16.mxu1 %v574_v6 }
  0x17   : > { %531 = vmatpush3.bf16.msra.mxu0 %v574_v6  ;;  %558 = vmatpush3.bf16.msra.mxu1 %v574_v6 }
  0x18   : > { %532 = vmatprep.subr.bf16.mxu0 %v575_v7  ;;  %551 = vmatprep.subr.bf16.mxu1 %v575_v7 }
  0x1b   : > { %533 = vmatpush3.bf16.msra.mxu0 %v575_v7  ;;  %559 = vmatpush3.bf16.msra.mxu1 %v575_v7 }
  0x1c   : > { %534 = vmatprep.subr.bf16.mxu0 %v576_v8  ;;  %552 = vmatprep.subr.bf16.mxu1 %v576_v8 }
  0x1f   : > { %535 = vmatpush3.bf16.msra.mxu0 %v576_v8  ;;  %560 = vmatpush3.bf16.msra.mxu1 %v576_v8 }
  0x20   : > { %536 = vmatprep.subr.bf16.mxu0 %v577_v9  ;;  %553 = vmatprep.subr.bf16.mxu1 %v577_v9 }
  0x23   : > { %537 = vmatpush3.bf16.msra.mxu0 %v577_v9  ;;  %561 = vmatpush3.bf16.msra.mxu1 %v577_v9 }
  0x26   : > { %539 = vmatmul.mubr.bf16.vlgmr.msra.gmra.mrb[0].mxu0 %v580_v10  ;;  %543 = vmatmul.mubr.bf16.vlgmr.msra.gmra.mrb[0].mxu1 %v581_v11 }
  0xf9   : > { %v540_v13 = vpop.f32.mrb[0].mxu0  ;;  %v544_v14 = vpop.f32.mrb[0].mxu1 }
  0xfa   : > { %v321_v15 = vadd.f32 %v540_v13, %v456_v12  ;;  %v337_v16 = vadd.f32 %v544_v14, %v456_v12  ;;  %v312_v17 = vpop.f32.mrb[1].mxu0  ;;  %v328_v18 = vpop.f32.mrb[1].mxu1 }
  0xfb   : > { %v313_v19 = vadd.f32 %v456_v12, %v312_v17  ;;  %v329_v20 = vadd.f32 %v456_v12, %v328_v18  ;;  %v541_v21 = vpop.f32.mrb[2].mxu0  ;;  %v545_v22 = vpop.f32.mrb[2].mxu1 }
  0xfc   : > { %v324_v23 = vadd.f32 %v541_v21, %v456_v12  ;;  %v340_v24 = vadd.f32 %v545_v22, %v456_v12  ;;  %v315_v25 = vpop.f32.mrb[3].mxu0  ;;  %v331_v26 = vpop.f32.mrb[3].mxu1  ;;  %v345_v29 = vmax.f32 %v321_v15, 0.0  ;;  %v349_v30 = vmax.f32 %v337_v16, 0.0 }
  0xfd   : > { %v316_v27 = vadd.f32 %v456_v12, %v315_v25  ;;  %v332_v28 = vadd.f32 %v456_v12, %v331_v26  ;;  %v343_v33 = vmax.f32 %v313_v19, 0.0  ;;  %v347_v34 = vmax.f32 %v329_v20, 0.0 }
  0xfe   : > { %v346_v31 = vmax.f32 %v324_v23, 0.0  ;;  %v350_v32 = vmax.f32 %v340_v24, 0.0 }
  0xff   : > { %v344_v35 = vmax.f32 %v316_v27, 0.0  ;;  %v348_v36 = vmax.f32 %v332_v28, 0.0 }
 0x100   : > { %v495_v37 = vpack.c.bf16 %v346_v31, %v345_v29  ;;  %v505_v38 = vpack.c.bf16 %v350_v32, %v349_v30 }
 0x101   : > { %v490_v39 = vpack.c.bf16 %v344_v35, %v343_v33  ;;  %v500_v40 = vpack.c.bf16 %v348_v36, %v347_v34 }
 0x102   : > { %507 = vst [vmem:[%s172_s13 + $0x8] sm:$0xff] %v495_v37   ;;  %509 = vst [vmem:[%s172_s13 + $0x18] sm:$0xff] %v505_v38  }
 0x103   : > { %491 = vst [vmem:[%s172_s13] sm:$0xff] %v490_v39   ;;  %508 = vst [vmem:[%s172_s13 + $0x10] sm:$0xff] %v500_v40  }
 0x104 PF: > { %s13_s12 = sadd.s32 1, %s588_s12  }
 0x105   : > { %p10_p4 = scmp.ge.s32.totalorder %s13_s12, 4  }
 0x107   :  { %12 = sbr.rel (!%p10_p4) target bundleno = 1 (0x1), region = 62 }

// kernel: encoder_forward.50
= control target key start
LH: loop header
LB: loop body
LE: loop exit
PB: predicated region body
PF: predicated region fallthrough
CT: control target
= control target key end

     0   :  { %s635_s12 = smov 0   ;;  %s723_s0 = inlined_call_operand.vmem [shape: bf16[128,128], index: 0, kind: input, shape index: {}]   ;;  %s724_s1 = inlined_call_operand.vmem [shape: bf16[128,256], index: 1, kind: input, shape index: {}]   ;;  %s725_s2 = inlined_call_operand.vmem [shape: f32[1,256], index: 2, kind: input, shape index: {}]   ;;  %s726_s3 = inlined_call_operand.vmem [shape: bf16[128,256], index: 3, kind: output, shape index: {}]  }
   0x1 LB: > { %s504_s13 = sadd.s32 4294967295, %s612_s12   ;;  %p508_p0 = scmp.ge.s32.totalorder %s612_s12, 1  ;;  %s612_s12 = sphi %s635_s12, %s13_s12  }
   0x2   : > { %p138_p1 = scmp.lt.s32.totalorder %s612_s12, 3 }
   0x4   : > { %p139_p2 = pnand %p508_p0, %p138_p1 }
   0x5   : > { %v578_v0 = vld [vmem:[%s724_s1 + $0x4] ss:$8 sps:$4 sm:$0xff] (!%p139_p2)   ;;  %s509_s16 = sshll.u32 (!%p139_p2), %s504_s13, 3  ;;  %v580_v1 = vld [vmem:[%s724_s1] ss:$8 sps:$4 sm:$0xff] (!%p139_p2)   ;;  %v614_v2 = vmov (!%p139_p2), 0   ;;  %v203_v21 = vlaneseq (!%p139_p2) }
   0x6   : > { %142 = sbr.rel (%p139_p2) target bundleno = 267 (0x10b), region = 32  ;;  %349 = vmatprep.mubr.bf16.mxu0 (!%p139_p2), %v614_v2  ;;  %369 = vmatprep.mubr.bf16.mxu1 (!%p139_p2), %v614_v2  ;;  %p164_p3 = scmp.lt.s32.totalorder (!%p139_p2), %s509_s16, 15  ;;  %v581_v3 = vld [vmem:[%s724_s1 + $0x14] ss:$8 sps:$4 sm:$0xff] (!%p139_p2)   ;;  %v583_v4 = vld [vmem:[%s724_s1 + $0x10] ss:$8 sps:$4 sm:$0xff] (!%p139_p2)  }
   0x7   : > { %317 = vmatprep.subr.bf16.mxu0 (!%p139_p2), %v578_v0  ;;  %553 = vmatprep.subr.bf16.mxu1 (!%p139_p2), %v578_v0  ;;  %v584_v5 = vld [vmem:[%s724_s1 + $0x24] ss:$8 sps:$4 sm:$0xff] (!%p139_p2)   ;;  %v586_v6 = vld [vmem:[%s724_s1 + $0x20] ss:$8 sps:$4 sm:$0xff] (!%p139_p2)   ;;  %v587_v7 = vld [vmem:[%s724_s1 + $0x34] ss:$8 sps:$4 sm:$0xff] (!%p139_p2)  }
   0x8   : > { %318 = vmatpush1.bf16.msra.mxu0 (!%p139_p2), %v580_v1  ;;  %561 = vmatpush1.bf16.msra.mxu1 (!%p139_p2), %v580_v1  ;;  %v589_v8 = vld [vmem:[%s724_s1 + $0x30] ss:$8 sps:$4 sm:$0xff] (!%p139_p2)   ;;  %v590_v9 = vld [vmem:[%s724_s1 + $0x44] ss:$8 sps:$4 sm:$0xff] (!%p139_p2)   ;;  %v592_v10 = vld [vmem:[%s724_s1 + $0x40] ss:$8 sps:$4 sm:$0xff] (!%p139_p2)  }
   0x9   : > { %319 = vmatprep.subr.bf16.mxu0 (!%p139_p2), %v581_v3  ;;  %554 = vmatprep.subr.bf16.mxu1 (!%p139_p2), %v581_v3  ;;  %v593_v11 = vld [vmem:[%s724_s1 + $0x54] ss:$8 sps:$4 sm:$0xff] (!%p139_p2)   ;;  %v595_v12 = vld [vmem:[%s724_s1 + $0x50] ss:$8 sps:$4 sm:$0xff] (!%p139_p2)   ;;  %v596_v13 = vld [vmem:[%s724_s1 + $0x64] ss:$8 sps:$4 sm:$0xff] (!%p139_p2)  }
   0xa   : > { %v598_v14 = vld [vmem:[%s724_s1 + $0x60] ss:$8 sps:$4 sm:$0xff] (!%p139_p2)   ;;  %v599_v15 = vld [vmem:[%s724_s1 + $0x74] ss:$8 sps:$4 sm:$0xff] (!%p139_p2)   ;;  %v601_v16 = vld [vmem:[%s724_s1 + $0x70] ss:$8 sps:$4 sm:$0xff] (!%p139_p2)  }
   0xb   : > { %v204_v22 = vshrl.u32 (!%p139_p2), %v203_v21, 7  ;;  %v201_v24 = vld [vmem:[%s725_s2] sm:$0x3] (!%p139_p2) }
   0xc   : > { %320 = vmatpush1.bf16.msra.mxu0 (!%p139_p2), %v583_v4  ;;  %562 = vmatpush1.bf16.msra.mxu1 (!%p139_p2), %v583_v4 }
   0xd   : > { %s728_s16 = smov (!%p164_p3, %s509_s16), 15  ;;  %321 = vmatprep.subr.bf16.mxu0 %v584_v5  ;;  %555 = vmatprep.subr.bf16.mxu1 %v584_v5  ;;  %v205_v23 = vsub.s32 0, %v204_v22  ;;  %v209_v25 = vsub.s32 1, %v204_v22 }
   0xe   : > { %s510_s25 = sshll.u32 %s728_s16, 2  ;;  %s544_s28 = sshll.u32 %s728_s16, 3 }
   0xf   : > { %s670_s5 = scalar_lea.vmem %s723_s0, %s510_s25  ;;  %v206_v26 = vrot.slane %v201_v24, %v205_v23  ;;  %v210_v27 = vrot.slane %v201_v24, %v209_v25  ;;  %s710_s4 = scalar_lea.vmem %s726_s3, %s544_s28 }
  0x10   : > { %322 = vmatpush1.bf16.msra.mxu0 %v586_v6  ;;  %563 = vmatpush1.bf16.msra.mxu1 %v586_v6  ;;  %v602_v17 = vld [vmem:[%s670_s5] sm:$0xff]   ;;  %v603_v18 = vld [vmem:[%s670_s5 + $0x10] sm:$0xff]   ;;  %v604_v19 = vld [vmem:[%s670_s5 + $0x8] sm:$0xff]  }
  0x11   : > { %323 = vmatprep.subr.bf16.mxu0 %v587_v7  ;;  %556 = vmatprep.subr.bf16.mxu1 %v587_v7  ;;  %v605_v20 = vld [vmem:[%s670_s5 + $0x18] sm:$0xff]  }
  0x14   : > { %324 = vmatpush1.bf16.msra.mxu0 %v589_v8  ;;  %564 = vmatpush1.bf16.msra.mxu1 %v589_v8 }
  0x15   : > { %325 = vmatprep.subr.bf16.mxu0 %v590_v9  ;;  %557 = vmatprep.subr.bf16.mxu1 %v590_v9 }
  0x18   : > { %326 = vmatpush1.bf16.msra.mxu0 %v592_v10  ;;  %565 = vmatpush1.bf16.msra.mxu1 %v592_v10 }
  0x19   : > { %327 = vmatprep.subr.bf16.mxu0 %v593_v11  ;;  %558 = vmatprep.subr.bf16.mxu1 %v593_v11 }
  0x1c   : > { %328 = vmatpush1.bf16.msra.mxu0 %v595_v12  ;;  %566 = vmatpush1.bf16.msra.mxu1 %v595_v12 }
  0x1d   : > { %329 = vmatprep.subr.bf16.mxu0 %v596_v13  ;;  %559 = vmatprep.subr.bf16.mxu1 %v596_v13 }
  0x20   : > { %330 = vmatpush1.bf16.msra.mxu0 %v598_v14  ;;  %567 = vmatpush1.bf16.msra.mxu1 %v598_v14 }
  0x21   : > { %331 = vmatprep.subr.bf16.mxu0 %v599_v15  ;;  %560 = vmatprep.subr.bf16.mxu1 %v599_v15 }
  0x24   : > { %332 = vmatpush1.bf16.msra.mxu0 %v601_v16  ;;  %568 = vmatpush1.bf16.msra.mxu1 %v601_v16 }
  0x27   : > { %350 = vmatmul.mubr.bf16.vlgmr.msra.gmra.mrb[0].mxu0 %v602_v17  ;;  %370 = vmatmul.mubr.bf16.vlgmr.msra.gmra.mrb[0].mxu1 %v603_v18 }
  0x28   : > { %359 = vmatprep.mubr.bf16.mxu0 %v614_v2  ;;  %379 = vmatprep.mubr.bf16.mxu1 %v614_v2 }
  0x2f   : > { %360 = vmatmul.mubr.bf16.gmra.mrb[4].mxu0 %v604_v19  ;;  %380 = vmatmul.mubr.bf16.gmra.mrb[4].mxu1 %v605_v20 }
  0xfa   : > { %v351_v28 = vpop.f32.mrb[0].mxu0  ;;  %v371_v29 = vpop.f32.mrb[0].mxu1 }
  0xfb   : > { %v352_v30 = vadd.f32 %v351_v28, %v206_v26  ;;  %v372_v31 = vadd.f32 %v371_v29, %v206_v26  ;;  %v353_v32 = vpop.f32.mrb[1].mxu0  ;;  %v373_v33 = vpop.f32.mrb[1].mxu1 }
  0xfc   : > { %v354_v34 = vadd.f32 %v353_v32, %v210_v27  ;;  %v374_v35 = vadd.f32 %v373_v33, %v210_v27  ;;  %v355_v36 = vpop.f32.mrb[2].mxu0  ;;  %v375_v37 = vpop.f32.mrb[2].mxu1 }
  0xfd   : > { %v356_v38 = vadd.f32 %v355_v36, %v206_v26  ;;  %v376_v39 = vadd.f32 %v375_v37, %v206_v26  ;;  %v357_v40 = vpop.f32.mrb[3].mxu0  ;;  %v377_v41 = vpop.f32.mrb[3].mxu1 }
  0xfe   : > { %v545_v42 = vpack.c.bf16 %v354_v34, %v352_v30  ;;  %v549_v43 = vpack.c.bf16 %v374_v35, %v372_v31  ;;  %v358_v44 = vadd.f32 %v357_v40, %v210_v27  ;;  %v378_v45 = vadd.f32 %v377_v41, %v210_v27 }
 0x100   : > { %438 = vst [vmem:[%s710_s4] sm:$0xff] %v545_v42  ;;  %442 = vst [vmem:[%s710_s4 + $0x20] sm:$0xff] %v549_v43  ;;  %v546_v46 = vpack.c.bf16 %v358_v44, %v356_v38  ;;  %v550_v47 = vpack.c.bf16 %v378_v45, %v376_v39 }
 0x102   : > { %439 = vst [vmem:[%s710_s4 + $0x8] sm:$0xff] %v546_v46  ;;  %443 = vst [vmem:[%s710_s4 + $0x28] sm:$0xff] %v550_v47  ;;  %v361_v48 = vpop.f32.mrb[4].mxu0  ;;  %v381_v49 = vpop.f32.mrb[4].mxu1 }
 0x103   : > { %v362_v50 = vadd.f32 %v361_v48, %v206_v26  ;;  %v382_v51 = vadd.f32 %v381_v49, %v206_v26  ;;  %v363_v52 = vpop.f32.mrb[5].mxu0  ;;  %v383_v53 = vpop.f32.mrb[5].mxu1 }
 0x104   : > { %v364_v54 = vadd.f32 %v363_v52, %v210_v27  ;;  %v384_v55 = vadd.f32 %v383_v53, %v210_v27  ;;  %v365_v56 = vpop.f32.mrb[6].mxu0  ;;  %v385_v57 = vpop.f32.mrb[6].mxu1 }
 0x105   : > { %v366_v58 = vadd.f32 %v365_v56, %v206_v26  ;;  %v386_v59 = vadd.f32 %v385_v57, %v206_v26  ;;  %v367_v60 = vpop.f32.mrb[7].mxu0  ;;  %v387_v61 = vpop.f32.mrb[7].mxu1 }
 0x106   : > { %v547_v62 = vpack.c.bf16 %v364_v54, %v362_v50  ;;  %v551_v63 = vpack.c.bf16 %v384_v55, %v382_v51  ;;  %v368_v0 = vadd.f32 %v367_v60, %v210_v27  ;;  %v388_v1 = vadd.f32 %v387_v61, %v210_v27 }
 0x108   : > { %440 = vst [vmem:[%s710_s4 + $0x10] sm:$0xff] %v547_v62  ;;  %444 = vst [vmem:[%s710_s4 + $0x30] sm:$0xff] %v551_v63  ;;  %v548_v2 = vpack.c.bf16 %v368_v0, %v366_v58  ;;  %v552_v3 = vpack.c.bf16 %v388_v1, %v386_v59 }
 0x10a   : > { %441 = vst [vmem:[%s710_s4 + $0x18] sm:$0xff] %v548_v2  ;;  %445 = vst [vmem:[%s710_s4 + $0x38] sm:$0xff] %v552_v3 }
 0x10b PF: > { %s13_s12 = sadd.s32 1, %s612_s12  }
 0x10c   : > { %p10_p4 = scmp.ge.s32.totalorder %s13_s12, 4  }
 0x10e   :  { %12 = sbr.rel (!%p10_p4) target bundleno = 1 (0x1), region = 62 }

// kernel: encoder_forward.49
= control target key start
LH: loop header
LB: loop body
LE: loop exit
PB: predicated region body
PF: predicated region fallthrough
CT: control target
= control target key end

     0   :  { %s1233_s12 = smov 0   ;;  %s1389_s0 = inlined_call_operand.vmem [shape: bf16[128,576], index: 0, kind: input, shape index: {}]   ;;  %s1390_s1 = inlined_call_operand.vmem [shape: bf16[576,128], index: 1, kind: input, shape index: {}]   ;;  %s1391_s2 = inlined_call_operand.vmem [shape: f32[1,128], index: 2, kind: input, shape index: {}]   ;;  %s1392_s3 = inlined_call_operand.vmem [shape: bf16[128,128], index: 3, kind: output, shape index: {}]  }
   0x1 LB: > { %s909_s13 = sadd.s32 4294967295, %s1211_s12   ;;  %p913_p0 = scmp.ge.s32.totalorder %s1211_s12, 1  ;;  %s1211_s12 = sphi %s1233_s12, %s13_s12  }
   0x2   : > { %p139_p1 = scmp.lt.s32.totalorder %s1211_s12, 3 }
   0x4   : > { %p140_p2 = pnand %p913_p0, %p139_p1 }
   0x5   : > { %v1141_v0 = vld [vmem:[%s1390_s1 + $0x40] sm:$0xff] (!%p140_p2)   ;;  %v1145_v4 = vld [vmem:[%s1390_s1 + $0x48] sm:$0xff] (!%p140_p2)   ;;  %v1149_v8 = vld [vmem:[%s1390_s1 + $0x50] sm:$0xff] (!%p140_p2)   ;;  %s914_s19 = sshll.u32 (!%p140_p2), %s909_s13, 3  ;;  %vm597_vm0 = vcmask (!%p140_p2), 523264  }
   0x6   : > { %143 = sbr.rel (%p140_p2) target bundleno = 294 (0x126), region = 32  ;;  %v1142_v1 = vld [vmem:[%s1390_s1 + $0xc0] sm:$0xff] (!%p140_p2)   ;;  %1020 = vmatprep.subr.bf16.mxu0 (!%p140_p2), %v1141_v0  ;;  %v1146_v5 = vld [vmem:[%s1390_s1 + $0xc8] sm:$0xff] (!%p140_p2)   ;;  %v1150_v9 = vld [vmem:[%s1390_s1 + $0xd0] sm:$0xff] (!%p140_p2)   ;;  %p165_p3 = scmp.lt.s32.totalorder (!%p140_p2), %s914_s19, 15 }
   0x7   : > { %v1143_v2 = vld [vmem:[%s1390_s1] sm:$0xff] (!%p140_p2)   ;;  %1060 = vmatprep.subr.bf16.mxu1 (!%p140_p2), %v1142_v1  ;;  %v1147_v6 = vld [vmem:[%s1390_s1 + $0x8] sm:$0xff] (!%p140_p2)   ;;  %v1151_v10 = vld [vmem:[%s1390_s1 + $0x10] sm:$0xff] (!%p140_p2)  }
   0x8   : > { %v1144_v3 = vld [vmem:[%s1390_s1 + $0x80] sm:$0xff] (!%p140_p2)   ;;  %1021 = vmatpush3.bf16.msra.mxu0 (!%p140_p2), %v1143_v2  ;;  %v1148_v7 = vld [vmem:[%s1390_s1 + $0x88] sm:$0xff] (!%p140_p2)   ;;  %v1152_v11 = vld [vmem:[%s1390_s1 + $0x90] sm:$0xff] (!%p140_p2)  }
   0x9   : > { %1061 = vmatpush3.bf16.msra.mxu1 (!%p140_p2), %v1144_v3  ;;  %1022 = vmatprep.subr.bf16.mxu0 (!%p140_p2), %v1145_v4  ;;  %v1153_v12 = vld [vmem:[%s1390_s1 + $0x58] sm:$0xff] (!%p140_p2)   ;;  %v1157_v16 = vld [vmem:[%s1390_s1 + $0x60] sm:$0xff] (!%p140_p2)   ;;  %v1161_v20 = vld [vmem:[%s1390_s1 + $0x68] sm:$0xff] (!%p140_p2)  }
   0xa   : > { %1062 = vmatprep.subr.bf16.mxu1 (!%p140_p2), %v1146_v5  ;;  %v1154_v13 = vld [vmem:[%s1390_s1 + $0xd8] sm:$0xff] (!%p140_p2)   ;;  %v1158_v17 = vld [vmem:[%s1390_s1 + $0xe0] sm:$0xff] (!%p140_p2)   ;;  %v1162_v21 = vld [vmem:[%s1390_s1 + $0xe8] sm:$0xff] (!%p140_p2)  }
   0xb   : > { %v1155_v14 = vld [vmem:[%s1390_s1 + $0x18] sm:$0xff] (!%p140_p2)   ;;  %v1159_v18 = vld [vmem:[%s1390_s1 + $0x20] sm:$0xff] (!%p140_p2)   ;;  %v1163_v22 = vld [vmem:[%s1390_s1 + $0x28] sm:$0xff] (!%p140_p2)  }
   0xc   : > { %1023 = vmatpush3.bf16.msra.mxu0 (!%p140_p2), %v1147_v6  ;;  %v1156_v15 = vld [vmem:[%s1390_s1 + $0x98] sm:$0xff] (!%p140_p2)   ;;  %v1160_v19 = vld [vmem:[%s1390_s1 + $0xa0] sm:$0xff] (!%p140_p2)   ;;  %v1164_v23 = vld [vmem:[%s1390_s1 + $0xa8] sm:$0xff] (!%p140_p2)  }
   0xd   : > { %1063 = vmatpush3.bf16.msra.mxu1 %v1148_v7  ;;  %1024 = vmatprep.subr.bf16.mxu0 %v1149_v8  ;;  %s1394_s19 = smov (!%p165_p3, %s914_s19), 15  ;;  %v1165_v24 = vld [vmem:[%s1390_s1 + $0x70] sm:$0xff]   ;;  %v1169_v28 = vld [vmem:[%s1390_s1 + $0x78] sm:$0xff]   ;;  %v1179_v36 = vld [vmem:[%s1390_s1 + $0x100] sm:$0xff]  }
   0xe   : > { %1064 = vmatprep.subr.bf16.mxu1 %v1150_v9  ;;  %v1166_v25 = vld [vmem:[%s1390_s1 + $0xf0] sm:$0xff]   ;;  %s1132_s16 = smul.u32 20, %s1394_s19  ;;  %v1170_v29 = vld [vmem:[%s1390_s1 + $0xf8] sm:$0xff]   ;;  %v1186_v39 = vld [vmem:[%s1390_s1 + $0x108] sm:$0xff]   ;;  %s917_s17 = sshll.u32 %s1394_s19, 2 }
   0xf   : > { %v1167_v26 = vld [vmem:[%s1390_s1 + $0x30] sm:$0xff]   ;;  %v1171_v30 = vld [vmem:[%s1390_s1 + $0x38] sm:$0xff]   ;;  %v918_v58 = vld [vmem:[%s1391_s2] ss:$0 sm:$0xff]  ;;  %s175_s21 = scalar_lea.vmem %s1392_s3, %s917_s17 }
  0x10   : > { %1025 = vmatpush3.bf16.msra.mxu0 %v1151_v10  ;;  %v1168_v27 = vld [vmem:[%s1390_s1 + $0xb0] sm:$0xff]   ;;  %s1339_s13 = scalar_lea.vmem %s1389_s0, %s1132_s16  ;;  %v1172_v31 = vld [vmem:[%s1390_s1 + $0xb8] sm:$0xff]  }
  0x11   : > { %1065 = vmatpush3.bf16.msra.mxu1 %v1152_v11  ;;  %1026 = vmatprep.subr.bf16.mxu0 %v1153_v12  ;;  %v1173_v32 = vld [vmem:[%s1339_s13] ss:$20 sps:$4 sm:$0xff]   ;;  %v1175_v33 = vld [vmem:[%s1339_s13 + $0x4] ss:$20 sps:$4 sm:$0xff]   ;;  %v1176_v34 = vld [vmem:[%s1339_s13 + $0x8] ss:$20 sps:$4 sm:$0xff]  }
  0x12   : > { %1066 = vmatprep.subr.bf16.mxu1 %v1154_v13  ;;  %v1178_v35 = vld [vmem:[%s1339_s13 + $0xc] ss:$20 sps:$4 sm:$0xff]   ;;  %642 = vmatprep.mubr.bf16.mxu0 %v1175_v33  ;;  %v1182_v38 = vld [vmem:[%s1339_s13 + $0x34] ss:$20 sps:$4 sm:$0xff]   ;;  %v1185_v41 = vld [vmem:[%s1339_s13 + $0x30] ss:$20 sps:$4 sm:$0xff]  }
  0x13   : > { %707 = vmatprep.mubr.bf16.mxu1 %v1178_v35  ;;  %v1180_v37 = vld [vmem:[%s1339_s13 + $0x2c] ss:$20 sps:$4 sm:$0xff]   ;;  %v1184_v40 = vld [vmem:[%s1339_s13 + $0x28] ss:$20 sps:$4 sm:$0xff]   ;;  %v1193_v44 = vld [vmem:[%s1390_s1 + $0x110] sm:$0xff]  }
  0x14   : > { %1027 = vmatpush3.bf16.msra.mxu0 %v1155_v14  ;;  %v1187_v42 = vld [vmem:[%s1339_s13 + $0x54] ss:$20 sps:$4 sm:$0xff]   ;;  %v1189_v43 = vld [vmem:[%s1339_s13 + $0x5c] ss:$20 sps:$4 sm:$0xff]   ;;  %v1192_v47 = vld [vmem:[%s1339_s13 + $0x58] ss:$20 sps:$4 sm:$0xff]  }
  0x15   : > { %1067 = vmatpush3.bf16.msra.mxu1 %v1156_v15  ;;  %1028 = vmatprep.subr.bf16.mxu0 %v1157_v16  ;;  %v1200_v45 = vld [vmem:[%s1390_s1 + $0x118] sm:$0xff]   ;;  %v1191_v46 = vld [vmem:[%s1339_s13 + $0x50] ss:$20 sps:$4 sm:$0xff]   ;;  %v1199_v51 = vld [vmem:[%s1339_s13 + $0x80] ss:$20 sps:$4 sm:$0xff]  }
  0x16   : > { %1068 = vmatprep.subr.bf16.mxu1 %v1158_v17  ;;  %v1194_v48 = vld [vmem:[%s1339_s13 + $0x7c] ss:$20 sps:$4 sm:$0xff]   ;;  %v1196_v49 = vld [vmem:[%s1339_s13 + $0x84] ss:$20 sps:$4 sm:$0xff]   ;;  %v1202_v53 = vld [vmem:[%s1339_s13 + $0x60] ss:$20 sps:$4 sm:$0xff]  }
  0x17   : > { %v1198_v50 = vld [vmem:[%s1339_s13 + $0x78] ss:$20 sps:$4 sm:$0xff]   ;;  %v1201_v52 = vld [vmem:[%s1339_s13 + $0x10] ss:$20 sps:$4 sm:$0xff]   ;;  %v1204_v55 = vld [vmem:[%s1339_s13 + $0x88] ss:$20 sps:$4 sm:$0xff]  }
  0x18   : > { %1029 = vmatpush3.bf16.msra.mxu0 %v1159_v18  ;;  %v1203_v54 = vld [vmem:[%s1339_s13 + $0x38] ss:$20 sps:$4 sm:$0xff]  }
  0x19   : > { %1069 = vmatpush3.bf16.msra.mxu1 %v1160_v19  ;;  %1030 = vmatprep.subr.bf16.mxu0 %v1161_v20 }
  0x1a   : > { %1070 = vmatprep.subr.bf16.mxu1 %v1162_v21 }
  0x1c   : > { %1031 = vmatpush3.bf16.msra.mxu0 %v1163_v22 }
  0x1d   : > { %1071 = vmatpush3.bf16.msra.mxu1 %v1164_v23  ;;  %1032 = vmatprep.subr.bf16.mxu0 %v1165_v24 }
  0x1e   : > { %1072 = vmatprep.subr.bf16.mxu1 %v1166_v25 }
  0x20   : > { %1033 = vmatpush3.bf16.msra.mxu0 %v1167_v26 }
  0x21   : > { %1073 = vmatpush3.bf16.msra.mxu1 %v1168_v27  ;;  %1034 = vmatprep.subr.bf16.mxu0 %v1169_v28 }
  0x22   : > { %1074 = vmatprep.subr.bf16.mxu1 %v1170_v29 }
  0x24   : > { %1035 = vmatpush3.bf16.msra.mxu0 %v1171_v30 }
  0x25   : > { %1075 = vmatpush3.bf16.msra.mxu1 %v1172_v31  ;;  %1108 = vmatprep.subr.bf16.mxu0 %v1179_v36 }
  0x26   : > { %1124 = vmatprep.subr.bf16.mxu1 %v1179_v36 }
  0x27   : > { %643 = vmatmul.mubr.bf16.vlgmr.msra.gmra.mrb[0].mxu0 %v1173_v32 }
  0x28   : > { %708 = vmatmul.mubr.bf16.vlgmr.msra.gmra.mrb[0].mxu1 %v1176_v34  ;;  %1109 = vmatpush3.bf16.msra.mxu0 %v1179_v36 }
  0x29   : > { %1128 = vmatpush3.bf16.msra.mxu1 %v1179_v36  ;;  %650 = vmatprep.mubr.bf16.mxu0 %v1180_v37 }
  0x2a   : > { %715 = vmatprep.mubr.bf16.mxu1 %v1182_v38  ;;  %1110 = vmatprep.subr.bf16.mxu0 %v1186_v39 }
  0x2b   : > { %1125 = vmatprep.subr.bf16.mxu1 %v1186_v39 }
  0x2c   : > { %1111 = vmatpush3.bf16.msra.mxu0 %v1186_v39 }
  0x2d   : > { %1129 = vmatpush3.bf16.msra.mxu1 %v1186_v39  ;;  %1112 = vmatprep.subr.bf16.mxu0 %v1193_v44 }
  0x2e   : > { %1126 = vmatprep.subr.bf16.mxu1 %v1193_v44 }
  0x2f   : > { %651 = vmatmul.mubr.bf16.gmra.mrb[4].mxu0 %v1184_v40 }
  0x30   : > { %716 = vmatmul.mubr.bf16.gmra.mrb[4].mxu1 %v1185_v41  ;;  %658 = vmatprep.mubr.bf16.mxu0 %v1187_v42 }
  0x31   : > { %723 = vmatprep.mubr.bf16.mxu1 %v1189_v43  ;;  %1113 = vmatpush3.bf16.msra.mxu0 %v1193_v44 }
  0x32   : > { %1130 = vmatpush3.bf16.msra.mxu1 %v1193_v44  ;;  %1114 = vmatprep.subr.bf16.mxu0 %v1200_v45 }
  0x33   : > { %1127 = vmatprep.subr.bf16.mxu1 %v1200_v45 }
  0x35   : > { %1115 = vmatpush3.bf16.msra.mxu0 %v1200_v45 }
  0x36   : > { %1131 = vmatpush3.bf16.msra.mxu1 %v1200_v45 }
  0x37   : > { %659 = vmatmul.mubr.bf16.gmra.mrb[8].mxu0 %v1191_v46 }
  0x38   : > { %724 = vmatmul.mubr.bf16.gmra.mrb[8].mxu1 %v1192_v47  ;;  %666 = vmatprep.mubr.bf16.mxu0 %v1194_v48 }
  0x39   : > { %731 = vmatprep.mubr.bf16.mxu1 %v1196_v49 }
  0x3f   : > { %667 = vmatmul.mubr.bf16.gmra.mrb[12].mxu0 %v1198_v50 }
  0x40   : > { %732 = vmatmul.mubr.bf16.gmra.mrb[12].mxu1 %v1199_v51  ;;  %1116 = vmatprep.mubr.msk.bf16.mxu0 %vm597_vm0, %v1201_v52 }
  0x41   : > { %1120 = vmatprep.mubr.msk.bf16.mxu1 %vm597_vm0, %v1202_v53 }
  0x47   : > { %1117 = vmatmul.mubr.msk.bf16.vlgmr.msra.gmra.mrb[16].mxu0 %vm597_vm0, %v1203_v54 }
  0x48   : > { %1121 = vmatmul.mubr.msk.bf16.vlgmr.msra.gmra.mrb[16].mxu1 %vm597_vm0, %v1204_v55 }
  0xfa   : > { %v1036_v56 = vpop.f32.mrb[0].mxu0 }
  0xfb   : > { %v1076_v57 = vpop.f32.mrb[0].mxu1  ;;  %v1037_v59 = vpop.f32.mrb[1].mxu0 }
  0xfc   : > { %v1038_v60 = vadd.f32 %v1037_v59, %v1036_v56  ;;  %v1077_v61 = vpop.f32.mrb[1].mxu1  ;;  %v1039_v62 = vpop.f32.mrb[2].mxu0 }
  0xfd   : > { %v1078_v63 = vadd.f32 %v1077_v61, %v1076_v57  ;;  %v1079_v0 = vpop.f32.mrb[2].mxu1  ;;  %v1040_v1 = vpop.f32.mrb[3].mxu0 }
  0xfe   : > { %v645_v2 = vadd.f32 %v1038_v60, %v918_v58  ;;  %v1041_v3 = vadd.f32 %v1040_v1, %v1039_v62  ;;  %v1080_v4 = vpop.f32.mrb[3].mxu1 }
  0xff   : > { %v1081_v5 = vadd.f32 %v1080_v4, %v1079_v0 }
 0x100   : > { %v648_v6 = vadd.f32 %v1041_v3, %v918_v58  ;;  %v710_v7 = vadd.f32 %v1078_v63, %v645_v2 }
 0x102   : > { %v1042_v8 = vpop.f32.mrb[4].mxu0  ;;  %v713_v9 = vadd.f32 %v1081_v5, %v648_v6 }
 0x103   : > { %v1082_v10 = vpop.f32.mrb[4].mxu1  ;;  %v1043_v11 = vpop.f32.mrb[5].mxu0 }
 0x104   : > { %v1044_v12 = vadd.f32 %v1043_v11, %v1042_v8  ;;  %v1083_v13 = vpop.f32.mrb[5].mxu1  ;;  %v1045_v14 = vpop.f32.mrb[6].mxu0 }
 0x105   : > { %v1084_v15 = vadd.f32 %v1083_v13, %v1082_v10  ;;  %v1085_v16 = vpop.f32.mrb[6].mxu1  ;;  %v1046_v17 = vpop.f32.mrb[7].mxu0 }
 0x106   : > { %v653_v18 = vadd.f32 %v1044_v12, %v918_v58  ;;  %v1047_v19 = vadd.f32 %v1046_v17, %v1045_v14  ;;  %v1086_v20 = vpop.f32.mrb[7].mxu1 }
 0x107   : > { %v1087_v21 = vadd.f32 %v1086_v20, %v1085_v16 }
 0x108   : > { %v656_v22 = vadd.f32 %v1047_v19, %v918_v58  ;;  %v718_v23 = vadd.f32 %v1084_v15, %v653_v18 }
 0x10a   : > { %v1048_v24 = vpop.f32.mrb[8].mxu0  ;;  %v721_v25 = vadd.f32 %v1087_v21, %v656_v22 }
 0x10b   : > { %v1088_v26 = vpop.f32.mrb[8].mxu1  ;;  %v1049_v27 = vpop.f32.mrb[9].mxu0 }
 0x10c   : > { %v1050_v28 = vadd.f32 %v1049_v27, %v1048_v24  ;;  %v1089_v29 = vpop.f32.mrb[9].mxu1  ;;  %v1051_v30 = vpop.f32.mrb[10].mxu0 }
 0x10d   : > { %v1090_v31 = vadd.f32 %v1089_v29, %v1088_v26  ;;  %v1091_v32 = vpop.f32.mrb[10].mxu1  ;;  %v1052_v33 = vpop.f32.mrb[11].mxu0 }
 0x10e   : > { %v661_v34 = vadd.f32 %v1050_v28, %v918_v58  ;;  %v1053_v35 = vadd.f32 %v1052_v33, %v1051_v30  ;;  %v1092_v36 = vpop.f32.mrb[11].mxu1 }
 0x10f   : > { %v1093_v37 = vadd.f32 %v1092_v36, %v1091_v32 }
 0x110   : > { %v664_v38 = vadd.f32 %v1053_v35, %v918_v58  ;;  %v726_v39 = vadd.f32 %v1090_v31, %v661_v34 }
 0x112   : > { %v1054_v40 = vpop.f32.mrb[12].mxu0  ;;  %v729_v41 = vadd.f32 %v1093_v37, %v664_v38 }
 0x113   : > { %v1094_v42 = vpop.f32.mrb[12].mxu1  ;;  %v1055_v43 = vpop.f32.mrb[13].mxu0 }
 0x114   : > { %v1056_v44 = vadd.f32 %v1055_v43, %v1054_v40  ;;  %v1095_v45 = vpop.f32.mrb[13].mxu1  ;;  %v1057_v46 = vpop.f32.mrb[14].mxu0 }
 0x115   : > { %v1096_v47 = vadd.f32 %v1095_v45, %v1094_v42  ;;  %v1097_v48 = vpop.f32.mrb[14].mxu1  ;;  %v1058_v49 = vpop.f32.mrb[15].mxu0 }
 0x116   : > { %v669_v50 = vadd.f32 %v1056_v44, %v918_v58  ;;  %v1059_v51 = vadd.f32 %v1058_v49, %v1057_v46  ;;  %v1098_v52 = vpop.f32.mrb[15].mxu1 }
 0x117   : > { %v1099_v53 = vadd.f32 %v1098_v52, %v1097_v48 }
 0x118   : > { %v672_v54 = vadd.f32 %v1059_v51, %v918_v58  ;;  %v734_v55 = vadd.f32 %v1096_v47, %v669_v50 }
 0x11a   : > { %v1118_v56 = vpop.f32.mrb[16].mxu0  ;;  %v737_v57 = vadd.f32 %v1099_v53, %v672_v54 }
 0x11b   : > { %v783_v59 = vadd.f32 %v1118_v56, %v718_v23  ;;  %v1122_v60 = vpop.f32.mrb[16].mxu1  ;;  %v774_v61 = vpop.f32.mrb[17].mxu0 }
 0x11c   : > { %v799_v62 = vadd.f32 %v1122_v60, %v734_v55  ;;  %v775_v63 = vadd.f32 %v774_v61, %v710_v7  ;;  %v790_v0 = vpop.f32.mrb[17].mxu1  ;;  %v1119_v1 = vpop.f32.mrb[18].mxu0 }
 0x11d   : > { %v791_v2 = vadd.f32 %v790_v0, %v726_v39  ;;  %v786_v3 = vadd.f32 %v1119_v1, %v721_v25  ;;  %v1123_v4 = vpop.f32.mrb[18].mxu1  ;;  %v777_v5 = vpop.f32.mrb[19].mxu0  ;;  %v807_v11 = vmax.f32 %v783_v59, 0.0 }
 0x11e   : > { %v802_v6 = vadd.f32 %v1123_v4, %v737_v57  ;;  %v778_v8 = vadd.f32 %v777_v5, %v713_v9  ;;  %v793_v10 = vpop.f32.mrb[19].mxu1  ;;  %v811_v13 = vmax.f32 %v799_v62, 0.0  ;;  %v805_v14 = vmax.f32 %v775_v63, 0.0 }
 0x11f   : > { %v808_v58 = vmax.f32 %v786_v3, 0.0  ;;  %v794_v12 = vadd.f32 %v793_v10, %v729_v41  ;;  %v809_v16 = vmax.f32 %v791_v2, 0.0 }
 0x120   : > { %v812_v7 = vmax.f32 %v802_v6, 0.0  ;;  %v806_v15 = vmax.f32 %v778_v8, 0.0 }
 0x121   : > { %v1005_v17 = vpack.c.bf16 %v808_v58, %v807_v11  ;;  %v810_v18 = vmax.f32 %v794_v12, 0.0 }
 0x122   : > { %v1015_v19 = vpack.c.bf16 %v812_v7, %v811_v13  ;;  %v1000_v20 = vpack.c.bf16 %v806_v15, %v805_v14 }
 0x123   : > { %1017 = vst [vmem:[%s175_s21 + $0x8] sm:$0xff] %v1005_v17   ;;  %v1010_v21 = vpack.c.bf16 %v810_v18, %v809_v16 }
 0x124   : > { %1019 = vst [vmem:[%s175_s21 + $0x18] sm:$0xff] %v1015_v19   ;;  %1001 = vst [vmem:[%s175_s21] sm:$0xff] %v1000_v20  }
 0x125   : > { %1018 = vst [vmem:[%s175_s21 + $0x10] sm:$0xff] %v1010_v21  }
 0x126 PF: > { %s13_s12 = sadd.s32 1, %s1211_s12  }
 0x127   : > { %p10_p4 = scmp.ge.s32.totalorder %s13_s12, 4  }
 0x129   :  { %12 = sbr.rel (!%p10_p4) target bundleno = 1 (0x1), region = 62 }

// kernel: encoder_forward.52
= control target key start
LH: loop header
LB: loop body
LE: loop exit
PB: predicated region body
PF: predicated region fallthrough
CT: control target
= control target key end

     0   :  { %s727_s12 = smov 0   ;;  %s809_s0 = inlined_call_operand.vmem [shape: bf16[128,256], index: 0, kind: input, shape index: {}]   ;;  %s810_s1 = inlined_call_operand.vmem [shape: bf16[256,128], index: 1, kind: input, shape index: {}]   ;;  %s811_s2 = inlined_call_operand.vmem [shape: f32[1,128], index: 2, kind: input, shape index: {}]   ;;  %s812_s3 = inlined_call_operand.vmem [shape: bf16[128,128], index: 3, kind: output, shape index: {}]  }
   0x1 LB: > { %s530_s13 = sadd.s32 4294967295, %s705_s12   ;;  %p534_p0 = scmp.ge.s32.totalorder %s705_s12, 1  ;;  %s705_s12 = sphi %s727_s12, %s13_s12  }
   0x2   : > { %p139_p1 = scmp.lt.s32.totalorder %s705_s12, 3 }
   0x4   : > { %p140_p2 = pnand %p534_p0, %p139_p1 }
   0x5   : > { %v671_v0 = vld [vmem:[%s810_s1 + $0x40] sm:$0xff] (!%p140_p2)   ;;  %s535_s16 = sshll.u32 (!%p140_p2), %s530_s13, 3  ;;  %v673_v2 = vld [vmem:[%s810_s1 + $0x48] sm:$0xff] (!%p140_p2)   ;;  %v675_v4 = vld [vmem:[%s810_s1 + $0x50] sm:$0xff] (!%p140_p2)  }
   0x6   : > { %143 = sbr.rel (%p140_p2) target bundleno = 271 (0x10f), region = 32  ;;  %v672_v1 = vld [vmem:[%s810_s1] sm:$0xff] (!%p140_p2)   ;;  %607 = vmatprep.subr.bf16.mxu0 (!%p140_p2), %v671_v0  ;;  %647 = vmatprep.subr.bf16.mxu1 (!%p140_p2), %v671_v0  ;;  %v674_v3 = vld [vmem:[%s810_s1 + $0x8] sm:$0xff] (!%p140_p2)   ;;  %p165_p3 = scmp.lt.s32.totalorder (!%p140_p2), %s535_s16, 15  ;;  %v676_v5 = vld [vmem:[%s810_s1 + $0x10] sm:$0xff] (!%p140_p2)  }
   0x7   : > { %608 = vmatpush3.bf16.msra.mxu0 (!%p140_p2), %v672_v1  ;;  %655 = vmatpush3.bf16.msra.mxu1 (!%p140_p2), %v672_v1  ;;  %v677_v6 = vld [vmem:[%s810_s1 + $0x58] sm:$0xff] (!%p140_p2)   ;;  %v679_v8 = vld [vmem:[%s810_s1 + $0x60] sm:$0xff] (!%p140_p2)   ;;  %v681_v10 = vld [vmem:[%s810_s1 + $0x68] sm:$0xff] (!%p140_p2)  }
   0x8   : > { %609 = vmatprep.subr.bf16.mxu0 (!%p140_p2), %v673_v2  ;;  %648 = vmatprep.subr.bf16.mxu1 (!%p140_p2), %v673_v2  ;;  %v678_v7 = vld [vmem:[%s810_s1 + $0x18] sm:$0xff] (!%p140_p2)   ;;  %v680_v9 = vld [vmem:[%s810_s1 + $0x20] sm:$0xff] (!%p140_p2)   ;;  %v682_v13 = vld [vmem:[%s810_s1 + $0x28] sm:$0xff] (!%p140_p2)  }
   0x9   : > { %v683_v14 = vld [vmem:[%s810_s1 + $0x70] sm:$0xff] (!%p140_p2)   ;;  %v685_v16 = vld [vmem:[%s810_s1 + $0x78] sm:$0xff] (!%p140_p2)   ;;  %v540_v26 = vld [vmem:[%s811_s2] ss:$0 sm:$0xff] (!%p140_p2) }
   0xa   : > { %v684_v15 = vld [vmem:[%s810_s1 + $0x30] sm:$0xff] (!%p140_p2)   ;;  %v686_v17 = vld [vmem:[%s810_s1 + $0x38] sm:$0xff] (!%p140_p2)  }
   0xb   : > { %610 = vmatpush3.bf16.msra.mxu0 (!%p140_p2), %v674_v3  ;;  %656 = vmatpush3.bf16.msra.mxu1 (!%p140_p2), %v674_v3 }
   0xc   : > { %611 = vmatprep.subr.bf16.mxu0 (!%p140_p2), %v675_v4  ;;  %649 = vmatprep.subr.bf16.mxu1 (!%p140_p2), %v675_v4 }
   0xd   : > { %s814_s16 = smov (!%p165_p3, %s535_s16), 15 }
   0xe   : > { %s575_s4 = sshll.u32 %s814_s16, 3  ;;  %s539_s28 = sshll.u32 %s814_s16, 2 }
   0xf   : > { %612 = vmatpush3.bf16.msra.mxu0 %v676_v5  ;;  %657 = vmatpush3.bf16.msra.mxu1 %v676_v5  ;;  %s768_s9 = scalar_lea.vmem %s809_s0, %s575_s4  ;;  %s175_s4 = scalar_lea.vmem %s812_s3, %s539_s28 }
  0x10   : > { %613 = vmatprep.subr.bf16.mxu0 %v677_v6  ;;  %650 = vmatprep.subr.bf16.mxu1 %v677_v6  ;;  %v689_v11 = vld [vmem:[%s768_s9 + $0x4] ss:$8 sps:$4 sm:$0xff]   ;;  %v687_v18 = vld [vmem:[%s768_s9] ss:$8 sps:$4 sm:$0xff]   ;;  %v693_v20 = vld [vmem:[%s768_s9 + $0x14] ss:$8 sps:$4 sm:$0xff]  }
  0x11   : > { %v692_v12 = vld [vmem:[%s768_s9 + $0x24] ss:$8 sps:$4 sm:$0xff]   ;;  %393 = vmatprep.mubr.bf16.mxu0 %v689_v11  ;;  %v690_v19 = vld [vmem:[%s768_s9 + $0x20] ss:$8 sps:$4 sm:$0xff]   ;;  %v695_v21 = vld [vmem:[%s768_s9 + $0x34] ss:$8 sps:$4 sm:$0xff]  }
  0x12   : > { %409 = vmatprep.mubr.bf16.mxu1 %v692_v12  ;;  %v697_v22 = vld [vmem:[%s768_s9 + $0x10] ss:$8 sps:$4 sm:$0xff]  }
  0x13   : > { %614 = vmatpush3.bf16.msra.mxu0 %v678_v7  ;;  %658 = vmatpush3.bf16.msra.mxu1 %v678_v7  ;;  %v698_v23 = vld [vmem:[%s768_s9 + $0x30] ss:$8 sps:$4 sm:$0xff]  }
  0x14   : > { %615 = vmatprep.subr.bf16.mxu0 %v679_v8  ;;  %651 = vmatprep.subr.bf16.mxu1 %v679_v8 }
  0x17   : > { %616 = vmatpush3.bf16.msra.mxu0 %v680_v9  ;;  %659 = vmatpush3.bf16.msra.mxu1 %v680_v9 }
  0x18   : > { %617 = vmatprep.subr.bf16.mxu0 %v681_v10  ;;  %652 = vmatprep.subr.bf16.mxu1 %v681_v10 }
  0x1b   : > { %618 = vmatpush3.bf16.msra.mxu0 %v682_v13  ;;  %660 = vmatpush3.bf16.msra.mxu1 %v682_v13 }
  0x1c   : > { %619 = vmatprep.subr.bf16.mxu0 %v683_v14  ;;  %653 = vmatprep.subr.bf16.mxu1 %v683_v14 }
  0x1f   : > { %620 = vmatpush3.bf16.msra.mxu0 %v684_v15  ;;  %661 = vmatpush3.bf16.msra.mxu1 %v684_v15 }
  0x20   : > { %621 = vmatprep.subr.bf16.mxu0 %v685_v16  ;;  %654 = vmatprep.subr.bf16.mxu1 %v685_v16 }
  0x23   : > { %622 = vmatpush3.bf16.msra.mxu0 %v686_v17  ;;  %662 = vmatpush3.bf16.msra.mxu1 %v686_v17 }
  0x26   : > { %394 = vmatmul.mubr.bf16.vlgmr.msra.gmra.mrb[0].mxu0 %v687_v18  ;;  %410 = vmatmul.mubr.bf16.vlgmr.msra.gmra.mrb[0].mxu1 %v690_v19 }
  0x27   : > { %401 = vmatprep.mubr.bf16.mxu0 %v693_v20  ;;  %417 = vmatprep.mubr.bf16.mxu1 %v695_v21 }
  0x2e   : > { %402 = vmatmul.mubr.bf16.gmra.mrb[4].mxu0 %v697_v22  ;;  %418 = vmatmul.mubr.bf16.gmra.mrb[4].mxu1 %v698_v23 }
  0xf9   : > { %v623_v24 = vpop.f32.mrb[0].mxu0  ;;  %v635_v25 = vpop.f32.mrb[0].mxu1 }
  0xfa   : > { %v624_v27 = vpop.f32.mrb[1].mxu0  ;;  %v636_v28 = vpop.f32.mrb[1].mxu1 }
  0xfb   : > { %v625_v29 = vadd.f32 %v624_v27, %v623_v24  ;;  %v637_v30 = vadd.f32 %v636_v28, %v635_v25  ;;  %v626_v31 = vpop.f32.mrb[2].mxu0  ;;  %v638_v32 = vpop.f32.mrb[2].mxu1 }
  0xfc   : > { %v627_v33 = vpop.f32.mrb[3].mxu0  ;;  %v639_v34 = vpop.f32.mrb[3].mxu1 }
  0xfd   : > { %v396_v35 = vadd.f32 %v625_v29, %v540_v26  ;;  %v412_v36 = vadd.f32 %v637_v30, %v540_v26  ;;  %v628_v37 = vadd.f32 %v627_v33, %v626_v31  ;;  %v640_v38 = vadd.f32 %v639_v34, %v638_v32 }
  0xff   : > { %v399_v39 = vadd.f32 %v628_v37, %v540_v26  ;;  %v415_v40 = vadd.f32 %v640_v38, %v540_v26  ;;  %v426_v41 = vmax.f32 %v396_v35, 0.0  ;;  %v430_v42 = vmax.f32 %v412_v36, 0.0 }
 0x101   : > { %v427_v43 = vmax.f32 %v399_v39, 0.0  ;;  %v431_v44 = vmax.f32 %v415_v40, 0.0  ;;  %v629_v45 = vpop.f32.mrb[4].mxu0  ;;  %v641_v46 = vpop.f32.mrb[4].mxu1 }
 0x102   : > { %v630_v47 = vpop.f32.mrb[5].mxu0  ;;  %v642_v48 = vpop.f32.mrb[5].mxu1 }
 0x103   : > { %v587_v49 = vpack.c.bf16 %v427_v43, %v426_v41  ;;  %v597_v50 = vpack.c.bf16 %v431_v44, %v430_v42  ;;  %v631_v51 = vadd.f32 %v630_v47, %v629_v45  ;;  %v643_v52 = vadd.f32 %v642_v48, %v641_v46  ;;  %v632_v53 = vpop.f32.mrb[6].mxu0  ;;  %v644_v54 = vpop.f32.mrb[6].mxu1 }
 0x104   : > { %v633_v55 = vpop.f32.mrb[7].mxu0  ;;  %v645_v56 = vpop.f32.mrb[7].mxu1 }
 0x105   : > { %588 = vst [vmem:[%s175_s4] sm:$0xff] %v587_v49   ;;  %605 = vst [vmem:[%s175_s4 + $0x10] sm:$0xff] %v597_v50   ;;  %v404_v57 = vadd.f32 %v631_v51, %v540_v26  ;;  %v420_v58 = vadd.f32 %v643_v52, %v540_v26  ;;  %v634_v59 = vadd.f32 %v633_v55, %v632_v53 }
 0x106   : > { %v646_v60 = vadd.f32 %v645_v56, %v644_v54 }
 0x107   : > { %v407_v61 = vadd.f32 %v634_v59, %v540_v26  ;;  %v428_v63 = vmax.f32 %v404_v57, 0.0  ;;  %v432_v0 = vmax.f32 %v420_v58, 0.0 }
 0x108   : > { %v423_v62 = vadd.f32 %v646_v60, %v540_v26 }
 0x109   : > { %v429_v1 = vmax.f32 %v407_v61, 0.0 }
 0x10a   : > { %v433_v2 = vmax.f32 %v423_v62, 0.0 }
 0x10b   : > { %v592_v3 = vpack.c.bf16 %v429_v1, %v428_v63 }
 0x10c   : > { %v602_v4 = vpack.c.bf16 %v433_v2, %v432_v0 }
 0x10d   : > { %604 = vst [vmem:[%s175_s4 + $0x8] sm:$0xff] %v592_v3  }
 0x10e   : > { %606 = vst [vmem:[%s175_s4 + $0x18] sm:$0xff] %v602_v4  }
 0x10f PF: > { %s13_s12 = sadd.s32 1, %s705_s12  }
 0x110   : > { %p10_p4 = scmp.ge.s32.totalorder %s13_s12, 4  }
 0x112   :  { %12 = sbr.rel (!%p10_p4) target bundleno = 1 (0x1), region = 62 }

// kernel: encoder_forward.51
= control target key start
LH: loop header
LB: loop body
LE: loop exit
PB: predicated region body
PF: predicated region fallthrough
CT: control target
= control target key end

     0   :  { %s764_s15 = smov 0   ;;  %s897_s0 = inlined_call_operand.vmem [shape: bf16[128,128], index: 0, kind: input, shape index: {}]   ;;  %s898_s1 = inlined_call_operand.vmem [shape: bf16[128,256], index: 1, kind: input, shape index: {}]   ;;  %s899_s2 = inlined_call_operand.vmem [shape: f32[1,256], index: 2, kind: input, shape index: {}]   ;;  %s900_s3 = inlined_call_operand.vmem [shape: bf16[128,256], index: 3, kind: input, shape index: {}]   ;;  %s901_s4 = inlined_call_operand.vmem [shape: bf16[128,256], index: 4, kind: output, shape index: {}]  }
   0x1 LB: > { %s624_s16 = sadd.s32 4294967295, %s736_s15   ;;  %p628_p0 = scmp.ge.s32.totalorder %s736_s15, 1  ;;  %s736_s15 = sphi %s764_s15, %s14_s15  }
   0x2   : > { %p175_p1 = scmp.lt.s32.totalorder %s736_s15, 3 }
   0x4   : > { %p176_p2 = pnand %p628_p0, %p175_p1 }
   0x5   : > { %v702_v0 = vld [vmem:[%s898_s1 + $0x4] ss:$8 sps:$4 sm:$0xff] (!%p176_p2)   ;;  %s629_s19 = sshll.u32 (!%p176_p2), %s624_s16, 3  ;;  %v704_v1 = vld [vmem:[%s898_s1] ss:$8 sps:$4 sm:$0xff] (!%p176_p2)   ;;  %v738_v2 = vmov (!%p176_p2), 0   ;;  %v255_v21 = vlaneseq (!%p176_p2) }
   0x6   : > { %179 = sbr.rel (%p176_p2) target bundleno = 272 (0x110), region = 36  ;;  %401 = vmatprep.mubr.bf16.mxu0 (!%p176_p2), %v738_v2  ;;  %421 = vmatprep.mubr.bf16.mxu1 (!%p176_p2), %v738_v2  ;;  %p209_p3 = scmp.lt.s32.totalorder (!%p176_p2), %s629_s19, 15  ;;  %v705_v3 = vld [vmem:[%s898_s1 + $0x14] ss:$8 sps:$4 sm:$0xff] (!%p176_p2)   ;;  %v707_v4 = vld [vmem:[%s898_s1 + $0x10] ss:$8 sps:$4 sm:$0xff] (!%p176_p2)  }
   0x7   : > { %369 = vmatprep.subr.bf16.mxu0 (!%p176_p2), %v702_v0  ;;  %677 = vmatprep.subr.bf16.mxu1 (!%p176_p2), %v702_v0  ;;  %v708_v5 = vld [vmem:[%s898_s1 + $0x24] ss:$8 sps:$4 sm:$0xff] (!%p176_p2)   ;;  %v710_v6 = vld [vmem:[%s898_s1 + $0x20] ss:$8 sps:$4 sm:$0xff] (!%p176_p2)   ;;  %v711_v7 = vld [vmem:[%s898_s1 + $0x34] ss:$8 sps:$4 sm:$0xff] (!%p176_p2)  }
   0x8   : > { %370 = vmatpush1.bf16.msra.mxu0 (!%p176_p2), %v704_v1  ;;  %685 = vmatpush1.bf16.msra.mxu1 (!%p176_p2), %v704_v1  ;;  %v713_v8 = vld [vmem:[%s898_s1 + $0x30] ss:$8 sps:$4 sm:$0xff] (!%p176_p2)   ;;  %v714_v9 = vld [vmem:[%s898_s1 + $0x44] ss:$8 sps:$4 sm:$0xff] (!%p176_p2)   ;;  %v716_v10 = vld [vmem:[%s898_s1 + $0x40] ss:$8 sps:$4 sm:$0xff] (!%p176_p2)  }
   0x9   : > { %371 = vmatprep.subr.bf16.mxu0 (!%p176_p2), %v705_v3  ;;  %678 = vmatprep.subr.bf16.mxu1 (!%p176_p2), %v705_v3  ;;  %v717_v11 = vld [vmem:[%s898_s1 + $0x54] ss:$8 sps:$4 sm:$0xff] (!%p176_p2)   ;;  %v719_v12 = vld [vmem:[%s898_s1 + $0x50] ss:$8 sps:$4 sm:$0xff] (!%p176_p2)   ;;  %v720_v13 = vld [vmem:[%s898_s1 + $0x64] ss:$8 sps:$4 sm:$0xff] (!%p176_p2)  }
   0xa   : > { %v722_v14 = vld [vmem:[%s898_s1 + $0x60] ss:$8 sps:$4 sm:$0xff] (!%p176_p2)   ;;  %v723_v15 = vld [vmem:[%s898_s1 + $0x74] ss:$8 sps:$4 sm:$0xff] (!%p176_p2)   ;;  %v725_v16 = vld [vmem:[%s898_s1 + $0x70] ss:$8 sps:$4 sm:$0xff] (!%p176_p2)  }
   0xb   : > { %v256_v22 = vshrl.u32 (!%p176_p2), %v255_v21, 7  ;;  %v253_v24 = vld [vmem:[%s899_s2] sm:$0x3] (!%p176_p2) }
   0xc   : > { %372 = vmatpush1.bf16.msra.mxu0 (!%p176_p2), %v707_v4  ;;  %686 = vmatpush1.bf16.msra.mxu1 (!%p176_p2), %v707_v4 }
   0xd   : > { %s903_s19 = smov (!%p209_p3, %s629_s19), 15  ;;  %373 = vmatprep.subr.bf16.mxu0 %v708_v5  ;;  %679 = vmatprep.subr.bf16.mxu1 %v708_v5  ;;  %v257_v23 = vsub.s32 0, %v256_v22  ;;  %v261_v25 = vsub.s32 1, %v256_v22 }
   0xe   : > { %s630_s28 = sshll.u32 %s903_s19, 2  ;;  %s667_s30 = sshll.u32 %s903_s19, 3 }
   0xf   : > { %s799_s9 = scalar_lea.vmem %s897_s0, %s630_s28  ;;  %s838_s7 = scalar_lea.vmem %s900_s3, %s667_s30  ;;  %v845_v28 = vrot.slane %v253_v24, %v257_v23  ;;  %v849_v31 = vrot.slane %v253_v24, %v261_v25 }
  0x10   : > { %374 = vmatpush1.bf16.msra.mxu0 %v710_v6  ;;  %687 = vmatpush1.bf16.msra.mxu1 %v710_v6  ;;  %v726_v17 = vld [vmem:[%s799_s9] sm:$0xff]   ;;  %v727_v18 = vld [vmem:[%s799_s9 + $0x10] sm:$0xff]   ;;  %v728_v19 = vld [vmem:[%s799_s9 + $0x8] sm:$0xff]   ;;  %s876_s12 = scalar_lea.vmem %s901_s4, %s667_s30 }
  0x11   : > { %375 = vmatprep.subr.bf16.mxu0 %v711_v7  ;;  %680 = vmatprep.subr.bf16.mxu1 %v711_v7  ;;  %v729_v20 = vld [vmem:[%s799_s9 + $0x18] sm:$0xff]   ;;  %v442_v26 = vld [vmem:[%s838_s7] sm:$0xff]  ;;  %v443_v29 = vld [vmem:[%s838_s7 + $0x8] sm:$0xff] }
  0x12   : > { %v446_v27 = vld [vmem:[%s838_s7 + $0x20] sm:$0xff]  ;;  %v447_v30 = vld [vmem:[%s838_s7 + $0x28] sm:$0xff]  ;;  %v852_v32 = vld [vmem:[%s838_s7 + $0x10] sm:$0xff]  ;;  %v450_v34 = vunpack.c.l.bf16 %v442_v26  ;;  %v451_v36 = vunpack.c.h.bf16 %v442_v26  ;;  %v452_v40 = vunpack.c.l.bf16 %v443_v29  ;;  %v453_v42 = vunpack.c.h.bf16 %v443_v29 }
  0x13   : > { %v855_v33 = vld [vmem:[%s838_s7 + $0x30] sm:$0xff]  ;;  %v458_v35 = vunpack.c.l.bf16 %v446_v27  ;;  %v459_v37 = vunpack.c.h.bf16 %v446_v27  ;;  %v460_v41 = vunpack.c.l.bf16 %v447_v30  ;;  %v461_v43 = vunpack.c.h.bf16 %v447_v30  ;;  %v449_v3 = vld [vmem:[%s838_s7 + $0x38] sm:$0xff] }
  0x14   : > { %376 = vmatpush1.bf16.msra.mxu0 %v713_v8  ;;  %688 = vmatpush1.bf16.msra.mxu1 %v713_v8  ;;  %v454_v48 = vunpack.c.l.bf16 %v852_v32  ;;  %v462_v49 = vunpack.c.l.bf16 %v855_v33  ;;  %v455_v54 = vunpack.c.h.bf16 %v852_v32  ;;  %v463_v55 = vunpack.c.h.bf16 %v855_v33 }
  0x15   : > { %377 = vmatprep.subr.bf16.mxu0 %v714_v9  ;;  %681 = vmatprep.subr.bf16.mxu1 %v714_v9  ;;  %v465_v27 = vunpack.c.h.bf16 %v449_v3 }
  0x18   : > { %378 = vmatpush1.bf16.msra.mxu0 %v716_v10  ;;  %689 = vmatpush1.bf16.msra.mxu1 %v716_v10 }
  0x19   : > { %379 = vmatprep.subr.bf16.mxu0 %v717_v11  ;;  %682 = vmatprep.subr.bf16.mxu1 %v717_v11 }
  0x1c   : > { %380 = vmatpush1.bf16.msra.mxu0 %v719_v12  ;;  %690 = vmatpush1.bf16.msra.mxu1 %v719_v12 }
  0x1d   : > { %381 = vmatprep.subr.bf16.mxu0 %v720_v13  ;;  %683 = vmatprep.subr.bf16.mxu1 %v720_v13 }
  0x20   : > { %382 = vmatpush1.bf16.msra.mxu0 %v722_v14  ;;  %691 = vmatpush1.bf16.msra.mxu1 %v722_v14 }
  0x21   : > { %383 = vmatprep.subr.bf16.mxu0 %v723_v15  ;;  %684 = vmatprep.subr.bf16.mxu1 %v723_v15  ;;  %v464_v15 = vunpack.c.l.bf16 %v449_v3 }
  0x24   : > { %384 = vmatpush1.bf16.msra.mxu0 %v725_v16  ;;  %692 = vmatpush1.bf16.msra.mxu1 %v725_v16 }
  0x27   : > { %402 = vmatmul.mubr.bf16.vlgmr.msra.gmra.mrb[0].mxu0 %v726_v17  ;;  %422 = vmatmul.mubr.bf16.vlgmr.msra.gmra.mrb[0].mxu1 %v727_v18 }
  0x28   : > { %411 = vmatprep.mubr.bf16.mxu0 %v738_v2  ;;  %431 = vmatprep.mubr.bf16.mxu1 %v738_v2  ;;  %v445_v2 = vld [vmem:[%s838_s7 + $0x18] sm:$0xff] }
  0x29   : > { %v456_v14 = vunpack.c.l.bf16 %v445_v2  ;;  %v457_v26 = vunpack.c.h.bf16 %v445_v2 }
  0x2f   : > { %412 = vmatmul.mubr.bf16.gmra.mrb[4].mxu0 %v728_v19  ;;  %432 = vmatmul.mubr.bf16.gmra.mrb[4].mxu1 %v729_v20 }
  0xfa   : > { %v403_v38 = vpop.f32.mrb[0].mxu0  ;;  %v423_v39 = vpop.f32.mrb[0].mxu1 }
  0xfb   : > { %v404_v44 = vadd.f32 %v403_v38, %v845_v28  ;;  %v424_v45 = vadd.f32 %v423_v39, %v845_v28  ;;  %v405_v46 = vpop.f32.mrb[1].mxu0  ;;  %v425_v47 = vpop.f32.mrb[1].mxu1 }
  0xfc   : > { %v406_v50 = vadd.f32 %v405_v46, %v849_v31  ;;  %v426_v51 = vadd.f32 %v425_v47, %v849_v31  ;;  %v407_v52 = vpop.f32.mrb[2].mxu0  ;;  %v427_v53 = vpop.f32.mrb[2].mxu1 }
  0xfd   : > { %v466_v56 = vadd.f32 %v450_v34, %v404_v44  ;;  %v474_v57 = vadd.f32 %v458_v35, %v424_v45  ;;  %v408_v58 = vadd.f32 %v407_v52, %v845_v28  ;;  %v428_v59 = vadd.f32 %v427_v53, %v845_v28  ;;  %v409_v60 = vpop.f32.mrb[3].mxu0  ;;  %v429_v61 = vpop.f32.mrb[3].mxu1 }
  0xfe   : > { %v467_v62 = vadd.f32 %v451_v36, %v406_v50  ;;  %v475_v63 = vadd.f32 %v459_v37, %v426_v51  ;;  %v410_v0 = vadd.f32 %v409_v60, %v849_v31  ;;  %v430_v1 = vadd.f32 %v429_v61, %v849_v31 }
  0xff   : > { %v482_v4 = vmax.f32 %v466_v56, 0.0  ;;  %v490_v5 = vmax.f32 %v474_v57, 0.0  ;;  %v468_v6 = vadd.f32 %v452_v40, %v408_v58  ;;  %v476_v7 = vadd.f32 %v460_v41, %v428_v59 }
 0x100   : > { %v483_v8 = vmax.f32 %v467_v62, 0.0  ;;  %v491_v9 = vmax.f32 %v475_v63, 0.0  ;;  %v469_v10 = vadd.f32 %v453_v42, %v410_v0  ;;  %v477_v11 = vadd.f32 %v461_v43, %v430_v1 }
 0x101   : > { %v484_v12 = vmax.f32 %v468_v6, 0.0  ;;  %v492_v13 = vmax.f32 %v476_v7, 0.0 }
 0x102   : > { %v669_v16 = vpack.c.bf16 %v483_v8, %v482_v4  ;;  %v673_v17 = vpack.c.bf16 %v491_v9, %v490_v5  ;;  %v485_v18 = vmax.f32 %v469_v10, 0.0  ;;  %v493_v19 = vmax.f32 %v477_v11, 0.0  ;;  %v413_v20 = vpop.f32.mrb[4].mxu0  ;;  %v433_v21 = vpop.f32.mrb[4].mxu1 }
 0x103   : > { %v414_v22 = vadd.f32 %v413_v20, %v845_v28  ;;  %v434_v23 = vadd.f32 %v433_v21, %v845_v28  ;;  %v415_v24 = vpop.f32.mrb[5].mxu0  ;;  %v435_v25 = vpop.f32.mrb[5].mxu1 }
 0x104   : > { %546 = vst [vmem:[%s876_s12] sm:$0xff] %v669_v16  ;;  %550 = vst [vmem:[%s876_s12 + $0x20] sm:$0xff] %v673_v17  ;;  %v670_v29 = vpack.c.bf16 %v485_v18, %v484_v12  ;;  %v674_v30 = vpack.c.bf16 %v493_v19, %v492_v13  ;;  %v416_v32 = vadd.f32 %v415_v24, %v849_v31  ;;  %v417_v34 = vpop.f32.mrb[6].mxu0  ;;  %v437_v35 = vpop.f32.mrb[6].mxu1 }
 0x105   : > { %v436_v33 = vadd.f32 %v435_v25, %v849_v31  ;;  %v470_v36 = vadd.f32 %v454_v48, %v414_v22  ;;  %v478_v37 = vadd.f32 %v462_v49, %v434_v23  ;;  %v418_v38 = vadd.f32 %v417_v34, %v845_v28  ;;  %v419_v40 = vpop.f32.mrb[7].mxu0  ;;  %v439_v41 = vpop.f32.mrb[7].mxu1 }
 0x106   : > { %v438_v39 = vadd.f32 %v437_v35, %v845_v28  ;;  %547 = vst [vmem:[%s876_s12 + $0x8] sm:$0xff] %v670_v29  ;;  %551 = vst [vmem:[%s876_s12 + $0x28] sm:$0xff] %v674_v30  ;;  %v471_v42 = vadd.f32 %v455_v54, %v416_v32  ;;  %v420_v44 = vadd.f32 %v419_v40, %v849_v31 }
 0x107   : > { %v479_v43 = vadd.f32 %v463_v55, %v436_v33  ;;  %v440_v45 = vadd.f32 %v439_v41, %v849_v31  ;;  %v486_v46 = vmax.f32 %v470_v36, 0.0  ;;  %v494_v47 = vmax.f32 %v478_v37, 0.0 }
 0x108   : > { %v472_v48 = vadd.f32 %v456_v14, %v418_v38  ;;  %v480_v49 = vadd.f32 %v464_v15, %v438_v39  ;;  %v487_v50 = vmax.f32 %v471_v42, 0.0  ;;  %v473_v51 = vadd.f32 %v457_v26, %v420_v44 }
 0x109   : > { %v495_v28 = vmax.f32 %v479_v43, 0.0  ;;  %v481_v52 = vadd.f32 %v465_v27, %v440_v45 }
 0x10a   : > { %v488_v53 = vmax.f32 %v472_v48, 0.0  ;;  %v496_v56 = vmax.f32 %v480_v49, 0.0  ;;  %v671_v54 = vpack.c.bf16 %v487_v50, %v486_v46  ;;  %v489_v57 = vmax.f32 %v473_v51, 0.0 }
 0x10b   : > { %v675_v55 = vpack.c.bf16 %v495_v28, %v494_v47  ;;  %v497_v58 = vmax.f32 %v481_v52, 0.0 }
 0x10c   : > { %548 = vst [vmem:[%s876_s12 + $0x10] sm:$0xff] %v671_v54  ;;  %v672_v31 = vpack.c.bf16 %v489_v57, %v488_v53 }
 0x10d   : > { %552 = vst [vmem:[%s876_s12 + $0x30] sm:$0xff] %v675_v55  ;;  %v676_v59 = vpack.c.bf16 %v497_v58, %v496_v56 }
 0x10e   : > { %549 = vst [vmem:[%s876_s12 + $0x18] sm:$0xff] %v672_v31 }
 0x10f   : > { %553 = vst [vmem:[%s876_s12 + $0x38] sm:$0xff] %v676_v59 }
 0x110 PF: > { %s14_s15 = sadd.s32 1, %s736_s15  }
 0x111   : > { %p11_p4 = scmp.ge.s32.totalorder %s14_s15, 4  }
 0x113   :  { %13 = sbr.rel (!%p11_p4) target bundleno = 1 (0x1), region = 69 }

// kernel: encoder_forward.60
= control target key start
LH: loop header
LB: loop body
LE: loop exit
PB: predicated region body
PF: predicated region fallthrough
CT: control target
= control target key end

     0   :  { %s993_s12 = smov 0   ;;  %s1215_s0 = inlined_call_operand.vmem [shape: bf16[32,256], index: 0, kind: input, shape index: {}]   ;;  %s1216_s1 = inlined_call_operand.vmem [shape: bf16[256,512], index: 1, kind: input, shape index: {}]   ;;  %s1217_s2 = inlined_call_operand.vmem [shape: f32[1,512], index: 2, kind: input, shape index: {}]   ;;  %s1218_s3 = inlined_call_operand.vmem [shape: bf16[32,512], index: 3, kind: output, shape index: {}]  }
   0x1 LB: > { %s769_s13 = sadd.s32 4294967295, %s971_s12   ;;  %p773_p0 = scmp.ge.s32.totalorder %s971_s12, 1  ;;  %s971_s12 = sphi %s993_s12, %s13_s12  }
   0x2   : > { %p139_p1 = scmp.lt.s32.totalorder %s971_s12, 3 }
   0x4   : > { %p140_p2 = pnand %p773_p0, %p139_p1 }
   0x5   : > { %v866_v0 = vld [vmem:[%s1216_s1 + $0x4] ss:$16 sps:$4 sm:$0xff] (!%p140_p2)   ;;  %v868_v1 = vld [vmem:[%s1216_s1 + $0xc] ss:$16 sps:$4 sm:$0xff] (!%p140_p2)   ;;  %v870_v2 = vld [vmem:[%s1216_s1] ss:$16 sps:$4 sm:$0xff] (!%p140_p2)  }
   0x6   : > { %143 = sbr.rel (%p140_p2) target bundleno = 290 (0x122), region = 32  ;;  %597 = vmatprep.subr.bf16.mxu0 (!%p140_p2), %v866_v0  ;;  %v871_v3 = vld [vmem:[%s1216_s1 + $0x8] ss:$16 sps:$4 sm:$0xff] (!%p140_p2)   ;;  %640 = vmatprep.subr.bf16.mxu1 (!%p140_p2), %v868_v1  ;;  %v872_v4 = vld [vmem:[%s1216_s1 + $0x24] ss:$16 sps:$4 sm:$0xff] (!%p140_p2)   ;;  %s774_s24 = sshll.u32 (!%p140_p2), %s769_s13, 1 }
   0x7   : > { %598 = vmatpush1.bf16.msra.mxu0 (!%p140_p2), %v870_v2  ;;  %641 = vmatpush1.bf16.msra.mxu1 (!%p140_p2), %v871_v3  ;;  %v874_v5 = vld [vmem:[%s1216_s1 + $0x2c] ss:$16 sps:$4 sm:$0xff] (!%p140_p2)   ;;  %v876_v6 = vld [vmem:[%s1216_s1 + $0x20] ss:$16 sps:$4 sm:$0xff] (!%p140_p2)   ;;  %v877_v7 = vld [vmem:[%s1216_s1 + $0x28] ss:$16 sps:$4 sm:$0xff] (!%p140_p2)   ;;  %v247_v2 = vlaneseq (!%p140_p2) }
   0x8   : > { %599 = vmatprep.subr.bf16.mxu0 (!%p140_p2), %v872_v4  ;;  %642 = vmatprep.subr.bf16.mxu1 (!%p140_p2), %v874_v5  ;;  %v878_v8 = vld [vmem:[%s1216_s1 + $0x44] ss:$16 sps:$4 sm:$0xff] (!%p140_p2)   ;;  %v880_v9 = vld [vmem:[%s1216_s1 + $0x4c] ss:$16 sps:$4 sm:$0xff] (!%p140_p2)   ;;  %v882_v10 = vld [vmem:[%s1216_s1 + $0x40] ss:$16 sps:$4 sm:$0xff] (!%p140_p2)  }
   0x9   : > { %v883_v11 = vld [vmem:[%s1216_s1 + $0x48] ss:$16 sps:$4 sm:$0xff] (!%p140_p2)   ;;  %v884_v12 = vld [vmem:[%s1216_s1 + $0x64] ss:$16 sps:$4 sm:$0xff] (!%p140_p2)   ;;  %v886_v13 = vld [vmem:[%s1216_s1 + $0x6c] ss:$16 sps:$4 sm:$0xff] (!%p140_p2)  }
   0xa   : > { %v888_v14 = vld [vmem:[%s1216_s1 + $0x60] ss:$16 sps:$4 sm:$0xff] (!%p140_p2)   ;;  %v889_v15 = vld [vmem:[%s1216_s1 + $0x68] ss:$16 sps:$4 sm:$0xff] (!%p140_p2)   ;;  %v890_v16 = vld [vmem:[%s1216_s1 + $0x84] ss:$16 sps:$4 sm:$0xff] (!%p140_p2)  }
   0xb   : > { %600 = vmatpush1.bf16.msra.mxu0 (!%p140_p2), %v876_v6  ;;  %643 = vmatpush1.bf16.msra.mxu1 (!%p140_p2), %v877_v7  ;;  %v892_v17 = vld [vmem:[%s1216_s1 + $0x8c] ss:$16 sps:$4 sm:$0xff] (!%p140_p2)   ;;  %v894_v18 = vld [vmem:[%s1216_s1 + $0x80] ss:$16 sps:$4 sm:$0xff] (!%p140_p2)   ;;  %v895_v19 = vld [vmem:[%s1216_s1 + $0x88] ss:$16 sps:$4 sm:$0xff] (!%p140_p2)  }
   0xc   : > { %601 = vmatprep.subr.bf16.mxu0 (!%p140_p2), %v878_v8  ;;  %644 = vmatprep.subr.bf16.mxu1 (!%p140_p2), %v880_v9  ;;  %v896_v20 = vld [vmem:[%s1216_s1 + $0xa4] ss:$16 sps:$4 sm:$0xff] (!%p140_p2)   ;;  %v898_v21 = vld [vmem:[%s1216_s1 + $0xac] ss:$16 sps:$4 sm:$0xff] (!%p140_p2)   ;;  %v900_v22 = vld [vmem:[%s1216_s1 + $0xa0] ss:$16 sps:$4 sm:$0xff] (!%p140_p2)  }
   0xd   : > { %v901_v23 = vld [vmem:[%s1216_s1 + $0xa8] ss:$16 sps:$4 sm:$0xff]   ;;  %v902_v24 = vld [vmem:[%s1216_s1 + $0xc4] ss:$16 sps:$4 sm:$0xff]   ;;  %v904_v25 = vld [vmem:[%s1216_s1 + $0xcc] ss:$16 sps:$4 sm:$0xff]  }
   0xe   : > { %v906_v26 = vld [vmem:[%s1216_s1 + $0xc0] ss:$16 sps:$4 sm:$0xff]   ;;  %v907_v27 = vld [vmem:[%s1216_s1 + $0xc8] ss:$16 sps:$4 sm:$0xff]   ;;  %v908_v28 = vld [vmem:[%s1216_s1 + $0xe4] ss:$16 sps:$4 sm:$0xff]  }
   0xf   : > { %602 = vmatpush1.bf16.msra.mxu0 %v882_v10  ;;  %645 = vmatpush1.bf16.msra.mxu1 %v883_v11  ;;  %v910_v29 = vld [vmem:[%s1216_s1 + $0xec] ss:$16 sps:$4 sm:$0xff]   ;;  %v912_v30 = vld [vmem:[%s1216_s1 + $0xe0] ss:$16 sps:$4 sm:$0xff]   ;;  %v913_v31 = vld [vmem:[%s1216_s1 + $0xe8] ss:$16 sps:$4 sm:$0xff]  }
  0x10   : > { %603 = vmatprep.subr.bf16.mxu0 %v884_v12  ;;  %646 = vmatprep.subr.bf16.mxu1 %v886_v13  ;;  %v914_v32 = vld [vmem:[%s1216_s1 + $0x104] ss:$16 sps:$4 sm:$0xff]   ;;  %v916_v33 = vld [vmem:[%s1216_s1 + $0x10c] ss:$16 sps:$4 sm:$0xff]   ;;  %p166_p3 = scmp.lt.s32.totalorder %s774_s24, 3  ;;  %v248_v3 = vshrl.u32 %v247_v2, 7 }
  0x11   : > { %v918_v34 = vld [vmem:[%s1216_s1 + $0x100] ss:$16 sps:$4 sm:$0xff]   ;;  %v919_v35 = vld [vmem:[%s1216_s1 + $0x108] ss:$16 sps:$4 sm:$0xff]   ;;  %v920_v36 = vld [vmem:[%s1216_s1 + $0x124] ss:$16 sps:$4 sm:$0xff]  }
  0x12   : > { %v922_v37 = vld [vmem:[%s1216_s1 + $0x12c] ss:$16 sps:$4 sm:$0xff]   ;;  %s1220_s24 = smov (!%p166_p3, %s774_s24), 3  ;;  %v924_v38 = vld [vmem:[%s1216_s1 + $0x120] ss:$16 sps:$4 sm:$0xff]   ;;  %v249_v4 = vsub.s32 0, %v248_v3 }
  0x13   : > { %604 = vmatpush1.bf16.msra.mxu0 %v888_v14  ;;  %647 = vmatpush1.bf16.msra.mxu1 %v889_v15  ;;  %v925_v39 = vld [vmem:[%s1216_s1 + $0x128] ss:$16 sps:$4 sm:$0xff]   ;;  %v926_v40 = vld [vmem:[%s1216_s1 + $0x144] ss:$16 sps:$4 sm:$0xff]   ;;  %v928_v41 = vld [vmem:[%s1216_s1 + $0x14c] ss:$16 sps:$4 sm:$0xff]  }
  0x14   : > { %605 = vmatprep.subr.bf16.mxu0 %v890_v16  ;;  %648 = vmatprep.subr.bf16.mxu1 %v892_v17  ;;  %s852_s23 = sshll.u32 %s1220_s24, 3  ;;  %v930_v42 = vld [vmem:[%s1216_s1 + $0x140] ss:$16 sps:$4 sm:$0xff]   ;;  %v931_v43 = vld [vmem:[%s1216_s1 + $0x148] ss:$16 sps:$4 sm:$0xff]   ;;  %v257_v5 = vsub.s32 2, %v248_v3 }
  0x15   : > { %v932_v44 = vld [vmem:[%s1216_s1 + $0x164] ss:$16 sps:$4 sm:$0xff]   ;;  %s1144_s13 = scalar_lea.vmem %s1215_s0, %s852_s23  ;;  %v934_v45 = vld [vmem:[%s1216_s1 + $0x16c] ss:$16 sps:$4 sm:$0xff]   ;;  %v936_v47 = vld [vmem:[%s1216_s1 + $0x160] ss:$16 sps:$4 sm:$0xff]  }
  0x16   : > { %v964_v46 = vld [vmem:[%s1144_s13 + $0x4] ss:$8 sps:$4 sm:$0xff]   ;;  %v937_v48 = vld [vmem:[%s1216_s1 + $0x168] ss:$16 sps:$4 sm:$0xff]   ;;  %v942_v51 = vld [vmem:[%s1216_s1 + $0x180] ss:$16 sps:$4 sm:$0xff]  }
  0x17   : > { %606 = vmatpush1.bf16.msra.mxu0 %v894_v18  ;;  %649 = vmatpush1.bf16.msra.mxu1 %v895_v19  ;;  %v938_v49 = vld [vmem:[%s1216_s1 + $0x184] ss:$16 sps:$4 sm:$0xff]   ;;  %v940_v50 = vld [vmem:[%s1216_s1 + $0x18c] ss:$16 sps:$4 sm:$0xff]   ;;  %v943_v52 = vld [vmem:[%s1216_s1 + $0x188] ss:$16 sps:$4 sm:$0xff]  }
  0x18   : > { %607 = vmatprep.subr.bf16.mxu0 %v896_v20  ;;  %650 = vmatprep.subr.bf16.mxu1 %v898_v21  ;;  %v944_v53 = vld [vmem:[%s1216_s1 + $0x1a4] ss:$16 sps:$4 sm:$0xff]   ;;  %v946_v54 = vld [vmem:[%s1216_s1 + $0x1ac] ss:$16 sps:$4 sm:$0xff]   ;;  %v948_v55 = vld [vmem:[%s1216_s1 + $0x1a0] ss:$16 sps:$4 sm:$0xff]  }
  0x19   : > { %629 = vmatprep.mubr.bf16.mxu0 %v964_v46  ;;  %672 = vmatprep.mubr.bf16.mxu1 %v964_v46  ;;  %v949_v56 = vld [vmem:[%s1216_s1 + $0x1a8] ss:$16 sps:$4 sm:$0xff]   ;;  %v950_v57 = vld [vmem:[%s1216_s1 + $0x1c4] ss:$16 sps:$4 sm:$0xff]   ;;  %v952_v58 = vld [vmem:[%s1216_s1 + $0x1cc] ss:$16 sps:$4 sm:$0xff]  }
  0x1a   : > { %v954_v59 = vld [vmem:[%s1216_s1 + $0x1c0] ss:$16 sps:$4 sm:$0xff]   ;;  %v955_v60 = vld [vmem:[%s1216_s1 + $0x1c8] ss:$16 sps:$4 sm:$0xff]   ;;  %v956_v61 = vld [vmem:[%s1216_s1 + $0x1e4] ss:$16 sps:$4 sm:$0xff]  }
  0x1b   : > { %608 = vmatpush1.bf16.msra.mxu0 %v900_v22  ;;  %651 = vmatpush1.bf16.msra.mxu1 %v901_v23  ;;  %v958_v62 = vld [vmem:[%s1216_s1 + $0x1ec] ss:$16 sps:$4 sm:$0xff]   ;;  %v960_v63 = vld [vmem:[%s1216_s1 + $0x1e0] ss:$16 sps:$4 sm:$0xff]   ;;  %v961_v0 = vld [vmem:[%s1216_s1 + $0x1e8] ss:$16 sps:$4 sm:$0xff]  }
  0x1c   : > { %609 = vmatprep.subr.bf16.mxu0 %v902_v24  ;;  %652 = vmatprep.subr.bf16.mxu1 %v904_v25  ;;  %v962_v1 = vld [vmem:[%s1144_s13] ss:$8 sps:$4 sm:$0xff]   ;;  %v253_v7 = vsub.s32 1, %v248_v3  ;;  %v261_v8 = vsub.s32 3, %v248_v3  ;;  %s853_s13 = sshll.u32 %s1220_s24, 4 }
  0x1d   : > { %v245_v6 = vld [vmem:[%s1217_s2] sm:$0xf]  ;;  %s177_s27 = scalar_lea.vmem %s1218_s3, %s853_s13 }
  0x1e   : > { %v250_v9 = vrot.slane %v245_v6, %v249_v4  ;;  %v258_v10 = vrot.slane %v245_v6, %v257_v5  ;;  %v254_v11 = vrot.slane %v245_v6, %v253_v7  ;;  %v262_v12 = vrot.slane %v245_v6, %v261_v8 }
  0x1f   : > { %610 = vmatpush1.bf16.msra.mxu0 %v906_v26  ;;  %653 = vmatpush1.bf16.msra.mxu1 %v907_v27 }
  0x20   : > { %611 = vmatprep.subr.bf16.mxu0 %v908_v28  ;;  %654 = vmatprep.subr.bf16.mxu1 %v910_v29 }
  0x23   : > { %612 = vmatpush1.bf16.msra.mxu0 %v912_v30  ;;  %655 = vmatpush1.bf16.msra.mxu1 %v913_v31 }
  0x24   : > { %613 = vmatprep.subr.bf16.mxu0 %v914_v32  ;;  %656 = vmatprep.subr.bf16.mxu1 %v916_v33 }
  0x27   : > { %614 = vmatpush1.bf16.msra.mxu0 %v918_v34  ;;  %657 = vmatpush1.bf16.msra.mxu1 %v919_v35 }
  0x28   : > { %615 = vmatprep.subr.bf16.mxu0 %v920_v36  ;;  %658 = vmatprep.subr.bf16.mxu1 %v922_v37 }
  0x2b   : > { %616 = vmatpush1.bf16.msra.mxu0 %v924_v38  ;;  %659 = vmatpush1.bf16.msra.mxu1 %v925_v39 }
  0x2c   : > { %617 = vmatprep.subr.bf16.mxu0 %v926_v40  ;;  %660 = vmatprep.subr.bf16.mxu1 %v928_v41 }
  0x2f   : > { %618 = vmatpush1.bf16.msra.mxu0 %v930_v42  ;;  %661 = vmatpush1.bf16.msra.mxu1 %v931_v43 }
  0x30   : > { %619 = vmatprep.subr.bf16.mxu0 %v932_v44  ;;  %662 = vmatprep.subr.bf16.mxu1 %v934_v45 }
  0x33   : > { %620 = vmatpush1.bf16.msra.mxu0 %v936_v47  ;;  %663 = vmatpush1.bf16.msra.mxu1 %v937_v48 }
  0x34   : > { %621 = vmatprep.subr.bf16.mxu0 %v938_v49  ;;  %664 = vmatprep.subr.bf16.mxu1 %v940_v50 }
  0x37   : > { %622 = vmatpush1.bf16.msra.mxu0 %v942_v51  ;;  %665 = vmatpush1.bf16.msra.mxu1 %v943_v52 }
  0x38   : > { %623 = vmatprep.subr.bf16.mxu0 %v944_v53  ;;  %666 = vmatprep.subr.bf16.mxu1 %v946_v54 }
  0x3b   : > { %624 = vmatpush1.bf16.msra.mxu0 %v948_v55  ;;  %667 = vmatpush1.bf16.msra.mxu1 %v949_v56 }
  0x3c   : > { %625 = vmatprep.subr.bf16.mxu0 %v950_v57  ;;  %668 = vmatprep.subr.bf16.mxu1 %v952_v58 }
  0x3f   : > { %626 = vmatpush1.bf16.msra.mxu0 %v954_v59  ;;  %669 = vmatpush1.bf16.msra.mxu1 %v955_v60 }
  0x40   : > { %627 = vmatprep.subr.bf16.mxu0 %v956_v61  ;;  %670 = vmatprep.subr.bf16.mxu1 %v958_v62 }
  0x43   : > { %628 = vmatpush1.bf16.msra.mxu0 %v960_v63  ;;  %671 = vmatpush1.bf16.msra.mxu1 %v961_v0 }
  0x46   : > { %630 = vmatmul.mubr.bf16.vlgmr.msra.gmra.mrb[0].mxu0 %v962_v1  ;;  %673 = vmatmul.mubr.bf16.vlgmr.msra.gmra.mrb[0].mxu1 %v962_v1 }
 0x119   : > { %v631_v13 = vpop.f32.mrb[0].mxu0  ;;  %v674_v14 = vpop.f32.mrb[0].mxu1 }
 0x11a   : > { %v632_v15 = vadd.f32 %v631_v13, %v250_v9  ;;  %v675_v16 = vadd.f32 %v674_v14, %v258_v10  ;;  %v633_v17 = vpop.f32.mrb[1].mxu0  ;;  %v676_v18 = vpop.f32.mrb[1].mxu1 }
 0x11b   : > { %v634_v19 = vadd.f32 %v633_v17, %v254_v11  ;;  %v677_v20 = vadd.f32 %v676_v18, %v262_v12  ;;  %v635_v21 = vpop.f32.mrb[2].mxu0  ;;  %v678_v22 = vpop.f32.mrb[2].mxu1 }
 0x11c   : > { %v636_v23 = vadd.f32 %v635_v21, %v250_v9  ;;  %v679_v24 = vadd.f32 %v678_v22, %v258_v10  ;;  %v637_v25 = vpop.f32.mrb[3].mxu0  ;;  %v680_v26 = vpop.f32.mrb[3].mxu1 }
 0x11d   : > { %v854_v27 = vpack.c.bf16 %v634_v19, %v632_v15  ;;  %v855_v28 = vpack.c.bf16 %v677_v20, %v675_v16  ;;  %v638_v29 = vadd.f32 %v637_v25, %v254_v11  ;;  %v681_v30 = vadd.f32 %v680_v26, %v262_v12 }
 0x11f   : > { %707 = vst [vmem:[%s177_s27] sm:$0xff] %v854_v27  ;;  %708 = vst [vmem:[%s177_s27 + $0x8] sm:$0xff] %v855_v28  ;;  %v856_v31 = vpack.c.bf16 %v638_v29, %v636_v23  ;;  %v857_v32 = vpack.c.bf16 %v681_v30, %v679_v24 }
 0x121   : > { %709 = vst [vmem:[%s177_s27 + $0x10] sm:$0xff] %v856_v31  ;;  %710 = vst [vmem:[%s177_s27 + $0x18] sm:$0xff] %v857_v32 }
 0x122 PF: > { %s13_s12 = sadd.s32 1, %s971_s12  }
 0x123   : > { %p10_p4 = scmp.ge.s32.totalorder %s13_s12, 4  }
 0x125   :  { %12 = sbr.rel (!%p10_p4) target bundleno = 1 (0x1), region = 62 }

// kernel: encoder_forward.61
= control target key start
LH: loop header
LB: loop body
LE: loop exit
PB: predicated region body
PF: predicated region fallthrough
CT: control target
= control target key end

     0   :  { %s813_s15 = smov 0   ;;  %s940_s0 = inlined_call_operand.vmem [shape: bf16[32,128], index: 0, kind: input, shape index: {}]   ;;  %s941_s1 = inlined_call_operand.vmem [shape: bf16[128,512], index: 1, kind: input, shape index: {}]   ;;  %s942_s2 = inlined_call_operand.vmem [shape: f32[1,512], index: 2, kind: input, shape index: {}]   ;;  %s943_s3 = inlined_call_operand.vmem [shape: bf16[32,512], index: 3, kind: input, shape index: {}]   ;;  %s944_s4 = inlined_call_operand.vmem [shape: bf16[32,512], index: 4, kind: output, shape index: {}]  }
   0x1 LB: > { %s663_s16 = sadd.s32 4294967295, %s785_s15   ;;  %p667_p0 = scmp.ge.s32.totalorder %s785_s15, 1  ;;  %s785_s15 = sphi %s813_s15, %s14_s15  }
   0x2   : > { %p175_p1 = scmp.lt.s32.totalorder %s785_s15, 3 }
   0x4   : > { %p176_p2 = pnand %p667_p0, %p175_p1 }
   0x5   : > { %v730_v0 = vld [vmem:[%s941_s1 + $0x4] ss:$16 sps:$4 sm:$0xff] (!%p176_p2)   ;;  %v732_v1 = vld [vmem:[%s941_s1 + $0xc] ss:$16 sps:$4 sm:$0xff] (!%p176_p2)   ;;  %v787_v2 = vmov (!%p176_p2), 0   ;;  %s668_s9 = sshll.u32 (!%p176_p2), %s663_s16, 1  ;;  %v265_v34 = vlaneseq (!%p176_p2) }
   0x6   : > { %179 = sbr.rel (%p176_p2) target bundleno = 263 (0x107), region = 36  ;;  %483 = vmatprep.mubr.bf16.mxu0 (!%p176_p2), %v787_v2  ;;  %526 = vmatprep.mubr.bf16.mxu1 (!%p176_p2), %v787_v2  ;;  %v734_v3 = vld [vmem:[%s941_s1] ss:$16 sps:$4 sm:$0xff] (!%p176_p2)   ;;  %v735_v4 = vld [vmem:[%s941_s1 + $0x8] ss:$16 sps:$4 sm:$0xff] (!%p176_p2)   ;;  %p209_p3 = scmp.lt.s32.totalorder (!%p176_p2), %s668_s9, 3 }
   0x7   : > { %451 = vmatprep.subr.bf16.mxu0 (!%p176_p2), %v730_v0  ;;  %494 = vmatprep.subr.bf16.mxu1 (!%p176_p2), %v732_v1  ;;  %v736_v5 = vld [vmem:[%s941_s1 + $0x24] ss:$16 sps:$4 sm:$0xff] (!%p176_p2)   ;;  %v738_v6 = vld [vmem:[%s941_s1 + $0x2c] ss:$16 sps:$4 sm:$0xff] (!%p176_p2)   ;;  %v740_v7 = vld [vmem:[%s941_s1 + $0x20] ss:$16 sps:$4 sm:$0xff] (!%p176_p2)  }
   0x8   : > { %452 = vmatpush1.bf16.msra.mxu0 (!%p176_p2), %v734_v3  ;;  %495 = vmatpush1.bf16.msra.mxu1 (!%p176_p2), %v735_v4  ;;  %v741_v8 = vld [vmem:[%s941_s1 + $0x28] ss:$16 sps:$4 sm:$0xff] (!%p176_p2)   ;;  %v742_v9 = vld [vmem:[%s941_s1 + $0x44] ss:$16 sps:$4 sm:$0xff] (!%p176_p2)   ;;  %v744_v10 = vld [vmem:[%s941_s1 + $0x4c] ss:$16 sps:$4 sm:$0xff] (!%p176_p2)  }
   0x9   : > { %453 = vmatprep.subr.bf16.mxu0 (!%p176_p2), %v736_v5  ;;  %496 = vmatprep.subr.bf16.mxu1 (!%p176_p2), %v738_v6  ;;  %v746_v11 = vld [vmem:[%s941_s1 + $0x40] ss:$16 sps:$4 sm:$0xff] (!%p176_p2)   ;;  %v747_v12 = vld [vmem:[%s941_s1 + $0x48] ss:$16 sps:$4 sm:$0xff] (!%p176_p2)   ;;  %v748_v13 = vld [vmem:[%s941_s1 + $0x64] ss:$16 sps:$4 sm:$0xff] (!%p176_p2)  }
   0xa   : > { %v750_v14 = vld [vmem:[%s941_s1 + $0x6c] ss:$16 sps:$4 sm:$0xff] (!%p176_p2)   ;;  %v752_v15 = vld [vmem:[%s941_s1 + $0x60] ss:$16 sps:$4 sm:$0xff] (!%p176_p2)   ;;  %v753_v16 = vld [vmem:[%s941_s1 + $0x68] ss:$16 sps:$4 sm:$0xff] (!%p176_p2)  }
   0xb   : > { %v754_v17 = vld [vmem:[%s941_s1 + $0x84] ss:$16 sps:$4 sm:$0xff] (!%p176_p2)   ;;  %v756_v18 = vld [vmem:[%s941_s1 + $0x8c] ss:$16 sps:$4 sm:$0xff] (!%p176_p2)   ;;  %v758_v19 = vld [vmem:[%s941_s1 + $0x80] ss:$16 sps:$4 sm:$0xff] (!%p176_p2)  }
   0xc   : > { %454 = vmatpush1.bf16.msra.mxu0 (!%p176_p2), %v740_v7  ;;  %497 = vmatpush1.bf16.msra.mxu1 (!%p176_p2), %v741_v8  ;;  %v759_v20 = vld [vmem:[%s941_s1 + $0x88] ss:$16 sps:$4 sm:$0xff] (!%p176_p2)   ;;  %v760_v21 = vld [vmem:[%s941_s1 + $0xa4] ss:$16 sps:$4 sm:$0xff] (!%p176_p2)   ;;  %v762_v22 = vld [vmem:[%s941_s1 + $0xac] ss:$16 sps:$4 sm:$0xff] (!%p176_p2)  }
   0xd   : > { %455 = vmatprep.subr.bf16.mxu0 %v742_v9  ;;  %498 = vmatprep.subr.bf16.mxu1 %v744_v10  ;;  %s946_s9 = smov (!%p209_p3, %s668_s9), 3  ;;  %v764_v23 = vld [vmem:[%s941_s1 + $0xa0] ss:$16 sps:$4 sm:$0xff]   ;;  %v765_v24 = vld [vmem:[%s941_s1 + $0xa8] ss:$16 sps:$4 sm:$0xff]   ;;  %v266_v35 = vshrl.u32 %v265_v34, 7 }
   0xe   : > { %s669_s12 = sshll.u32 %s946_s9, 2  ;;  %v766_v25 = vld [vmem:[%s941_s1 + $0xc4] ss:$16 sps:$4 sm:$0xff]   ;;  %v768_v26 = vld [vmem:[%s941_s1 + $0xcc] ss:$16 sps:$4 sm:$0xff]  }
   0xf   : > { %s212_s22 = scalar_lea.vmem %s940_s0, %s669_s12  ;;  %v770_v27 = vld [vmem:[%s941_s1 + $0xc0] ss:$16 sps:$4 sm:$0xff]   ;;  %v771_v28 = vld [vmem:[%s941_s1 + $0xc8] ss:$16 sps:$4 sm:$0xff]   ;;  %v772_v29 = vld [vmem:[%s941_s1 + $0xe4] ss:$16 sps:$4 sm:$0xff]  }
  0x10   : > { %456 = vmatpush1.bf16.msra.mxu0 %v746_v11  ;;  %499 = vmatpush1.bf16.msra.mxu1 %v747_v12  ;;  %v774_v30 = vld [vmem:[%s941_s1 + $0xec] ss:$16 sps:$4 sm:$0xff]   ;;  %v776_v31 = vld [vmem:[%s941_s1 + $0xe0] ss:$16 sps:$4 sm:$0xff]   ;;  %v777_v32 = vld [vmem:[%s941_s1 + $0xe8] ss:$16 sps:$4 sm:$0xff]  }
  0x11   : > { %457 = vmatprep.subr.bf16.mxu0 %v748_v13  ;;  %500 = vmatprep.subr.bf16.mxu1 %v750_v14  ;;  %v778_v33 = vld [vmem:[%s212_s22] sm:$0xff]   ;;  %s715_s12 = sshll.u32 %s946_s9, 4  ;;  %v267_v36 = vsub.s32 0, %v266_v35  ;;  %v275_v37 = vsub.s32 2, %v266_v35  ;;  %v271_v39 = vsub.s32 1, %v266_v35  ;;  %v279_v40 = vsub.s32 3, %v266_v35 }
  0x12   : > { %s219_s17 = scalar_lea.vmem %s943_s3, %s715_s12  ;;  %v263_v38 = vld [vmem:[%s942_s2] sm:$0xf]  ;;  %s226_s21 = scalar_lea.vmem %s944_s4, %s715_s12 }
  0x13   : > { %v537_v41 = vld [vmem:[%s219_s17] sm:$0xff]  ;;  %v538_v42 = vld [vmem:[%s219_s17 + $0x8] sm:$0xff]  ;;  %v268_v43 = vrot.slane %v263_v38, %v267_v36  ;;  %v276_v44 = vrot.slane %v263_v38, %v275_v37  ;;  %v272_v45 = vrot.slane %v263_v38, %v271_v39  ;;  %v280_v46 = vrot.slane %v263_v38, %v279_v40  ;;  %v539_v47 = vld [vmem:[%s219_s17 + $0x10] sm:$0xff] }
  0x14   : > { %458 = vmatpush1.bf16.msra.mxu0 %v752_v15  ;;  %501 = vmatpush1.bf16.msra.mxu1 %v753_v16  ;;  %v540_v48 = vld [vmem:[%s219_s17 + $0x18] sm:$0xff]  ;;  %v541_v49 = vunpack.c.l.bf16 %v537_v41  ;;  %v543_v50 = vunpack.c.l.bf16 %v538_v42  ;;  %v542_v53 = vunpack.c.h.bf16 %v537_v41  ;;  %v544_v54 = vunpack.c.h.bf16 %v538_v42 }
  0x15   : > { %459 = vmatprep.subr.bf16.mxu0 %v754_v17  ;;  %502 = vmatprep.subr.bf16.mxu1 %v756_v18  ;;  %v545_v59 = vunpack.c.l.bf16 %v539_v47  ;;  %v547_v60 = vunpack.c.l.bf16 %v540_v48  ;;  %v546_v1 = vunpack.c.h.bf16 %v539_v47  ;;  %v548_v2 = vunpack.c.h.bf16 %v540_v48 }
  0x18   : > { %460 = vmatpush1.bf16.msra.mxu0 %v758_v19  ;;  %503 = vmatpush1.bf16.msra.mxu1 %v759_v20 }
  0x19   : > { %461 = vmatprep.subr.bf16.mxu0 %v760_v21  ;;  %504 = vmatprep.subr.bf16.mxu1 %v762_v22 }
  0x1c   : > { %462 = vmatpush1.bf16.msra.mxu0 %v764_v23  ;;  %505 = vmatpush1.bf16.msra.mxu1 %v765_v24 }
  0x1d   : > { %463 = vmatprep.subr.bf16.mxu0 %v766_v25  ;;  %506 = vmatprep.subr.bf16.mxu1 %v768_v26 }
  0x20   : > { %464 = vmatpush1.bf16.msra.mxu0 %v770_v27  ;;  %507 = vmatpush1.bf16.msra.mxu1 %v771_v28 }
  0x21   : > { %465 = vmatprep.subr.bf16.mxu0 %v772_v29  ;;  %508 = vmatprep.subr.bf16.mxu1 %v774_v30 }
  0x24   : > { %466 = vmatpush1.bf16.msra.mxu0 %v776_v31  ;;  %509 = vmatpush1.bf16.msra.mxu1 %v777_v32 }
  0x27   : > { %484 = vmatmul.mubr.bf16.vlgmr.msra.gmra.mrb[0].mxu0 %v778_v33  ;;  %527 = vmatmul.mubr.bf16.vlgmr.msra.gmra.mrb[0].mxu1 %v778_v33 }
  0xfa   : > { %v485_v51 = vpop.f32.mrb[0].mxu0  ;;  %v528_v52 = vpop.f32.mrb[0].mxu1 }
  0xfb   : > { %v486_v55 = vadd.f32 %v485_v51, %v268_v43  ;;  %v529_v56 = vadd.f32 %v528_v52, %v276_v44  ;;  %v487_v57 = vpop.f32.mrb[1].mxu0  ;;  %v530_v58 = vpop.f32.mrb[1].mxu1 }
  0xfc   : > { %v488_v61 = vadd.f32 %v487_v57, %v272_v45  ;;  %v531_v62 = vadd.f32 %v530_v58, %v280_v46  ;;  %v489_v63 = vpop.f32.mrb[2].mxu0  ;;  %v532_v0 = vpop.f32.mrb[2].mxu1 }
  0xfd   : > { %v549_v3 = vadd.f32 %v541_v49, %v486_v55  ;;  %v551_v4 = vadd.f32 %v543_v50, %v529_v56  ;;  %v490_v5 = vadd.f32 %v489_v63, %v268_v43  ;;  %v533_v6 = vadd.f32 %v532_v0, %v276_v44  ;;  %v491_v7 = vpop.f32.mrb[3].mxu0  ;;  %v534_v8 = vpop.f32.mrb[3].mxu1 }
  0xfe   : > { %v550_v9 = vadd.f32 %v542_v53, %v488_v61  ;;  %v552_v10 = vadd.f32 %v544_v54, %v531_v62  ;;  %v492_v11 = vadd.f32 %v491_v7, %v272_v45  ;;  %v535_v12 = vadd.f32 %v534_v8, %v280_v46 }
  0xff   : > { %v557_v13 = vmax.f32 %v549_v3, 0.0  ;;  %v559_v14 = vmax.f32 %v551_v4, 0.0  ;;  %v553_v15 = vadd.f32 %v545_v59, %v490_v5  ;;  %v555_v16 = vadd.f32 %v547_v60, %v533_v6 }
 0x100   : > { %v558_v17 = vmax.f32 %v550_v9, 0.0  ;;  %v560_v18 = vmax.f32 %v552_v10, 0.0  ;;  %v554_v19 = vadd.f32 %v546_v1, %v492_v11  ;;  %v556_v20 = vadd.f32 %v548_v2, %v535_v12 }
 0x101   : > { %v561_v21 = vmax.f32 %v553_v15, 0.0  ;;  %v563_v22 = vmax.f32 %v555_v16, 0.0 }
 0x102   : > { %v717_v23 = vpack.c.bf16 %v558_v17, %v557_v13  ;;  %v718_v24 = vpack.c.bf16 %v560_v18, %v559_v14  ;;  %v562_v25 = vmax.f32 %v554_v19, 0.0  ;;  %v564_v26 = vmax.f32 %v556_v20, 0.0 }
 0x104   : > { %589 = vst [vmem:[%s226_s21] sm:$0xff] %v717_v23  ;;  %590 = vst [vmem:[%s226_s21 + $0x8] sm:$0xff] %v718_v24  ;;  %v719_v27 = vpack.c.bf16 %v562_v25, %v561_v21  ;;  %v720_v28 = vpack.c.bf16 %v564_v26, %v563_v22 }
 0x106   : > { %591 = vst [vmem:[%s226_s21 + $0x10] sm:$0xff] %v719_v27  ;;  %592 = vst [vmem:[%s226_s21 + $0x18] sm:$0xff] %v720_v28 }
 0x107 PF: > { %s14_s15 = sadd.s32 1, %s785_s15  }
 0x108   : > { %p11_p4 = scmp.ge.s32.totalorder %s14_s15, 4  }
 0x10a   :  { %13 = sbr.rel (!%p11_p4) target bundleno = 1 (0x1), region = 69 }

// kernel: encoder_forward.59
= control target key start
LH: loop header
LB: loop body
LE: loop exit
PB: predicated region body
PF: predicated region fallthrough
CT: control target
= control target key end

     0   :  { %s1435_s12 = smov 0   ;;  %s1688_s0 = inlined_call_operand.vmem [shape: bf16[32,1152], index: 0, kind: input, shape index: {}]   ;;  %s1689_s1 = inlined_call_operand.vmem [shape: bf16[1152,128], index: 1, kind: input, shape index: {}]   ;;  %s1690_s2 = inlined_call_operand.vmem [shape: f32[1,128], index: 2, kind: input, shape index: {}]   ;;  %s1691_s3 = inlined_call_operand.vmem [shape: bf16[32,128], index: 3, kind: output, shape index: {}]  }
   0x1 LB: > { %s1090_s13 = sadd.s32 4294967295, %s1411_s12   ;;  %p1094_p0 = scmp.ge.s32.totalorder %s1411_s12, 1  ;;  %s1411_s12 = sphi %s1435_s12, %s13_s12  }
   0x2   : > { %p139_p1 = scmp.lt.s32.totalorder %s1411_s12, 3 }
   0x4   : > { %p140_p2 = pnand %p1094_p0, %p139_p1 }
   0x5   : > { %v1320_v0 = vld [vmem:[%s1689_s1 + $0x40] sm:$0xff] (!%p140_p2)   ;;  %v1324_v4 = vld [vmem:[%s1689_s1 + $0x48] sm:$0xff] (!%p140_p2)   ;;  %v1328_v8 = vld [vmem:[%s1689_s1 + $0x50] sm:$0xff] (!%p140_p2)   ;;  %s1095_s17 = sshll.u32 (!%p140_p2), %s1090_s13, 1  ;;  %vm1414_vm0 = vmmov (!%p140_p2), 0  }
   0x6   : > { %143 = sbr.rel (%p140_p2) target bundleno = 323 (0x143), region = 32  ;;  %v1321_v1 = vld [vmem:[%s1689_s1] sm:$0xff] (!%p140_p2)   ;;  %1192 = vmatprep.subr.bf16.mxu0 (!%p140_p2), %v1320_v0  ;;  %v1325_v5 = vld [vmem:[%s1689_s1 + $0x8] sm:$0xff] (!%p140_p2)   ;;  %v1329_v9 = vld [vmem:[%s1689_s1 + $0x10] sm:$0xff] (!%p140_p2)   ;;  %p165_p3 = scmp.lt.s32.totalorder (!%p140_p2), %s1095_s17, 3 }
   0x7   : > { %v1322_v2 = vld [vmem:[%s1689_s1 + $0xc0] sm:$0xff] (!%p140_p2)   ;;  %1193 = vmatpush3.bf16.msra.mxu0 (!%p140_p2), %v1321_v1  ;;  %v1326_v6 = vld [vmem:[%s1689_s1 + $0xc8] sm:$0xff] (!%p140_p2)   ;;  %v1330_v10 = vld [vmem:[%s1689_s1 + $0xd0] sm:$0xff] (!%p140_p2)  }
   0x8   : > { %v1323_v3 = vld [vmem:[%s1689_s1 + $0x80] sm:$0xff] (!%p140_p2)   ;;  %1214 = vmatprep.subr.bf16.mxu1 (!%p140_p2), %v1322_v2  ;;  %1194 = vmatprep.subr.bf16.mxu0 (!%p140_p2), %v1324_v4  ;;  %v1327_v7 = vld [vmem:[%s1689_s1 + $0x88] sm:$0xff] (!%p140_p2)   ;;  %v1331_v11 = vld [vmem:[%s1689_s1 + $0x90] sm:$0xff] (!%p140_p2)  }
   0x9   : > { %1215 = vmatpush3.bf16.msra.mxu1 (!%p140_p2), %v1323_v3  ;;  %v1332_v12 = vld [vmem:[%s1689_s1 + $0x58] sm:$0xff] (!%p140_p2)   ;;  %v1336_v16 = vld [vmem:[%s1689_s1 + $0x60] sm:$0xff] (!%p140_p2)   ;;  %v1340_v20 = vld [vmem:[%s1689_s1 + $0x68] sm:$0xff] (!%p140_p2)  }
   0xa   : > { %1216 = vmatprep.subr.bf16.mxu1 (!%p140_p2), %v1326_v6  ;;  %v1333_v13 = vld [vmem:[%s1689_s1 + $0x18] sm:$0xff] (!%p140_p2)   ;;  %v1337_v17 = vld [vmem:[%s1689_s1 + $0x20] sm:$0xff] (!%p140_p2)   ;;  %v1341_v21 = vld [vmem:[%s1689_s1 + $0x28] sm:$0xff] (!%p140_p2)   ;;  %v1413_v6 = vmov (!%p140_p2), 0.0  }
   0xb   : > { %1195 = vmatpush3.bf16.msra.mxu0 (!%p140_p2), %v1325_v5  ;;  %v1334_v14 = vld [vmem:[%s1689_s1 + $0xd8] sm:$0xff] (!%p140_p2)   ;;  %v1338_v18 = vld [vmem:[%s1689_s1 + $0xe0] sm:$0xff] (!%p140_p2)   ;;  %v1342_v22 = vld [vmem:[%s1689_s1 + $0xe8] sm:$0xff] (!%p140_p2)  }
   0xc   : > { %1196 = vmatprep.subr.bf16.mxu0 (!%p140_p2), %v1328_v8  ;;  %v1335_v15 = vld [vmem:[%s1689_s1 + $0x98] sm:$0xff] (!%p140_p2)   ;;  %v1339_v19 = vld [vmem:[%s1689_s1 + $0xa0] sm:$0xff] (!%p140_p2)   ;;  %v1343_v23 = vld [vmem:[%s1689_s1 + $0xa8] sm:$0xff] (!%p140_p2)  }
   0xd   : > { %1217 = vmatpush3.bf16.msra.mxu1 %v1327_v7  ;;  %s1693_s17 = smov (!%p165_p3, %s1095_s17), 3  ;;  %v1344_v24 = vld [vmem:[%s1689_s1 + $0x70] sm:$0xff]   ;;  %v1348_v28 = vld [vmem:[%s1689_s1 + $0x78] sm:$0xff]   ;;  %v1355_v34 = vld [vmem:[%s1689_s1 + $0x140] sm:$0xff]  }
   0xe   : > { %1218 = vmatprep.subr.bf16.mxu1 %v1330_v10  ;;  %s1309_s14 = smul.u32 36, %s1693_s17  ;;  %v1345_v25 = vld [vmem:[%s1689_s1 + $0x30] sm:$0xff]   ;;  %v1349_v29 = vld [vmem:[%s1689_s1 + $0x38] sm:$0xff]   ;;  %v1359_v37 = vld [vmem:[%s1689_s1 + $0x100] sm:$0xff]  }
   0xf   : > { %1197 = vmatpush3.bf16.msra.mxu0 %v1329_v9  ;;  %v1346_v26 = vld [vmem:[%s1689_s1 + $0xf0] sm:$0xff]   ;;  %v1350_v30 = vld [vmem:[%s1689_s1 + $0xf8] sm:$0xff]   ;;  %v1360_v38 = vld [vmem:[%s1689_s1 + $0x1c0] sm:$0xff]  }
  0x10   : > { %1198 = vmatprep.subr.bf16.mxu0 %v1332_v12  ;;  %v1347_v27 = vld [vmem:[%s1689_s1 + $0xb0] sm:$0xff]   ;;  %s1538_s13 = scalar_lea.vmem %s1688_s0, %s1309_s14  ;;  %v1354_v33 = vld [vmem:[%s1689_s1 + $0xb8] sm:$0xff]   ;;  %v1361_v39 = vld [vmem:[%s1689_s1 + $0x180] sm:$0xff]  }
  0x11   : > { %1219 = vmatpush3.bf16.msra.mxu1 %v1331_v11  ;;  %v1351_v31 = vld [vmem:[%s1538_s13] ss:$36 sps:$4 sm:$0xff]   ;;  %v1356_v35 = vld [vmem:[%s1538_s13 + $0x8] ss:$36 sps:$4 sm:$0xff]   ;;  %v1366_v44 = vld [vmem:[%s1689_s1 + $0x150] sm:$0xff]  }
  0x12   : > { %1220 = vmatprep.subr.bf16.mxu1 %v1334_v14  ;;  %v1353_v32 = vld [vmem:[%s1538_s13 + $0x4] ss:$36 sps:$4 sm:$0xff]   ;;  %v1358_v36 = vld [vmem:[%s1538_s13 + $0xc] ss:$36 sps:$4 sm:$0xff]   ;;  %v1370_v48 = vld [vmem:[%s1689_s1 + $0x158] sm:$0xff]  }
  0x13   : > { %1199 = vmatpush3.bf16.msra.mxu0 %v1333_v13  ;;  %849 = vmatprep.mubr.bf16.mxu0 %v1353_v32  ;;  %v1362_v40 = vld [vmem:[%s1689_s1 + $0x148] sm:$0xff]   ;;  %v1367_v45 = vld [vmem:[%s1689_s1 + $0x110] sm:$0xff]   ;;  %v1371_v49 = vld [vmem:[%s1689_s1 + $0x118] sm:$0xff]  }
  0x14   : > { %1200 = vmatprep.subr.bf16.mxu0 %v1336_v16  ;;  %890 = vmatprep.mubr.bf16.mxu1 %v1358_v36  ;;  %v1363_v41 = vld [vmem:[%s1689_s1 + $0x108] sm:$0xff]   ;;  %v1368_v46 = vld [vmem:[%s1689_s1 + $0x1d0] sm:$0xff]   ;;  %v1372_v50 = vld [vmem:[%s1689_s1 + $0x1d8] sm:$0xff]  }
  0x15   : > { %1221 = vmatpush3.bf16.msra.mxu1 %v1335_v15  ;;  %v1364_v42 = vld [vmem:[%s1689_s1 + $0x1c8] sm:$0xff]   ;;  %v1369_v47 = vld [vmem:[%s1689_s1 + $0x190] sm:$0xff]   ;;  %v1373_v51 = vld [vmem:[%s1689_s1 + $0x198] sm:$0xff]  }
  0x16   : > { %1222 = vmatprep.subr.bf16.mxu1 %v1338_v18  ;;  %v1365_v43 = vld [vmem:[%s1689_s1 + $0x188] sm:$0xff]   ;;  %v1374_v52 = vld [vmem:[%s1689_s1 + $0x160] sm:$0xff]   ;;  %v1382_v60 = vld [vmem:[%s1689_s1 + $0x170] sm:$0xff]  }
  0x17   : > { %1201 = vmatpush3.bf16.msra.mxu0 %v1337_v17  ;;  %v1375_v53 = vld [vmem:[%s1689_s1 + $0x120] sm:$0xff]   ;;  %v1378_v56 = vld [vmem:[%s1689_s1 + $0x168] sm:$0xff]   ;;  %v1383_v61 = vld [vmem:[%s1689_s1 + $0x130] sm:$0xff]  }
  0x18   : > { %1202 = vmatprep.subr.bf16.mxu0 %v1340_v20  ;;  %v1376_v54 = vld [vmem:[%s1689_s1 + $0x1e0] sm:$0xff]   ;;  %v1379_v57 = vld [vmem:[%s1689_s1 + $0x128] sm:$0xff]   ;;  %v1384_v62 = vld [vmem:[%s1689_s1 + $0x1f0] sm:$0xff]  }
  0x19   : > { %1223 = vmatpush3.bf16.msra.mxu1 %v1339_v19  ;;  %v1377_v55 = vld [vmem:[%s1689_s1 + $0x1a0] sm:$0xff]   ;;  %v1380_v58 = vld [vmem:[%s1689_s1 + $0x1e8] sm:$0xff]   ;;  %v1385_v63 = vld [vmem:[%s1689_s1 + $0x1b0] sm:$0xff]  }
  0x1a   : > { %1224 = vmatprep.subr.bf16.mxu1 %v1342_v22  ;;  %v1381_v59 = vld [vmem:[%s1689_s1 + $0x1a8] sm:$0xff]   ;;  %v1386_v0 = vld [vmem:[%s1689_s1 + $0x178] sm:$0xff]   ;;  %v1389_v3 = vld [vmem:[%s1538_s13 + $0x10] ss:$36 sps:$4 sm:$0xff]  }
  0x1b   : > { %1203 = vmatpush3.bf16.msra.mxu0 %v1341_v21  ;;  %v1387_v1 = vld [vmem:[%s1689_s1 + $0x138] sm:$0xff]   ;;  %v1396_v9 = vld [vmem:[%s1689_s1 + $0x200] sm:$0xff]   ;;  %v1397_v10 = vld [vmem:[%s1689_s1 + $0x208] sm:$0xff]  }
  0x1c   : > { %1204 = vmatprep.subr.bf16.mxu0 %v1344_v24  ;;  %v1388_v2 = vld [vmem:[%s1689_s1 + $0x1f8] sm:$0xff]   ;;  %v1398_v11 = vld [vmem:[%s1689_s1 + $0x210] sm:$0xff]   ;;  %v1400_v13 = vld [vmem:[%s1689_s1 + $0x220] sm:$0xff]  }
  0x1d   : > { %1225 = vmatpush3.bf16.msra.mxu1 %v1343_v23  ;;  %v1391_v4 = vld [vmem:[%s1538_s13 + $0x14] ss:$36 sps:$4 sm:$0xff]   ;;  %v1395_v8 = vld [vmem:[%s1538_s13 + $0x1c] ss:$36 sps:$4 sm:$0xff]   ;;  %v1401_v14 = vld [vmem:[%s1689_s1 + $0x228] sm:$0xff]  }
  0x1e   : > { %1226 = vmatprep.subr.bf16.mxu1 %v1346_v26  ;;  %v1392_v5 = vld [vmem:[%s1689_s1 + $0x1b8] sm:$0xff]   ;;  %v1402_v15 = vld [vmem:[%s1689_s1 + $0x230] sm:$0xff]   ;;  %v1404_v17 = vld [vmem:[%s1538_s13 + $0x20] ss:$36 sps:$4 sm:$0xff]  }
  0x1f   : > { %1205 = vmatpush3.bf16.msra.mxu0 %v1345_v25  ;;  %v1393_v7 = vld [vmem:[%s1538_s13 + $0x18] ss:$36 sps:$4 sm:$0xff]   ;;  %v1099_v19 = vld [vmem:[%s1690_s2] ss:$0 sm:$0xff]  ;;  %s1098_s13 = sshll.u32 %s1693_s17, 2 }
  0x20   : > { %1206 = vmatprep.subr.bf16.mxu0 %v1348_v28  ;;  %v1399_v12 = vld [vmem:[%s1689_s1 + $0x218] sm:$0xff]   ;;  %s175_s20 = scalar_lea.vmem %s1691_s3, %s1098_s13 }
  0x21   : > { %1227 = vmatpush3.bf16.msra.mxu1 %v1347_v27  ;;  %v1403_v16 = vld [vmem:[%s1689_s1 + $0x238] sm:$0xff]  }
  0x22   : > { %1228 = vmatprep.subr.bf16.mxu1 %v1350_v30 }
  0x23   : > { %1207 = vmatpush3.bf16.msra.mxu0 %v1349_v29 }
  0x24   : > { %1236 = vmatprep.subr.bf16.mxu0 %v1355_v34 }
  0x25   : > { %1229 = vmatpush3.bf16.msra.mxu1 %v1354_v33 }
  0x26   : > { %850 = vmatmul.mubr.bf16.vlgmr.msra.gmra.mrb[0].mxu0 %v1351_v31  ;;  %1258 = vmatprep.subr.bf16.mxu1 %v1360_v38 }
  0x27   : > { %1237 = vmatpush3.bf16.msra.mxu0 %v1359_v37  ;;  %931 = vmatprep.mubr.bf16.mxu0 %v1391_v4 }
  0x28   : > { %891 = vmatmul.mubr.bf16.vlgmr.msra.gmra.mrb[0].mxu1 %v1356_v35  ;;  %1238 = vmatprep.subr.bf16.mxu0 %v1362_v40 }
  0x29   : > { %1259 = vmatpush3.bf16.msra.mxu1 %v1361_v39  ;;  %972 = vmatprep.mubr.bf16.mxu1 %v1395_v8 }
  0x2a   : > { %1260 = vmatprep.subr.bf16.mxu1 %v1364_v42 }
  0x2b   : > { %1239 = vmatpush3.bf16.msra.mxu0 %v1363_v41 }
  0x2c   : > { %1240 = vmatprep.subr.bf16.mxu0 %v1366_v44 }
  0x2d   : > { %1261 = vmatpush3.bf16.msra.mxu1 %v1365_v43 }
  0x2e   : > { %1262 = vmatprep.subr.bf16.mxu1 %v1368_v46 }
  0x2f   : > { %1241 = vmatpush3.bf16.msra.mxu0 %v1367_v45 }
  0x30   : > { %1242 = vmatprep.subr.bf16.mxu0 %v1370_v48 }
  0x31   : > { %1263 = vmatpush3.bf16.msra.mxu1 %v1369_v47 }
  0x32   : > { %1264 = vmatprep.subr.bf16.mxu1 %v1372_v50 }
  0x33   : > { %1243 = vmatpush3.bf16.msra.mxu0 %v1371_v49 }
  0x34   : > { %1244 = vmatprep.subr.bf16.mxu0 %v1374_v52 }
  0x35   : > { %1265 = vmatpush3.bf16.msra.mxu1 %v1373_v51 }
  0x36   : > { %1266 = vmatprep.subr.bf16.mxu1 %v1376_v54 }
  0x37   : > { %1245 = vmatpush3.bf16.msra.mxu0 %v1375_v53 }
  0x38   : > { %1246 = vmatprep.subr.bf16.mxu0 %v1378_v56 }
  0x39   : > { %1267 = vmatpush3.bf16.msra.mxu1 %v1377_v55 }
  0x3a   : > { %1268 = vmatprep.subr.bf16.mxu1 %v1380_v58 }
  0x3b   : > { %1247 = vmatpush3.bf16.msra.mxu0 %v1379_v57 }
  0x3c   : > { %1248 = vmatprep.subr.bf16.mxu0 %v1382_v60 }
  0x3d   : > { %1269 = vmatpush3.bf16.msra.mxu1 %v1381_v59 }
  0x3e   : > { %1270 = vmatprep.subr.bf16.mxu1 %v1384_v62 }
  0x3f   : > { %1249 = vmatpush3.bf16.msra.mxu0 %v1383_v61 }
  0x40   : > { %1250 = vmatprep.subr.bf16.mxu0 %v1386_v0 }
  0x41   : > { %1271 = vmatpush3.bf16.msra.mxu1 %v1385_v63 }
  0x42   : > { %1272 = vmatprep.subr.bf16.mxu1 %v1388_v2 }
  0x43   : > { %1251 = vmatpush3.bf16.msra.mxu0 %v1387_v1 }
  0x44   : > { %1289 = vmatprep.subr.bf16.mxu0 %v1413_v6 }
  0x45   : > { %1273 = vmatpush3.bf16.msra.mxu1 %v1392_v5 }
  0x46   : > { %932 = vmatmul.mubr.bf16.vlgmr.msra.gmra.mrb[4].mxu0 %v1389_v3 }
  0x47   : > { %1305 = vmatprep.mubr.msk.bf16.mxu0 %vm1414_vm0, %v1413_v6  ;;  %1290 = vmatpush3.bf16.msra.mxu0 %v1396_v9 }
  0x48   : > { %973 = vmatmul.mubr.bf16.vlgmr.msra.gmra.mrb[4].mxu1 %v1393_v7  ;;  %1291 = vmatprep.subr.bf16.mxu0 %v1413_v6 }
  0x4b   : > { %1292 = vmatpush3.bf16.msra.mxu0 %v1397_v10 }
  0x4c   : > { %1293 = vmatprep.subr.bf16.mxu0 %v1413_v6 }
  0x4f   : > { %1294 = vmatpush3.bf16.msra.mxu0 %v1398_v11 }
  0x50   : > { %1295 = vmatprep.subr.bf16.mxu0 %v1413_v6 }
  0x53   : > { %1296 = vmatpush3.bf16.msra.mxu0 %v1399_v12 }
  0x54   : > { %1297 = vmatprep.subr.bf16.mxu0 %v1413_v6 }
  0x57   : > { %1298 = vmatpush3.bf16.msra.mxu0 %v1400_v13 }
  0x58   : > { %1299 = vmatprep.subr.bf16.mxu0 %v1413_v6 }
  0x5b   : > { %1300 = vmatpush3.bf16.msra.mxu0 %v1401_v14 }
  0x5c   : > { %1301 = vmatprep.subr.bf16.mxu0 %v1413_v6 }
  0x5f   : > { %1302 = vmatpush3.bf16.msra.mxu0 %v1402_v15 }
  0x60   : > { %1303 = vmatprep.subr.bf16.mxu0 %v1413_v6 }
  0x63   : > { %1304 = vmatpush3.bf16.msra.mxu0 %v1403_v16 }
  0x66   : > { %1306 = vmatmul.mubr.bf16.vlgmr.msra.gmra.mrb[8].mxu0 %v1404_v17 }
  0xf9   : > { %v1208_v18 = vpop.f32.mrb[0].mxu0 }
  0xfa   : > { %v1209_v20 = vpop.f32.mrb[1].mxu0 }
  0xfb   : > { %v1210_v21 = vadd.f32 %v1209_v20, %v1208_v18  ;;  %v1211_v22 = vpop.f32.mrb[2].mxu0  ;;  %v1230_v23 = vpop.f32.mrb[0].mxu1 }
  0xfc   : > { %v1212_v24 = vpop.f32.mrb[3].mxu0  ;;  %v1231_v27 = vpop.f32.mrb[1].mxu1 }
  0xfd   : > { %v852_v25 = vadd.f32 %v1210_v21, %v1099_v19  ;;  %v1213_v26 = vadd.f32 %v1212_v24, %v1211_v22  ;;  %v1232_v28 = vadd.f32 %v1231_v27, %v1230_v23  ;;  %v1233_v29 = vpop.f32.mrb[2].mxu1 }
  0xfe   : > { %v1234_v31 = vpop.f32.mrb[3].mxu1 }
  0xff   : > { %v855_v30 = vadd.f32 %v1213_v26, %v1099_v19  ;;  %v893_v32 = vadd.f32 %v1232_v28, %v852_v25  ;;  %v1235_v33 = vadd.f32 %v1234_v31, %v1233_v29 }
 0x101   : > { %v896_v34 = vadd.f32 %v1235_v33, %v855_v30 }
 0x119   : > { %v1252_v35 = vpop.f32.mrb[4].mxu0 }
 0x11a   : > { %v1253_v36 = vpop.f32.mrb[5].mxu0 }
 0x11b   : > { %v1254_v37 = vadd.f32 %v1253_v36, %v1252_v35  ;;  %v1255_v38 = vpop.f32.mrb[6].mxu0  ;;  %v1274_v39 = vpop.f32.mrb[4].mxu1 }
 0x11c   : > { %v1256_v40 = vpop.f32.mrb[7].mxu0  ;;  %v1275_v43 = vpop.f32.mrb[5].mxu1 }
 0x11d   : > { %v934_v41 = vadd.f32 %v1254_v37, %v893_v32  ;;  %v1257_v42 = vadd.f32 %v1256_v40, %v1255_v38  ;;  %v1276_v44 = vadd.f32 %v1275_v43, %v1274_v39  ;;  %v1277_v45 = vpop.f32.mrb[6].mxu1 }
 0x11e   : > { %v1278_v47 = vpop.f32.mrb[7].mxu1 }
 0x11f   : > { %v937_v46 = vadd.f32 %v1257_v42, %v896_v34  ;;  %v1279_v48 = vadd.f32 %v1278_v47, %v1277_v45  ;;  %v975_v49 = vadd.f32 %v1276_v44, %v934_v41 }
 0x121   : > { %v978_v50 = vadd.f32 %v1279_v48, %v937_v46 }
 0x139   : > { %v1015_v51 = vpop.f32.mrb[8].mxu0 }
 0x13a   : > { %v1016_v52 = vadd.f32 %v1015_v51, %v975_v49  ;;  %v1307_v53 = vpop.f32.mrb[9].mxu0 }
 0x13b   : > { %v1018_v54 = vpop.f32.mrb[10].mxu0 }
 0x13c   : > { %v1019_v55 = vadd.f32 %v1018_v54, %v978_v50  ;;  %v1308_v56 = vpop.f32.mrb[11].mxu0  ;;  %v1022_v57 = vmax.f32 %v1016_v52, 0.0 }
 0x13e   : > { %v1023_v58 = vmax.f32 %v1019_v55, 0.0 }
 0x140   : > { %v1190_v59 = vpack.c.bf16 %v1023_v58, %v1022_v57 }
 0x142   : > { %1191 = vst [vmem:[%s175_s20] sm:$0xff] %v1190_v59  }
 0x143 PF: > { %s13_s12 = sadd.s32 1, %s1411_s12  }
 0x144   : > { %p10_p4 = scmp.ge.s32.totalorder %s13_s12, 4  }
 0x146   :  { %12 = sbr.rel (!%p10_p4) target bundleno = 1 (0x1), region = 62 }

// kernel: encoder_forward.62
= control target key start
LH: loop header
LB: loop body
LE: loop exit
PB: predicated region body
PF: predicated region fallthrough
CT: control target
= control target key end

     0   :  { %s792_s12 = smov 0   ;;  %s914_s0 = inlined_call_operand.vmem [shape: bf16[32,512], index: 0, kind: input, shape index: {}]   ;;  %s915_s1 = inlined_call_operand.vmem [shape: bf16[512,128], index: 1, kind: input, shape index: {}]   ;;  %s916_s2 = inlined_call_operand.vmem [shape: f32[1,128], index: 2, kind: input, shape index: {}]   ;;  %s917_s3 = inlined_call_operand.vmem [shape: bf16[32,128], index: 3, kind: output, shape index: {}]  }
   0x1 LB: > { %s615_s13 = sadd.s32 4294967295, %s770_s12   ;;  %p619_p0 = scmp.ge.s32.totalorder %s770_s12, 1  ;;  %s770_s12 = sphi %s792_s12, %s13_s12  }
   0x2   : > { %p139_p1 = scmp.lt.s32.totalorder %s770_s12, 3 }
   0x4   : > { %p140_p2 = pnand %p619_p0, %p139_p1 }
   0x5   : > { %v726_v0 = vld [vmem:[%s915_s1 + $0x40] sm:$0xff] (!%p140_p2)   ;;  %v730_v4 = vld [vmem:[%s915_s1 + $0x48] sm:$0xff] (!%p140_p2)   ;;  %v734_v8 = vld [vmem:[%s915_s1 + $0x50] sm:$0xff] (!%p140_p2)   ;;  %s620_s21 = sshll.u32 (!%p140_p2), %s615_s13, 1 }
   0x6   : > { %143 = sbr.rel (%p140_p2) target bundleno = 265 (0x109), region = 32  ;;  %v727_v1 = vld [vmem:[%s915_s1 + $0xc0] sm:$0xff] (!%p140_p2)   ;;  %674 = vmatprep.subr.bf16.mxu0 (!%p140_p2), %v726_v0  ;;  %v731_v5 = vld [vmem:[%s915_s1 + $0xc8] sm:$0xff] (!%p140_p2)   ;;  %v735_v9 = vld [vmem:[%s915_s1 + $0xd0] sm:$0xff] (!%p140_p2)   ;;  %p165_p3 = scmp.lt.s32.totalorder (!%p140_p2), %s620_s21, 3 }
   0x7   : > { %v728_v2 = vld [vmem:[%s915_s1] sm:$0xff] (!%p140_p2)   ;;  %696 = vmatprep.subr.bf16.mxu1 (!%p140_p2), %v727_v1  ;;  %v732_v6 = vld [vmem:[%s915_s1 + $0x8] sm:$0xff] (!%p140_p2)   ;;  %v736_v10 = vld [vmem:[%s915_s1 + $0x10] sm:$0xff] (!%p140_p2)  }
   0x8   : > { %v729_v3 = vld [vmem:[%s915_s1 + $0x80] sm:$0xff] (!%p140_p2)   ;;  %675 = vmatpush3.bf16.msra.mxu0 (!%p140_p2), %v728_v2  ;;  %v733_v7 = vld [vmem:[%s915_s1 + $0x88] sm:$0xff] (!%p140_p2)   ;;  %v737_v11 = vld [vmem:[%s915_s1 + $0x90] sm:$0xff] (!%p140_p2)  }
   0x9   : > { %697 = vmatpush3.bf16.msra.mxu1 (!%p140_p2), %v729_v3  ;;  %676 = vmatprep.subr.bf16.mxu0 (!%p140_p2), %v730_v4  ;;  %v738_v12 = vld [vmem:[%s915_s1 + $0x58] sm:$0xff] (!%p140_p2)   ;;  %v742_v16 = vld [vmem:[%s915_s1 + $0x60] sm:$0xff] (!%p140_p2)   ;;  %v746_v20 = vld [vmem:[%s915_s1 + $0x68] sm:$0xff] (!%p140_p2)  }
   0xa   : > { %698 = vmatprep.subr.bf16.mxu1 (!%p140_p2), %v731_v5  ;;  %v739_v13 = vld [vmem:[%s915_s1 + $0xd8] sm:$0xff] (!%p140_p2)   ;;  %v743_v17 = vld [vmem:[%s915_s1 + $0xe0] sm:$0xff] (!%p140_p2)   ;;  %v747_v21 = vld [vmem:[%s915_s1 + $0xe8] sm:$0xff] (!%p140_p2)  }
   0xb   : > { %v740_v14 = vld [vmem:[%s915_s1 + $0x18] sm:$0xff] (!%p140_p2)   ;;  %v744_v18 = vld [vmem:[%s915_s1 + $0x20] sm:$0xff] (!%p140_p2)   ;;  %v748_v22 = vld [vmem:[%s915_s1 + $0x28] sm:$0xff] (!%p140_p2)  }
   0xc   : > { %677 = vmatpush3.bf16.msra.mxu0 (!%p140_p2), %v732_v6  ;;  %v741_v15 = vld [vmem:[%s915_s1 + $0x98] sm:$0xff] (!%p140_p2)   ;;  %v745_v19 = vld [vmem:[%s915_s1 + $0xa0] sm:$0xff] (!%p140_p2)   ;;  %v749_v23 = vld [vmem:[%s915_s1 + $0xa8] sm:$0xff] (!%p140_p2)  }
   0xd   : > { %699 = vmatpush3.bf16.msra.mxu1 %v733_v7  ;;  %678 = vmatprep.subr.bf16.mxu0 %v734_v8  ;;  %s919_s21 = smov (!%p165_p3, %s620_s21), 3  ;;  %v750_v24 = vld [vmem:[%s915_s1 + $0x70] sm:$0xff]   ;;  %v754_v28 = vld [vmem:[%s915_s1 + $0x78] sm:$0xff]   ;;  %v625_v38 = vld [vmem:[%s916_s2] ss:$0 sm:$0xff] }
   0xe   : > { %700 = vmatprep.subr.bf16.mxu1 %v735_v9  ;;  %v751_v25 = vld [vmem:[%s915_s1 + $0xf0] sm:$0xff]   ;;  %s666_s18 = sshll.u32 %s919_s21, 4  ;;  %v755_v29 = vld [vmem:[%s915_s1 + $0xf8] sm:$0xff]   ;;  %s624_s7 = sshll.u32 %s919_s21, 2 }
   0xf   : > { %v752_v26 = vld [vmem:[%s915_s1 + $0x30] sm:$0xff]   ;;  %s169_s28 = scalar_lea.vmem %s914_s0, %s666_s18  ;;  %v756_v30 = vld [vmem:[%s915_s1 + $0x38] sm:$0xff]   ;;  %s175_s10 = scalar_lea.vmem %s917_s3, %s624_s7 }
  0x10   : > { %679 = vmatpush3.bf16.msra.mxu0 %v736_v10  ;;  %v753_v27 = vld [vmem:[%s915_s1 + $0xb0] sm:$0xff]   ;;  %v757_v31 = vld [vmem:[%s915_s1 + $0xb8] sm:$0xff]  }
  0x11   : > { %701 = vmatpush3.bf16.msra.mxu1 %v737_v11  ;;  %680 = vmatprep.subr.bf16.mxu0 %v738_v12  ;;  %v758_v32 = vld [vmem:[%s169_s28] ss:$16 sps:$4 sm:$0xff]   ;;  %v760_v33 = vld [vmem:[%s169_s28 + $0x4] ss:$16 sps:$4 sm:$0xff]   ;;  %v761_v34 = vld [vmem:[%s169_s28 + $0x8] ss:$16 sps:$4 sm:$0xff]  }
  0x12   : > { %702 = vmatprep.subr.bf16.mxu1 %v739_v13  ;;  %v763_v35 = vld [vmem:[%s169_s28 + $0xc] ss:$16 sps:$4 sm:$0xff]   ;;  %497 = vmatprep.mubr.bf16.mxu0 %v760_v33 }
  0x13   : > { %538 = vmatprep.mubr.bf16.mxu1 %v763_v35 }
  0x14   : > { %681 = vmatpush3.bf16.msra.mxu0 %v740_v14 }
  0x15   : > { %703 = vmatpush3.bf16.msra.mxu1 %v741_v15  ;;  %682 = vmatprep.subr.bf16.mxu0 %v742_v16 }
  0x16   : > { %704 = vmatprep.subr.bf16.mxu1 %v743_v17 }
  0x18   : > { %683 = vmatpush3.bf16.msra.mxu0 %v744_v18 }
  0x19   : > { %705 = vmatpush3.bf16.msra.mxu1 %v745_v19  ;;  %684 = vmatprep.subr.bf16.mxu0 %v746_v20 }
  0x1a   : > { %706 = vmatprep.subr.bf16.mxu1 %v747_v21 }
  0x1c   : > { %685 = vmatpush3.bf16.msra.mxu0 %v748_v22 }
  0x1d   : > { %707 = vmatpush3.bf16.msra.mxu1 %v749_v23  ;;  %686 = vmatprep.subr.bf16.mxu0 %v750_v24 }
  0x1e   : > { %708 = vmatprep.subr.bf16.mxu1 %v751_v25 }
  0x20   : > { %687 = vmatpush3.bf16.msra.mxu0 %v752_v26 }
  0x21   : > { %709 = vmatpush3.bf16.msra.mxu1 %v753_v27  ;;  %688 = vmatprep.subr.bf16.mxu0 %v754_v28 }
  0x22   : > { %710 = vmatprep.subr.bf16.mxu1 %v755_v29 }
  0x24   : > { %689 = vmatpush3.bf16.msra.mxu0 %v756_v30 }
  0x25   : > { %711 = vmatpush3.bf16.msra.mxu1 %v757_v31 }
  0x27   : > { %498 = vmatmul.mubr.bf16.vlgmr.msra.gmra.mrb[0].mxu0 %v758_v32 }
  0x28   : > { %539 = vmatmul.mubr.bf16.vlgmr.msra.gmra.mrb[0].mxu1 %v761_v34 }
  0xfa   : > { %v690_v36 = vpop.f32.mrb[0].mxu0 }
  0xfb   : > { %v712_v37 = vpop.f32.mrb[0].mxu1  ;;  %v691_v39 = vpop.f32.mrb[1].mxu0 }
  0xfc   : > { %v692_v40 = vadd.f32 %v691_v39, %v690_v36  ;;  %v713_v41 = vpop.f32.mrb[1].mxu1  ;;  %v693_v42 = vpop.f32.mrb[2].mxu0 }
  0xfd   : > { %v714_v43 = vadd.f32 %v713_v41, %v712_v37  ;;  %v715_v44 = vpop.f32.mrb[2].mxu1  ;;  %v694_v45 = vpop.f32.mrb[3].mxu0 }
  0xfe   : > { %v500_v46 = vadd.f32 %v692_v40, %v625_v38  ;;  %v695_v47 = vadd.f32 %v694_v45, %v693_v42  ;;  %v716_v48 = vpop.f32.mrb[3].mxu1 }
  0xff   : > { %v717_v49 = vadd.f32 %v716_v48, %v715_v44 }
 0x100   : > { %v541_v50 = vadd.f32 %v714_v43, %v500_v46  ;;  %v503_v51 = vadd.f32 %v695_v47, %v625_v38 }
 0x102   : > { %v544_v52 = vadd.f32 %v717_v49, %v503_v51  ;;  %v547_v53 = vmax.f32 %v541_v50, 0.0 }
 0x104   : > { %v548_v54 = vmax.f32 %v544_v52, 0.0 }
 0x106   : > { %v672_v55 = vpack.c.bf16 %v548_v54, %v547_v53 }
 0x108   : > { %673 = vst [vmem:[%s175_s10] sm:$0xff] %v672_v55  }
 0x109 PF: > { %s13_s12 = sadd.s32 1, %s770_s12  }
 0x10a   : > { %p10_p4 = scmp.ge.s32.totalorder %s13_s12, 4  }
 0x10c   :  { %12 = sbr.rel (!%p10_p4) target bundleno = 1 (0x1), region = 62 }

// kernel: encoder_forward.71
= control target key start
LH: loop header
LB: loop body
LE: loop exit
PB: predicated region body
PF: predicated region fallthrough
CT: control target
= control target key end

     0   :  { %s994_s12 = smov 0   ;;  %s1218_s0 = inlined_call_operand.vmem [shape: bf16[32,512], index: 0, kind: input, shape index: {}]   ;;  %s1219_s1 = inlined_call_operand.vmem [shape: bf16[512,256], index: 1, kind: input, shape index: {}]   ;;  %s1220_s2 = inlined_call_operand.vmem [shape: f32[1,256], index: 2, kind: input, shape index: {}]   ;;  %s1221_s3 = inlined_call_operand.vmem [shape: bf16[32,256], index: 3, kind: output, shape index: {}]  }
   0x1 LB: > { %s761_s13 = sadd.s32 4294967295, %s972_s12   ;;  %p765_p0 = scmp.ge.s32.totalorder %s972_s12, 1  ;;  %s972_s12 = sphi %s994_s12, %s13_s12  }
   0x2   : > { %p139_p1 = scmp.lt.s32.totalorder %s972_s12, 3 }
   0x4   : > { %p140_p2 = pnand %p765_p0, %p139_p1 }
   0x5   : > { %v864_v0 = vld [vmem:[%s1219_s1 + $0x4] ss:$8 sps:$4 sm:$0xff] (!%p140_p2)   ;;  %v868_v2 = vld [vmem:[%s1219_s1] ss:$8 sps:$4 sm:$0xff] (!%p140_p2)   ;;  %v870_v4 = vld [vmem:[%s1219_s1 + $0x14] ss:$8 sps:$4 sm:$0xff] (!%p140_p2)  }
   0x6   : > { %143 = sbr.rel (%p140_p2) target bundleno = 294 (0x126), region = 32  ;;  %v866_v1 = vld [vmem:[%s1219_s1 + $0x104] ss:$8 sps:$4 sm:$0xff] (!%p140_p2)   ;;  %599 = vmatprep.subr.bf16.mxu1 (!%p140_p2), %v864_v0  ;;  %v869_v3 = vld [vmem:[%s1219_s1 + $0x100] ss:$8 sps:$4 sm:$0xff] (!%p140_p2)   ;;  %s766_s24 = sshll.u32 (!%p140_p2), %s761_s13, 1 }
   0x7   : > { %642 = vmatprep.subr.bf16.mxu0 (!%p140_p2), %v866_v1  ;;  %600 = vmatpush1.bf16.msra.mxu1 (!%p140_p2), %v868_v2  ;;  %v872_v5 = vld [vmem:[%s1219_s1 + $0x114] ss:$8 sps:$4 sm:$0xff] (!%p140_p2)   ;;  %v874_v6 = vld [vmem:[%s1219_s1 + $0x10] ss:$8 sps:$4 sm:$0xff] (!%p140_p2)   ;;  %v876_v8 = vld [vmem:[%s1219_s1 + $0x24] ss:$8 sps:$4 sm:$0xff] (!%p140_p2)  }
   0x8   : > { %643 = vmatpush1.bf16.msra.mxu0 (!%p140_p2), %v869_v3  ;;  %601 = vmatprep.subr.bf16.mxu1 (!%p140_p2), %v870_v4  ;;  %v875_v7 = vld [vmem:[%s1219_s1 + $0x110] ss:$8 sps:$4 sm:$0xff] (!%p140_p2)   ;;  %v878_v9 = vld [vmem:[%s1219_s1 + $0x124] ss:$8 sps:$4 sm:$0xff] (!%p140_p2)   ;;  %v880_v10 = vld [vmem:[%s1219_s1 + $0x20] ss:$8 sps:$4 sm:$0xff] (!%p140_p2)   ;;  %v249_v4 = vlaneseq (!%p140_p2) }
   0x9   : > { %644 = vmatprep.subr.bf16.mxu0 (!%p140_p2), %v872_v5  ;;  %v881_v11 = vld [vmem:[%s1219_s1 + $0x120] ss:$8 sps:$4 sm:$0xff] (!%p140_p2)   ;;  %v882_v12 = vld [vmem:[%s1219_s1 + $0x34] ss:$8 sps:$4 sm:$0xff] (!%p140_p2)   ;;  %v886_v14 = vld [vmem:[%s1219_s1 + $0x30] ss:$8 sps:$4 sm:$0xff] (!%p140_p2)  }
   0xa   : > { %v884_v13 = vld [vmem:[%s1219_s1 + $0x134] ss:$8 sps:$4 sm:$0xff] (!%p140_p2)   ;;  %v887_v15 = vld [vmem:[%s1219_s1 + $0x130] ss:$8 sps:$4 sm:$0xff] (!%p140_p2)   ;;  %v888_v16 = vld [vmem:[%s1219_s1 + $0x44] ss:$8 sps:$4 sm:$0xff] (!%p140_p2)  }
   0xb   : > { %602 = vmatpush1.bf16.msra.mxu1 (!%p140_p2), %v874_v6  ;;  %v890_v17 = vld [vmem:[%s1219_s1 + $0x144] ss:$8 sps:$4 sm:$0xff] (!%p140_p2)   ;;  %v892_v18 = vld [vmem:[%s1219_s1 + $0x40] ss:$8 sps:$4 sm:$0xff] (!%p140_p2)   ;;  %v894_v20 = vld [vmem:[%s1219_s1 + $0x54] ss:$8 sps:$4 sm:$0xff] (!%p140_p2)  }
   0xc   : > { %645 = vmatpush1.bf16.msra.mxu0 (!%p140_p2), %v875_v7  ;;  %603 = vmatprep.subr.bf16.mxu1 (!%p140_p2), %v876_v8  ;;  %v893_v19 = vld [vmem:[%s1219_s1 + $0x140] ss:$8 sps:$4 sm:$0xff] (!%p140_p2)   ;;  %v896_v21 = vld [vmem:[%s1219_s1 + $0x154] ss:$8 sps:$4 sm:$0xff] (!%p140_p2)   ;;  %v898_v22 = vld [vmem:[%s1219_s1 + $0x50] ss:$8 sps:$4 sm:$0xff] (!%p140_p2)  }
   0xd   : > { %646 = vmatprep.subr.bf16.mxu0 %v878_v9  ;;  %v899_v23 = vld [vmem:[%s1219_s1 + $0x150] ss:$8 sps:$4 sm:$0xff]   ;;  %v900_v24 = vld [vmem:[%s1219_s1 + $0x64] ss:$8 sps:$4 sm:$0xff]   ;;  %v904_v26 = vld [vmem:[%s1219_s1 + $0x60] ss:$8 sps:$4 sm:$0xff]  }
   0xe   : > { %v902_v25 = vld [vmem:[%s1219_s1 + $0x164] ss:$8 sps:$4 sm:$0xff]   ;;  %v905_v27 = vld [vmem:[%s1219_s1 + $0x160] ss:$8 sps:$4 sm:$0xff]   ;;  %v906_v28 = vld [vmem:[%s1219_s1 + $0x74] ss:$8 sps:$4 sm:$0xff]  }
   0xf   : > { %604 = vmatpush1.bf16.msra.mxu1 %v880_v10  ;;  %v908_v29 = vld [vmem:[%s1219_s1 + $0x174] ss:$8 sps:$4 sm:$0xff]   ;;  %v910_v30 = vld [vmem:[%s1219_s1 + $0x70] ss:$8 sps:$4 sm:$0xff]   ;;  %v912_v32 = vld [vmem:[%s1219_s1 + $0x84] ss:$8 sps:$4 sm:$0xff]  }
  0x10   : > { %647 = vmatpush1.bf16.msra.mxu0 %v881_v11  ;;  %605 = vmatprep.subr.bf16.mxu1 %v882_v12  ;;  %v911_v31 = vld [vmem:[%s1219_s1 + $0x170] ss:$8 sps:$4 sm:$0xff]   ;;  %v914_v33 = vld [vmem:[%s1219_s1 + $0x184] ss:$8 sps:$4 sm:$0xff]   ;;  %p166_p3 = scmp.lt.s32.totalorder %s766_s24, 3  ;;  %v250_v5 = vshrl.u32 %v249_v4, 7 }
  0x11   : > { %648 = vmatprep.subr.bf16.mxu0 %v884_v13  ;;  %v916_v34 = vld [vmem:[%s1219_s1 + $0x80] ss:$8 sps:$4 sm:$0xff]   ;;  %v918_v36 = vld [vmem:[%s1219_s1 + $0x94] ss:$8 sps:$4 sm:$0xff]   ;;  %v922_v38 = vld [vmem:[%s1219_s1 + $0x90] ss:$8 sps:$4 sm:$0xff]  }
  0x12   : > { %v917_v35 = vld [vmem:[%s1219_s1 + $0x180] ss:$8 sps:$4 sm:$0xff]   ;;  %v920_v37 = vld [vmem:[%s1219_s1 + $0x194] ss:$8 sps:$4 sm:$0xff]   ;;  %s1223_s24 = smov (!%p166_p3, %s766_s24), 3  ;;  %v251_v6 = vsub.s32 0, %v250_v5 }
  0x13   : > { %606 = vmatpush1.bf16.msra.mxu1 %v886_v14  ;;  %v923_v39 = vld [vmem:[%s1219_s1 + $0x190] ss:$8 sps:$4 sm:$0xff]   ;;  %v924_v40 = vld [vmem:[%s1219_s1 + $0xa4] ss:$8 sps:$4 sm:$0xff]   ;;  %s844_s23 = sshll.u32 %s1223_s24, 4  ;;  %v255_v8 = vsub.s32 1, %v250_v5 }
  0x14   : > { %649 = vmatpush1.bf16.msra.mxu0 %v887_v15  ;;  %607 = vmatprep.subr.bf16.mxu1 %v888_v16  ;;  %v926_v41 = vld [vmem:[%s1219_s1 + $0x1a4] ss:$8 sps:$4 sm:$0xff]   ;;  %v928_v42 = vld [vmem:[%s1219_s1 + $0xa0] ss:$8 sps:$4 sm:$0xff]   ;;  %v930_v44 = vld [vmem:[%s1219_s1 + $0xb4] ss:$8 sps:$4 sm:$0xff]   ;;  %s1145_s13 = scalar_lea.vmem %s1218_s0, %s844_s23 }
  0x15   : > { %650 = vmatprep.subr.bf16.mxu0 %v890_v17  ;;  %v929_v43 = vld [vmem:[%s1219_s1 + $0x1a0] ss:$8 sps:$4 sm:$0xff]   ;;  %v932_v45 = vld [vmem:[%s1219_s1 + $0x1b4] ss:$8 sps:$4 sm:$0xff]   ;;  %v934_v46 = vld [vmem:[%s1219_s1 + $0xb0] ss:$8 sps:$4 sm:$0xff]  }
  0x16   : > { %v962_v47 = vld [vmem:[%s1145_s13 + $0x4] ss:$16 sps:$4 sm:$0xff]   ;;  %v935_v48 = vld [vmem:[%s1219_s1 + $0x1b0] ss:$8 sps:$4 sm:$0xff]   ;;  %v965_v51 = vld [vmem:[%s1145_s13 + $0xc] ss:$16 sps:$4 sm:$0xff]  }
  0x17   : > { %608 = vmatpush1.bf16.msra.mxu1 %v892_v18  ;;  %v936_v49 = vld [vmem:[%s1219_s1 + $0xc4] ss:$8 sps:$4 sm:$0xff]   ;;  %631 = vmatprep.mubr.bf16.mxu1 %v962_v47  ;;  %v940_v52 = vld [vmem:[%s1219_s1 + $0xc0] ss:$8 sps:$4 sm:$0xff]   ;;  %v942_v54 = vld [vmem:[%s1219_s1 + $0xd4] ss:$8 sps:$4 sm:$0xff]  }
  0x18   : > { %651 = vmatpush1.bf16.msra.mxu0 %v893_v19  ;;  %609 = vmatprep.subr.bf16.mxu1 %v894_v20  ;;  %v938_v50 = vld [vmem:[%s1219_s1 + $0x1c4] ss:$8 sps:$4 sm:$0xff]   ;;  %v941_v53 = vld [vmem:[%s1219_s1 + $0x1c0] ss:$8 sps:$4 sm:$0xff]   ;;  %v944_v55 = vld [vmem:[%s1219_s1 + $0x1d4] ss:$8 sps:$4 sm:$0xff]  }
  0x19   : > { %652 = vmatprep.subr.bf16.mxu0 %v896_v21  ;;  %674 = vmatprep.mubr.bf16.mxu0 %v965_v51  ;;  %v946_v56 = vld [vmem:[%s1219_s1 + $0xd0] ss:$8 sps:$4 sm:$0xff]   ;;  %v948_v58 = vld [vmem:[%s1219_s1 + $0xe4] ss:$8 sps:$4 sm:$0xff]   ;;  %v952_v60 = vld [vmem:[%s1219_s1 + $0xe0] ss:$8 sps:$4 sm:$0xff]  }
  0x1a   : > { %v947_v57 = vld [vmem:[%s1219_s1 + $0x1d0] ss:$8 sps:$4 sm:$0xff]   ;;  %v950_v59 = vld [vmem:[%s1219_s1 + $0x1e4] ss:$8 sps:$4 sm:$0xff]   ;;  %v953_v61 = vld [vmem:[%s1219_s1 + $0x1e0] ss:$8 sps:$4 sm:$0xff]  }
  0x1b   : > { %610 = vmatpush1.bf16.msra.mxu1 %v898_v22  ;;  %v954_v62 = vld [vmem:[%s1219_s1 + $0xf4] ss:$8 sps:$4 sm:$0xff]   ;;  %v958_v0 = vld [vmem:[%s1219_s1 + $0xf0] ss:$8 sps:$4 sm:$0xff]   ;;  %v247_v7 = vld [vmem:[%s1220_s2] sm:$0x3] }
  0x1c   : > { %653 = vmatpush1.bf16.msra.mxu0 %v899_v23  ;;  %611 = vmatprep.subr.bf16.mxu1 %v900_v24  ;;  %v956_v63 = vld [vmem:[%s1219_s1 + $0x1f4] ss:$8 sps:$4 sm:$0xff]   ;;  %v959_v1 = vld [vmem:[%s1219_s1 + $0x1f0] ss:$8 sps:$4 sm:$0xff]   ;;  %v252_v9 = vrot.slane %v247_v7, %v251_v6  ;;  %v256_v10 = vrot.slane %v247_v7, %v255_v8 }
  0x1d   : > { %654 = vmatprep.subr.bf16.mxu0 %v902_v25  ;;  %v960_v2 = vld [vmem:[%s1145_s13] ss:$16 sps:$4 sm:$0xff]   ;;  %v963_v3 = vld [vmem:[%s1145_s13 + $0x8] ss:$16 sps:$4 sm:$0xff]   ;;  %s845_s13 = sshll.u32 %s1223_s24, 3 }
  0x1e   : > { %s177_s27 = scalar_lea.vmem %s1221_s3, %s845_s13 }
  0x1f   : > { %612 = vmatpush1.bf16.msra.mxu1 %v904_v26 }
  0x20   : > { %655 = vmatpush1.bf16.msra.mxu0 %v905_v27  ;;  %613 = vmatprep.subr.bf16.mxu1 %v906_v28 }
  0x21   : > { %656 = vmatprep.subr.bf16.mxu0 %v908_v29 }
  0x23   : > { %614 = vmatpush1.bf16.msra.mxu1 %v910_v30 }
  0x24   : > { %657 = vmatpush1.bf16.msra.mxu0 %v911_v31  ;;  %615 = vmatprep.subr.bf16.mxu1 %v912_v32 }
  0x25   : > { %658 = vmatprep.subr.bf16.mxu0 %v914_v33 }
  0x27   : > { %616 = vmatpush1.bf16.msra.mxu1 %v916_v34 }
  0x28   : > { %659 = vmatpush1.bf16.msra.mxu0 %v917_v35  ;;  %617 = vmatprep.subr.bf16.mxu1 %v918_v36 }
  0x29   : > { %660 = vmatprep.subr.bf16.mxu0 %v920_v37 }
  0x2b   : > { %618 = vmatpush1.bf16.msra.mxu1 %v922_v38 }
  0x2c   : > { %661 = vmatpush1.bf16.msra.mxu0 %v923_v39  ;;  %619 = vmatprep.subr.bf16.mxu1 %v924_v40 }
  0x2d   : > { %662 = vmatprep.subr.bf16.mxu0 %v926_v41 }
  0x2f   : > { %620 = vmatpush1.bf16.msra.mxu1 %v928_v42 }
  0x30   : > { %663 = vmatpush1.bf16.msra.mxu0 %v929_v43  ;;  %621 = vmatprep.subr.bf16.mxu1 %v930_v44 }
  0x31   : > { %664 = vmatprep.subr.bf16.mxu0 %v932_v45 }
  0x33   : > { %622 = vmatpush1.bf16.msra.mxu1 %v934_v46 }
  0x34   : > { %665 = vmatpush1.bf16.msra.mxu0 %v935_v48  ;;  %623 = vmatprep.subr.bf16.mxu1 %v936_v49 }
  0x35   : > { %666 = vmatprep.subr.bf16.mxu0 %v938_v50 }
  0x37   : > { %624 = vmatpush1.bf16.msra.mxu1 %v940_v52 }
  0x38   : > { %667 = vmatpush1.bf16.msra.mxu0 %v941_v53  ;;  %625 = vmatprep.subr.bf16.mxu1 %v942_v54 }
  0x39   : > { %668 = vmatprep.subr.bf16.mxu0 %v944_v55 }
  0x3b   : > { %626 = vmatpush1.bf16.msra.mxu1 %v946_v56 }
  0x3c   : > { %669 = vmatpush1.bf16.msra.mxu0 %v947_v57  ;;  %627 = vmatprep.subr.bf16.mxu1 %v948_v58 }
  0x3d   : > { %670 = vmatprep.subr.bf16.mxu0 %v950_v59 }
  0x3f   : > { %628 = vmatpush1.bf16.msra.mxu1 %v952_v60 }
  0x40   : > { %671 = vmatpush1.bf16.msra.mxu0 %v953_v61  ;;  %629 = vmatprep.subr.bf16.mxu1 %v954_v62 }
  0x41   : > { %672 = vmatprep.subr.bf16.mxu0 %v956_v63 }
  0x43   : > { %630 = vmatpush1.bf16.msra.mxu1 %v958_v0 }
  0x44   : > { %673 = vmatpush1.bf16.msra.mxu0 %v959_v1 }
  0x46   : > { %632 = vmatmul.mubr.bf16.vlgmr.msra.gmra.mrb[0].mxu1 %v960_v2 }
  0x47   : > { %675 = vmatmul.mubr.bf16.vlgmr.msra.gmra.mrb[0].mxu0 %v963_v3 }
 0x119   : > { %v633_v11 = vpop.f32.mrb[0].mxu1 }
 0x11a   : > { %v676_v12 = vpop.f32.mrb[0].mxu0  ;;  %v634_v13 = vadd.f32 %v633_v11, %v252_v9  ;;  %v635_v14 = vpop.f32.mrb[1].mxu1 }
 0x11b   : > { %v678_v15 = vpop.f32.mrb[1].mxu0  ;;  %v636_v16 = vadd.f32 %v635_v14, %v256_v10  ;;  %v637_v17 = vpop.f32.mrb[2].mxu1 }
 0x11c   : > { %v680_v18 = vpop.f32.mrb[2].mxu0  ;;  %v677_v19 = vadd.f32 %v676_v12, %v634_v13  ;;  %v638_v20 = vadd.f32 %v637_v17, %v252_v9  ;;  %v639_v21 = vpop.f32.mrb[3].mxu1 }
 0x11d   : > { %v682_v22 = vpop.f32.mrb[3].mxu0  ;;  %v679_v23 = vadd.f32 %v678_v15, %v636_v16  ;;  %v640_v24 = vadd.f32 %v639_v21, %v256_v10 }
 0x11e   : > { %v685_v25 = vmax.f32 %v677_v19, 0.0  ;;  %v681_v26 = vadd.f32 %v680_v18, %v638_v20 }
 0x11f   : > { %v686_v27 = vmax.f32 %v679_v23, 0.0  ;;  %v683_v28 = vadd.f32 %v682_v22, %v640_v24 }
 0x120   : > { %v687_v29 = vmax.f32 %v681_v26, 0.0 }
 0x121   : > { %v846_v30 = vpack.c.bf16 %v686_v27, %v685_v25  ;;  %v688_v31 = vmax.f32 %v683_v28, 0.0 }
 0x123   : > { %701 = vst [vmem:[%s177_s27] sm:$0xff] %v846_v30  ;;  %v847_v32 = vpack.c.bf16 %v688_v31, %v687_v29 }
 0x125   : > { %702 = vst [vmem:[%s177_s27 + $0x8] sm:$0xff] %v847_v32 }
 0x126 PF: > { %s13_s12 = sadd.s32 1, %s972_s12  }
 0x127   : > { %p10_p4 = scmp.ge.s32.totalorder %s13_s12, 4  }
 0x129   :  { %12 = sbr.rel (!%p10_p4) target bundleno = 1 (0x1), region = 62 }

// kernel: encoder_forward.74
= control target key start
LH: loop header
LB: loop body
LE: loop exit
PB: predicated region body
PF: predicated region fallthrough
CT: control target
= control target key end

     0   :  { %s1616_s15 = smov 0   ;;  %s2089_s0 = inlined_call_operand.vmem [shape: bf16[32,256], index: 0, kind: input, shape index: {}]   ;;  %s2090_s1 = inlined_call_operand.vmem [shape: bf16[256,1024], index: 1, kind: input, shape index: {}]   ;;  %s2091_s2 = inlined_call_operand.vmem [shape: f32[1,1024], index: 2, kind: input, shape index: {}]   ;;  %s2092_s3 = inlined_call_operand.vmem [shape: bf16[32,1024], index: 3, kind: input, shape index: {}]   ;;  %s2093_s4 = inlined_call_operand.vmem [shape: bf16[32,1024], index: 4, kind: output, shape index: {}]  }
   0x1 LB: > { %s1407_s16 = sadd.s32 4294967295, %s1589_s15   ;;  %p1411_p0 = scmp.ge.s32.totalorder %s1589_s15, 1  ;;  %s1589_s15 = sphi %s1616_s15, %s14_s15  }
   0x2   : > { %p176_p1 = scmp.lt.s32.totalorder %s1589_s15, 3 }
   0x4   : > { %p177_p2 = pnand %p1411_p0, %p176_p1 }
   0x5   : > { %v233_v0 = vld [vmem:[%s2090_s1] sm:$0xff] (!%p177_p2)  ;;  %v234_v2 = vld [vmem:[%s2090_s1 + $0x8] sm:$0xff] (!%p177_p2)  ;;  %s1412_s17 = sshll.u32 (!%p177_p2), %s1407_s16, 1 }
   0x6   : > { %180 = sbr.rel (%p177_p2) target bundleno = 361 (0x169), region = 36  ;;  %v237_v1 = vld [vmem:[%s2090_s1 + $0x20] sm:$0xff] (!%p177_p2)  ;;  %v238_v4 = vld [vmem:[%s2090_s1 + $0x28] sm:$0xff] (!%p177_p2)  ;;  %p211_p3 = scmp.lt.s32.totalorder (!%p177_p2), %s1412_s17, 3 }
   0x7   : > { %v1424_v3 = vcombine.high (!%p177_p2), %v233_v0, %v237_v1  ;;  %v1423_v5 = vcombine.low (!%p177_p2), %v233_v0, %v237_v1  ;;  %v241_v6 = vld [vmem:[%s2090_s1 + $0x40] sm:$0xff] (!%p177_p2)  ;;  %v1426_v8 = vcombine.high (!%p177_p2), %v234_v2, %v238_v4  ;;  %v1425_v9 = vcombine.low (!%p177_p2), %v234_v2, %v238_v4  ;;  %v242_v11 = vld [vmem:[%s2090_s1 + $0x48] sm:$0xff] (!%p177_p2) }
   0x8   : > { %v245_v7 = vld [vmem:[%s2090_s1 + $0x60] sm:$0xff] (!%p177_p2)  ;;  %v246_v12 = vld [vmem:[%s2090_s1 + $0x68] sm:$0xff] (!%p177_p2) }
   0x9   : > { %v1432_v10 = vcombine.high (!%p177_p2), %v241_v6, %v245_v7  ;;  %v249_v13 = vld [vmem:[%s2090_s1 + $0x80] sm:$0xff] (!%p177_p2)  ;;  %1053 = vmatprep.subr.bf16.mxu0 (!%p177_p2), %v1424_v3  ;;  %v1434_v14 = vcombine.high (!%p177_p2), %v242_v11, %v246_v12  ;;  %v250_v16 = vld [vmem:[%s2090_s1 + $0x88] sm:$0xff] (!%p177_p2)  ;;  %1096 = vmatprep.subr.bf16.mxu1 (!%p177_p2), %v1426_v8  ;;  %v1431_v18 = vcombine.low (!%p177_p2), %v241_v6, %v245_v7 }
   0xa   : > { %v253_v15 = vld [vmem:[%s2090_s1 + $0xa0] sm:$0xff] (!%p177_p2)  ;;  %v254_v17 = vld [vmem:[%s2090_s1 + $0xa8] sm:$0xff] (!%p177_p2)  ;;  %1054 = vmatpush1.bf16.msra.mxu0 (!%p177_p2), %v1423_v5  ;;  %1097 = vmatpush1.bf16.msra.mxu1 (!%p177_p2), %v1425_v9  ;;  %v1433_v19 = vcombine.low (!%p177_p2), %v242_v11, %v246_v12 }
   0xb   : > { %1055 = vmatprep.subr.bf16.mxu0 (!%p177_p2), %v1432_v10  ;;  %v1440_v20 = vcombine.high (!%p177_p2), %v249_v13, %v253_v15  ;;  %1098 = vmatprep.subr.bf16.mxu1 (!%p177_p2), %v1434_v14  ;;  %v1442_v21 = vcombine.high (!%p177_p2), %v250_v16, %v254_v17  ;;  %v257_v22 = vld [vmem:[%s2090_s1 + $0xc0] sm:$0xff] (!%p177_p2)  ;;  %v258_v24 = vld [vmem:[%s2090_s1 + $0xc8] sm:$0xff] (!%p177_p2)  ;;  %v1439_v26 = vcombine.low (!%p177_p2), %v249_v13, %v253_v15 }
   0xc   : > { %v261_v23 = vld [vmem:[%s2090_s1 + $0xe0] sm:$0xff] (!%p177_p2)  ;;  %v262_v25 = vld [vmem:[%s2090_s1 + $0xe8] sm:$0xff] (!%p177_p2)  ;;  %v1441_v27 = vcombine.low (!%p177_p2), %v250_v16, %v254_v17 }
   0xd   : > { %v1448_v28 = vcombine.high %v257_v22, %v261_v23  ;;  %v1450_v29 = vcombine.high %v258_v24, %v262_v25  ;;  %v265_v30 = vld [vmem:[%s2090_s1 + $0x100] sm:$0xff]  ;;  %v266_v32 = vld [vmem:[%s2090_s1 + $0x108] sm:$0xff]  ;;  %v1447_v34 = vcombine.low %v257_v22, %v261_v23  ;;  %s2095_s17 = smov (!%p211_p3, %s1412_s17), 3  ;;  %v1449_v35 = vcombine.low %v258_v24, %v262_v25 }
   0xe   : > { %1056 = vmatpush1.bf16.msra.mxu0 %v1431_v18  ;;  %1099 = vmatpush1.bf16.msra.mxu1 %v1433_v19  ;;  %v269_v31 = vld [vmem:[%s2090_s1 + $0x120] sm:$0xff]  ;;  %v270_v33 = vld [vmem:[%s2090_s1 + $0x128] sm:$0xff]  ;;  %s1561_s18 = sshll.u32 %s2095_s17, 3  ;;  %s1562_s14 = sshll.u32 %s2095_s17, 5 }
   0xf   : > { %1057 = vmatprep.subr.bf16.mxu0 %v1440_v20  ;;  %1100 = vmatprep.subr.bf16.mxu1 %v1442_v21  ;;  %v1456_v36 = vcombine.high %v265_v30, %v269_v31  ;;  %v1458_v37 = vcombine.high %v266_v32, %v270_v33  ;;  %v273_v38 = vld [vmem:[%s2090_s1 + $0x140] sm:$0xff]  ;;  %v274_v40 = vld [vmem:[%s2090_s1 + $0x148] sm:$0xff]  ;;  %v1455_v42 = vcombine.low %v265_v30, %v269_v31  ;;  %s1716_s28 = scalar_lea.vmem %s2089_s0, %s1561_s18  ;;  %s2040_s20 = scalar_lea.vmem %s2092_s3, %s1562_s14 }
  0x10   : > { %v277_v39 = vld [vmem:[%s2090_s1 + $0x160] sm:$0xff]  ;;  %v278_v41 = vld [vmem:[%s2090_s1 + $0x168] sm:$0xff]  ;;  %v1457_v43 = vcombine.low %v266_v32, %v270_v33  ;;  %s2064_s25 = scalar_lea.vmem %s2093_s4, %s1562_s14 }
  0x11   : > { %v1464_v44 = vcombine.high %v273_v38, %v277_v39  ;;  %v1466_v45 = vcombine.high %v274_v40, %v278_v41  ;;  %v281_v46 = vld [vmem:[%s2090_s1 + $0x180] sm:$0xff]  ;;  %v282_v48 = vld [vmem:[%s2090_s1 + $0x188] sm:$0xff]  ;;  %v1463_v50 = vcombine.low %v273_v38, %v277_v39  ;;  %v1465_v51 = vcombine.low %v274_v40, %v278_v41 }
  0x12   : > { %1058 = vmatpush1.bf16.msra.mxu0 %v1439_v26  ;;  %1101 = vmatpush1.bf16.msra.mxu1 %v1441_v27  ;;  %v285_v47 = vld [vmem:[%s2090_s1 + $0x1a0] sm:$0xff]  ;;  %v286_v49 = vld [vmem:[%s2090_s1 + $0x1a8] sm:$0xff] }
  0x13   : > { %1059 = vmatprep.subr.bf16.mxu0 %v1448_v28  ;;  %1102 = vmatprep.subr.bf16.mxu1 %v1450_v29  ;;  %v1472_v52 = vcombine.high %v281_v46, %v285_v47  ;;  %v1474_v53 = vcombine.high %v282_v48, %v286_v49  ;;  %v289_v54 = vld [vmem:[%s2090_s1 + $0x1c0] sm:$0xff]  ;;  %v290_v57 = vld [vmem:[%s2090_s1 + $0x1c8] sm:$0xff]  ;;  %v1471_v59 = vcombine.low %v281_v46, %v285_v47 }
  0x14   : > { %v293_v55 = vld [vmem:[%s2090_s1 + $0x1e0] sm:$0xff]  ;;  %v294_v58 = vld [vmem:[%s2090_s1 + $0x1e8] sm:$0xff]  ;;  %v1473_v60 = vcombine.low %v282_v48, %v286_v49 }
  0x15   : > { %v1725_v56 = vld [vmem:[%s1716_s28 + $0x4] ss:$8 sps:$4 sm:$0xff]   ;;  %v1480_v61 = vcombine.high %v289_v54, %v293_v55  ;;  %v1482_v62 = vcombine.high %v290_v57, %v294_v58  ;;  %v1479_v3 = vcombine.low %v289_v54, %v293_v55  ;;  %v1481_v4 = vcombine.low %v290_v57, %v294_v58 }
  0x16   : > { %1060 = vmatpush1.bf16.msra.mxu0 %v1447_v34  ;;  %1103 = vmatpush1.bf16.msra.mxu1 %v1449_v35  ;;  %v297_v63 = vld [vmem:[%s2090_s1 + $0x200] sm:$0xff]  ;;  %v298_v1 = vld [vmem:[%s2090_s1 + $0x208] sm:$0xff] }
  0x17   : > { %1061 = vmatprep.subr.bf16.mxu0 %v1456_v36  ;;  %1104 = vmatprep.subr.bf16.mxu1 %v1458_v37  ;;  %v301_v0 = vld [vmem:[%s2090_s1 + $0x220] sm:$0xff]  ;;  %v302_v2 = vld [vmem:[%s2090_s1 + $0x228] sm:$0xff] }
  0x18   : > { %1085 = vmatprep.mubr.bf16.mxu0 %v1725_v56  ;;  %1128 = vmatprep.mubr.bf16.mxu1 %v1725_v56  ;;  %v1488_v5 = vcombine.high %v297_v63, %v301_v0  ;;  %v1490_v6 = vcombine.high %v298_v1, %v302_v2  ;;  %v305_v7 = vld [vmem:[%s2090_s1 + $0x240] sm:$0xff]  ;;  %v306_v9 = vld [vmem:[%s2090_s1 + $0x248] sm:$0xff]  ;;  %v1487_v11 = vcombine.low %v297_v63, %v301_v0  ;;  %v235_v0 = vld [vmem:[%s2090_s1 + $0x10] sm:$0xff] }
  0x19   : > { %v309_v8 = vld [vmem:[%s2090_s1 + $0x260] sm:$0xff]  ;;  %v310_v10 = vld [vmem:[%s2090_s1 + $0x268] sm:$0xff]  ;;  %v1489_v12 = vcombine.low %v298_v1, %v302_v2  ;;  %v239_v1 = vld [vmem:[%s2090_s1 + $0x30] sm:$0xff] }
  0x1a   : > { %1062 = vmatpush1.bf16.msra.mxu0 %v1455_v42  ;;  %1105 = vmatpush1.bf16.msra.mxu1 %v1457_v43  ;;  %v1496_v13 = vcombine.high %v305_v7, %v309_v8  ;;  %v1498_v14 = vcombine.high %v306_v9, %v310_v10  ;;  %v313_v15 = vld [vmem:[%s2090_s1 + $0x280] sm:$0xff]  ;;  %v314_v17 = vld [vmem:[%s2090_s1 + $0x288] sm:$0xff]  ;;  %v1495_v19 = vcombine.low %v305_v7, %v309_v8  ;;  %v236_v2 = vld [vmem:[%s2090_s1 + $0x18] sm:$0xff] }
  0x1b   : > { %1063 = vmatprep.subr.bf16.mxu0 %v1464_v44  ;;  %1106 = vmatprep.subr.bf16.mxu1 %v1466_v45  ;;  %v317_v16 = vld [vmem:[%s2090_s1 + $0x2a0] sm:$0xff]  ;;  %v318_v18 = vld [vmem:[%s2090_s1 + $0x2a8] sm:$0xff]  ;;  %v1497_v20 = vcombine.low %v306_v9, %v310_v10  ;;  %v243_v8 = vld [vmem:[%s2090_s1 + $0x50] sm:$0xff] }
  0x1c   : > { %v1504_v21 = vcombine.high %v313_v15, %v317_v16  ;;  %v1506_v22 = vcombine.high %v314_v17, %v318_v18  ;;  %v321_v23 = vld [vmem:[%s2090_s1 + $0x2c0] sm:$0xff]  ;;  %v322_v25 = vld [vmem:[%s2090_s1 + $0x2c8] sm:$0xff]  ;;  %v1503_v27 = vcombine.low %v313_v15, %v317_v16  ;;  %v1505_v28 = vcombine.low %v314_v17, %v318_v18  ;;  %v247_v9 = vld [vmem:[%s2090_s1 + $0x70] sm:$0xff] }
  0x1d   : > { %v325_v24 = vld [vmem:[%s2090_s1 + $0x2e0] sm:$0xff]  ;;  %v326_v26 = vld [vmem:[%s2090_s1 + $0x2e8] sm:$0xff]  ;;  %v1436_v15 = vcombine.high %v243_v8, %v247_v9  ;;  %v251_v17 = vld [vmem:[%s2090_s1 + $0x90] sm:$0xff] }
  0x1e   : > { %1064 = vmatpush1.bf16.msra.mxu0 %v1463_v50  ;;  %1107 = vmatpush1.bf16.msra.mxu1 %v1465_v51  ;;  %v1512_v29 = vcombine.high %v321_v23, %v325_v24  ;;  %v1514_v30 = vcombine.high %v322_v25, %v326_v26  ;;  %v329_v31 = vld [vmem:[%s2090_s1 + $0x300] sm:$0xff]  ;;  %v330_v33 = vld [vmem:[%s2090_s1 + $0x308] sm:$0xff]  ;;  %v1511_v35 = vcombine.low %v321_v23, %v325_v24  ;;  %v255_v18 = vld [vmem:[%s2090_s1 + $0xb0] sm:$0xff] }
  0x1f   : > { %1065 = vmatprep.subr.bf16.mxu0 %v1472_v52  ;;  %1108 = vmatprep.subr.bf16.mxu1 %v1474_v53  ;;  %v333_v32 = vld [vmem:[%s2090_s1 + $0x320] sm:$0xff]  ;;  %v334_v34 = vld [vmem:[%s2090_s1 + $0x328] sm:$0xff]  ;;  %v1513_v36 = vcombine.low %v322_v25, %v326_v26  ;;  %v1444_v23 = vcombine.high %v251_v17, %v255_v18  ;;  %v259_v25 = vld [vmem:[%s2090_s1 + $0xd0] sm:$0xff] }
  0x20   : > { %v1520_v37 = vcombine.high %v329_v31, %v333_v32  ;;  %v1522_v38 = vcombine.high %v330_v33, %v334_v34  ;;  %v337_v39 = vld [vmem:[%s2090_s1 + $0x340] sm:$0xff]  ;;  %v338_v41 = vld [vmem:[%s2090_s1 + $0x348] sm:$0xff]  ;;  %v1519_v43 = vcombine.low %v329_v31, %v333_v32  ;;  %v1521_v44 = vcombine.low %v330_v33, %v334_v34  ;;  %v263_v26 = vld [vmem:[%s2090_s1 + $0xf0] sm:$0xff] }
  0x21   : > { %v341_v40 = vld [vmem:[%s2090_s1 + $0x360] sm:$0xff]  ;;  %v342_v42 = vld [vmem:[%s2090_s1 + $0x368] sm:$0xff]  ;;  %v1452_v31 = vcombine.high %v259_v25, %v263_v26  ;;  %v267_v33 = vld [vmem:[%s2090_s1 + $0x110] sm:$0xff] }
  0x22   : > { %1066 = vmatpush1.bf16.msra.mxu0 %v1471_v59  ;;  %1109 = vmatpush1.bf16.msra.mxu1 %v1473_v60  ;;  %v1528_v45 = vcombine.high %v337_v39, %v341_v40  ;;  %v1530_v46 = vcombine.high %v338_v41, %v342_v42  ;;  %v345_v47 = vld [vmem:[%s2090_s1 + $0x380] sm:$0xff]  ;;  %v346_v49 = vld [vmem:[%s2090_s1 + $0x388] sm:$0xff]  ;;  %v1527_v51 = vcombine.low %v337_v39, %v341_v40  ;;  %v271_v34 = vld [vmem:[%s2090_s1 + $0x130] sm:$0xff] }
  0x23   : > { %1067 = vmatprep.subr.bf16.mxu0 %v1480_v61  ;;  %1110 = vmatprep.subr.bf16.mxu1 %v1482_v62  ;;  %v349_v48 = vld [vmem:[%s2090_s1 + $0x3a0] sm:$0xff]  ;;  %v350_v50 = vld [vmem:[%s2090_s1 + $0x3a8] sm:$0xff]  ;;  %v1529_v52 = vcombine.low %v338_v41, %v342_v42  ;;  %v275_v40 = vld [vmem:[%s2090_s1 + $0x150] sm:$0xff] }
  0x24   : > { %v1536_v53 = vcombine.high %v345_v47, %v349_v48  ;;  %v1538_v54 = vcombine.high %v346_v49, %v350_v50  ;;  %v353_v55 = vld [vmem:[%s2090_s1 + $0x3c0] sm:$0xff]  ;;  %v354_v58 = vld [vmem:[%s2090_s1 + $0x3c8] sm:$0xff]  ;;  %v1535_v60 = vcombine.low %v345_v47, %v349_v48  ;;  %v1537_v61 = vcombine.low %v346_v49, %v350_v50  ;;  %v279_v41 = vld [vmem:[%s2090_s1 + $0x170] sm:$0xff] }
  0x25   : > { %v357_v57 = vld [vmem:[%s2090_s1 + $0x3e0] sm:$0xff]  ;;  %v358_v59 = vld [vmem:[%s2090_s1 + $0x3e8] sm:$0xff]  ;;  %v276_v42 = vld [vmem:[%s2090_s1 + $0x158] sm:$0xff] }
  0x26   : > { %1068 = vmatpush1.bf16.msra.mxu0 %v1479_v3  ;;  %1111 = vmatpush1.bf16.msra.mxu1 %v1481_v4  ;;  %v1544_v62 = vcombine.high %v353_v55, %v357_v57  ;;  %v1546_v63 = vcombine.high %v354_v58, %v358_v59  ;;  %v240_v3 = vld [vmem:[%s2090_s1 + $0x38] sm:$0xff]  ;;  %v1543_v4 = vcombine.low %v353_v55, %v357_v57  ;;  %v1850_v10 = vld [vmem:[%s1716_s28] ss:$8 sps:$4 sm:$0xff]   ;;  %v283_v48 = vld [vmem:[%s2090_s1 + $0x190] sm:$0xff] }
  0x27   : > { %1069 = vmatprep.subr.bf16.mxu0 %v1488_v5  ;;  %1112 = vmatprep.subr.bf16.mxu1 %v1490_v6  ;;  %v1545_v5 = vcombine.low %v354_v58, %v358_v59  ;;  %v1428_v6 = vcombine.high %v235_v0, %v239_v1  ;;  %v1430_v7 = vcombine.high %v236_v2, %v240_v3  ;;  %v287_v49 = vld [vmem:[%s2090_s1 + $0x1b0] sm:$0xff]  ;;  %v284_v50 = vld [vmem:[%s2090_s1 + $0x198] sm:$0xff] }
  0x28   : > { %v291_v57 = vld [vmem:[%s2090_s1 + $0x1d0] sm:$0xff]  ;;  %v292_v59 = vld [vmem:[%s2090_s1 + $0x1d8] sm:$0xff] }
  0x29   : > { %v295_v58 = vld [vmem:[%s2090_s1 + $0x1f0] sm:$0xff] }
  0x2a   : > { %1070 = vmatpush1.bf16.msra.mxu0 %v1487_v11  ;;  %1113 = vmatpush1.bf16.msra.mxu1 %v1489_v12  ;;  %v244_v11 = vld [vmem:[%s2090_s1 + $0x58] sm:$0xff] }
  0x2b   : > { %1071 = vmatprep.subr.bf16.mxu0 %v1496_v13  ;;  %1114 = vmatprep.subr.bf16.mxu1 %v1498_v14  ;;  %v248_v12 = vld [vmem:[%s2090_s1 + $0x78] sm:$0xff]  ;;  %v1427_v13 = vcombine.low %v235_v0, %v239_v1  ;;  %v1429_v14 = vcombine.low %v236_v2, %v240_v3  ;;  %v299_v1 = vld [vmem:[%s2090_s1 + $0x210] sm:$0xff] }
  0x2c   : > { %v1438_v16 = vcombine.high %v244_v11, %v248_v12  ;;  %v303_v2 = vld [vmem:[%s2090_s1 + $0x230] sm:$0xff]  ;;  %v300_v3 = vld [vmem:[%s2090_s1 + $0x218] sm:$0xff] }
  0x2e   : > { %1072 = vmatpush1.bf16.msra.mxu0 %v1495_v19  ;;  %1115 = vmatpush1.bf16.msra.mxu1 %v1497_v20  ;;  %v252_v19 = vld [vmem:[%s2090_s1 + $0x98] sm:$0xff] }
  0x2f   : > { %1073 = vmatprep.subr.bf16.mxu0 %v1504_v21  ;;  %1116 = vmatprep.subr.bf16.mxu1 %v1506_v22  ;;  %v256_v20 = vld [vmem:[%s2090_s1 + $0xb8] sm:$0xff]  ;;  %v1435_v21 = vcombine.low %v243_v8, %v247_v9  ;;  %v1437_v22 = vcombine.low %v244_v11, %v248_v12  ;;  %v307_v9 = vld [vmem:[%s2090_s1 + $0x250] sm:$0xff] }
  0x30   : > { %v1446_v24 = vcombine.high %v252_v19, %v256_v20  ;;  %v311_v11 = vld [vmem:[%s2090_s1 + $0x270] sm:$0xff]  ;;  %v308_v12 = vld [vmem:[%s2090_s1 + $0x258] sm:$0xff] }
  0x32   : > { %1074 = vmatpush1.bf16.msra.mxu0 %v1503_v27  ;;  %1117 = vmatpush1.bf16.msra.mxu1 %v1505_v28  ;;  %v260_v27 = vld [vmem:[%s2090_s1 + $0xd8] sm:$0xff] }
  0x33   : > { %1075 = vmatprep.subr.bf16.mxu0 %v1512_v29  ;;  %1118 = vmatprep.subr.bf16.mxu1 %v1514_v30  ;;  %v264_v28 = vld [vmem:[%s2090_s1 + $0xf8] sm:$0xff]  ;;  %v1443_v29 = vcombine.low %v251_v17, %v255_v18  ;;  %v1445_v30 = vcombine.low %v252_v19, %v256_v20  ;;  %v315_v18 = vld [vmem:[%s2090_s1 + $0x290] sm:$0xff] }
  0x34   : > { %v1454_v32 = vcombine.high %v260_v27, %v264_v28  ;;  %v319_v19 = vld [vmem:[%s2090_s1 + $0x2b0] sm:$0xff]  ;;  %v316_v20 = vld [vmem:[%s2090_s1 + $0x298] sm:$0xff] }
  0x36   : > { %1076 = vmatpush1.bf16.msra.mxu0 %v1511_v35  ;;  %1119 = vmatpush1.bf16.msra.mxu1 %v1513_v36  ;;  %v272_v35 = vld [vmem:[%s2090_s1 + $0x138] sm:$0xff]  ;;  %v1451_v36 = vcombine.low %v259_v25, %v263_v26  ;;  %v323_v26 = vld [vmem:[%s2090_s1 + $0x2d0] sm:$0xff] }
  0x37   : > { %1077 = vmatprep.subr.bf16.mxu0 %v1520_v37  ;;  %1120 = vmatprep.subr.bf16.mxu1 %v1522_v38  ;;  %v1453_v37 = vcombine.low %v260_v27, %v264_v28  ;;  %v1460_v38 = vcombine.high %v267_v33, %v271_v34  ;;  %v327_v27 = vld [vmem:[%s2090_s1 + $0x2f0] sm:$0xff]  ;;  %v324_v28 = vld [vmem:[%s2090_s1 + $0x2d8] sm:$0xff] }
  0x3a   : > { %1078 = vmatpush1.bf16.msra.mxu0 %v1519_v43  ;;  %1121 = vmatpush1.bf16.msra.mxu1 %v1521_v44  ;;  %v280_v43 = vld [vmem:[%s2090_s1 + $0x178] sm:$0xff]  ;;  %v1459_v44 = vcombine.low %v267_v33, %v271_v34  ;;  %v331_v34 = vld [vmem:[%s2090_s1 + $0x310] sm:$0xff] }
  0x3b   : > { %1079 = vmatprep.subr.bf16.mxu0 %v1528_v45  ;;  %1122 = vmatprep.subr.bf16.mxu1 %v1530_v46  ;;  %v1468_v46 = vcombine.high %v275_v40, %v279_v41  ;;  %v1470_v47 = vcombine.high %v276_v42, %v280_v43 }
  0x3e   : > { %1080 = vmatpush1.bf16.msra.mxu0 %v1527_v51  ;;  %1123 = vmatpush1.bf16.msra.mxu1 %v1529_v52  ;;  %v288_v51 = vld [vmem:[%s2090_s1 + $0x1b8] sm:$0xff]  ;;  %v1467_v52 = vcombine.low %v275_v40, %v279_v41  ;;  %v339_v41 = vld [vmem:[%s2090_s1 + $0x350] sm:$0xff] }
  0x3f   : > { %1081 = vmatprep.subr.bf16.mxu0 %v1536_v53  ;;  %1124 = vmatprep.subr.bf16.mxu1 %v1538_v54  ;;  %v1469_v53 = vcombine.low %v276_v42, %v280_v43  ;;  %v1476_v54 = vcombine.high %v283_v48, %v287_v49  ;;  %v1478_v55 = vcombine.high %v284_v50, %v288_v51  ;;  %v343_v42 = vld [vmem:[%s2090_s1 + $0x370] sm:$0xff]  ;;  %v340_v43 = vld [vmem:[%s2090_s1 + $0x358] sm:$0xff] }
  0x42   : > { %1082 = vmatpush1.bf16.msra.mxu0 %v1535_v60  ;;  %1125 = vmatpush1.bf16.msra.mxu1 %v1537_v61  ;;  %v296_v60 = vld [vmem:[%s2090_s1 + $0x1f8] sm:$0xff]  ;;  %v1475_v61 = vcombine.low %v283_v48, %v287_v49  ;;  %v347_v49 = vld [vmem:[%s2090_s1 + $0x390] sm:$0xff] }
  0x43   : > { %1083 = vmatprep.subr.bf16.mxu0 %v1544_v62  ;;  %1126 = vmatprep.subr.bf16.mxu1 %v1546_v63  ;;  %v1477_v62 = vcombine.low %v284_v50, %v288_v51  ;;  %v1484_v63 = vcombine.high %v291_v57, %v295_v58  ;;  %v1486_v0 = vcombine.high %v292_v59, %v296_v60  ;;  %v351_v50 = vld [vmem:[%s2090_s1 + $0x3b0] sm:$0xff]  ;;  %v348_v51 = vld [vmem:[%s2090_s1 + $0x398] sm:$0xff] }
  0x46   : > { %1084 = vmatpush1.bf16.msra.mxu0 %v1543_v4  ;;  %1127 = vmatpush1.bf16.msra.mxu1 %v1545_v5  ;;  %v304_v4 = vld [vmem:[%s2090_s1 + $0x238] sm:$0xff]  ;;  %v1483_v5 = vcombine.low %v291_v57, %v295_v58  ;;  %v355_v58 = vld [vmem:[%s2090_s1 + $0x3d0] sm:$0xff] }
  0x47   : > { %1139 = vmatprep.subr.bf16.mxu0 %v1428_v6  ;;  %1182 = vmatprep.subr.bf16.mxu1 %v1430_v7  ;;  %v1485_v6 = vcombine.low %v292_v59, %v296_v60  ;;  %v1492_v7 = vcombine.high %v299_v1, %v303_v2  ;;  %v1494_v8 = vcombine.high %v300_v3, %v304_v4  ;;  %v359_v59 = vld [vmem:[%s2090_s1 + $0x3f0] sm:$0xff]  ;;  %v356_v60 = vld [vmem:[%s2090_s1 + $0x3d8] sm:$0xff] }
  0x49   : > { %1086 = vmatmul.mubr.bf16.vlgmr.msra.gmra.mrb[0].mxu0 %v1850_v10  ;;  %1129 = vmatmul.mubr.bf16.vlgmr.msra.gmra.mrb[0].mxu1 %v1850_v10 }
  0x4a   : > { %1140 = vmatpush1.bf16.msra.mxu0 %v1427_v13  ;;  %1183 = vmatpush1.bf16.msra.mxu1 %v1429_v14  ;;  %v312_v13 = vld [vmem:[%s2090_s1 + $0x278] sm:$0xff]  ;;  %v1491_v14 = vcombine.low %v299_v1, %v303_v2  ;;  %v1547_v2 = vcombine.low %v355_v58, %v359_v59 }
  0x4b   : > { %1141 = vmatprep.subr.bf16.mxu0 %v1436_v15  ;;  %1184 = vmatprep.subr.bf16.mxu1 %v1438_v16  ;;  %v1493_v15 = vcombine.low %v300_v3, %v304_v4  ;;  %v1500_v16 = vcombine.high %v307_v9, %v311_v11  ;;  %v1502_v17 = vcombine.high %v308_v12, %v312_v13  ;;  %v363_v4 = vlaneseq }
  0x4c   : > { %1171 = vmatprep.mubr.bf16.mxu0 %v1725_v56  ;;  %1214 = vmatprep.mubr.bf16.mxu1 %v1725_v56  ;;  %v268_v56 = vld [vmem:[%s2090_s1 + $0x118] sm:$0xff] }
  0x4d   : > { %v1462_v39 = vcombine.high %v268_v56, %v272_v35  ;;  %v1461_v45 = vcombine.low %v268_v56, %v272_v35  ;;  %v335_v56 = vld [vmem:[%s2090_s1 + $0x330] sm:$0xff]  ;;  %v332_v35 = vld [vmem:[%s2090_s1 + $0x318] sm:$0xff] }
  0x4e   : > { %1142 = vmatpush1.bf16.msra.mxu0 %v1435_v21  ;;  %1185 = vmatpush1.bf16.msra.mxu1 %v1437_v22  ;;  %v320_v21 = vld [vmem:[%s2090_s1 + $0x2b8] sm:$0xff]  ;;  %v1499_v22 = vcombine.low %v307_v9, %v311_v11  ;;  %v1225_v11 = vld [vmem:[%s2040_s20] sm:$0xff] }
  0x4f   : > { %1143 = vmatprep.subr.bf16.mxu0 %v1444_v23  ;;  %1186 = vmatprep.subr.bf16.mxu1 %v1446_v24  ;;  %v1501_v23 = vcombine.low %v308_v12, %v312_v13  ;;  %v1508_v24 = vcombine.high %v315_v18, %v319_v19  ;;  %v1510_v25 = vcombine.high %v316_v20, %v320_v21  ;;  %v1226_v13 = vld [vmem:[%s2040_s20 + $0x8] sm:$0xff] }
  0x52   : > { %1144 = vmatpush1.bf16.msra.mxu0 %v1443_v29  ;;  %1187 = vmatpush1.bf16.msra.mxu1 %v1445_v30  ;;  %v328_v29 = vld [vmem:[%s2090_s1 + $0x2f8] sm:$0xff]  ;;  %v1507_v30 = vcombine.low %v315_v18, %v319_v19  ;;  %v1230_v19 = vld [vmem:[%s2040_s20 + $0x28] sm:$0xff] }
  0x53   : > { %1145 = vmatprep.subr.bf16.mxu0 %v1452_v31  ;;  %1188 = vmatprep.subr.bf16.mxu1 %v1454_v32  ;;  %v1509_v31 = vcombine.low %v316_v20, %v320_v21  ;;  %v1516_v32 = vcombine.high %v323_v26, %v327_v27  ;;  %v1518_v33 = vcombine.high %v324_v28, %v328_v29  ;;  %v1235_v21 = vunpack.c.l.bf16 %v1226_v13 }
  0x56   : > { %1146 = vmatpush1.bf16.msra.mxu0 %v1451_v36  ;;  %1189 = vmatpush1.bf16.msra.mxu1 %v1453_v37  ;;  %v336_v36 = vld [vmem:[%s2090_s1 + $0x338] sm:$0xff]  ;;  %v1515_v37 = vcombine.low %v323_v26, %v327_v27  ;;  %v1236_v26 = vunpack.c.h.bf16 %v1226_v13 }
  0x57   : > { %1147 = vmatprep.subr.bf16.mxu0 %v1460_v38  ;;  %1190 = vmatprep.subr.bf16.mxu1 %v1462_v39  ;;  %v1517_v38 = vcombine.low %v324_v28, %v328_v29  ;;  %v1524_v39 = vcombine.high %v331_v34, %v335_v56  ;;  %v1526_v40 = vcombine.high %v332_v35, %v336_v36  ;;  %v1232_v13 = vld [vmem:[%s2040_s20 + $0x38] sm:$0xff] }
  0x5a   : > { %1148 = vmatpush1.bf16.msra.mxu0 %v1459_v44  ;;  %1191 = vmatpush1.bf16.msra.mxu1 %v1461_v45  ;;  %v344_v44 = vld [vmem:[%s2090_s1 + $0x378] sm:$0xff]  ;;  %v1523_v45 = vcombine.low %v331_v34, %v335_v56 }
  0x5b   : > { %1149 = vmatprep.subr.bf16.mxu0 %v1468_v46  ;;  %1192 = vmatprep.subr.bf16.mxu1 %v1470_v47  ;;  %v1525_v46 = vcombine.low %v332_v35, %v336_v36  ;;  %v1532_v47 = vcombine.high %v339_v41, %v343_v42  ;;  %v1534_v48 = vcombine.high %v340_v43, %v344_v44 }
  0x5e   : > { %1150 = vmatpush1.bf16.msra.mxu0 %v1467_v52  ;;  %1193 = vmatpush1.bf16.msra.mxu1 %v1469_v53  ;;  %v352_v52 = vld [vmem:[%s2090_s1 + $0x3b8] sm:$0xff]  ;;  %v1531_v53 = vcombine.low %v339_v41, %v343_v42 }
  0x5f   : > { %1151 = vmatprep.subr.bf16.mxu0 %v1476_v54  ;;  %1194 = vmatprep.subr.bf16.mxu1 %v1478_v55  ;;  %v1533_v54 = vcombine.low %v340_v43, %v344_v44  ;;  %v1540_v55 = vcombine.high %v347_v49, %v351_v50  ;;  %v1542_v57 = vcombine.high %v348_v51, %v352_v52 }
  0x62   : > { %1152 = vmatpush1.bf16.msra.mxu0 %v1475_v61  ;;  %1195 = vmatpush1.bf16.msra.mxu1 %v1477_v62  ;;  %v360_v61 = vld [vmem:[%s2090_s1 + $0x3f8] sm:$0xff]  ;;  %v1539_v62 = vcombine.low %v347_v49, %v351_v50 }
  0x63   : > { %1153 = vmatprep.subr.bf16.mxu0 %v1484_v63  ;;  %1196 = vmatprep.subr.bf16.mxu1 %v1486_v0  ;;  %v1541_v63 = vcombine.low %v348_v51, %v352_v52  ;;  %v1548_v0 = vcombine.high %v355_v58, %v359_v59  ;;  %v1550_v1 = vcombine.high %v356_v60, %v360_v61 }
  0x64   : > { %v1549_v3 = vcombine.low %v356_v60, %v360_v61 }
  0x66   : > { %1154 = vmatpush1.bf16.msra.mxu0 %v1483_v5  ;;  %1197 = vmatpush1.bf16.msra.mxu1 %v1485_v6  ;;  %v2032_v5 = vshrl.u32 %v363_v4, 7 }
  0x67   : > { %1155 = vmatprep.subr.bf16.mxu0 %v1492_v7  ;;  %1198 = vmatprep.subr.bf16.mxu1 %v1494_v8 }
  0x68   : > { %v365_v6 = vsub.s32 0, %v2032_v5  ;;  %v373_v7 = vsub.s32 2, %v2032_v5  ;;  %v369_v8 = vsub.s32 1, %v2032_v5  ;;  %v377_v9 = vsub.s32 3, %v2032_v5 }
  0x6a   : > { %1156 = vmatpush1.bf16.msra.mxu0 %v1491_v14  ;;  %1199 = vmatpush1.bf16.msra.mxu1 %v1493_v15 }
  0x6b   : > { %1157 = vmatprep.subr.bf16.mxu0 %v1500_v16  ;;  %1200 = vmatprep.subr.bf16.mxu1 %v1502_v17  ;;  %v1229_v16 = vld [vmem:[%s2040_s20 + $0x20] sm:$0xff]  ;;  %v1233_v17 = vunpack.c.l.bf16 %v1225_v11 }
  0x6c   : > { %v1241_v27 = vunpack.c.l.bf16 %v1229_v16 }
  0x6e   : > { %1158 = vmatpush1.bf16.msra.mxu0 %v1499_v22  ;;  %1201 = vmatpush1.bf16.msra.mxu1 %v1501_v23  ;;  %v1234_v22 = vunpack.c.h.bf16 %v1225_v11 }
  0x6f   : > { %1159 = vmatprep.subr.bf16.mxu0 %v1508_v24  ;;  %1202 = vmatprep.subr.bf16.mxu1 %v1510_v25 }
  0x72   : > { %1160 = vmatpush1.bf16.msra.mxu0 %v1507_v30  ;;  %1203 = vmatpush1.bf16.msra.mxu1 %v1509_v31 }
  0x73   : > { %1161 = vmatprep.subr.bf16.mxu0 %v1516_v32  ;;  %1204 = vmatprep.subr.bf16.mxu1 %v1518_v33  ;;  %v1243_v32 = vunpack.c.l.bf16 %v1230_v19  ;;  %v1242_v33 = vunpack.c.h.bf16 %v1229_v16 }
  0x76   : > { %1162 = vmatpush1.bf16.msra.mxu0 %v1515_v37  ;;  %1205 = vmatpush1.bf16.msra.mxu1 %v1517_v38  ;;  %v1244_v38 = vunpack.c.h.bf16 %v1230_v19 }
  0x77   : > { %1163 = vmatprep.subr.bf16.mxu0 %v1524_v39  ;;  %1206 = vmatprep.subr.bf16.mxu1 %v1526_v40 }
  0x7a   : > { %1164 = vmatpush1.bf16.msra.mxu0 %v1523_v45  ;;  %1207 = vmatpush1.bf16.msra.mxu1 %v1525_v46 }
  0x7b   : > { %1165 = vmatprep.subr.bf16.mxu0 %v1532_v47  ;;  %1208 = vmatprep.subr.bf16.mxu1 %v1534_v48 }
  0x7e   : > { %1166 = vmatpush1.bf16.msra.mxu0 %v1531_v53  ;;  %1209 = vmatpush1.bf16.msra.mxu1 %v1533_v54 }
  0x7f   : > { %1167 = vmatprep.subr.bf16.mxu0 %v1540_v55  ;;  %1210 = vmatprep.subr.bf16.mxu1 %v1542_v57 }
  0x82   : > { %1168 = vmatpush1.bf16.msra.mxu0 %v1539_v62  ;;  %1211 = vmatpush1.bf16.msra.mxu1 %v1541_v63  ;;  %v381_v63 = vsub.s32 4, %v2032_v5 }
  0x83   : > { %1169 = vmatprep.subr.bf16.mxu0 %v1548_v0  ;;  %1212 = vmatprep.subr.bf16.mxu1 %v1550_v1  ;;  %v389_v0 = vsub.s32 6, %v2032_v5  ;;  %v385_v1 = vsub.s32 5, %v2032_v5 }
  0x86   : > { %1170 = vmatpush1.bf16.msra.mxu0 %v1547_v2  ;;  %1213 = vmatpush1.bf16.msra.mxu1 %v1549_v3  ;;  %v393_v2 = vsub.s32 7, %v2032_v5  ;;  %v1227_v3 = vld [vmem:[%s2040_s20 + $0x10] sm:$0xff] }
  0x87   : > { %v1237_v11 = vunpack.c.l.bf16 %v1227_v3  ;;  %v1238_v16 = vunpack.c.h.bf16 %v1227_v3 }
  0x89   : > { %1172 = vmatmul.mubr.bf16.vlgmr.msra.gmra.mrb[4].mxu0 %v1850_v10  ;;  %1215 = vmatmul.mubr.bf16.vlgmr.msra.gmra.mrb[4].mxu1 %v1850_v10  ;;  %v2046_v10 = vld [vmem:[%s2091_s2] sm:$0xff] }
  0x8a   : > { %v366_v12 = vrot.slane %v2046_v10, %v365_v6  ;;  %v374_v14 = vrot.slane %v2046_v10, %v373_v7  ;;  %v370_v15 = vrot.slane %v2046_v10, %v369_v8  ;;  %v378_v18 = vrot.slane %v2046_v10, %v377_v9  ;;  %v1228_v6 = vld [vmem:[%s2040_s20 + $0x18] sm:$0xff]  ;;  %v1231_v9 = vld [vmem:[%s2040_s20 + $0x30] sm:$0xff] }
  0x8b   : > { %v382_v4 = vrot.slane %v2046_v10, %v381_v63  ;;  %v390_v7 = vrot.slane %v2046_v10, %v389_v0  ;;  %v386_v8 = vrot.slane %v2046_v10, %v385_v1  ;;  %v1240_v5 = vunpack.c.h.bf16 %v1228_v6 }
 0x11c   : > { %v1087_v20 = vpop.f32.mrb[0].mxu0  ;;  %v1130_v24 = vpop.f32.mrb[0].mxu1 }
 0x11d   : > { %v1088_v23 = vadd.f32 %v1087_v20, %v366_v12  ;;  %v1089_v25 = vpop.f32.mrb[1].mxu0  ;;  %v1131_v28 = vadd.f32 %v1130_v24, %v374_v14  ;;  %v1132_v30 = vpop.f32.mrb[1].mxu1  ;;  %v1245_v20 = vunpack.c.l.bf16 %v1231_v9 }
 0x11e   : > { %v1090_v29 = vadd.f32 %v1089_v25, %v370_v15  ;;  %v1091_v31 = vpop.f32.mrb[2].mxu0  ;;  %v1133_v56 = vadd.f32 %v1132_v30, %v378_v18  ;;  %v1134_v36 = vpop.f32.mrb[2].mxu1  ;;  %v1247_v25 = vunpack.c.l.bf16 %v1232_v13 }
 0x11f   : > { %v1249_v34 = vadd.f32 %v1233_v17, %v1088_v23  ;;  %v1092_v35 = vadd.f32 %v1091_v31, %v366_v12  ;;  %v1093_v37 = vpop.f32.mrb[3].mxu0  ;;  %v1251_v39 = vadd.f32 %v1235_v21, %v1131_v28  ;;  %v1135_v41 = vadd.f32 %v1134_v36, %v374_v14  ;;  %v1136_v43 = vpop.f32.mrb[3].mxu1 }
 0x120   : > { %v1250_v40 = vadd.f32 %v1234_v22, %v1090_v29  ;;  %v1094_v42 = vadd.f32 %v1093_v37, %v370_v15  ;;  %v1252_v45 = vadd.f32 %v1236_v26, %v1133_v56  ;;  %v1137_v47 = vadd.f32 %v1136_v43, %v378_v18 }
 0x121   : > { %v1265_v44 = vmax.f32 %v1249_v34, 0.0  ;;  %v1257_v46 = vadd.f32 %v1241_v27, %v1092_v35  ;;  %v1267_v48 = vmax.f32 %v1251_v39, 0.0  ;;  %v1259_v50 = vadd.f32 %v1243_v32, %v1135_v41 }
 0x122   : > { %v1266_v49 = vmax.f32 %v1250_v40, 0.0  ;;  %v1258_v51 = vadd.f32 %v1242_v33, %v1094_v42  ;;  %v1268_v52 = vmax.f32 %v1252_v45, 0.0  ;;  %v1260_v54 = vadd.f32 %v1244_v38, %v1137_v47 }
 0x123   : > { %v1273_v53 = vmax.f32 %v1257_v46, 0.0  ;;  %v1275_v57 = vmax.f32 %v1259_v50, 0.0  ;;  %v394_v12 = vrot.slane %v2046_v10, %v393_v2  ;;  %v1239_v15 = vunpack.c.l.bf16 %v1228_v6 }
 0x124   : > { %v1564_v55 = vpack.c.bf16 %v1266_v49, %v1265_v44  ;;  %v1274_v58 = vmax.f32 %v1258_v51, 0.0  ;;  %v1565_v59 = vpack.c.bf16 %v1268_v52, %v1267_v48  ;;  %v1276_v60 = vmax.f32 %v1260_v54, 0.0 }
 0x125   : > { %v1246_v26 = vunpack.c.h.bf16 %v1231_v9  ;;  %v1248_v31 = vunpack.c.h.bf16 %v1232_v13 }
 0x126   : > { %1329 = vst [vmem:[%s2064_s25] sm:$0xff] %v1564_v55  ;;  %v1568_v61 = vpack.c.bf16 %v1274_v58, %v1273_v53  ;;  %1330 = vst [vmem:[%s2064_s25 + $0x8] sm:$0xff] %v1565_v59  ;;  %v1569_v62 = vpack.c.bf16 %v1276_v60, %v1275_v57 }
 0x128   : > { %1333 = vst [vmem:[%s2064_s25 + $0x20] sm:$0xff] %v1568_v61  ;;  %1334 = vst [vmem:[%s2064_s25 + $0x28] sm:$0xff] %v1569_v62 }
 0x15c   : > { %v1173_v14 = vpop.f32.mrb[4].mxu0  ;;  %v1216_v18 = vpop.f32.mrb[4].mxu1 }
 0x15d   : > { %v1174_v17 = vadd.f32 %v1173_v14, %v382_v4  ;;  %v1175_v19 = vpop.f32.mrb[5].mxu0  ;;  %v1217_v21 = vadd.f32 %v1216_v18, %v390_v7  ;;  %v1218_v23 = vpop.f32.mrb[5].mxu1 }
 0x15e   : > { %v1176_v22 = vadd.f32 %v1175_v19, %v386_v8  ;;  %v1177_v24 = vpop.f32.mrb[6].mxu0  ;;  %v1219_v28 = vadd.f32 %v1218_v23, %v394_v12  ;;  %v1220_v30 = vpop.f32.mrb[6].mxu1 }
 0x15f   : > { %v1253_v27 = vadd.f32 %v1237_v11, %v1174_v17  ;;  %v1178_v29 = vadd.f32 %v1177_v24, %v382_v4  ;;  %v1179_v10 = vpop.f32.mrb[7].mxu0  ;;  %v1255_v32 = vadd.f32 %v1239_v15, %v1217_v21  ;;  %v1221_v34 = vadd.f32 %v1220_v30, %v390_v7  ;;  %v1222_v35 = vpop.f32.mrb[7].mxu1 }
 0x160   : > { %v1254_v33 = vadd.f32 %v1238_v16, %v1176_v22  ;;  %v1180_v56 = vadd.f32 %v1179_v10, %v386_v8  ;;  %v1256_v37 = vadd.f32 %v1240_v5, %v1219_v28  ;;  %v1223_v39 = vadd.f32 %v1222_v35, %v394_v12 }
 0x161   : > { %v1269_v36 = vmax.f32 %v1253_v27, 0.0  ;;  %v1261_v38 = vadd.f32 %v1245_v20, %v1178_v29  ;;  %v1271_v40 = vmax.f32 %v1255_v32, 0.0  ;;  %v1263_v42 = vadd.f32 %v1247_v25, %v1221_v34 }
 0x162   : > { %v1270_v41 = vmax.f32 %v1254_v33, 0.0  ;;  %v1262_v43 = vadd.f32 %v1246_v26, %v1180_v56  ;;  %v1272_v44 = vmax.f32 %v1256_v37, 0.0  ;;  %v1264_v46 = vadd.f32 %v1248_v31, %v1223_v39 }
 0x163   : > { %v1277_v45 = vmax.f32 %v1261_v38, 0.0  ;;  %v1279_v48 = vmax.f32 %v1263_v42, 0.0 }
 0x164   : > { %v1566_v47 = vpack.c.bf16 %v1270_v41, %v1269_v36  ;;  %v1278_v49 = vmax.f32 %v1262_v43, 0.0  ;;  %v1567_v50 = vpack.c.bf16 %v1272_v44, %v1271_v40  ;;  %v1280_v51 = vmax.f32 %v1264_v46, 0.0 }
 0x166   : > { %1331 = vst [vmem:[%s2064_s25 + $0x10] sm:$0xff] %v1566_v47  ;;  %v1570_v52 = vpack.c.bf16 %v1278_v49, %v1277_v45  ;;  %1332 = vst [vmem:[%s2064_s25 + $0x18] sm:$0xff] %v1567_v50  ;;  %v1571_v53 = vpack.c.bf16 %v1280_v51, %v1279_v48 }
 0x168   : > { %1335 = vst [vmem:[%s2064_s25 + $0x30] sm:$0xff] %v1570_v52  ;;  %1336 = vst [vmem:[%s2064_s25 + $0x38] sm:$0xff] %v1571_v53 }
 0x169 PF: > { %s14_s15 = sadd.s32 1, %s1589_s15  }
 0x16a   : > { %p11_p4 = scmp.ge.s32.totalorder %s14_s15, 4  }
 0x16c   :  { %13 = sbr.rel (!%p11_p4) target bundleno = 1 (0x1), region = 69 }

// kernel: encoder_forward.73
= control target key start
LH: loop header
LB: loop body
LE: loop exit
PB: predicated region body
PF: predicated region fallthrough
CT: control target
= control target key end

     0   :  { %s2604_s12 = smov 0   ;;  %s3438_s0 = inlined_call_operand.vmem [shape: bf16[32,512], index: 0, kind: input, shape index: {}]   ;;  %s3439_s1 = inlined_call_operand.vmem [shape: bf16[512,1024], index: 1, kind: input, shape index: {}]   ;;  %s3440_s2 = inlined_call_operand.vmem [shape: f32[1,1024], index: 2, kind: input, shape index: {}]   ;;  %s3441_s3 = inlined_call_operand.vmem [shape: bf16[32,1024], index: 3, kind: output, shape index: {}]  }
   0x1 LB: > { %s2239_s13 = sadd.s32 4294967295, %s2582_s12   ;;  %p2243_p0 = scmp.ge.s32.totalorder %s2582_s12, 1  ;;  %s2582_s12 = sphi %s2604_s12, %s13_s12  }
   0x2   : > { %p139_p1 = scmp.lt.s32.totalorder %s2582_s12, 3 }
   0x4   : > { %p140_p2 = pnand %p2243_p0, %p139_p1 }
   0x5   : > { %v183_v0 = vld [vmem:[%s3439_s1] sm:$0xff] (!%p140_p2)  ;;  %v184_v2 = vld [vmem:[%s3439_s1 + $0x8] sm:$0xff] (!%p140_p2)  ;;  %s2244_s11 = sshll.u32 (!%p140_p2), %s2239_s13, 1 }
   0x6   : > { %143 = sbr.rel (%p140_p2) target bundleno = 485 (0x1e5), region = 32  ;;  %v187_v1 = vld [vmem:[%s3439_s1 + $0x20] sm:$0xff] (!%p140_p2)  ;;  %v188_v4 = vld [vmem:[%s3439_s1 + $0x28] sm:$0xff] (!%p140_p2)  ;;  %p166_p3 = scmp.lt.s32.totalorder (!%p140_p2), %s2244_s11, 3 }
   0x7   : > { %v2255_v3 = vcombine.high (!%p140_p2), %v183_v0, %v187_v1  ;;  %v2254_v5 = vcombine.low (!%p140_p2), %v183_v0, %v187_v1  ;;  %v191_v6 = vld [vmem:[%s3439_s1 + $0x40] sm:$0xff] (!%p140_p2)  ;;  %v2257_v8 = vcombine.high (!%p140_p2), %v184_v2, %v188_v4  ;;  %v2256_v9 = vcombine.low (!%p140_p2), %v184_v2, %v188_v4  ;;  %v192_v11 = vld [vmem:[%s3439_s1 + $0x48] sm:$0xff] (!%p140_p2) }
   0x8   : > { %v195_v7 = vld [vmem:[%s3439_s1 + $0x60] sm:$0xff] (!%p140_p2)  ;;  %v196_v12 = vld [vmem:[%s3439_s1 + $0x68] sm:$0xff] (!%p140_p2) }
   0x9   : > { %v2263_v10 = vcombine.high (!%p140_p2), %v191_v6, %v195_v7  ;;  %v199_v13 = vld [vmem:[%s3439_s1 + $0x80] sm:$0xff] (!%p140_p2)  ;;  %1781 = vmatprep.subr.bf16.mxu0 (!%p140_p2), %v2255_v3  ;;  %v2265_v14 = vcombine.high (!%p140_p2), %v192_v11, %v196_v12  ;;  %v200_v16 = vld [vmem:[%s3439_s1 + $0x88] sm:$0xff] (!%p140_p2)  ;;  %1867 = vmatprep.subr.bf16.mxu1 (!%p140_p2), %v2257_v8  ;;  %v2262_v18 = vcombine.low (!%p140_p2), %v191_v6, %v195_v7 }
   0xa   : > { %v203_v15 = vld [vmem:[%s3439_s1 + $0xa0] sm:$0xff] (!%p140_p2)  ;;  %v204_v17 = vld [vmem:[%s3439_s1 + $0xa8] sm:$0xff] (!%p140_p2)  ;;  %1782 = vmatpush1.bf16.msra.mxu0 (!%p140_p2), %v2254_v5  ;;  %1868 = vmatpush1.bf16.msra.mxu1 (!%p140_p2), %v2256_v9  ;;  %v2264_v19 = vcombine.low (!%p140_p2), %v192_v11, %v196_v12 }
   0xb   : > { %1783 = vmatprep.subr.bf16.mxu0 (!%p140_p2), %v2263_v10  ;;  %v2271_v20 = vcombine.high (!%p140_p2), %v199_v13, %v203_v15  ;;  %1869 = vmatprep.subr.bf16.mxu1 (!%p140_p2), %v2265_v14  ;;  %v2273_v21 = vcombine.high (!%p140_p2), %v200_v16, %v204_v17  ;;  %v207_v22 = vld [vmem:[%s3439_s1 + $0xc0] sm:$0xff] (!%p140_p2)  ;;  %v208_v24 = vld [vmem:[%s3439_s1 + $0xc8] sm:$0xff] (!%p140_p2)  ;;  %v2270_v26 = vcombine.low (!%p140_p2), %v199_v13, %v203_v15 }
   0xc   : > { %v211_v23 = vld [vmem:[%s3439_s1 + $0xe0] sm:$0xff] (!%p140_p2)  ;;  %v212_v25 = vld [vmem:[%s3439_s1 + $0xe8] sm:$0xff] (!%p140_p2)  ;;  %v2272_v27 = vcombine.low (!%p140_p2), %v200_v16, %v204_v17 }
   0xd   : > { %v2279_v28 = vcombine.high %v207_v22, %v211_v23  ;;  %v2281_v29 = vcombine.high %v208_v24, %v212_v25  ;;  %v215_v30 = vld [vmem:[%s3439_s1 + $0x100] sm:$0xff]  ;;  %v216_v32 = vld [vmem:[%s3439_s1 + $0x108] sm:$0xff]  ;;  %v2278_v34 = vcombine.low %v207_v22, %v211_v23  ;;  %s3443_s11 = smov (!%p166_p3, %s2244_s11), 3  ;;  %v2280_v35 = vcombine.low %v208_v24, %v212_v25 }
   0xe   : > { %1784 = vmatpush1.bf16.msra.mxu0 %v2262_v18  ;;  %1870 = vmatpush1.bf16.msra.mxu1 %v2264_v19  ;;  %v219_v31 = vld [vmem:[%s3439_s1 + $0x120] sm:$0xff]  ;;  %v220_v33 = vld [vmem:[%s3439_s1 + $0x128] sm:$0xff]  ;;  %s2520_s10 = sshll.u32 %s3443_s11, 4  ;;  %s2521_s16 = sshll.u32 %s3443_s11, 5 }
   0xf   : > { %1785 = vmatprep.subr.bf16.mxu0 %v2271_v20  ;;  %1871 = vmatprep.subr.bf16.mxu1 %v2273_v21  ;;  %v2287_v36 = vcombine.high %v215_v30, %v219_v31  ;;  %v2289_v37 = vcombine.high %v216_v32, %v220_v33  ;;  %v223_v38 = vld [vmem:[%s3439_s1 + $0x140] sm:$0xff]  ;;  %v224_v40 = vld [vmem:[%s3439_s1 + $0x148] sm:$0xff]  ;;  %v2286_v42 = vcombine.low %v215_v30, %v219_v31  ;;  %s2704_s23 = scalar_lea.vmem %s3438_s0, %s2520_s10  ;;  %s3425_s19 = scalar_lea.vmem %s3441_s3, %s2521_s16 }
  0x10   : > { %v227_v39 = vld [vmem:[%s3439_s1 + $0x160] sm:$0xff]  ;;  %v228_v41 = vld [vmem:[%s3439_s1 + $0x168] sm:$0xff]  ;;  %v2288_v43 = vcombine.low %v216_v32, %v220_v33 }
  0x11   : > { %v2295_v44 = vcombine.high %v223_v38, %v227_v39  ;;  %v2297_v45 = vcombine.high %v224_v40, %v228_v41  ;;  %v231_v46 = vld [vmem:[%s3439_s1 + $0x180] sm:$0xff]  ;;  %v232_v48 = vld [vmem:[%s3439_s1 + $0x188] sm:$0xff]  ;;  %v2294_v50 = vcombine.low %v223_v38, %v227_v39  ;;  %v2296_v51 = vcombine.low %v224_v40, %v228_v41 }
  0x12   : > { %1786 = vmatpush1.bf16.msra.mxu0 %v2270_v26  ;;  %1872 = vmatpush1.bf16.msra.mxu1 %v2272_v27  ;;  %v235_v47 = vld [vmem:[%s3439_s1 + $0x1a0] sm:$0xff]  ;;  %v236_v49 = vld [vmem:[%s3439_s1 + $0x1a8] sm:$0xff] }
  0x13   : > { %1787 = vmatprep.subr.bf16.mxu0 %v2279_v28  ;;  %1873 = vmatprep.subr.bf16.mxu1 %v2281_v29  ;;  %v2303_v52 = vcombine.high %v231_v46, %v235_v47  ;;  %v2305_v53 = vcombine.high %v232_v48, %v236_v49  ;;  %v239_v54 = vld [vmem:[%s3439_s1 + $0x1c0] sm:$0xff]  ;;  %v240_v57 = vld [vmem:[%s3439_s1 + $0x1c8] sm:$0xff]  ;;  %v2302_v59 = vcombine.low %v231_v46, %v235_v47 }
  0x14   : > { %v243_v55 = vld [vmem:[%s3439_s1 + $0x1e0] sm:$0xff]  ;;  %v244_v58 = vld [vmem:[%s3439_s1 + $0x1e8] sm:$0xff]  ;;  %v2304_v60 = vcombine.low %v232_v48, %v236_v49 }
  0x15   : > { %v2713_v56 = vld [vmem:[%s2704_s23 + $0x4] ss:$16 sps:$4 sm:$0xff]   ;;  %v2311_v61 = vcombine.high %v239_v54, %v243_v55  ;;  %v2313_v62 = vcombine.high %v240_v57, %v244_v58  ;;  %v248_v1 = vld [vmem:[%s3439_s1 + $0x208] sm:$0xff]  ;;  %v2310_v3 = vcombine.low %v239_v54, %v243_v55  ;;  %v2312_v4 = vcombine.low %v240_v57, %v244_v58 }
  0x16   : > { %1788 = vmatpush1.bf16.msra.mxu0 %v2278_v34  ;;  %1874 = vmatpush1.bf16.msra.mxu1 %v2280_v35  ;;  %v247_v63 = vld [vmem:[%s3439_s1 + $0x200] sm:$0xff]  ;;  %v252_v2 = vld [vmem:[%s3439_s1 + $0x228] sm:$0xff] }
  0x17   : > { %1789 = vmatprep.subr.bf16.mxu0 %v2287_v36  ;;  %1875 = vmatprep.subr.bf16.mxu1 %v2289_v37  ;;  %v251_v0 = vld [vmem:[%s3439_s1 + $0x220] sm:$0xff]  ;;  %v2321_v6 = vcombine.high %v248_v1, %v252_v2  ;;  %v256_v9 = vld [vmem:[%s3439_s1 + $0x248] sm:$0xff]  ;;  %v2320_v12 = vcombine.low %v248_v1, %v252_v2 }
  0x18   : > { %1813 = vmatprep.mubr.bf16.mxu0 %v2713_v56  ;;  %1899 = vmatprep.mubr.bf16.mxu1 %v2713_v56  ;;  %v2319_v5 = vcombine.high %v247_v63, %v251_v0  ;;  %v255_v7 = vld [vmem:[%s3439_s1 + $0x240] sm:$0xff]  ;;  %v260_v10 = vld [vmem:[%s3439_s1 + $0x268] sm:$0xff]  ;;  %v2318_v11 = vcombine.low %v247_v63, %v251_v0 }
  0x19   : > { %v259_v8 = vld [vmem:[%s3439_s1 + $0x260] sm:$0xff]  ;;  %v2329_v14 = vcombine.high %v256_v9, %v260_v10  ;;  %v264_v17 = vld [vmem:[%s3439_s1 + $0x288] sm:$0xff]  ;;  %v2328_v20 = vcombine.low %v256_v9, %v260_v10 }
  0x1a   : > { %1790 = vmatpush1.bf16.msra.mxu0 %v2286_v42  ;;  %1876 = vmatpush1.bf16.msra.mxu1 %v2288_v43  ;;  %v2327_v13 = vcombine.high %v255_v7, %v259_v8  ;;  %v263_v15 = vld [vmem:[%s3439_s1 + $0x280] sm:$0xff]  ;;  %v268_v18 = vld [vmem:[%s3439_s1 + $0x2a8] sm:$0xff]  ;;  %v2326_v19 = vcombine.low %v255_v7, %v259_v8 }
  0x1b   : > { %1791 = vmatprep.subr.bf16.mxu0 %v2295_v44  ;;  %1877 = vmatprep.subr.bf16.mxu1 %v2297_v45  ;;  %v267_v16 = vld [vmem:[%s3439_s1 + $0x2a0] sm:$0xff]  ;;  %v2337_v22 = vcombine.high %v264_v17, %v268_v18  ;;  %v272_v25 = vld [vmem:[%s3439_s1 + $0x2c8] sm:$0xff]  ;;  %v2336_v28 = vcombine.low %v264_v17, %v268_v18 }
  0x1c   : > { %v2335_v21 = vcombine.high %v263_v15, %v267_v16  ;;  %v271_v23 = vld [vmem:[%s3439_s1 + $0x2c0] sm:$0xff]  ;;  %v276_v26 = vld [vmem:[%s3439_s1 + $0x2e8] sm:$0xff]  ;;  %v2334_v27 = vcombine.low %v263_v15, %v267_v16 }
  0x1d   : > { %v275_v24 = vld [vmem:[%s3439_s1 + $0x2e0] sm:$0xff]  ;;  %v2345_v30 = vcombine.high %v272_v25, %v276_v26  ;;  %v280_v33 = vld [vmem:[%s3439_s1 + $0x308] sm:$0xff]  ;;  %v2344_v36 = vcombine.low %v272_v25, %v276_v26 }
  0x1e   : > { %1792 = vmatpush1.bf16.msra.mxu0 %v2294_v50  ;;  %1878 = vmatpush1.bf16.msra.mxu1 %v2296_v51  ;;  %v2343_v29 = vcombine.high %v271_v23, %v275_v24  ;;  %v279_v31 = vld [vmem:[%s3439_s1 + $0x300] sm:$0xff]  ;;  %v284_v34 = vld [vmem:[%s3439_s1 + $0x328] sm:$0xff]  ;;  %v2342_v35 = vcombine.low %v271_v23, %v275_v24 }
  0x1f   : > { %1793 = vmatprep.subr.bf16.mxu0 %v2303_v52  ;;  %1879 = vmatprep.subr.bf16.mxu1 %v2305_v53  ;;  %v283_v32 = vld [vmem:[%s3439_s1 + $0x320] sm:$0xff]  ;;  %v2353_v38 = vcombine.high %v280_v33, %v284_v34  ;;  %v288_v41 = vld [vmem:[%s3439_s1 + $0x348] sm:$0xff]  ;;  %v2352_v44 = vcombine.low %v280_v33, %v284_v34 }
  0x20   : > { %v2351_v37 = vcombine.high %v279_v31, %v283_v32  ;;  %v287_v39 = vld [vmem:[%s3439_s1 + $0x340] sm:$0xff]  ;;  %v292_v42 = vld [vmem:[%s3439_s1 + $0x368] sm:$0xff]  ;;  %v2350_v43 = vcombine.low %v279_v31, %v283_v32 }
  0x21   : > { %v291_v40 = vld [vmem:[%s3439_s1 + $0x360] sm:$0xff]  ;;  %v2361_v46 = vcombine.high %v288_v41, %v292_v42  ;;  %v296_v49 = vld [vmem:[%s3439_s1 + $0x388] sm:$0xff]  ;;  %v2360_v52 = vcombine.low %v288_v41, %v292_v42 }
  0x22   : > { %1794 = vmatpush1.bf16.msra.mxu0 %v2302_v59  ;;  %1880 = vmatpush1.bf16.msra.mxu1 %v2304_v60  ;;  %v2359_v45 = vcombine.high %v287_v39, %v291_v40  ;;  %v295_v47 = vld [vmem:[%s3439_s1 + $0x380] sm:$0xff]  ;;  %v300_v50 = vld [vmem:[%s3439_s1 + $0x3a8] sm:$0xff]  ;;  %v2358_v51 = vcombine.low %v287_v39, %v291_v40 }
  0x23   : > { %1795 = vmatprep.subr.bf16.mxu0 %v2311_v61  ;;  %1881 = vmatprep.subr.bf16.mxu1 %v2313_v62  ;;  %v299_v48 = vld [vmem:[%s3439_s1 + $0x3a0] sm:$0xff]  ;;  %v2369_v54 = vcombine.high %v296_v49, %v300_v50  ;;  %v304_v58 = vld [vmem:[%s3439_s1 + $0x3c8] sm:$0xff]  ;;  %v2368_v61 = vcombine.low %v296_v49, %v300_v50 }
  0x24   : > { %v2367_v53 = vcombine.high %v295_v47, %v299_v48  ;;  %v303_v55 = vld [vmem:[%s3439_s1 + $0x3c0] sm:$0xff]  ;;  %v308_v59 = vld [vmem:[%s3439_s1 + $0x3e8] sm:$0xff]  ;;  %v2366_v60 = vcombine.low %v295_v47, %v299_v48 }
  0x25   : > { %v307_v57 = vld [vmem:[%s3439_s1 + $0x3e0] sm:$0xff]  ;;  %v2377_v63 = vcombine.high %v304_v58, %v308_v59  ;;  %v312_v2 = vld [vmem:[%s3439_s1 + $0x408] sm:$0xff] }
  0x26   : > { %1796 = vmatpush1.bf16.msra.mxu0 %v2310_v3  ;;  %1882 = vmatpush1.bf16.msra.mxu1 %v2312_v4  ;;  %v2375_v62 = vcombine.high %v303_v55, %v307_v57  ;;  %v311_v0 = vld [vmem:[%s3439_s1 + $0x400] sm:$0xff]  ;;  %v316_v3 = vld [vmem:[%s3439_s1 + $0x428] sm:$0xff]  ;;  %v2374_v4 = vcombine.low %v303_v55, %v307_v57 }
  0x27   : > { %1797 = vmatprep.subr.bf16.mxu0 %v2319_v5  ;;  %1883 = vmatprep.subr.bf16.mxu1 %v2321_v6  ;;  %v315_v1 = vld [vmem:[%s3439_s1 + $0x420] sm:$0xff]  ;;  %v2376_v5 = vcombine.low %v304_v58, %v308_v59  ;;  %v2385_v7 = vcombine.high %v312_v2, %v316_v3 }
  0x28   : > { %v2383_v6 = vcombine.high %v311_v0, %v315_v1  ;;  %v319_v8 = vld [vmem:[%s3439_s1 + $0x440] sm:$0xff] }
  0x29   : > { %v323_v9 = vld [vmem:[%s3439_s1 + $0x460] sm:$0xff] }
  0x2a   : > { %1798 = vmatpush1.bf16.msra.mxu0 %v2318_v11  ;;  %1884 = vmatpush1.bf16.msra.mxu1 %v2320_v12  ;;  %v2838_v10 = vld [vmem:[%s2704_s23] ss:$16 sps:$4 sm:$0xff]   ;;  %v320_v11 = vld [vmem:[%s3439_s1 + $0x448] sm:$0xff]  ;;  %v2391_v15 = vcombine.high %v319_v8, %v323_v9 }
  0x2b   : > { %1799 = vmatprep.subr.bf16.mxu0 %v2327_v13  ;;  %1885 = vmatprep.subr.bf16.mxu1 %v2329_v14  ;;  %v324_v12 = vld [vmem:[%s3439_s1 + $0x468] sm:$0xff]  ;;  %v2382_v13 = vcombine.low %v311_v0, %v315_v1  ;;  %v2384_v14 = vcombine.low %v312_v2, %v316_v3  ;;  %v327_v17 = vld [vmem:[%s3439_s1 + $0x480] sm:$0xff] }
  0x2c   : > { %v2393_v16 = vcombine.high %v320_v11, %v324_v12  ;;  %v331_v18 = vld [vmem:[%s3439_s1 + $0x4a0] sm:$0xff]  ;;  %v2392_v23 = vcombine.low %v320_v11, %v324_v12 }
  0x2d   : > { %v2399_v24 = vcombine.high %v327_v17, %v331_v18  ;;  %v335_v26 = vld [vmem:[%s3439_s1 + $0x4c0] sm:$0xff] }
  0x2e   : > { %1800 = vmatpush1.bf16.msra.mxu0 %v2326_v19  ;;  %1886 = vmatpush1.bf16.msra.mxu1 %v2328_v20  ;;  %v2853_v19 = vld [vmem:[%s2704_s23 + $0xc] ss:$16 sps:$4 sm:$0xff]   ;;  %v343_v34 = vld [vmem:[%s3439_s1 + $0x500] sm:$0xff] }
  0x2f   : > { %1801 = vmatprep.subr.bf16.mxu0 %v2335_v21  ;;  %1887 = vmatprep.subr.bf16.mxu1 %v2337_v22  ;;  %v328_v20 = vld [vmem:[%s3439_s1 + $0x488] sm:$0xff]  ;;  %v2390_v22 = vcombine.low %v319_v8, %v323_v9  ;;  %v351_v42 = vld [vmem:[%s3439_s1 + $0x540] sm:$0xff] }
  0x30   : > { %v332_v21 = vld [vmem:[%s3439_s1 + $0x4a8] sm:$0xff]  ;;  %v359_v50 = vld [vmem:[%s3439_s1 + $0x580] sm:$0xff] }
  0x31   : > { %v2401_v25 = vcombine.high %v328_v20, %v332_v21  ;;  %v2400_v31 = vcombine.low %v328_v20, %v332_v21  ;;  %v367_v59 = vld [vmem:[%s3439_s1 + $0x5c0] sm:$0xff] }
  0x32   : > { %1802 = vmatpush1.bf16.msra.mxu0 %v2334_v27  ;;  %1888 = vmatpush1.bf16.msra.mxu1 %v2336_v28  ;;  %v339_v27 = vld [vmem:[%s3439_s1 + $0x4e0] sm:$0xff]  ;;  %v336_v28 = vld [vmem:[%s3439_s1 + $0x4c8] sm:$0xff] }
  0x33   : > { %1803 = vmatprep.subr.bf16.mxu0 %v2343_v29  ;;  %1889 = vmatprep.subr.bf16.mxu1 %v2345_v30  ;;  %v340_v29 = vld [vmem:[%s3439_s1 + $0x4e8] sm:$0xff]  ;;  %v2398_v30 = vcombine.low %v327_v17, %v331_v18  ;;  %v2407_v32 = vcombine.high %v335_v26, %v339_v27  ;;  %v375_v3 = vld [vmem:[%s3439_s1 + $0x600] sm:$0xff] }
  0x34   : > { %v2409_v33 = vcombine.high %v336_v28, %v340_v29  ;;  %v2408_v39 = vcombine.low %v336_v28, %v340_v29  ;;  %v383_v12 = vld [vmem:[%s3439_s1 + $0x640] sm:$0xff] }
  0x35   : > { %v391_v21 = vld [vmem:[%s3439_s1 + $0x680] sm:$0xff] }
  0x36   : > { %1804 = vmatpush1.bf16.msra.mxu0 %v2342_v35  ;;  %1890 = vmatpush1.bf16.msra.mxu1 %v2344_v36  ;;  %v347_v35 = vld [vmem:[%s3439_s1 + $0x520] sm:$0xff]  ;;  %v344_v36 = vld [vmem:[%s3439_s1 + $0x508] sm:$0xff] }
  0x37   : > { %1805 = vmatprep.subr.bf16.mxu0 %v2351_v37  ;;  %1891 = vmatprep.subr.bf16.mxu1 %v2353_v38  ;;  %v348_v37 = vld [vmem:[%s3439_s1 + $0x528] sm:$0xff]  ;;  %v2406_v38 = vcombine.low %v335_v26, %v339_v27  ;;  %v2415_v40 = vcombine.high %v343_v34, %v347_v35  ;;  %v399_v29 = vld [vmem:[%s3439_s1 + $0x6c0] sm:$0xff] }
  0x38   : > { %v2417_v41 = vcombine.high %v344_v36, %v348_v37  ;;  %v2416_v47 = vcombine.low %v344_v36, %v348_v37  ;;  %v407_v37 = vld [vmem:[%s3439_s1 + $0x700] sm:$0xff] }
  0x3a   : > { %1806 = vmatpush1.bf16.msra.mxu0 %v2350_v43  ;;  %1892 = vmatpush1.bf16.msra.mxu1 %v2352_v44  ;;  %v355_v43 = vld [vmem:[%s3439_s1 + $0x560] sm:$0xff]  ;;  %v352_v44 = vld [vmem:[%s3439_s1 + $0x548] sm:$0xff] }
  0x3b   : > { %1807 = vmatprep.subr.bf16.mxu0 %v2359_v45  ;;  %1893 = vmatprep.subr.bf16.mxu1 %v2361_v46  ;;  %v356_v45 = vld [vmem:[%s3439_s1 + $0x568] sm:$0xff]  ;;  %v2414_v46 = vcombine.low %v343_v34, %v347_v35  ;;  %v2423_v48 = vcombine.high %v351_v42, %v355_v43 }
  0x3c   : > { %v2425_v49 = vcombine.high %v352_v44, %v356_v45  ;;  %v2424_v55 = vcombine.low %v352_v44, %v356_v45  ;;  %v415_v45 = vld [vmem:[%s3439_s1 + $0x740] sm:$0xff] }
  0x3e   : > { %1808 = vmatpush1.bf16.msra.mxu0 %v2358_v51  ;;  %1894 = vmatpush1.bf16.msra.mxu1 %v2360_v52  ;;  %v363_v51 = vld [vmem:[%s3439_s1 + $0x5a0] sm:$0xff]  ;;  %v360_v52 = vld [vmem:[%s3439_s1 + $0x588] sm:$0xff] }
  0x3f   : > { %1809 = vmatprep.subr.bf16.mxu0 %v2367_v53  ;;  %1895 = vmatprep.subr.bf16.mxu1 %v2369_v54  ;;  %v364_v53 = vld [vmem:[%s3439_s1 + $0x5a8] sm:$0xff]  ;;  %v2422_v54 = vcombine.low %v351_v42, %v355_v43  ;;  %v2431_v57 = vcombine.high %v359_v50, %v363_v51 }
  0x40   : > { %v2433_v58 = vcombine.high %v360_v52, %v364_v53  ;;  %v2432_v0 = vcombine.low %v360_v52, %v364_v53  ;;  %v423_v53 = vld [vmem:[%s3439_s1 + $0x780] sm:$0xff] }
  0x42   : > { %1810 = vmatpush1.bf16.msra.mxu0 %v2366_v60  ;;  %1896 = vmatpush1.bf16.msra.mxu1 %v2368_v61  ;;  %v371_v60 = vld [vmem:[%s3439_s1 + $0x5e0] sm:$0xff]  ;;  %v368_v61 = vld [vmem:[%s3439_s1 + $0x5c8] sm:$0xff] }
  0x43   : > { %1811 = vmatprep.subr.bf16.mxu0 %v2375_v62  ;;  %1897 = vmatprep.subr.bf16.mxu1 %v2377_v63  ;;  %v372_v62 = vld [vmem:[%s3439_s1 + $0x5e8] sm:$0xff]  ;;  %v2430_v63 = vcombine.low %v359_v50, %v363_v51  ;;  %v2439_v1 = vcombine.high %v367_v59, %v371_v60 }
  0x44   : > { %v2441_v2 = vcombine.high %v368_v61, %v372_v62  ;;  %v2440_v8 = vcombine.low %v368_v61, %v372_v62  ;;  %v431_v62 = vld [vmem:[%s3439_s1 + $0x7c0] sm:$0xff] }
  0x46   : > { %1812 = vmatpush1.bf16.msra.mxu0 %v2374_v4  ;;  %1898 = vmatpush1.bf16.msra.mxu1 %v2376_v5  ;;  %v379_v4 = vld [vmem:[%s3439_s1 + $0x620] sm:$0xff]  ;;  %v376_v5 = vld [vmem:[%s3439_s1 + $0x608] sm:$0xff] }
  0x47   : > { %1824 = vmatprep.subr.bf16.mxu0 %v2383_v6  ;;  %1910 = vmatprep.subr.bf16.mxu1 %v2385_v7  ;;  %v380_v6 = vld [vmem:[%s3439_s1 + $0x628] sm:$0xff]  ;;  %v2438_v7 = vcombine.low %v367_v59, %v371_v60  ;;  %v2447_v9 = vcombine.high %v375_v3, %v379_v4 }
  0x48   : > { %v2449_v11 = vcombine.high %v376_v5, %v380_v6  ;;  %v2448_v17 = vcombine.low %v376_v5, %v380_v6  ;;  %v185_v6 = vld [vmem:[%s3439_s1 + $0x10] sm:$0xff] }
  0x49   : > { %1814 = vmatmul.mubr.bf16.vlgmr.msra.gmra.mrb[0].mxu0 %v2838_v10  ;;  %1900 = vmatmul.mubr.bf16.vlgmr.msra.gmra.mrb[0].mxu1 %v2838_v10 }
  0x4a   : > { %1825 = vmatpush1.bf16.msra.mxu0 %v2382_v13  ;;  %1911 = vmatpush1.bf16.msra.mxu1 %v2384_v14  ;;  %v387_v13 = vld [vmem:[%s3439_s1 + $0x660] sm:$0xff]  ;;  %v384_v14 = vld [vmem:[%s3439_s1 + $0x648] sm:$0xff] }
  0x4b   : > { %1826 = vmatprep.subr.bf16.mxu0 %v2391_v15  ;;  %1912 = vmatprep.subr.bf16.mxu1 %v2393_v16  ;;  %v388_v15 = vld [vmem:[%s3439_s1 + $0x668] sm:$0xff]  ;;  %v2446_v16 = vcombine.low %v375_v3, %v379_v4  ;;  %v2455_v18 = vcombine.high %v383_v12, %v387_v13 }
  0x4c   : > { %1856 = vmatprep.mubr.bf16.mxu0 %v2853_v19  ;;  %1942 = vmatprep.mubr.bf16.mxu1 %v2853_v19  ;;  %v2457_v20 = vcombine.high %v384_v14, %v388_v15  ;;  %v2456_v26 = vcombine.low %v384_v14, %v388_v15  ;;  %v193_v15 = vld [vmem:[%s3439_s1 + $0x50] sm:$0xff] }
  0x4e   : > { %1827 = vmatpush1.bf16.msra.mxu0 %v2390_v22  ;;  %1913 = vmatpush1.bf16.msra.mxu1 %v2392_v23  ;;  %v395_v22 = vld [vmem:[%s3439_s1 + $0x6a0] sm:$0xff]  ;;  %v392_v23 = vld [vmem:[%s3439_s1 + $0x688] sm:$0xff] }
  0x4f   : > { %1828 = vmatprep.subr.bf16.mxu0 %v2399_v24  ;;  %1914 = vmatprep.subr.bf16.mxu1 %v2401_v25  ;;  %v396_v24 = vld [vmem:[%s3439_s1 + $0x6a8] sm:$0xff]  ;;  %v2454_v25 = vcombine.low %v383_v12, %v387_v13  ;;  %v2463_v27 = vcombine.high %v391_v21, %v395_v22 }
  0x50   : > { %v2465_v28 = vcombine.high %v392_v23, %v396_v24  ;;  %v2464_v34 = vcombine.low %v392_v23, %v396_v24 }
  0x52   : > { %1829 = vmatpush1.bf16.msra.mxu0 %v2398_v30  ;;  %1915 = vmatpush1.bf16.msra.mxu1 %v2400_v31  ;;  %v403_v30 = vld [vmem:[%s3439_s1 + $0x6e0] sm:$0xff]  ;;  %v400_v31 = vld [vmem:[%s3439_s1 + $0x6c8] sm:$0xff] }
  0x53   : > { %1830 = vmatprep.subr.bf16.mxu0 %v2407_v32  ;;  %1916 = vmatprep.subr.bf16.mxu1 %v2409_v33  ;;  %v404_v32 = vld [vmem:[%s3439_s1 + $0x6e8] sm:$0xff]  ;;  %v2462_v33 = vcombine.low %v391_v21, %v395_v22  ;;  %v2471_v35 = vcombine.high %v399_v29, %v403_v30 }
  0x54   : > { %v2473_v36 = vcombine.high %v400_v31, %v404_v32  ;;  %v2472_v42 = vcombine.low %v400_v31, %v404_v32 }
  0x56   : > { %1831 = vmatpush1.bf16.msra.mxu0 %v2406_v38  ;;  %1917 = vmatpush1.bf16.msra.mxu1 %v2408_v39  ;;  %v411_v38 = vld [vmem:[%s3439_s1 + $0x720] sm:$0xff]  ;;  %v408_v39 = vld [vmem:[%s3439_s1 + $0x708] sm:$0xff] }
  0x57   : > { %1832 = vmatprep.subr.bf16.mxu0 %v2415_v40  ;;  %1918 = vmatprep.subr.bf16.mxu1 %v2417_v41  ;;  %v412_v40 = vld [vmem:[%s3439_s1 + $0x728] sm:$0xff]  ;;  %v2470_v41 = vcombine.low %v399_v29, %v403_v30  ;;  %v2479_v43 = vcombine.high %v407_v37, %v411_v38 }
  0x58   : > { %v2481_v44 = vcombine.high %v408_v39, %v412_v40  ;;  %v2480_v50 = vcombine.low %v408_v39, %v412_v40 }
  0x5a   : > { %1833 = vmatpush1.bf16.msra.mxu0 %v2414_v46  ;;  %1919 = vmatpush1.bf16.msra.mxu1 %v2416_v47  ;;  %v419_v46 = vld [vmem:[%s3439_s1 + $0x760] sm:$0xff]  ;;  %v416_v47 = vld [vmem:[%s3439_s1 + $0x748] sm:$0xff] }
  0x5b   : > { %1834 = vmatprep.subr.bf16.mxu0 %v2423_v48  ;;  %1920 = vmatprep.subr.bf16.mxu1 %v2425_v49  ;;  %v420_v48 = vld [vmem:[%s3439_s1 + $0x768] sm:$0xff]  ;;  %v2478_v49 = vcombine.low %v407_v37, %v411_v38  ;;  %v2487_v51 = vcombine.high %v415_v45, %v419_v46 }
  0x5c   : > { %v2489_v52 = vcombine.high %v416_v47, %v420_v48  ;;  %v2488_v59 = vcombine.low %v416_v47, %v420_v48  ;;  %v225_v48 = vld [vmem:[%s3439_s1 + $0x150] sm:$0xff] }
  0x5e   : > { %1835 = vmatpush1.bf16.msra.mxu0 %v2422_v54  ;;  %1921 = vmatpush1.bf16.msra.mxu1 %v2424_v55  ;;  %v427_v54 = vld [vmem:[%s3439_s1 + $0x7a0] sm:$0xff]  ;;  %v424_v55 = vld [vmem:[%s3439_s1 + $0x788] sm:$0xff] }
  0x5f   : > { %1836 = vmatprep.subr.bf16.mxu0 %v2431_v57  ;;  %1922 = vmatprep.subr.bf16.mxu1 %v2433_v58  ;;  %v428_v57 = vld [vmem:[%s3439_s1 + $0x7a8] sm:$0xff]  ;;  %v2486_v58 = vcombine.low %v415_v45, %v419_v46  ;;  %v2495_v60 = vcombine.high %v423_v53, %v427_v54 }
  0x60   : > { %v2497_v61 = vcombine.high %v424_v55, %v428_v57  ;;  %v2496_v3 = vcombine.low %v424_v55, %v428_v57  ;;  %v233_v57 = vld [vmem:[%s3439_s1 + $0x190] sm:$0xff] }
  0x62   : > { %1837 = vmatpush1.bf16.msra.mxu0 %v2430_v63  ;;  %1923 = vmatpush1.bf16.msra.mxu1 %v2432_v0  ;;  %v435_v63 = vld [vmem:[%s3439_s1 + $0x7e0] sm:$0xff]  ;;  %v432_v0 = vld [vmem:[%s3439_s1 + $0x7c8] sm:$0xff] }
  0x63   : > { %1838 = vmatprep.subr.bf16.mxu0 %v2439_v1  ;;  %1924 = vmatprep.subr.bf16.mxu1 %v2441_v2  ;;  %v436_v1 = vld [vmem:[%s3439_s1 + $0x7e8] sm:$0xff]  ;;  %v2494_v2 = vcombine.low %v423_v53, %v427_v54  ;;  %v2503_v4 = vcombine.high %v431_v62, %v435_v63 }
  0x64   : > { %v2505_v5 = vcombine.high %v432_v0, %v436_v1  ;;  %v2504_v12 = vcombine.low %v432_v0, %v436_v1  ;;  %v241_v1 = vld [vmem:[%s3439_s1 + $0x1d0] sm:$0xff] }
  0x66   : > { %1839 = vmatpush1.bf16.msra.mxu0 %v2438_v7  ;;  %1925 = vmatpush1.bf16.msra.mxu1 %v2440_v8  ;;  %v189_v7 = vld [vmem:[%s3439_s1 + $0x30] sm:$0xff]  ;;  %v186_v8 = vld [vmem:[%s3439_s1 + $0x18] sm:$0xff] }
  0x67   : > { %1840 = vmatprep.subr.bf16.mxu0 %v2447_v9  ;;  %1926 = vmatprep.subr.bf16.mxu1 %v2449_v11  ;;  %v190_v9 = vld [vmem:[%s3439_s1 + $0x38] sm:$0xff]  ;;  %v2502_v11 = vcombine.low %v431_v62, %v435_v63  ;;  %v2259_v13 = vcombine.high %v185_v6, %v189_v7  ;;  %v2258_v21 = vcombine.low %v185_v6, %v189_v7 }
  0x68   : > { %v2261_v14 = vcombine.high %v186_v8, %v190_v9  ;;  %v2260_v22 = vcombine.low %v186_v8, %v190_v9  ;;  %v249_v9 = vld [vmem:[%s3439_s1 + $0x210] sm:$0xff] }
  0x6a   : > { %1841 = vmatpush1.bf16.msra.mxu0 %v2446_v16  ;;  %1927 = vmatpush1.bf16.msra.mxu1 %v2448_v17  ;;  %v197_v16 = vld [vmem:[%s3439_s1 + $0x70] sm:$0xff]  ;;  %v3040_v17 = vld [vmem:[%s2704_s23 + $0x8] ss:$16 sps:$4 sm:$0xff]  }
  0x6b   : > { %1842 = vmatprep.subr.bf16.mxu0 %v2455_v18  ;;  %1928 = vmatprep.subr.bf16.mxu1 %v2457_v20  ;;  %v194_v18 = vld [vmem:[%s3439_s1 + $0x58] sm:$0xff]  ;;  %v2267_v23 = vcombine.high %v193_v15, %v197_v16  ;;  %v2266_v29 = vcombine.low %v193_v15, %v197_v16 }
  0x6c   : > { %v198_v20 = vld [vmem:[%s3439_s1 + $0x78] sm:$0xff] }
  0x6d   : > { %v2269_v24 = vcombine.high %v194_v18, %v198_v20  ;;  %v2268_v30 = vcombine.low %v194_v18, %v198_v20  ;;  %v257_v20 = vld [vmem:[%s3439_s1 + $0x250] sm:$0xff] }
  0x6e   : > { %1843 = vmatpush1.bf16.msra.mxu0 %v2454_v25  ;;  %1929 = vmatpush1.bf16.msra.mxu1 %v2456_v26  ;;  %v201_v25 = vld [vmem:[%s3439_s1 + $0x90] sm:$0xff] }
  0x6f   : > { %1844 = vmatprep.subr.bf16.mxu0 %v2463_v27  ;;  %1930 = vmatprep.subr.bf16.mxu1 %v2465_v28  ;;  %v205_v26 = vld [vmem:[%s3439_s1 + $0xb0] sm:$0xff]  ;;  %v202_v27 = vld [vmem:[%s3439_s1 + $0x98] sm:$0xff] }
  0x70   : > { %v206_v28 = vld [vmem:[%s3439_s1 + $0xb8] sm:$0xff]  ;;  %v2275_v31 = vcombine.high %v201_v25, %v205_v26  ;;  %v2274_v37 = vcombine.low %v201_v25, %v205_v26 }
  0x71   : > { %v2277_v32 = vcombine.high %v202_v27, %v206_v28  ;;  %v2276_v38 = vcombine.low %v202_v27, %v206_v28  ;;  %v265_v28 = vld [vmem:[%s3439_s1 + $0x290] sm:$0xff] }
  0x72   : > { %1845 = vmatpush1.bf16.msra.mxu0 %v2462_v33  ;;  %1931 = vmatpush1.bf16.msra.mxu1 %v2464_v34  ;;  %v209_v33 = vld [vmem:[%s3439_s1 + $0xd0] sm:$0xff] }
  0x73   : > { %1846 = vmatprep.subr.bf16.mxu0 %v2471_v35  ;;  %1932 = vmatprep.subr.bf16.mxu1 %v2473_v36  ;;  %v213_v34 = vld [vmem:[%s3439_s1 + $0xf0] sm:$0xff]  ;;  %v210_v35 = vld [vmem:[%s3439_s1 + $0xd8] sm:$0xff] }
  0x74   : > { %v214_v36 = vld [vmem:[%s3439_s1 + $0xf8] sm:$0xff]  ;;  %v2283_v39 = vcombine.high %v209_v33, %v213_v34 }
  0x75   : > { %v2285_v40 = vcombine.high %v210_v35, %v214_v36  ;;  %v2284_v45 = vcombine.low %v210_v35, %v214_v36  ;;  %v273_v36 = vld [vmem:[%s3439_s1 + $0x2d0] sm:$0xff] }
  0x76   : > { %1847 = vmatpush1.bf16.msra.mxu0 %v2470_v41  ;;  %1933 = vmatpush1.bf16.msra.mxu1 %v2472_v42  ;;  %v217_v41 = vld [vmem:[%s3439_s1 + $0x110] sm:$0xff] }
  0x77   : > { %1848 = vmatprep.subr.bf16.mxu0 %v2479_v43  ;;  %1934 = vmatprep.subr.bf16.mxu1 %v2481_v44  ;;  %v221_v42 = vld [vmem:[%s3439_s1 + $0x130] sm:$0xff]  ;;  %v222_v43 = vld [vmem:[%s3439_s1 + $0x138] sm:$0xff]  ;;  %v2282_v44 = vcombine.low %v209_v33, %v213_v34 }
  0x78   : > { %v2291_v46 = vcombine.high %v217_v41, %v221_v42 }
  0x7a   : > { %1849 = vmatpush1.bf16.msra.mxu0 %v2478_v49  ;;  %1935 = vmatpush1.bf16.msra.mxu1 %v2480_v50  ;;  %v229_v49 = vld [vmem:[%s3439_s1 + $0x170] sm:$0xff]  ;;  %v226_v50 = vld [vmem:[%s3439_s1 + $0x158] sm:$0xff] }
  0x7b   : > { %1850 = vmatprep.subr.bf16.mxu0 %v2487_v51  ;;  %1936 = vmatprep.subr.bf16.mxu1 %v2489_v52  ;;  %v230_v51 = vld [vmem:[%s3439_s1 + $0x178] sm:$0xff]  ;;  %v2290_v52 = vcombine.low %v217_v41, %v221_v42  ;;  %v2299_v54 = vcombine.high %v225_v48, %v229_v49 }
  0x7c   : > { %v2301_v55 = vcombine.high %v226_v50, %v230_v51  ;;  %v2300_v62 = vcombine.low %v226_v50, %v230_v51  ;;  %v289_v51 = vld [vmem:[%s3439_s1 + $0x350] sm:$0xff] }
  0x7e   : > { %1851 = vmatpush1.bf16.msra.mxu0 %v2486_v58  ;;  %1937 = vmatpush1.bf16.msra.mxu1 %v2488_v59  ;;  %v237_v58 = vld [vmem:[%s3439_s1 + $0x1b0] sm:$0xff]  ;;  %v234_v59 = vld [vmem:[%s3439_s1 + $0x198] sm:$0xff] }
  0x7f   : > { %1852 = vmatprep.subr.bf16.mxu0 %v2495_v60  ;;  %1938 = vmatprep.subr.bf16.mxu1 %v2497_v61  ;;  %v238_v60 = vld [vmem:[%s3439_s1 + $0x1b8] sm:$0xff]  ;;  %v2298_v61 = vcombine.low %v225_v48, %v229_v49  ;;  %v2307_v63 = vcombine.high %v233_v57, %v237_v58 }
  0x80   : > { %v2309_v0 = vcombine.high %v234_v59, %v238_v60  ;;  %v2308_v6 = vcombine.low %v234_v59, %v238_v60  ;;  %v297_v60 = vld [vmem:[%s3439_s1 + $0x390] sm:$0xff] }
  0x82   : > { %1853 = vmatpush1.bf16.msra.mxu0 %v2494_v2  ;;  %1939 = vmatpush1.bf16.msra.mxu1 %v2496_v3  ;;  %v245_v2 = vld [vmem:[%s3439_s1 + $0x1f0] sm:$0xff]  ;;  %v242_v3 = vld [vmem:[%s3439_s1 + $0x1d8] sm:$0xff] }
  0x83   : > { %1854 = vmatprep.subr.bf16.mxu0 %v2503_v4  ;;  %1940 = vmatprep.subr.bf16.mxu1 %v2505_v5  ;;  %v246_v4 = vld [vmem:[%s3439_s1 + $0x1f8] sm:$0xff]  ;;  %v2306_v5 = vcombine.low %v233_v57, %v237_v58  ;;  %v2315_v7 = vcombine.high %v241_v1, %v245_v2 }
  0x84   : > { %v2317_v8 = vcombine.high %v242_v3, %v246_v4  ;;  %v2316_v15 = vcombine.low %v242_v3, %v246_v4  ;;  %v305_v4 = vld [vmem:[%s3439_s1 + $0x3d0] sm:$0xff] }
  0x86   : > { %1855 = vmatpush1.bf16.msra.mxu0 %v2502_v11  ;;  %1941 = vmatpush1.bf16.msra.mxu1 %v2504_v12  ;;  %v253_v11 = vld [vmem:[%s3439_s1 + $0x230] sm:$0xff]  ;;  %v250_v12 = vld [vmem:[%s3439_s1 + $0x218] sm:$0xff] }
  0x87   : > { %1953 = vmatprep.subr.bf16.mxu0 %v2259_v13  ;;  %2039 = vmatprep.subr.bf16.mxu1 %v2261_v14  ;;  %v254_v13 = vld [vmem:[%s3439_s1 + $0x238] sm:$0xff]  ;;  %v2314_v14 = vcombine.low %v241_v1, %v245_v2  ;;  %v2323_v16 = vcombine.high %v249_v9, %v253_v11 }
  0x88   : > { %v2325_v18 = vcombine.high %v250_v12, %v254_v13  ;;  %v2324_v25 = vcombine.low %v250_v12, %v254_v13  ;;  %v313_v13 = vld [vmem:[%s3439_s1 + $0x410] sm:$0xff] }
  0x89   : > { %1857 = vmatmul.mubr.bf16.vlgmr.msra.gmra.mrb[0].mxu0 %v3040_v17  ;;  %1943 = vmatmul.mubr.bf16.vlgmr.msra.gmra.mrb[0].mxu1 %v3040_v17 }
  0x8a   : > { %1954 = vmatpush1.bf16.msra.mxu0 %v2258_v21  ;;  %2040 = vmatpush1.bf16.msra.mxu1 %v2260_v22  ;;  %v261_v21 = vld [vmem:[%s3439_s1 + $0x270] sm:$0xff]  ;;  %v258_v22 = vld [vmem:[%s3439_s1 + $0x258] sm:$0xff] }
  0x8b   : > { %1955 = vmatprep.subr.bf16.mxu0 %v2267_v23  ;;  %2041 = vmatprep.subr.bf16.mxu1 %v2269_v24  ;;  %v262_v23 = vld [vmem:[%s3439_s1 + $0x278] sm:$0xff]  ;;  %v2322_v24 = vcombine.low %v249_v9, %v253_v11  ;;  %v2331_v26 = vcombine.high %v257_v20, %v261_v21 }
  0x8c   : > { %1985 = vmatprep.mubr.bf16.mxu0 %v2713_v56  ;;  %2071 = vmatprep.mubr.bf16.mxu1 %v2713_v56  ;;  %v218_v56 = vld [vmem:[%s3439_s1 + $0x118] sm:$0xff]  ;;  %v2333_v27 = vcombine.high %v258_v22, %v262_v23  ;;  %v2332_v33 = vcombine.low %v258_v22, %v262_v23  ;;  %v321_v23 = vld [vmem:[%s3439_s1 + $0x450] sm:$0xff] }
  0x8d   : > { %v2293_v47 = vcombine.high %v218_v56, %v222_v43  ;;  %v2292_v53 = vcombine.low %v218_v56, %v222_v43  ;;  %v281_v43 = vld [vmem:[%s3439_s1 + $0x310] sm:$0xff] }
  0x8e   : > { %1956 = vmatpush1.bf16.msra.mxu0 %v2266_v29  ;;  %2042 = vmatpush1.bf16.msra.mxu1 %v2268_v30  ;;  %v269_v29 = vld [vmem:[%s3439_s1 + $0x2b0] sm:$0xff]  ;;  %v266_v30 = vld [vmem:[%s3439_s1 + $0x298] sm:$0xff] }
  0x8f   : > { %1957 = vmatprep.subr.bf16.mxu0 %v2275_v31  ;;  %2043 = vmatprep.subr.bf16.mxu1 %v2277_v32  ;;  %v270_v31 = vld [vmem:[%s3439_s1 + $0x2b8] sm:$0xff]  ;;  %v2330_v32 = vcombine.low %v257_v20, %v261_v21  ;;  %v2339_v34 = vcombine.high %v265_v28, %v269_v29 }
  0x90   : > { %v2341_v35 = vcombine.high %v266_v30, %v270_v31  ;;  %v2340_v41 = vcombine.low %v266_v30, %v270_v31  ;;  %v329_v31 = vld [vmem:[%s3439_s1 + $0x490] sm:$0xff] }
  0x92   : > { %1958 = vmatpush1.bf16.msra.mxu0 %v2274_v37  ;;  %2044 = vmatpush1.bf16.msra.mxu1 %v2276_v38  ;;  %v277_v37 = vld [vmem:[%s3439_s1 + $0x2f0] sm:$0xff]  ;;  %v274_v38 = vld [vmem:[%s3439_s1 + $0x2d8] sm:$0xff] }
  0x93   : > { %1959 = vmatprep.subr.bf16.mxu0 %v2283_v39  ;;  %2045 = vmatprep.subr.bf16.mxu1 %v2285_v40  ;;  %v278_v39 = vld [vmem:[%s3439_s1 + $0x2f8] sm:$0xff]  ;;  %v2338_v40 = vcombine.low %v265_v28, %v269_v29  ;;  %v2347_v42 = vcombine.high %v273_v36, %v277_v37 }
  0x94   : > { %v2349_v56 = vcombine.high %v274_v38, %v278_v39  ;;  %v2348_v48 = vcombine.low %v274_v38, %v278_v39  ;;  %v337_v39 = vld [vmem:[%s3439_s1 + $0x4d0] sm:$0xff] }
  0x96   : > { %1960 = vmatpush1.bf16.msra.mxu0 %v2282_v44  ;;  %2046 = vmatpush1.bf16.msra.mxu1 %v2284_v45  ;;  %v285_v44 = vld [vmem:[%s3439_s1 + $0x330] sm:$0xff]  ;;  %v282_v45 = vld [vmem:[%s3439_s1 + $0x318] sm:$0xff] }
  0x97   : > { %1961 = vmatprep.subr.bf16.mxu0 %v2291_v46  ;;  %2047 = vmatprep.subr.bf16.mxu1 %v2293_v47  ;;  %v286_v46 = vld [vmem:[%s3439_s1 + $0x338] sm:$0xff]  ;;  %v2346_v47 = vcombine.low %v273_v36, %v277_v37  ;;  %v2355_v49 = vcombine.high %v281_v43, %v285_v44 }
  0x98   : > { %v2357_v50 = vcombine.high %v282_v45, %v286_v46  ;;  %v2356_v57 = vcombine.low %v282_v45, %v286_v46  ;;  %v345_v45 = vld [vmem:[%s3439_s1 + $0x510] sm:$0xff] }
  0x99   : > { %v349_v46 = vld [vmem:[%s3439_s1 + $0x530] sm:$0xff] }
  0x9a   : > { %1962 = vmatpush1.bf16.msra.mxu0 %v2290_v52  ;;  %2048 = vmatpush1.bf16.msra.mxu1 %v2292_v53  ;;  %v293_v52 = vld [vmem:[%s3439_s1 + $0x370] sm:$0xff]  ;;  %v290_v53 = vld [vmem:[%s3439_s1 + $0x358] sm:$0xff] }
  0x9b   : > { %1963 = vmatprep.subr.bf16.mxu0 %v2299_v54  ;;  %2049 = vmatprep.subr.bf16.mxu1 %v2301_v55  ;;  %v294_v54 = vld [vmem:[%s3439_s1 + $0x378] sm:$0xff]  ;;  %v2354_v55 = vcombine.low %v281_v43, %v285_v44  ;;  %v2363_v58 = vcombine.high %v289_v51, %v293_v52 }
  0x9c   : > { %v2365_v59 = vcombine.high %v290_v53, %v294_v54  ;;  %v2364_v1 = vcombine.low %v290_v53, %v294_v54  ;;  %v357_v53 = vld [vmem:[%s3439_s1 + $0x570] sm:$0xff]  ;;  %v354_v54 = vld [vmem:[%s3439_s1 + $0x558] sm:$0xff] }
  0x9e   : > { %1964 = vmatpush1.bf16.msra.mxu0 %v2298_v61  ;;  %2050 = vmatpush1.bf16.msra.mxu1 %v2300_v62  ;;  %v301_v61 = vld [vmem:[%s3439_s1 + $0x3b0] sm:$0xff]  ;;  %v298_v62 = vld [vmem:[%s3439_s1 + $0x398] sm:$0xff] }
  0x9f   : > { %1965 = vmatprep.subr.bf16.mxu0 %v2307_v63  ;;  %2051 = vmatprep.subr.bf16.mxu1 %v2309_v0  ;;  %v302_v63 = vld [vmem:[%s3439_s1 + $0x3b8] sm:$0xff]  ;;  %v2362_v0 = vcombine.low %v289_v51, %v293_v52  ;;  %v2371_v2 = vcombine.high %v297_v60, %v301_v61  ;;  %v353_v52 = vld [vmem:[%s3439_s1 + $0x550] sm:$0xff] }
  0xa0   : > { %v2373_v3 = vcombine.high %v298_v62, %v302_v63  ;;  %v2372_v9 = vcombine.low %v298_v62, %v302_v63  ;;  %v365_v62 = vld [vmem:[%s3439_s1 + $0x5b0] sm:$0xff]  ;;  %v362_v63 = vld [vmem:[%s3439_s1 + $0x598] sm:$0xff] }
  0xa2   : > { %1966 = vmatpush1.bf16.msra.mxu0 %v2306_v5  ;;  %2052 = vmatpush1.bf16.msra.mxu1 %v2308_v6  ;;  %v309_v5 = vld [vmem:[%s3439_s1 + $0x3f0] sm:$0xff]  ;;  %v306_v6 = vld [vmem:[%s3439_s1 + $0x3d8] sm:$0xff] }
  0xa3   : > { %1967 = vmatprep.subr.bf16.mxu0 %v2315_v7  ;;  %2053 = vmatprep.subr.bf16.mxu1 %v2317_v8  ;;  %v310_v7 = vld [vmem:[%s3439_s1 + $0x3f8] sm:$0xff]  ;;  %v2370_v8 = vcombine.low %v297_v60, %v301_v61  ;;  %v2379_v11 = vcombine.high %v305_v4, %v309_v5  ;;  %v361_v61 = vld [vmem:[%s3439_s1 + $0x590] sm:$0xff] }
  0xa4   : > { %v2381_v12 = vcombine.high %v306_v6, %v310_v7  ;;  %v2380_v20 = vcombine.low %v306_v6, %v310_v7  ;;  %v373_v6 = vld [vmem:[%s3439_s1 + $0x5f0] sm:$0xff]  ;;  %v370_v7 = vld [vmem:[%s3439_s1 + $0x5d8] sm:$0xff] }
  0xa6   : > { %1968 = vmatpush1.bf16.msra.mxu0 %v2314_v14  ;;  %2054 = vmatpush1.bf16.msra.mxu1 %v2316_v15  ;;  %v317_v14 = vld [vmem:[%s3439_s1 + $0x430] sm:$0xff]  ;;  %v314_v15 = vld [vmem:[%s3439_s1 + $0x418] sm:$0xff] }
  0xa7   : > { %1969 = vmatprep.subr.bf16.mxu0 %v2323_v16  ;;  %2055 = vmatprep.subr.bf16.mxu1 %v2325_v18  ;;  %v318_v16 = vld [vmem:[%s3439_s1 + $0x438] sm:$0xff]  ;;  %v2378_v18 = vcombine.low %v305_v4, %v309_v5  ;;  %v2387_v21 = vcombine.high %v313_v13, %v317_v14  ;;  %v369_v5 = vld [vmem:[%s3439_s1 + $0x5d0] sm:$0xff] }
  0xa8   : > { %v2389_v22 = vcombine.high %v314_v15, %v318_v16  ;;  %v2388_v28 = vcombine.low %v314_v15, %v318_v16  ;;  %v381_v15 = vld [vmem:[%s3439_s1 + $0x630] sm:$0xff]  ;;  %v378_v16 = vld [vmem:[%s3439_s1 + $0x618] sm:$0xff] }
  0xaa   : > { %1970 = vmatpush1.bf16.msra.mxu0 %v2322_v24  ;;  %2056 = vmatpush1.bf16.msra.mxu1 %v2324_v25  ;;  %v325_v24 = vld [vmem:[%s3439_s1 + $0x470] sm:$0xff]  ;;  %v322_v25 = vld [vmem:[%s3439_s1 + $0x458] sm:$0xff] }
  0xab   : > { %1971 = vmatprep.subr.bf16.mxu0 %v2331_v26  ;;  %2057 = vmatprep.subr.bf16.mxu1 %v2333_v27  ;;  %v326_v26 = vld [vmem:[%s3439_s1 + $0x478] sm:$0xff]  ;;  %v2386_v27 = vcombine.low %v313_v13, %v317_v14  ;;  %v2395_v29 = vcombine.high %v321_v23, %v325_v24  ;;  %v377_v14 = vld [vmem:[%s3439_s1 + $0x610] sm:$0xff] }
  0xac   : > { %v2397_v30 = vcombine.high %v322_v25, %v326_v26  ;;  %v2396_v36 = vcombine.low %v322_v25, %v326_v26  ;;  %v389_v25 = vld [vmem:[%s3439_s1 + $0x670] sm:$0xff]  ;;  %v386_v26 = vld [vmem:[%s3439_s1 + $0x658] sm:$0xff] }
  0xae   : > { %1972 = vmatpush1.bf16.msra.mxu0 %v2330_v32  ;;  %2058 = vmatpush1.bf16.msra.mxu1 %v2332_v33  ;;  %v333_v32 = vld [vmem:[%s3439_s1 + $0x4b0] sm:$0xff]  ;;  %v330_v33 = vld [vmem:[%s3439_s1 + $0x498] sm:$0xff] }
  0xaf   : > { %1973 = vmatprep.subr.bf16.mxu0 %v2339_v34  ;;  %2059 = vmatprep.subr.bf16.mxu1 %v2341_v35  ;;  %v334_v34 = vld [vmem:[%s3439_s1 + $0x4b8] sm:$0xff]  ;;  %v2394_v35 = vcombine.low %v321_v23, %v325_v24  ;;  %v2403_v37 = vcombine.high %v329_v31, %v333_v32  ;;  %v385_v24 = vld [vmem:[%s3439_s1 + $0x650] sm:$0xff] }
  0xb0   : > { %v2405_v38 = vcombine.high %v330_v33, %v334_v34 }
  0xb2   : > { %1974 = vmatpush1.bf16.msra.mxu0 %v2338_v40  ;;  %2060 = vmatpush1.bf16.msra.mxu1 %v2340_v41  ;;  %v341_v40 = vld [vmem:[%s3439_s1 + $0x4f0] sm:$0xff]  ;;  %v342_v41 = vld [vmem:[%s3439_s1 + $0x4f8] sm:$0xff] }
  0xb3   : > { %1975 = vmatprep.subr.bf16.mxu0 %v2347_v42  ;;  %2061 = vmatprep.subr.bf16.mxu1 %v2349_v56  ;;  %v2402_v42 = vcombine.low %v329_v31, %v333_v32  ;;  %v2404_v56 = vcombine.low %v330_v33, %v334_v34  ;;  %v2411_v43 = vcombine.high %v337_v39, %v341_v40  ;;  %v393_v32 = vld [vmem:[%s3439_s1 + $0x690] sm:$0xff]  ;;  %v394_v34 = vld [vmem:[%s3439_s1 + $0x698] sm:$0xff] }
  0xb4   : > { %v397_v33 = vld [vmem:[%s3439_s1 + $0x6b0] sm:$0xff] }
  0xb6   : > { %1976 = vmatpush1.bf16.msra.mxu0 %v2346_v47  ;;  %2062 = vmatpush1.bf16.msra.mxu1 %v2348_v48  ;;  %v350_v47 = vld [vmem:[%s3439_s1 + $0x538] sm:$0xff]  ;;  %v2410_v48 = vcombine.low %v337_v39, %v341_v40  ;;  %v401_v40 = vld [vmem:[%s3439_s1 + $0x6d0] sm:$0xff] }
  0xb7   : > { %1977 = vmatprep.subr.bf16.mxu0 %v2355_v49  ;;  %2063 = vmatprep.subr.bf16.mxu1 %v2357_v50  ;;  %v2419_v50 = vcombine.high %v345_v45, %v349_v46 }
  0xba   : > { %1978 = vmatpush1.bf16.msra.mxu0 %v2354_v55  ;;  %2064 = vmatpush1.bf16.msra.mxu1 %v2356_v57  ;;  %v358_v55 = vld [vmem:[%s3439_s1 + $0x578] sm:$0xff]  ;;  %v2418_v57 = vcombine.low %v345_v45, %v349_v46  ;;  %v409_v46 = vld [vmem:[%s3439_s1 + $0x710] sm:$0xff] }
  0xbb   : > { %1979 = vmatprep.subr.bf16.mxu0 %v2363_v58  ;;  %2065 = vmatprep.subr.bf16.mxu1 %v2365_v59  ;;  %v2427_v59 = vcombine.high %v353_v52, %v357_v53  ;;  %v2429_v60 = vcombine.high %v354_v54, %v358_v55 }
  0xbe   : > { %1980 = vmatpush1.bf16.msra.mxu0 %v2362_v0  ;;  %2066 = vmatpush1.bf16.msra.mxu1 %v2364_v1  ;;  %v366_v0 = vld [vmem:[%s3439_s1 + $0x5b8] sm:$0xff]  ;;  %v2426_v1 = vcombine.low %v353_v52, %v357_v53  ;;  %v417_v53 = vld [vmem:[%s3439_s1 + $0x750] sm:$0xff] }
  0xbf   : > { %1981 = vmatprep.subr.bf16.mxu0 %v2371_v2  ;;  %2067 = vmatprep.subr.bf16.mxu1 %v2373_v3  ;;  %v2428_v2 = vcombine.low %v354_v54, %v358_v55  ;;  %v2435_v3 = vcombine.high %v361_v61, %v365_v62  ;;  %v2437_v4 = vcombine.high %v362_v63, %v366_v0  ;;  %v421_v54 = vld [vmem:[%s3439_s1 + $0x770] sm:$0xff]  ;;  %v418_v55 = vld [vmem:[%s3439_s1 + $0x758] sm:$0xff] }
  0xc2   : > { %1982 = vmatpush1.bf16.msra.mxu0 %v2370_v8  ;;  %2068 = vmatpush1.bf16.msra.mxu1 %v2372_v9  ;;  %v374_v8 = vld [vmem:[%s3439_s1 + $0x5f8] sm:$0xff]  ;;  %v2434_v9 = vcombine.low %v361_v61, %v365_v62  ;;  %v425_v62 = vld [vmem:[%s3439_s1 + $0x790] sm:$0xff] }
  0xc3   : > { %1983 = vmatprep.subr.bf16.mxu0 %v2379_v11  ;;  %2069 = vmatprep.subr.bf16.mxu1 %v2381_v12  ;;  %v2436_v11 = vcombine.low %v362_v63, %v366_v0  ;;  %v2443_v12 = vcombine.high %v369_v5, %v373_v6  ;;  %v2445_v13 = vcombine.high %v370_v7, %v374_v8  ;;  %v429_v63 = vld [vmem:[%s3439_s1 + $0x7b0] sm:$0xff]  ;;  %v426_v0 = vld [vmem:[%s3439_s1 + $0x798] sm:$0xff] }
  0xc6   : > { %1984 = vmatpush1.bf16.msra.mxu0 %v2378_v18  ;;  %2070 = vmatpush1.bf16.msra.mxu1 %v2380_v20  ;;  %v382_v18 = vld [vmem:[%s3439_s1 + $0x638] sm:$0xff]  ;;  %v2442_v20 = vcombine.low %v369_v5, %v373_v6  ;;  %v433_v6 = vld [vmem:[%s3439_s1 + $0x7d0] sm:$0xff] }
  0xc7   : > { %1996 = vmatprep.subr.bf16.mxu0 %v2387_v21  ;;  %2082 = vmatprep.subr.bf16.mxu1 %v2389_v22  ;;  %v2444_v21 = vcombine.low %v370_v7, %v374_v8  ;;  %v2451_v22 = vcombine.high %v377_v14, %v381_v15  ;;  %v2453_v23 = vcombine.high %v378_v16, %v382_v18  ;;  %v437_v7 = vld [vmem:[%s3439_s1 + $0x7f0] sm:$0xff]  ;;  %v434_v8 = vld [vmem:[%s3439_s1 + $0x7d8] sm:$0xff] }
  0xc9   : > { %1986 = vmatmul.mubr.bf16.vlgmr.msra.gmra.mrb[4].mxu0 %v2838_v10  ;;  %2072 = vmatmul.mubr.bf16.vlgmr.msra.gmra.mrb[4].mxu1 %v2838_v10  ;;  %v338_v10 = vld [vmem:[%s3439_s1 + $0x4d8] sm:$0xff] }
  0xca   : > { %1997 = vmatpush1.bf16.msra.mxu0 %v2386_v27  ;;  %2083 = vmatpush1.bf16.msra.mxu1 %v2388_v28  ;;  %v2413_v44 = vcombine.high %v338_v10, %v342_v41  ;;  %v2412_v49 = vcombine.low %v338_v10, %v342_v41  ;;  %v390_v27 = vld [vmem:[%s3439_s1 + $0x678] sm:$0xff]  ;;  %v2450_v28 = vcombine.low %v377_v14, %v381_v15  ;;  %v405_v10 = vld [vmem:[%s3439_s1 + $0x6f0] sm:$0xff] }
  0xcb   : > { %1998 = vmatprep.subr.bf16.mxu0 %v2395_v29  ;;  %2084 = vmatprep.subr.bf16.mxu1 %v2397_v30  ;;  %v2452_v29 = vcombine.low %v378_v16, %v382_v18  ;;  %v2459_v30 = vcombine.high %v385_v24, %v389_v25  ;;  %v2461_v31 = vcombine.high %v386_v26, %v390_v27  ;;  %v402_v41 = vld [vmem:[%s3439_s1 + $0x6d8] sm:$0xff]  ;;  %v441_v18 = vlaneseq }
  0xcc   : > { %2028 = vmatprep.mubr.bf16.mxu0 %v2853_v19  ;;  %2114 = vmatprep.mubr.bf16.mxu1 %v2853_v19  ;;  %v346_v19 = vld [vmem:[%s3439_s1 + $0x518] sm:$0xff]  ;;  %v2506_v15 = vcombine.low %v433_v6, %v437_v7 }
  0xcd   : > { %v2421_v51 = vcombine.high %v346_v19, %v350_v47  ;;  %v2420_v58 = vcombine.low %v346_v19, %v350_v47  ;;  %v413_v19 = vld [vmem:[%s3439_s1 + $0x730] sm:$0xff]  ;;  %v410_v47 = vld [vmem:[%s3439_s1 + $0x718] sm:$0xff] }
  0xce   : > { %1999 = vmatpush1.bf16.msra.mxu0 %v2394_v35  ;;  %2085 = vmatpush1.bf16.msra.mxu1 %v2396_v36  ;;  %v398_v35 = vld [vmem:[%s3439_s1 + $0x6b8] sm:$0xff]  ;;  %v2458_v36 = vcombine.low %v385_v24, %v389_v25 }
  0xcf   : > { %2000 = vmatprep.subr.bf16.mxu0 %v2403_v37  ;;  %2086 = vmatprep.subr.bf16.mxu1 %v2405_v38  ;;  %v2460_v37 = vcombine.low %v386_v26, %v390_v27  ;;  %v2467_v38 = vcombine.high %v393_v32, %v397_v33  ;;  %v2469_v39 = vcombine.high %v394_v34, %v398_v35 }
  0xd2   : > { %2001 = vmatpush1.bf16.msra.mxu0 %v2402_v42  ;;  %2087 = vmatpush1.bf16.msra.mxu1 %v2404_v56  ;;  %v406_v42 = vld [vmem:[%s3439_s1 + $0x6f8] sm:$0xff]  ;;  %v2466_v56 = vcombine.low %v393_v32, %v397_v33 }
  0xd3   : > { %2002 = vmatprep.subr.bf16.mxu0 %v2411_v43  ;;  %2088 = vmatprep.subr.bf16.mxu1 %v2413_v44  ;;  %v2468_v43 = vcombine.low %v394_v34, %v398_v35  ;;  %v2475_v44 = vcombine.high %v401_v40, %v405_v10  ;;  %v2477_v45 = vcombine.high %v402_v41, %v406_v42 }
  0xd6   : > { %2003 = vmatpush1.bf16.msra.mxu0 %v2410_v48  ;;  %2089 = vmatpush1.bf16.msra.mxu1 %v2412_v49  ;;  %v414_v48 = vld [vmem:[%s3439_s1 + $0x738] sm:$0xff]  ;;  %v2474_v49 = vcombine.low %v401_v40, %v405_v10 }
  0xd7   : > { %2004 = vmatprep.subr.bf16.mxu0 %v2419_v50  ;;  %2090 = vmatprep.subr.bf16.mxu1 %v2421_v51  ;;  %v2476_v50 = vcombine.low %v402_v41, %v406_v42  ;;  %v2483_v51 = vcombine.high %v409_v46, %v413_v19  ;;  %v2485_v52 = vcombine.high %v410_v47, %v414_v48 }
  0xda   : > { %2005 = vmatpush1.bf16.msra.mxu0 %v2418_v57  ;;  %2091 = vmatpush1.bf16.msra.mxu1 %v2420_v58  ;;  %v422_v57 = vld [vmem:[%s3439_s1 + $0x778] sm:$0xff]  ;;  %v2482_v58 = vcombine.low %v409_v46, %v413_v19 }
  0xdb   : > { %2006 = vmatprep.subr.bf16.mxu0 %v2427_v59  ;;  %2092 = vmatprep.subr.bf16.mxu1 %v2429_v60  ;;  %v2484_v59 = vcombine.low %v410_v47, %v414_v48  ;;  %v2491_v60 = vcombine.high %v417_v53, %v421_v54  ;;  %v2493_v61 = vcombine.high %v418_v55, %v422_v57 }
  0xde   : > { %2007 = vmatpush1.bf16.msra.mxu0 %v2426_v1  ;;  %2093 = vmatpush1.bf16.msra.mxu1 %v2428_v2  ;;  %v430_v1 = vld [vmem:[%s3439_s1 + $0x7b8] sm:$0xff]  ;;  %v2490_v2 = vcombine.low %v417_v53, %v421_v54 }
  0xdf   : > { %2008 = vmatprep.subr.bf16.mxu0 %v2435_v3  ;;  %2094 = vmatprep.subr.bf16.mxu1 %v2437_v4  ;;  %v2492_v3 = vcombine.low %v418_v55, %v422_v57  ;;  %v2499_v4 = vcombine.high %v425_v62, %v429_v63  ;;  %v2501_v5 = vcombine.high %v426_v0, %v430_v1 }
  0xe2   : > { %2009 = vmatpush1.bf16.msra.mxu0 %v2434_v9  ;;  %2095 = vmatpush1.bf16.msra.mxu1 %v2436_v11  ;;  %v438_v9 = vld [vmem:[%s3439_s1 + $0x7f8] sm:$0xff]  ;;  %v2498_v11 = vcombine.low %v425_v62, %v429_v63 }
  0xe3   : > { %2010 = vmatprep.subr.bf16.mxu0 %v2443_v12  ;;  %2096 = vmatprep.subr.bf16.mxu1 %v2445_v13  ;;  %v2500_v12 = vcombine.low %v426_v0, %v430_v1  ;;  %v2507_v13 = vcombine.high %v433_v6, %v437_v7  ;;  %v2509_v14 = vcombine.high %v434_v8, %v438_v9 }
  0xe4   : > { %v2508_v16 = vcombine.low %v434_v8, %v438_v9 }
  0xe6   : > { %2011 = vmatpush1.bf16.msra.mxu0 %v2442_v20  ;;  %2097 = vmatpush1.bf16.msra.mxu1 %v2444_v21  ;;  %v442_v20 = vshrl.u32 %v441_v18, 7 }
  0xe7   : > { %2012 = vmatprep.subr.bf16.mxu0 %v2451_v22  ;;  %2098 = vmatprep.subr.bf16.mxu1 %v2453_v23  ;;  %v439_v22 = vld [vmem:[%s3440_s2] sm:$0xff] }
  0xe8   : > { %v443_v21 = vsub.s32 0, %v442_v20  ;;  %v451_v23 = vsub.s32 2, %v442_v20  ;;  %v447_v24 = vsub.s32 1, %v442_v20  ;;  %v455_v25 = vsub.s32 3, %v442_v20 }
  0xe9   : > { %v459_v19 = vsub.s32 4, %v442_v20  ;;  %v467_v47 = vsub.s32 6, %v442_v20  ;;  %v463_v48 = vsub.s32 5, %v442_v20 }
  0xea   : > { %2013 = vmatpush1.bf16.msra.mxu0 %v2450_v28  ;;  %2099 = vmatpush1.bf16.msra.mxu1 %v2452_v29  ;;  %v444_v26 = vrot.slane %v439_v22, %v443_v21  ;;  %v452_v27 = vrot.slane %v439_v22, %v451_v23  ;;  %v448_v28 = vrot.slane %v439_v22, %v447_v24 }
  0xeb   : > { %2014 = vmatprep.subr.bf16.mxu0 %v2459_v30  ;;  %2100 = vmatprep.subr.bf16.mxu1 %v2461_v31  ;;  %v456_v29 = vrot.slane %v439_v22, %v455_v25 }
  0xee   : > { %2015 = vmatpush1.bf16.msra.mxu0 %v2458_v36  ;;  %2101 = vmatpush1.bf16.msra.mxu1 %v2460_v37 }
  0xef   : > { %2016 = vmatprep.subr.bf16.mxu0 %v2467_v38  ;;  %2102 = vmatprep.subr.bf16.mxu1 %v2469_v39 }
  0xf2   : > { %2017 = vmatpush1.bf16.msra.mxu0 %v2466_v56  ;;  %2103 = vmatpush1.bf16.msra.mxu1 %v2468_v43 }
  0xf3   : > { %2018 = vmatprep.subr.bf16.mxu0 %v2475_v44  ;;  %2104 = vmatprep.subr.bf16.mxu1 %v2477_v45 }
  0xf6   : > { %2019 = vmatpush1.bf16.msra.mxu0 %v2474_v49  ;;  %2105 = vmatpush1.bf16.msra.mxu1 %v2476_v50  ;;  %v471_v49 = vsub.s32 7, %v442_v20  ;;  %v460_v50 = vrot.slane %v439_v22, %v459_v19 }
  0xf7   : > { %2020 = vmatprep.subr.bf16.mxu0 %v2483_v51  ;;  %2106 = vmatprep.subr.bf16.mxu1 %v2485_v52  ;;  %v468_v51 = vrot.slane %v439_v22, %v467_v47  ;;  %v464_v52 = vrot.slane %v439_v22, %v463_v48 }
  0xf8   : > { %v472_v53 = vrot.slane %v439_v22, %v471_v49 }
  0xfa   : > { %2021 = vmatpush1.bf16.msra.mxu0 %v2482_v58  ;;  %2107 = vmatpush1.bf16.msra.mxu1 %v2484_v59 }
  0xfb   : > { %2022 = vmatprep.subr.bf16.mxu0 %v2491_v60  ;;  %2108 = vmatprep.subr.bf16.mxu1 %v2493_v61 }
  0xfe   : > { %2023 = vmatpush1.bf16.msra.mxu0 %v2490_v2  ;;  %2109 = vmatpush1.bf16.msra.mxu1 %v2492_v3 }
  0xff   : > { %2024 = vmatprep.subr.bf16.mxu0 %v2499_v4  ;;  %2110 = vmatprep.subr.bf16.mxu1 %v2501_v5 }
 0x102   : > { %2025 = vmatpush1.bf16.msra.mxu0 %v2498_v11  ;;  %2111 = vmatpush1.bf16.msra.mxu1 %v2500_v12 }
 0x103   : > { %2026 = vmatprep.subr.bf16.mxu0 %v2507_v13  ;;  %2112 = vmatprep.subr.bf16.mxu1 %v2509_v14 }
 0x106   : > { %2027 = vmatpush1.bf16.msra.mxu0 %v2506_v15  ;;  %2113 = vmatpush1.bf16.msra.mxu1 %v2508_v16 }
 0x109   : > { %2029 = vmatmul.mubr.bf16.vlgmr.msra.gmra.mrb[4].mxu0 %v3040_v17  ;;  %2115 = vmatmul.mubr.bf16.vlgmr.msra.gmra.mrb[4].mxu1 %v3040_v17 }
 0x15c   : > { %v1858_v30 = vpop.f32.mrb[0].mxu0  ;;  %v1944_v32 = vpop.f32.mrb[0].mxu1 }
 0x15d   : > { %v2530_v31 = vadd.f32 %v1858_v30, %v444_v26  ;;  %v1860_v33 = vpop.f32.mrb[1].mxu0  ;;  %v2534_v17 = vadd.f32 %v1944_v32, %v452_v27  ;;  %v1946_v35 = vpop.f32.mrb[1].mxu1 }
 0x15e   : > { %v2531_v34 = vadd.f32 %v1860_v33, %v448_v28  ;;  %v1862_v36 = vpop.f32.mrb[2].mxu0  ;;  %v2535_v37 = vadd.f32 %v1946_v35, %v456_v29  ;;  %v1948_v39 = vpop.f32.mrb[2].mxu1 }
 0x15f   : > { %v2532_v38 = vadd.f32 %v1862_v36, %v444_v26  ;;  %v1864_v40 = vpop.f32.mrb[3].mxu0  ;;  %v2536_v41 = vadd.f32 %v1948_v39, %v452_v27  ;;  %v1950_v56 = vpop.f32.mrb[3].mxu1 }
 0x160   : > { %v2522_v10 = vpack.c.bf16 %v2531_v34, %v2530_v31  ;;  %v2533_v42 = vadd.f32 %v1864_v40, %v448_v28  ;;  %v2523_v43 = vpack.c.bf16 %v2535_v37, %v2534_v17  ;;  %v2537_v44 = vadd.f32 %v1950_v56, %v456_v29 }
 0x162   : > { %2173 = vst [vmem:[%s3425_s19] sm:$0xff] %v2522_v10  ;;  %v2526_v45 = vpack.c.bf16 %v2533_v42, %v2532_v38  ;;  %2174 = vst [vmem:[%s3425_s19 + $0x8] sm:$0xff] %v2523_v43  ;;  %v2527_v46 = vpack.c.bf16 %v2537_v44, %v2536_v41 }
 0x164   : > { %2177 = vst [vmem:[%s3425_s19 + $0x20] sm:$0xff] %v2526_v45  ;;  %2178 = vst [vmem:[%s3425_s19 + $0x28] sm:$0xff] %v2527_v46 }
 0x1dc   : > { %v2030_v54 = vpop.f32.mrb[4].mxu0  ;;  %v2116_v57 = vpop.f32.mrb[4].mxu1 }
 0x1dd   : > { %v2538_v55 = vadd.f32 %v2030_v54, %v460_v50  ;;  %v2032_v58 = vpop.f32.mrb[5].mxu0  ;;  %v2542_v59 = vadd.f32 %v2116_v57, %v468_v51  ;;  %v2118_v61 = vpop.f32.mrb[5].mxu1 }
 0x1de   : > { %v2539_v60 = vadd.f32 %v2032_v58, %v464_v52  ;;  %v2034_v62 = vpop.f32.mrb[6].mxu0  ;;  %v2543_v63 = vadd.f32 %v2118_v61, %v472_v53  ;;  %v2120_v1 = vpop.f32.mrb[6].mxu1 }
 0x1df   : > { %v2540_v0 = vadd.f32 %v2034_v62, %v460_v50  ;;  %v2036_v2 = vpop.f32.mrb[7].mxu0  ;;  %v2544_v4 = vadd.f32 %v2120_v1, %v468_v51  ;;  %v2122_v6 = vpop.f32.mrb[7].mxu1 }
 0x1e0   : > { %v2524_v3 = vpack.c.bf16 %v2539_v60, %v2538_v55  ;;  %v2541_v5 = vadd.f32 %v2036_v2, %v464_v52  ;;  %v2525_v7 = vpack.c.bf16 %v2543_v63, %v2542_v59  ;;  %v2545_v8 = vadd.f32 %v2122_v6, %v472_v53 }
 0x1e2   : > { %2175 = vst [vmem:[%s3425_s19 + $0x10] sm:$0xff] %v2524_v3  ;;  %v2528_v9 = vpack.c.bf16 %v2541_v5, %v2540_v0  ;;  %2176 = vst [vmem:[%s3425_s19 + $0x18] sm:$0xff] %v2525_v7  ;;  %v2529_v11 = vpack.c.bf16 %v2545_v8, %v2544_v4 }
 0x1e4   : > { %2179 = vst [vmem:[%s3425_s19 + $0x30] sm:$0xff] %v2528_v9  ;;  %2180 = vst [vmem:[%s3425_s19 + $0x38] sm:$0xff] %v2529_v11 }
 0x1e5 PF: > { %s13_s12 = sadd.s32 1, %s2582_s12  }
 0x1e6   : > { %p10_p4 = scmp.ge.s32.totalorder %s13_s12, 4  }
 0x1e8   :  { %12 = sbr.rel (!%p10_p4) target bundleno = 1 (0x1), region = 62 }

// kernel: encoder_forward.75
= control target key start
LH: loop header
LB: loop body
LE: loop exit
PB: predicated region body
PF: predicated region fallthrough
CT: control target
= control target key end

     0   :  { %s1654_s12 = smov 0   ;;  %s2090_s0 = inlined_call_operand.vmem [shape: bf16[32,1024], index: 0, kind: input, shape index: {}]   ;;  %s2091_s1 = inlined_call_operand.vmem [shape: bf16[1024,256], index: 1, kind: input, shape index: {}]   ;;  %s2092_s2 = inlined_call_operand.vmem [shape: f32[1,256], index: 2, kind: input, shape index: {}]   ;;  %s2093_s3 = inlined_call_operand.vmem [shape: bf16[32,256], index: 3, kind: output, shape index: {}]  }
   0x1 LB: > { %s1255_s13 = sadd.s32 4294967295, %s1632_s12   ;;  %p1259_p0 = scmp.ge.s32.totalorder %s1632_s12, 1  ;;  %s1632_s12 = sphi %s1654_s12, %s13_s12  }
   0x2   : > { %p139_p1 = scmp.lt.s32.totalorder %s1632_s12, 3 }
   0x4   : > { %p140_p2 = pnand %p1259_p0, %p139_p1 }
   0x5   : > { %v1434_v0 = vld [vmem:[%s2091_s1 + $0x4] ss:$8 sps:$4 sm:$0xff] (!%p140_p2)   ;;  %v1438_v2 = vld [vmem:[%s2091_s1] ss:$8 sps:$4 sm:$0xff] (!%p140_p2)   ;;  %v1440_v4 = vld [vmem:[%s2091_s1 + $0x14] ss:$8 sps:$4 sm:$0xff] (!%p140_p2)  }
   0x6   : > { %143 = sbr.rel (%p140_p2) target bundleno = 358 (0x166), region = 32  ;;  %v1436_v1 = vld [vmem:[%s2091_s1 + $0x204] ss:$8 sps:$4 sm:$0xff] (!%p140_p2)   ;;  %1007 = vmatprep.subr.bf16.mxu1 (!%p140_p2), %v1434_v0  ;;  %v1439_v3 = vld [vmem:[%s2091_s1 + $0x200] ss:$8 sps:$4 sm:$0xff] (!%p140_p2)   ;;  %s1260_s24 = sshll.u32 (!%p140_p2), %s1255_s13, 1 }
   0x7   : > { %1093 = vmatprep.subr.bf16.mxu0 (!%p140_p2), %v1436_v1  ;;  %1008 = vmatpush1.bf16.msra.mxu1 (!%p140_p2), %v1438_v2  ;;  %v1442_v5 = vld [vmem:[%s2091_s1 + $0x214] ss:$8 sps:$4 sm:$0xff] (!%p140_p2)   ;;  %v1444_v6 = vld [vmem:[%s2091_s1 + $0x10] ss:$8 sps:$4 sm:$0xff] (!%p140_p2)   ;;  %v1446_v8 = vld [vmem:[%s2091_s1 + $0x24] ss:$8 sps:$4 sm:$0xff] (!%p140_p2)  }
   0x8   : > { %1094 = vmatpush1.bf16.msra.mxu0 (!%p140_p2), %v1439_v3  ;;  %1009 = vmatprep.subr.bf16.mxu1 (!%p140_p2), %v1440_v4  ;;  %v1445_v7 = vld [vmem:[%s2091_s1 + $0x210] ss:$8 sps:$4 sm:$0xff] (!%p140_p2)   ;;  %v1448_v9 = vld [vmem:[%s2091_s1 + $0x224] ss:$8 sps:$4 sm:$0xff] (!%p140_p2)   ;;  %v1450_v10 = vld [vmem:[%s2091_s1 + $0x20] ss:$8 sps:$4 sm:$0xff] (!%p140_p2)  }
   0x9   : > { %1095 = vmatprep.subr.bf16.mxu0 (!%p140_p2), %v1442_v5  ;;  %v1451_v11 = vld [vmem:[%s2091_s1 + $0x220] ss:$8 sps:$4 sm:$0xff] (!%p140_p2)   ;;  %v1452_v12 = vld [vmem:[%s2091_s1 + $0x34] ss:$8 sps:$4 sm:$0xff] (!%p140_p2)   ;;  %v1456_v14 = vld [vmem:[%s2091_s1 + $0x30] ss:$8 sps:$4 sm:$0xff] (!%p140_p2)  }
   0xa   : > { %v1454_v13 = vld [vmem:[%s2091_s1 + $0x234] ss:$8 sps:$4 sm:$0xff] (!%p140_p2)   ;;  %v1457_v15 = vld [vmem:[%s2091_s1 + $0x230] ss:$8 sps:$4 sm:$0xff] (!%p140_p2)   ;;  %v1458_v16 = vld [vmem:[%s2091_s1 + $0x44] ss:$8 sps:$4 sm:$0xff] (!%p140_p2)  }
   0xb   : > { %1010 = vmatpush1.bf16.msra.mxu1 (!%p140_p2), %v1444_v6  ;;  %v1460_v17 = vld [vmem:[%s2091_s1 + $0x244] ss:$8 sps:$4 sm:$0xff] (!%p140_p2)   ;;  %v1462_v18 = vld [vmem:[%s2091_s1 + $0x40] ss:$8 sps:$4 sm:$0xff] (!%p140_p2)   ;;  %v1464_v20 = vld [vmem:[%s2091_s1 + $0x54] ss:$8 sps:$4 sm:$0xff] (!%p140_p2)  }
   0xc   : > { %1096 = vmatpush1.bf16.msra.mxu0 (!%p140_p2), %v1445_v7  ;;  %1011 = vmatprep.subr.bf16.mxu1 (!%p140_p2), %v1446_v8  ;;  %v1463_v19 = vld [vmem:[%s2091_s1 + $0x240] ss:$8 sps:$4 sm:$0xff] (!%p140_p2)   ;;  %v1466_v21 = vld [vmem:[%s2091_s1 + $0x254] ss:$8 sps:$4 sm:$0xff] (!%p140_p2)   ;;  %v1468_v22 = vld [vmem:[%s2091_s1 + $0x50] ss:$8 sps:$4 sm:$0xff] (!%p140_p2)  }
   0xd   : > { %1097 = vmatprep.subr.bf16.mxu0 %v1448_v9  ;;  %v1469_v23 = vld [vmem:[%s2091_s1 + $0x250] ss:$8 sps:$4 sm:$0xff]   ;;  %v1470_v24 = vld [vmem:[%s2091_s1 + $0x64] ss:$8 sps:$4 sm:$0xff]   ;;  %v1474_v26 = vld [vmem:[%s2091_s1 + $0x60] ss:$8 sps:$4 sm:$0xff]  }
   0xe   : > { %v1472_v25 = vld [vmem:[%s2091_s1 + $0x264] ss:$8 sps:$4 sm:$0xff]   ;;  %v1475_v27 = vld [vmem:[%s2091_s1 + $0x260] ss:$8 sps:$4 sm:$0xff]   ;;  %v1476_v28 = vld [vmem:[%s2091_s1 + $0x74] ss:$8 sps:$4 sm:$0xff]  }
   0xf   : > { %1012 = vmatpush1.bf16.msra.mxu1 %v1450_v10  ;;  %v1478_v29 = vld [vmem:[%s2091_s1 + $0x274] ss:$8 sps:$4 sm:$0xff]   ;;  %v1480_v30 = vld [vmem:[%s2091_s1 + $0x70] ss:$8 sps:$4 sm:$0xff]   ;;  %v1482_v32 = vld [vmem:[%s2091_s1 + $0x84] ss:$8 sps:$4 sm:$0xff]  }
  0x10   : > { %1098 = vmatpush1.bf16.msra.mxu0 %v1451_v11  ;;  %1013 = vmatprep.subr.bf16.mxu1 %v1452_v12  ;;  %v1481_v31 = vld [vmem:[%s2091_s1 + $0x270] ss:$8 sps:$4 sm:$0xff]   ;;  %p166_p3 = scmp.lt.s32.totalorder %s1260_s24, 3  ;;  %v1484_v33 = vld [vmem:[%s2091_s1 + $0x284] ss:$8 sps:$4 sm:$0xff]  }
  0x11   : > { %1099 = vmatprep.subr.bf16.mxu0 %v1454_v13  ;;  %v1486_v34 = vld [vmem:[%s2091_s1 + $0x80] ss:$8 sps:$4 sm:$0xff]   ;;  %v1488_v36 = vld [vmem:[%s2091_s1 + $0x94] ss:$8 sps:$4 sm:$0xff]   ;;  %v1492_v38 = vld [vmem:[%s2091_s1 + $0x90] ss:$8 sps:$4 sm:$0xff]  }
  0x12   : > { %v1487_v35 = vld [vmem:[%s2091_s1 + $0x280] ss:$8 sps:$4 sm:$0xff]   ;;  %s2095_s24 = smov (!%p166_p3, %s1260_s24), 3  ;;  %v1490_v37 = vld [vmem:[%s2091_s1 + $0x294] ss:$8 sps:$4 sm:$0xff]  }
  0x13   : > { %1014 = vmatpush1.bf16.msra.mxu1 %v1456_v14  ;;  %v1493_v39 = vld [vmem:[%s2091_s1 + $0x290] ss:$8 sps:$4 sm:$0xff]   ;;  %v1494_v40 = vld [vmem:[%s2091_s1 + $0xa4] ss:$8 sps:$4 sm:$0xff]   ;;  %s1406_s21 = sshll.u32 %s2095_s24, 5  ;;  %s1407_s30 = sshll.u32 %s2095_s24, 3 }
  0x14   : > { %1100 = vmatpush1.bf16.msra.mxu0 %v1457_v15  ;;  %1015 = vmatprep.subr.bf16.mxu1 %v1458_v16  ;;  %v1496_v41 = vld [vmem:[%s2091_s1 + $0x2a4] ss:$8 sps:$4 sm:$0xff]   ;;  %v1498_v42 = vld [vmem:[%s2091_s1 + $0xa0] ss:$8 sps:$4 sm:$0xff]   ;;  %s1802_s4 = scalar_lea.vmem %s2090_s0, %s1406_s21  ;;  %v1500_v44 = vld [vmem:[%s2091_s1 + $0xb4] ss:$8 sps:$4 sm:$0xff]  }
  0x15   : > { %1101 = vmatprep.subr.bf16.mxu0 %v1460_v17  ;;  %v1499_v43 = vld [vmem:[%s2091_s1 + $0x2a0] ss:$8 sps:$4 sm:$0xff]   ;;  %v1502_v45 = vld [vmem:[%s2091_s1 + $0x2b4] ss:$8 sps:$4 sm:$0xff]   ;;  %v1504_v46 = vld [vmem:[%s2091_s1 + $0xb0] ss:$8 sps:$4 sm:$0xff]  }
  0x16   : > { %v1505_v47 = vld [vmem:[%s2091_s1 + $0x2b0] ss:$8 sps:$4 sm:$0xff]   ;;  %v179_v48 = vld [vmem:[%s1802_s4] sm:$0xff]  ;;  %v1512_v58 = vld [vmem:[%s2091_s1 + $0xd4] ss:$8 sps:$4 sm:$0xff]  }
  0x17   : > { %1016 = vmatpush1.bf16.msra.mxu1 %v1462_v18  ;;  %v183_v49 = vld [vmem:[%s1802_s4 + $0x20] sm:$0xff]  ;;  %v181_v53 = vld [vmem:[%s1802_s4 + $0x10] sm:$0xff] }
  0x18   : > { %1102 = vmatpush1.bf16.msra.mxu0 %v1463_v19  ;;  %1017 = vmatprep.subr.bf16.mxu1 %v1464_v20  ;;  %v1506_v50 = vld [vmem:[%s2091_s1 + $0xc4] ss:$8 sps:$4 sm:$0xff]   ;;  %v1267_v52 = vcombine.high %v179_v48, %v183_v49  ;;  %v185_v54 = vld [vmem:[%s1802_s4 + $0x30] sm:$0xff]  ;;  %v1510_v56 = vld [vmem:[%s2091_s1 + $0xc0] ss:$8 sps:$4 sm:$0xff]   ;;  %v1266_v8 = vcombine.low %v179_v48, %v183_v49 }
  0x19   : > { %1103 = vmatprep.subr.bf16.mxu0 %v1466_v21  ;;  %v1508_v51 = vld [vmem:[%s2091_s1 + $0x2c4] ss:$8 sps:$4 sm:$0xff]   ;;  %v1271_v55 = vcombine.high %v181_v53, %v185_v54  ;;  %v1511_v57 = vld [vmem:[%s2091_s1 + $0x2c0] ss:$8 sps:$4 sm:$0xff]   ;;  %v1514_v59 = vld [vmem:[%s2091_s1 + $0x2d4] ss:$8 sps:$4 sm:$0xff]   ;;  %v1270_v10 = vcombine.low %v181_v53, %v185_v54 }
  0x1a   : > { %1039 = vmatprep.mubr.bf16.mxu1 %v1267_v52  ;;  %v1516_v60 = vld [vmem:[%s2091_s1 + $0xd0] ss:$8 sps:$4 sm:$0xff]   ;;  %v1518_v62 = vld [vmem:[%s2091_s1 + $0xe4] ss:$8 sps:$4 sm:$0xff]   ;;  %v1522_v0 = vld [vmem:[%s2091_s1 + $0xe0] ss:$8 sps:$4 sm:$0xff]  }
  0x1b   : > { %1018 = vmatpush1.bf16.msra.mxu1 %v1468_v22  ;;  %1125 = vmatprep.mubr.bf16.mxu0 %v1271_v55  ;;  %v1517_v61 = vld [vmem:[%s2091_s1 + $0x2d0] ss:$8 sps:$4 sm:$0xff]   ;;  %v1520_v63 = vld [vmem:[%s2091_s1 + $0x2e4] ss:$8 sps:$4 sm:$0xff]   ;;  %v1523_v1 = vld [vmem:[%s2091_s1 + $0x2e0] ss:$8 sps:$4 sm:$0xff]  }
  0x1c   : > { %1104 = vmatpush1.bf16.msra.mxu0 %v1469_v23  ;;  %1019 = vmatprep.subr.bf16.mxu1 %v1470_v24  ;;  %v1524_v2 = vld [vmem:[%s2091_s1 + $0xf4] ss:$8 sps:$4 sm:$0xff]   ;;  %v1528_v4 = vld [vmem:[%s2091_s1 + $0xf0] ss:$8 sps:$4 sm:$0xff]   ;;  %v1532_v6 = vld [vmem:[%s2091_s1 + $0x104] ss:$8 sps:$4 sm:$0xff]  }
  0x1d   : > { %1105 = vmatprep.subr.bf16.mxu0 %v1472_v25  ;;  %v1526_v3 = vld [vmem:[%s2091_s1 + $0x2f4] ss:$8 sps:$4 sm:$0xff]   ;;  %v1529_v5 = vld [vmem:[%s2091_s1 + $0x2f0] ss:$8 sps:$4 sm:$0xff]   ;;  %v1535_v7 = vld [vmem:[%s2091_s1 + $0x304] ss:$8 sps:$4 sm:$0xff]  }
  0x1e   : > { %v1530_v9 = vld [vmem:[%s2091_s1 + $0x100] ss:$8 sps:$4 sm:$0xff]   ;;  %v1538_v12 = vld [vmem:[%s2091_s1 + $0x114] ss:$8 sps:$4 sm:$0xff]   ;;  %v1536_v14 = vld [vmem:[%s2091_s1 + $0x110] ss:$8 sps:$4 sm:$0xff]  }
  0x1f   : > { %1020 = vmatpush1.bf16.msra.mxu1 %v1474_v26  ;;  %v1533_v11 = vld [vmem:[%s2091_s1 + $0x300] ss:$8 sps:$4 sm:$0xff]   ;;  %v1541_v13 = vld [vmem:[%s2091_s1 + $0x314] ss:$8 sps:$4 sm:$0xff]   ;;  %v1539_v15 = vld [vmem:[%s2091_s1 + $0x310] ss:$8 sps:$4 sm:$0xff]  }
  0x20   : > { %1106 = vmatpush1.bf16.msra.mxu0 %v1475_v27  ;;  %1021 = vmatprep.subr.bf16.mxu1 %v1476_v28  ;;  %v1544_v16 = vld [vmem:[%s2091_s1 + $0x124] ss:$8 sps:$4 sm:$0xff]   ;;  %v1542_v18 = vld [vmem:[%s2091_s1 + $0x120] ss:$8 sps:$4 sm:$0xff]   ;;  %v1550_v20 = vld [vmem:[%s2091_s1 + $0x134] ss:$8 sps:$4 sm:$0xff]  }
  0x21   : > { %1107 = vmatprep.subr.bf16.mxu0 %v1478_v29  ;;  %v1547_v17 = vld [vmem:[%s2091_s1 + $0x324] ss:$8 sps:$4 sm:$0xff]   ;;  %v1545_v19 = vld [vmem:[%s2091_s1 + $0x320] ss:$8 sps:$4 sm:$0xff]   ;;  %v1553_v21 = vld [vmem:[%s2091_s1 + $0x334] ss:$8 sps:$4 sm:$0xff]  }
  0x22   : > { %v1548_v22 = vld [vmem:[%s2091_s1 + $0x130] ss:$8 sps:$4 sm:$0xff]   ;;  %v1556_v24 = vld [vmem:[%s2091_s1 + $0x144] ss:$8 sps:$4 sm:$0xff]   ;;  %v1554_v26 = vld [vmem:[%s2091_s1 + $0x140] ss:$8 sps:$4 sm:$0xff]  }
  0x23   : > { %1022 = vmatpush1.bf16.msra.mxu1 %v1480_v30  ;;  %v1551_v23 = vld [vmem:[%s2091_s1 + $0x330] ss:$8 sps:$4 sm:$0xff]   ;;  %v1559_v25 = vld [vmem:[%s2091_s1 + $0x344] ss:$8 sps:$4 sm:$0xff]   ;;  %v1557_v27 = vld [vmem:[%s2091_s1 + $0x340] ss:$8 sps:$4 sm:$0xff]  }
  0x24   : > { %1108 = vmatpush1.bf16.msra.mxu0 %v1481_v31  ;;  %1023 = vmatprep.subr.bf16.mxu1 %v1482_v32  ;;  %v1562_v28 = vld [vmem:[%s2091_s1 + $0x154] ss:$8 sps:$4 sm:$0xff]   ;;  %v1560_v30 = vld [vmem:[%s2091_s1 + $0x150] ss:$8 sps:$4 sm:$0xff]   ;;  %v1568_v32 = vld [vmem:[%s2091_s1 + $0x164] ss:$8 sps:$4 sm:$0xff]  }
  0x25   : > { %1109 = vmatprep.subr.bf16.mxu0 %v1484_v33  ;;  %v1565_v29 = vld [vmem:[%s2091_s1 + $0x354] ss:$8 sps:$4 sm:$0xff]   ;;  %v1563_v31 = vld [vmem:[%s2091_s1 + $0x350] ss:$8 sps:$4 sm:$0xff]   ;;  %v1571_v33 = vld [vmem:[%s2091_s1 + $0x364] ss:$8 sps:$4 sm:$0xff]  }
  0x26   : > { %v1578_v48 = vld [vmem:[%s2091_s1 + $0x180] ss:$8 sps:$4 sm:$0xff]   ;;  %v1584_v52 = vld [vmem:[%s2091_s1 + $0x190] ss:$8 sps:$4 sm:$0xff]   ;;  %v1592_v54 = vld [vmem:[%s2091_s1 + $0x1a4] ss:$8 sps:$4 sm:$0xff]  }
  0x27   : > { %1024 = vmatpush1.bf16.msra.mxu1 %v1486_v34  ;;  %v1947_v34 = vld [vmem:[%s1802_s4 + $0x8] sm:$0xff]  ;;  %v1587_v53 = vld [vmem:[%s2091_s1 + $0x390] ss:$8 sps:$4 sm:$0xff]  }
  0x28   : > { %1110 = vmatpush1.bf16.msra.mxu0 %v1487_v35  ;;  %1025 = vmatprep.subr.bf16.mxu1 %v1488_v36  ;;  %v1950_v35 = vld [vmem:[%s1802_s4 + $0x28] sm:$0xff]  ;;  %v1953_v36 = vld [vmem:[%s1802_s4 + $0x18] sm:$0xff] }
  0x29   : > { %1111 = vmatprep.subr.bf16.mxu0 %v1490_v37  ;;  %v1956_v37 = vld [vmem:[%s1802_s4 + $0x38] sm:$0xff]  ;;  %v1581_v49 = vld [vmem:[%s2091_s1 + $0x380] ss:$8 sps:$4 sm:$0xff]   ;;  %v1595_v55 = vld [vmem:[%s2091_s1 + $0x3a4] ss:$8 sps:$4 sm:$0xff]   ;;  %s177_s4 = scalar_lea.vmem %s2093_s3, %s1407_s30 }
  0x2b   : > { %1026 = vmatpush1.bf16.msra.mxu1 %v1492_v38  ;;  %v1566_v38 = vld [vmem:[%s2091_s1 + $0x160] ss:$8 sps:$4 sm:$0xff]  }
  0x2c   : > { %1112 = vmatpush1.bf16.msra.mxu0 %v1493_v39  ;;  %1027 = vmatprep.subr.bf16.mxu1 %v1494_v40  ;;  %v1569_v39 = vld [vmem:[%s2091_s1 + $0x360] ss:$8 sps:$4 sm:$0xff]   ;;  %v1269_v40 = vcombine.high %v1947_v34, %v1950_v35 }
  0x2d   : > { %1113 = vmatprep.subr.bf16.mxu0 %v1496_v41  ;;  %v1574_v41 = vld [vmem:[%s2091_s1 + $0x174] ss:$8 sps:$4 sm:$0xff]  }
  0x2f   : > { %1028 = vmatpush1.bf16.msra.mxu1 %v1498_v42  ;;  %v1577_v42 = vld [vmem:[%s2091_s1 + $0x374] ss:$8 sps:$4 sm:$0xff]  }
  0x30   : > { %1114 = vmatpush1.bf16.msra.mxu0 %v1499_v43  ;;  %1029 = vmatprep.subr.bf16.mxu1 %v1500_v44  ;;  %v1273_v43 = vcombine.high %v1953_v36, %v1956_v37  ;;  %v1572_v44 = vld [vmem:[%s2091_s1 + $0x170] ss:$8 sps:$4 sm:$0xff]  }
  0x31   : > { %1115 = vmatprep.subr.bf16.mxu0 %v1502_v45  ;;  %v1575_v45 = vld [vmem:[%s2091_s1 + $0x370] ss:$8 sps:$4 sm:$0xff]  }
  0x33   : > { %1030 = vmatpush1.bf16.msra.mxu1 %v1504_v46  ;;  %v1580_v46 = vld [vmem:[%s2091_s1 + $0x184] ss:$8 sps:$4 sm:$0xff]  }
  0x34   : > { %1116 = vmatpush1.bf16.msra.mxu0 %v1505_v47  ;;  %1031 = vmatprep.subr.bf16.mxu1 %v1506_v50  ;;  %v1583_v47 = vld [vmem:[%s2091_s1 + $0x384] ss:$8 sps:$4 sm:$0xff]   ;;  %v1586_v50 = vld [vmem:[%s2091_s1 + $0x194] ss:$8 sps:$4 sm:$0xff]  }
  0x35   : > { %1117 = vmatprep.subr.bf16.mxu0 %v1508_v51  ;;  %v1589_v51 = vld [vmem:[%s2091_s1 + $0x394] ss:$8 sps:$4 sm:$0xff]  }
  0x37   : > { %1032 = vmatpush1.bf16.msra.mxu1 %v1510_v56  ;;  %v1590_v56 = vld [vmem:[%s2091_s1 + $0x1a0] ss:$8 sps:$4 sm:$0xff]  }
  0x38   : > { %1118 = vmatpush1.bf16.msra.mxu0 %v1511_v57  ;;  %1033 = vmatprep.subr.bf16.mxu1 %v1512_v58  ;;  %v1593_v57 = vld [vmem:[%s2091_s1 + $0x3a0] ss:$8 sps:$4 sm:$0xff]   ;;  %v1598_v58 = vld [vmem:[%s2091_s1 + $0x1b4] ss:$8 sps:$4 sm:$0xff]  }
  0x39   : > { %1119 = vmatprep.subr.bf16.mxu0 %v1514_v59  ;;  %v1601_v59 = vld [vmem:[%s2091_s1 + $0x3b4] ss:$8 sps:$4 sm:$0xff]  }
  0x3b   : > { %1034 = vmatpush1.bf16.msra.mxu1 %v1516_v60  ;;  %v1596_v60 = vld [vmem:[%s2091_s1 + $0x1b0] ss:$8 sps:$4 sm:$0xff]  }
  0x3c   : > { %1120 = vmatpush1.bf16.msra.mxu0 %v1517_v61  ;;  %1035 = vmatprep.subr.bf16.mxu1 %v1518_v62  ;;  %v1599_v61 = vld [vmem:[%s2091_s1 + $0x3b0] ss:$8 sps:$4 sm:$0xff]   ;;  %v1604_v62 = vld [vmem:[%s2091_s1 + $0x1c4] ss:$8 sps:$4 sm:$0xff]  }
  0x3d   : > { %1121 = vmatprep.subr.bf16.mxu0 %v1520_v63  ;;  %v1607_v63 = vld [vmem:[%s2091_s1 + $0x3c4] ss:$8 sps:$4 sm:$0xff]  }
  0x3f   : > { %1036 = vmatpush1.bf16.msra.mxu1 %v1522_v0  ;;  %v1602_v0 = vld [vmem:[%s2091_s1 + $0x1c0] ss:$8 sps:$4 sm:$0xff]  }
  0x40   : > { %1122 = vmatpush1.bf16.msra.mxu0 %v1523_v1  ;;  %1037 = vmatprep.subr.bf16.mxu1 %v1524_v2  ;;  %v1605_v1 = vld [vmem:[%s2091_s1 + $0x3c0] ss:$8 sps:$4 sm:$0xff]   ;;  %v1610_v2 = vld [vmem:[%s2091_s1 + $0x1d4] ss:$8 sps:$4 sm:$0xff]  }
  0x41   : > { %1123 = vmatprep.subr.bf16.mxu0 %v1526_v3  ;;  %v1613_v3 = vld [vmem:[%s2091_s1 + $0x3d4] ss:$8 sps:$4 sm:$0xff]  }
  0x43   : > { %1038 = vmatpush1.bf16.msra.mxu1 %v1528_v4  ;;  %v1608_v4 = vld [vmem:[%s2091_s1 + $0x1d0] ss:$8 sps:$4 sm:$0xff]  }
  0x44   : > { %1124 = vmatpush1.bf16.msra.mxu0 %v1529_v5  ;;  %1050 = vmatprep.subr.bf16.mxu1 %v1532_v6  ;;  %v1611_v5 = vld [vmem:[%s2091_s1 + $0x3d0] ss:$8 sps:$4 sm:$0xff]   ;;  %v1616_v6 = vld [vmem:[%s2091_s1 + $0x1e4] ss:$8 sps:$4 sm:$0xff]  }
  0x45   : > { %1136 = vmatprep.subr.bf16.mxu0 %v1535_v7  ;;  %v1619_v7 = vld [vmem:[%s2091_s1 + $0x3e4] ss:$8 sps:$4 sm:$0xff]  }
  0x46   : > { %1040 = vmatmul.mubr.bf16.vlgmr.msra.gmra.mrb[0].mxu1 %v1266_v8  ;;  %v1614_v8 = vld [vmem:[%s2091_s1 + $0x1e0] ss:$8 sps:$4 sm:$0xff]  }
  0x47   : > { %1126 = vmatmul.mubr.bf16.vlgmr.msra.gmra.mrb[0].mxu0 %v1270_v10  ;;  %1051 = vmatpush1.bf16.msra.mxu1 %v1530_v9  ;;  %v1617_v9 = vld [vmem:[%s2091_s1 + $0x3e0] ss:$8 sps:$4 sm:$0xff]   ;;  %v1622_v10 = vld [vmem:[%s2091_s1 + $0x1f4] ss:$8 sps:$4 sm:$0xff]  }
  0x48   : > { %1137 = vmatpush1.bf16.msra.mxu0 %v1533_v11  ;;  %1052 = vmatprep.subr.bf16.mxu1 %v1538_v12  ;;  %v1625_v11 = vld [vmem:[%s2091_s1 + $0x3f4] ss:$8 sps:$4 sm:$0xff]   ;;  %v1620_v12 = vld [vmem:[%s2091_s1 + $0x1f0] ss:$8 sps:$4 sm:$0xff]  }
  0x49   : > { %1138 = vmatprep.subr.bf16.mxu0 %v1541_v13  ;;  %1082 = vmatprep.mubr.bf16.mxu1 %v1269_v40  ;;  %v1623_v13 = vld [vmem:[%s2091_s1 + $0x3f0] ss:$8 sps:$4 sm:$0xff]  }
  0x4a   : > { %1168 = vmatprep.mubr.bf16.mxu0 %v1273_v43 }
  0x4b   : > { %1053 = vmatpush1.bf16.msra.mxu1 %v1536_v14  ;;  %v1268_v14 = vcombine.low %v1947_v34, %v1950_v35 }
  0x4c   : > { %1139 = vmatpush1.bf16.msra.mxu0 %v1539_v15  ;;  %1054 = vmatprep.subr.bf16.mxu1 %v1544_v16  ;;  %v1272_v15 = vcombine.low %v1953_v36, %v1956_v37  ;;  %v317_v16 = vlaneseq }
  0x4d   : > { %1140 = vmatprep.subr.bf16.mxu0 %v1547_v17 }
  0x4e   : > { %v318_v17 = vshrl.u32 %v317_v16, 7 }
  0x4f   : > { %1055 = vmatpush1.bf16.msra.mxu1 %v1542_v18 }
  0x50   : > { %1141 = vmatpush1.bf16.msra.mxu0 %v1545_v19  ;;  %1056 = vmatprep.subr.bf16.mxu1 %v1550_v20  ;;  %v319_v18 = vsub.s32 0, %v318_v17  ;;  %v315_v19 = vld [vmem:[%s2092_s2] sm:$0x3]  ;;  %v323_v20 = vsub.s32 1, %v318_v17 }
  0x51   : > { %1142 = vmatprep.subr.bf16.mxu0 %v1553_v21 }
  0x52   : > { %v320_v21 = vrot.slane %v315_v19, %v319_v18 }
  0x53   : > { %1057 = vmatpush1.bf16.msra.mxu1 %v1548_v22  ;;  %v324_v22 = vrot.slane %v315_v19, %v323_v20 }
  0x54   : > { %1143 = vmatpush1.bf16.msra.mxu0 %v1551_v23  ;;  %1058 = vmatprep.subr.bf16.mxu1 %v1556_v24 }
  0x55   : > { %1144 = vmatprep.subr.bf16.mxu0 %v1559_v25 }
  0x57   : > { %1059 = vmatpush1.bf16.msra.mxu1 %v1554_v26 }
  0x58   : > { %1145 = vmatpush1.bf16.msra.mxu0 %v1557_v27  ;;  %1060 = vmatprep.subr.bf16.mxu1 %v1562_v28 }
  0x59   : > { %1146 = vmatprep.subr.bf16.mxu0 %v1565_v29 }
  0x5b   : > { %1061 = vmatpush1.bf16.msra.mxu1 %v1560_v30 }
  0x5c   : > { %1147 = vmatpush1.bf16.msra.mxu0 %v1563_v31  ;;  %1062 = vmatprep.subr.bf16.mxu1 %v1568_v32 }
  0x5d   : > { %1148 = vmatprep.subr.bf16.mxu0 %v1571_v33 }
  0x5f   : > { %1063 = vmatpush1.bf16.msra.mxu1 %v1566_v38 }
  0x60   : > { %1149 = vmatpush1.bf16.msra.mxu0 %v1569_v39  ;;  %1064 = vmatprep.subr.bf16.mxu1 %v1574_v41 }
  0x61   : > { %1150 = vmatprep.subr.bf16.mxu0 %v1577_v42 }
  0x63   : > { %1065 = vmatpush1.bf16.msra.mxu1 %v1572_v44 }
  0x64   : > { %1151 = vmatpush1.bf16.msra.mxu0 %v1575_v45  ;;  %1066 = vmatprep.subr.bf16.mxu1 %v1580_v46 }
  0x65   : > { %1152 = vmatprep.subr.bf16.mxu0 %v1583_v47 }
  0x67   : > { %1067 = vmatpush1.bf16.msra.mxu1 %v1578_v48 }
  0x68   : > { %1153 = vmatpush1.bf16.msra.mxu0 %v1581_v49  ;;  %1068 = vmatprep.subr.bf16.mxu1 %v1586_v50 }
  0x69   : > { %1154 = vmatprep.subr.bf16.mxu0 %v1589_v51 }
  0x6b   : > { %1069 = vmatpush1.bf16.msra.mxu1 %v1584_v52 }
  0x6c   : > { %1155 = vmatpush1.bf16.msra.mxu0 %v1587_v53  ;;  %1070 = vmatprep.subr.bf16.mxu1 %v1592_v54 }
  0x6d   : > { %1156 = vmatprep.subr.bf16.mxu0 %v1595_v55 }
  0x6f   : > { %1071 = vmatpush1.bf16.msra.mxu1 %v1590_v56 }
  0x70   : > { %1157 = vmatpush1.bf16.msra.mxu0 %v1593_v57  ;;  %1072 = vmatprep.subr.bf16.mxu1 %v1598_v58 }
  0x71   : > { %1158 = vmatprep.subr.bf16.mxu0 %v1601_v59 }
  0x73   : > { %1073 = vmatpush1.bf16.msra.mxu1 %v1596_v60 }
  0x74   : > { %1159 = vmatpush1.bf16.msra.mxu0 %v1599_v61  ;;  %1074 = vmatprep.subr.bf16.mxu1 %v1604_v62 }
  0x75   : > { %1160 = vmatprep.subr.bf16.mxu0 %v1607_v63 }
  0x77   : > { %1075 = vmatpush1.bf16.msra.mxu1 %v1602_v0 }
  0x78   : > { %1161 = vmatpush1.bf16.msra.mxu0 %v1605_v1  ;;  %1076 = vmatprep.subr.bf16.mxu1 %v1610_v2 }
  0x79   : > { %1162 = vmatprep.subr.bf16.mxu0 %v1613_v3 }
  0x7b   : > { %1077 = vmatpush1.bf16.msra.mxu1 %v1608_v4 }
  0x7c   : > { %1163 = vmatpush1.bf16.msra.mxu0 %v1611_v5  ;;  %1078 = vmatprep.subr.bf16.mxu1 %v1616_v6 }
  0x7d   : > { %1164 = vmatprep.subr.bf16.mxu0 %v1619_v7 }
  0x7f   : > { %1079 = vmatpush1.bf16.msra.mxu1 %v1614_v8 }
  0x80   : > { %1165 = vmatpush1.bf16.msra.mxu0 %v1617_v9  ;;  %1080 = vmatprep.subr.bf16.mxu1 %v1622_v10 }
  0x81   : > { %1166 = vmatprep.subr.bf16.mxu0 %v1625_v11 }
  0x83   : > { %1081 = vmatpush1.bf16.msra.mxu1 %v1620_v12 }
  0x84   : > { %1167 = vmatpush1.bf16.msra.mxu0 %v1623_v13 }
  0x86   : > { %1083 = vmatmul.mubr.bf16.vlgmr.msra.gmra.mrb[0].mxu1 %v1268_v14 }
  0x87   : > { %1169 = vmatmul.mubr.bf16.vlgmr.msra.gmra.mrb[0].mxu0 %v1272_v15 }
 0x159   : > { %v1084_v23 = vpop.f32.mrb[0].mxu1 }
 0x15a   : > { %v1170_v24 = vpop.f32.mrb[0].mxu0  ;;  %v1410_v25 = vadd.f32 %v1084_v23, %v320_v21  ;;  %v1086_v26 = vpop.f32.mrb[1].mxu1 }
 0x15b   : > { %v1172_v27 = vpop.f32.mrb[1].mxu0  ;;  %v1412_v28 = vadd.f32 %v1086_v26, %v324_v22  ;;  %v1088_v29 = vpop.f32.mrb[2].mxu1 }
 0x15c   : > { %v1174_v30 = vpop.f32.mrb[2].mxu0  ;;  %v1411_v31 = vadd.f32 %v1410_v25, %v1170_v24  ;;  %v1414_v32 = vadd.f32 %v1088_v29, %v320_v21  ;;  %v1090_v33 = vpop.f32.mrb[3].mxu1 }
 0x15d   : > { %v1176_v34 = vpop.f32.mrb[3].mxu0  ;;  %v1413_v35 = vadd.f32 %v1412_v28, %v1172_v27  ;;  %v1416_v36 = vadd.f32 %v1090_v33, %v324_v22 }
 0x15e   : > { %v1179_v37 = vmax.f32 %v1411_v31, 0.0  ;;  %v1415_v38 = vadd.f32 %v1414_v32, %v1174_v30 }
 0x15f   : > { %v1180_v39 = vmax.f32 %v1413_v35, 0.0  ;;  %v1417_v40 = vadd.f32 %v1416_v36, %v1176_v34 }
 0x160   : > { %v1181_v41 = vmax.f32 %v1415_v38, 0.0 }
 0x161   : > { %v1408_v42 = vpack.c.bf16 %v1180_v39, %v1179_v37  ;;  %v1182_v43 = vmax.f32 %v1417_v40, 0.0 }
 0x163   : > { %1195 = vst [vmem:[%s177_s4] sm:$0xff] %v1408_v42  ;;  %v1409_v44 = vpack.c.bf16 %v1182_v43, %v1181_v41 }
 0x165   : > { %1196 = vst [vmem:[%s177_s4 + $0x8] sm:$0xff] %v1409_v44 }
 0x166 PF: > { %s13_s12 = sadd.s32 1, %s1632_s12  }
 0x167   : > { %p10_p4 = scmp.ge.s32.totalorder %s13_s12, 4  }
 0x169   :  { %12 = sbr.rel (!%p10_p4) target bundleno = 1 (0x1), region = 62 }

// kernel: encoder_forward.72
= control target key start
LH: loop header
LB: loop body
LE: loop exit
PB: predicated region body
PF: predicated region fallthrough
CT: control target
= control target key end

     0   :  { %s3345_s12 = smov 0   ;;  %s4255_s0 = inlined_call_operand.vmem [shape: bf16[32,2304], index: 0, kind: input, shape index: {}]   ;;  %s4256_s1 = inlined_call_operand.vmem [shape: bf16[2304,256], index: 1, kind: input, shape index: {}]   ;;  %s4257_s2 = inlined_call_operand.vmem [shape: f32[1,256], index: 2, kind: input, shape index: {}]   ;;  %s4258_s3 = inlined_call_operand.vmem [shape: bf16[32,256], index: 3, kind: output, shape index: {}]  }
   0x1 LB: > { %s2490_s13 = sadd.s32 4294967295, %s3323_s12   ;;  %p2494_p0 = scmp.ge.s32.totalorder %s3323_s12, 1  ;;  %s3323_s12 = sphi %s3345_s12, %s13_s12  }
   0x2   : > { %p139_p1 = scmp.lt.s32.totalorder %s3323_s12, 3 }
   0x4   : > { %p140_p2 = pnand %p2494_p0, %p139_p1 }
   0x5   : > { %v2858_v0 = vld [vmem:[%s4256_s1 + $0x4] ss:$8 sps:$4 sm:$0xff] (!%p140_p2)   ;;  %v2862_v2 = vld [vmem:[%s4256_s1] ss:$8 sps:$4 sm:$0xff] (!%p140_p2)   ;;  %v2864_v4 = vld [vmem:[%s4256_s1 + $0x14] ss:$8 sps:$4 sm:$0xff] (!%p140_p2)  }
   0x6   : > { %143 = sbr.rel (%p140_p2) target bundleno = 549 (0x225), region = 32  ;;  %v2860_v1 = vld [vmem:[%s4256_s1 + $0x404] ss:$8 sps:$4 sm:$0xff] (!%p140_p2)   ;;  %2027 = vmatprep.subr.bf16.mxu1 (!%p140_p2), %v2858_v0  ;;  %v2863_v3 = vld [vmem:[%s4256_s1 + $0x400] ss:$8 sps:$4 sm:$0xff] (!%p140_p2)   ;;  %s2495_s24 = sshll.u32 (!%p140_p2), %s2490_s13, 1 }
   0x7   : > { %2199 = vmatprep.subr.bf16.mxu0 (!%p140_p2), %v2860_v1  ;;  %2028 = vmatpush1.bf16.msra.mxu1 (!%p140_p2), %v2862_v2  ;;  %v2866_v5 = vld [vmem:[%s4256_s1 + $0x414] ss:$8 sps:$4 sm:$0xff] (!%p140_p2)   ;;  %v2868_v6 = vld [vmem:[%s4256_s1 + $0x10] ss:$8 sps:$4 sm:$0xff] (!%p140_p2)   ;;  %v2870_v8 = vld [vmem:[%s4256_s1 + $0x24] ss:$8 sps:$4 sm:$0xff] (!%p140_p2)  }
   0x8   : > { %2200 = vmatpush1.bf16.msra.mxu0 (!%p140_p2), %v2863_v3  ;;  %2029 = vmatprep.subr.bf16.mxu1 (!%p140_p2), %v2864_v4  ;;  %v2869_v7 = vld [vmem:[%s4256_s1 + $0x410] ss:$8 sps:$4 sm:$0xff] (!%p140_p2)   ;;  %v2872_v9 = vld [vmem:[%s4256_s1 + $0x424] ss:$8 sps:$4 sm:$0xff] (!%p140_p2)   ;;  %v2874_v10 = vld [vmem:[%s4256_s1 + $0x20] ss:$8 sps:$4 sm:$0xff] (!%p140_p2)  }
   0x9   : > { %2201 = vmatprep.subr.bf16.mxu0 (!%p140_p2), %v2866_v5  ;;  %v2875_v11 = vld [vmem:[%s4256_s1 + $0x420] ss:$8 sps:$4 sm:$0xff] (!%p140_p2)   ;;  %v2876_v12 = vld [vmem:[%s4256_s1 + $0x34] ss:$8 sps:$4 sm:$0xff] (!%p140_p2)   ;;  %v2880_v14 = vld [vmem:[%s4256_s1 + $0x30] ss:$8 sps:$4 sm:$0xff] (!%p140_p2)  }
   0xa   : > { %v2878_v13 = vld [vmem:[%s4256_s1 + $0x434] ss:$8 sps:$4 sm:$0xff] (!%p140_p2)   ;;  %v2881_v15 = vld [vmem:[%s4256_s1 + $0x430] ss:$8 sps:$4 sm:$0xff] (!%p140_p2)   ;;  %v2882_v16 = vld [vmem:[%s4256_s1 + $0x44] ss:$8 sps:$4 sm:$0xff] (!%p140_p2)  }
   0xb   : > { %2030 = vmatpush1.bf16.msra.mxu1 (!%p140_p2), %v2868_v6  ;;  %v2884_v17 = vld [vmem:[%s4256_s1 + $0x444] ss:$8 sps:$4 sm:$0xff] (!%p140_p2)   ;;  %v2886_v18 = vld [vmem:[%s4256_s1 + $0x40] ss:$8 sps:$4 sm:$0xff] (!%p140_p2)   ;;  %v2888_v20 = vld [vmem:[%s4256_s1 + $0x54] ss:$8 sps:$4 sm:$0xff] (!%p140_p2)  }
   0xc   : > { %2202 = vmatpush1.bf16.msra.mxu0 (!%p140_p2), %v2869_v7  ;;  %2031 = vmatprep.subr.bf16.mxu1 (!%p140_p2), %v2870_v8  ;;  %v2887_v19 = vld [vmem:[%s4256_s1 + $0x440] ss:$8 sps:$4 sm:$0xff] (!%p140_p2)   ;;  %v2890_v21 = vld [vmem:[%s4256_s1 + $0x454] ss:$8 sps:$4 sm:$0xff] (!%p140_p2)   ;;  %v2892_v22 = vld [vmem:[%s4256_s1 + $0x50] ss:$8 sps:$4 sm:$0xff] (!%p140_p2)  }
   0xd   : > { %2203 = vmatprep.subr.bf16.mxu0 %v2872_v9  ;;  %v2893_v23 = vld [vmem:[%s4256_s1 + $0x450] ss:$8 sps:$4 sm:$0xff]   ;;  %v2894_v24 = vld [vmem:[%s4256_s1 + $0x64] ss:$8 sps:$4 sm:$0xff]   ;;  %v2898_v26 = vld [vmem:[%s4256_s1 + $0x60] ss:$8 sps:$4 sm:$0xff]  }
   0xe   : > { %v2896_v25 = vld [vmem:[%s4256_s1 + $0x464] ss:$8 sps:$4 sm:$0xff]   ;;  %v2899_v27 = vld [vmem:[%s4256_s1 + $0x460] ss:$8 sps:$4 sm:$0xff]   ;;  %v2900_v28 = vld [vmem:[%s4256_s1 + $0x74] ss:$8 sps:$4 sm:$0xff]  }
   0xf   : > { %2032 = vmatpush1.bf16.msra.mxu1 %v2874_v10  ;;  %v2902_v29 = vld [vmem:[%s4256_s1 + $0x474] ss:$8 sps:$4 sm:$0xff]   ;;  %v2904_v30 = vld [vmem:[%s4256_s1 + $0x70] ss:$8 sps:$4 sm:$0xff]   ;;  %v2906_v32 = vld [vmem:[%s4256_s1 + $0x84] ss:$8 sps:$4 sm:$0xff]  }
  0x10   : > { %2204 = vmatpush1.bf16.msra.mxu0 %v2875_v11  ;;  %2033 = vmatprep.subr.bf16.mxu1 %v2876_v12  ;;  %v2905_v31 = vld [vmem:[%s4256_s1 + $0x470] ss:$8 sps:$4 sm:$0xff]   ;;  %p166_p3 = scmp.lt.s32.totalorder %s2495_s24, 3  ;;  %v2908_v33 = vld [vmem:[%s4256_s1 + $0x484] ss:$8 sps:$4 sm:$0xff]  }
  0x11   : > { %2205 = vmatprep.subr.bf16.mxu0 %v2878_v13  ;;  %v2910_v34 = vld [vmem:[%s4256_s1 + $0x80] ss:$8 sps:$4 sm:$0xff]   ;;  %v2912_v36 = vld [vmem:[%s4256_s1 + $0x94] ss:$8 sps:$4 sm:$0xff]   ;;  %v2916_v38 = vld [vmem:[%s4256_s1 + $0x90] ss:$8 sps:$4 sm:$0xff]  }
  0x12   : > { %v2911_v35 = vld [vmem:[%s4256_s1 + $0x480] ss:$8 sps:$4 sm:$0xff]   ;;  %s4260_s24 = smov (!%p166_p3, %s2495_s24), 3  ;;  %v2914_v37 = vld [vmem:[%s4256_s1 + $0x494] ss:$8 sps:$4 sm:$0xff]  }
  0x13   : > { %2034 = vmatpush1.bf16.msra.mxu1 %v2880_v14  ;;  %v2917_v39 = vld [vmem:[%s4256_s1 + $0x490] ss:$8 sps:$4 sm:$0xff]   ;;  %v2918_v40 = vld [vmem:[%s4256_s1 + $0xa4] ss:$8 sps:$4 sm:$0xff]   ;;  %s2849_s21 = smul.u32 72, %s4260_s24 }
  0x14   : > { %2206 = vmatpush1.bf16.msra.mxu0 %v2881_v15  ;;  %2035 = vmatprep.subr.bf16.mxu1 %v2882_v16  ;;  %v2920_v41 = vld [vmem:[%s4256_s1 + $0x4a4] ss:$8 sps:$4 sm:$0xff]   ;;  %v2922_v42 = vld [vmem:[%s4256_s1 + $0xa0] ss:$8 sps:$4 sm:$0xff]   ;;  %v2924_v44 = vld [vmem:[%s4256_s1 + $0xb4] ss:$8 sps:$4 sm:$0xff]  }
  0x15   : > { %2207 = vmatprep.subr.bf16.mxu0 %v2884_v17  ;;  %v2923_v43 = vld [vmem:[%s4256_s1 + $0x4a0] ss:$8 sps:$4 sm:$0xff]   ;;  %s3496_s13 = scalar_lea.vmem %s4255_s0, %s2849_s21  ;;  %v2926_v45 = vld [vmem:[%s4256_s1 + $0x4b4] ss:$8 sps:$4 sm:$0xff]   ;;  %v2928_v46 = vld [vmem:[%s4256_s1 + $0xb0] ss:$8 sps:$4 sm:$0xff]  }
  0x16   : > { %v2929_v47 = vld [vmem:[%s4256_s1 + $0x4b0] ss:$8 sps:$4 sm:$0xff]   ;;  %v2956_v48 = vld [vmem:[%s3496_s13 + $0x4] ss:$72 sps:$4 sm:$0xff]   ;;  %v2934_v52 = vld [vmem:[%s4256_s1 + $0xc0] ss:$8 sps:$4 sm:$0xff]  }
  0x17   : > { %2036 = vmatpush1.bf16.msra.mxu1 %v2886_v18  ;;  %v2930_v49 = vld [vmem:[%s4256_s1 + $0xc4] ss:$8 sps:$4 sm:$0xff]   ;;  %2059 = vmatprep.mubr.bf16.mxu1 %v2956_v48  ;;  %v2935_v53 = vld [vmem:[%s4256_s1 + $0x4c0] ss:$8 sps:$4 sm:$0xff]   ;;  %v2936_v54 = vld [vmem:[%s4256_s1 + $0xd4] ss:$8 sps:$4 sm:$0xff]  }
  0x18   : > { %2208 = vmatpush1.bf16.msra.mxu0 %v2887_v19  ;;  %2037 = vmatprep.subr.bf16.mxu1 %v2888_v20  ;;  %v2932_v50 = vld [vmem:[%s4256_s1 + $0x4c4] ss:$8 sps:$4 sm:$0xff]   ;;  %v2938_v55 = vld [vmem:[%s4256_s1 + $0x4d4] ss:$8 sps:$4 sm:$0xff]   ;;  %v2940_v56 = vld [vmem:[%s4256_s1 + $0xd0] ss:$8 sps:$4 sm:$0xff]  }
  0x19   : > { %2209 = vmatprep.subr.bf16.mxu0 %v2890_v21  ;;  %v2962_v51 = vld [vmem:[%s3496_s13 + $0x24] ss:$72 sps:$4 sm:$0xff]   ;;  %v2941_v57 = vld [vmem:[%s4256_s1 + $0x4d0] ss:$8 sps:$4 sm:$0xff]   ;;  %v2946_v60 = vld [vmem:[%s4256_s1 + $0xe0] ss:$8 sps:$4 sm:$0xff]  }
  0x1a   : > { %2231 = vmatprep.mubr.bf16.mxu0 %v2962_v51  ;;  %v2942_v58 = vld [vmem:[%s4256_s1 + $0xe4] ss:$8 sps:$4 sm:$0xff]   ;;  %v2947_v61 = vld [vmem:[%s4256_s1 + $0x4e0] ss:$8 sps:$4 sm:$0xff]   ;;  %v2948_v62 = vld [vmem:[%s4256_s1 + $0xf4] ss:$8 sps:$4 sm:$0xff]  }
  0x1b   : > { %2038 = vmatpush1.bf16.msra.mxu1 %v2892_v22  ;;  %v2944_v59 = vld [vmem:[%s4256_s1 + $0x4e4] ss:$8 sps:$4 sm:$0xff]   ;;  %v2950_v63 = vld [vmem:[%s4256_s1 + $0x4f4] ss:$8 sps:$4 sm:$0xff]   ;;  %v2952_v0 = vld [vmem:[%s4256_s1 + $0xf0] ss:$8 sps:$4 sm:$0xff]  }
  0x1c   : > { %2210 = vmatpush1.bf16.msra.mxu0 %v2893_v23  ;;  %2039 = vmatprep.subr.bf16.mxu1 %v2894_v24  ;;  %v2953_v1 = vld [vmem:[%s4256_s1 + $0x4f0] ss:$8 sps:$4 sm:$0xff]   ;;  %v2959_v2 = vld [vmem:[%s4256_s1 + $0x104] ss:$8 sps:$4 sm:$0xff]   ;;  %v2954_v4 = vld [vmem:[%s3496_s13] ss:$72 sps:$4 sm:$0xff]  }
  0x1d   : > { %2211 = vmatprep.subr.bf16.mxu0 %v2896_v25  ;;  %v2965_v3 = vld [vmem:[%s4256_s1 + $0x504] ss:$8 sps:$4 sm:$0xff]   ;;  %v2957_v5 = vld [vmem:[%s4256_s1 + $0x100] ss:$8 sps:$4 sm:$0xff]   ;;  %v2968_v8 = vld [vmem:[%s4256_s1 + $0x114] ss:$8 sps:$4 sm:$0xff]  }
  0x1e   : > { %v2960_v6 = vld [vmem:[%s3496_s13 + $0x20] ss:$72 sps:$4 sm:$0xff]   ;;  %v2971_v9 = vld [vmem:[%s4256_s1 + $0x514] ss:$8 sps:$4 sm:$0xff]   ;;  %v2966_v10 = vld [vmem:[%s4256_s1 + $0x110] ss:$8 sps:$4 sm:$0xff]  }
  0x1f   : > { %2040 = vmatpush1.bf16.msra.mxu1 %v2898_v26  ;;  %v2963_v7 = vld [vmem:[%s4256_s1 + $0x500] ss:$8 sps:$4 sm:$0xff]   ;;  %v2969_v11 = vld [vmem:[%s4256_s1 + $0x510] ss:$8 sps:$4 sm:$0xff]   ;;  %v2974_v12 = vld [vmem:[%s4256_s1 + $0x124] ss:$8 sps:$4 sm:$0xff]  }
  0x20   : > { %2212 = vmatpush1.bf16.msra.mxu0 %v2899_v27  ;;  %2041 = vmatprep.subr.bf16.mxu1 %v2900_v28  ;;  %v2977_v13 = vld [vmem:[%s4256_s1 + $0x524] ss:$8 sps:$4 sm:$0xff]   ;;  %v2972_v14 = vld [vmem:[%s4256_s1 + $0x120] ss:$8 sps:$4 sm:$0xff]   ;;  %v2980_v16 = vld [vmem:[%s4256_s1 + $0x134] ss:$8 sps:$4 sm:$0xff]  }
  0x21   : > { %2213 = vmatprep.subr.bf16.mxu0 %v2902_v29  ;;  %v2975_v15 = vld [vmem:[%s4256_s1 + $0x520] ss:$8 sps:$4 sm:$0xff]   ;;  %v2983_v17 = vld [vmem:[%s4256_s1 + $0x534] ss:$8 sps:$4 sm:$0xff]   ;;  %v2978_v18 = vld [vmem:[%s4256_s1 + $0x130] ss:$8 sps:$4 sm:$0xff]  }
  0x22   : > { %v2981_v19 = vld [vmem:[%s4256_s1 + $0x530] ss:$8 sps:$4 sm:$0xff]   ;;  %v2986_v20 = vld [vmem:[%s4256_s1 + $0x144] ss:$8 sps:$4 sm:$0xff]   ;;  %v2984_v22 = vld [vmem:[%s4256_s1 + $0x140] ss:$8 sps:$4 sm:$0xff]  }
  0x23   : > { %2042 = vmatpush1.bf16.msra.mxu1 %v2904_v30  ;;  %v2989_v21 = vld [vmem:[%s4256_s1 + $0x544] ss:$8 sps:$4 sm:$0xff]   ;;  %v2987_v23 = vld [vmem:[%s4256_s1 + $0x540] ss:$8 sps:$4 sm:$0xff]   ;;  %v2992_v24 = vld [vmem:[%s4256_s1 + $0x154] ss:$8 sps:$4 sm:$0xff]  }
  0x24   : > { %2214 = vmatpush1.bf16.msra.mxu0 %v2905_v31  ;;  %2043 = vmatprep.subr.bf16.mxu1 %v2906_v32  ;;  %v2995_v25 = vld [vmem:[%s4256_s1 + $0x554] ss:$8 sps:$4 sm:$0xff]   ;;  %v2990_v26 = vld [vmem:[%s4256_s1 + $0x150] ss:$8 sps:$4 sm:$0xff]   ;;  %v2998_v28 = vld [vmem:[%s4256_s1 + $0x164] ss:$8 sps:$4 sm:$0xff]  }
  0x25   : > { %2215 = vmatprep.subr.bf16.mxu0 %v2908_v33  ;;  %v2993_v27 = vld [vmem:[%s4256_s1 + $0x550] ss:$8 sps:$4 sm:$0xff]   ;;  %v3001_v29 = vld [vmem:[%s4256_s1 + $0x564] ss:$8 sps:$4 sm:$0xff]   ;;  %v2996_v30 = vld [vmem:[%s4256_s1 + $0x160] ss:$8 sps:$4 sm:$0xff]  }
  0x26   : > { %v2999_v31 = vld [vmem:[%s4256_s1 + $0x560] ss:$8 sps:$4 sm:$0xff]   ;;  %v3004_v32 = vld [vmem:[%s4256_s1 + $0x174] ss:$8 sps:$4 sm:$0xff]  }
  0x27   : > { %2044 = vmatpush1.bf16.msra.mxu1 %v2910_v34  ;;  %v3007_v33 = vld [vmem:[%s4256_s1 + $0x574] ss:$8 sps:$4 sm:$0xff]   ;;  %v3020_v48 = vld [vmem:[%s4256_s1 + $0x1a0] ss:$8 sps:$4 sm:$0xff]  }
  0x28   : > { %2216 = vmatpush1.bf16.msra.mxu0 %v2911_v35  ;;  %2045 = vmatprep.subr.bf16.mxu1 %v2912_v36  ;;  %v3058_v34 = vld [vmem:[%s3496_s13 + $0xc] ss:$72 sps:$4 sm:$0xff]   ;;  %v3002_v35 = vld [vmem:[%s4256_s1 + $0x170] ss:$8 sps:$4 sm:$0xff]  }
  0x29   : > { %2217 = vmatprep.subr.bf16.mxu0 %v2914_v37  ;;  %v3005_v36 = vld [vmem:[%s4256_s1 + $0x570] ss:$8 sps:$4 sm:$0xff]   ;;  %v3064_v37 = vld [vmem:[%s3496_s13 + $0x2c] ss:$72 sps:$4 sm:$0xff]  }
  0x2a   : > { %v3031_v51 = vld [vmem:[%s4256_s1 + $0x5b4] ss:$8 sps:$4 sm:$0xff]  }
  0x2b   : > { %2046 = vmatpush1.bf16.msra.mxu1 %v2916_v38  ;;  %v3010_v38 = vld [vmem:[%s4256_s1 + $0x184] ss:$8 sps:$4 sm:$0xff]  }
  0x2c   : > { %2218 = vmatpush1.bf16.msra.mxu0 %v2917_v39  ;;  %2047 = vmatprep.subr.bf16.mxu1 %v2918_v40  ;;  %v3013_v39 = vld [vmem:[%s4256_s1 + $0x584] ss:$8 sps:$4 sm:$0xff]   ;;  %v3008_v40 = vld [vmem:[%s4256_s1 + $0x180] ss:$8 sps:$4 sm:$0xff]  }
  0x2d   : > { %2219 = vmatprep.subr.bf16.mxu0 %v2920_v41  ;;  %v3011_v41 = vld [vmem:[%s4256_s1 + $0x580] ss:$8 sps:$4 sm:$0xff]  }
  0x2f   : > { %2048 = vmatpush1.bf16.msra.mxu1 %v2922_v42  ;;  %v3016_v42 = vld [vmem:[%s4256_s1 + $0x194] ss:$8 sps:$4 sm:$0xff]  }
  0x30   : > { %2220 = vmatpush1.bf16.msra.mxu0 %v2923_v43  ;;  %2049 = vmatprep.subr.bf16.mxu1 %v2924_v44  ;;  %v3019_v43 = vld [vmem:[%s4256_s1 + $0x594] ss:$8 sps:$4 sm:$0xff]   ;;  %v3014_v44 = vld [vmem:[%s4256_s1 + $0x190] ss:$8 sps:$4 sm:$0xff]  }
  0x31   : > { %2221 = vmatprep.subr.bf16.mxu0 %v2926_v45  ;;  %v3017_v45 = vld [vmem:[%s4256_s1 + $0x590] ss:$8 sps:$4 sm:$0xff]  }
  0x33   : > { %2050 = vmatpush1.bf16.msra.mxu1 %v2928_v46  ;;  %v3022_v46 = vld [vmem:[%s4256_s1 + $0x1a4] ss:$8 sps:$4 sm:$0xff]  }
  0x34   : > { %2222 = vmatpush1.bf16.msra.mxu0 %v2929_v47  ;;  %2051 = vmatprep.subr.bf16.mxu1 %v2930_v49  ;;  %v3025_v47 = vld [vmem:[%s4256_s1 + $0x5a4] ss:$8 sps:$4 sm:$0xff]   ;;  %v3023_v49 = vld [vmem:[%s4256_s1 + $0x5a0] ss:$8 sps:$4 sm:$0xff]  }
  0x35   : > { %2223 = vmatprep.subr.bf16.mxu0 %v2932_v50  ;;  %v3028_v50 = vld [vmem:[%s4256_s1 + $0x1b4] ss:$8 sps:$4 sm:$0xff]  }
  0x37   : > { %2052 = vmatpush1.bf16.msra.mxu1 %v2934_v52  ;;  %v3026_v52 = vld [vmem:[%s4256_s1 + $0x1b0] ss:$8 sps:$4 sm:$0xff]  }
  0x38   : > { %2224 = vmatpush1.bf16.msra.mxu0 %v2935_v53  ;;  %2053 = vmatprep.subr.bf16.mxu1 %v2936_v54  ;;  %v3029_v53 = vld [vmem:[%s4256_s1 + $0x5b0] ss:$8 sps:$4 sm:$0xff]   ;;  %v3034_v54 = vld [vmem:[%s4256_s1 + $0x1c4] ss:$8 sps:$4 sm:$0xff]  }
  0x39   : > { %2225 = vmatprep.subr.bf16.mxu0 %v2938_v55  ;;  %v3037_v55 = vld [vmem:[%s4256_s1 + $0x5c4] ss:$8 sps:$4 sm:$0xff]  }
  0x3b   : > { %2054 = vmatpush1.bf16.msra.mxu1 %v2940_v56  ;;  %v3032_v56 = vld [vmem:[%s4256_s1 + $0x1c0] ss:$8 sps:$4 sm:$0xff]  }
  0x3c   : > { %2226 = vmatpush1.bf16.msra.mxu0 %v2941_v57  ;;  %2055 = vmatprep.subr.bf16.mxu1 %v2942_v58  ;;  %v3035_v57 = vld [vmem:[%s4256_s1 + $0x5c0] ss:$8 sps:$4 sm:$0xff]   ;;  %v3040_v58 = vld [vmem:[%s4256_s1 + $0x1d4] ss:$8 sps:$4 sm:$0xff]  }
  0x3d   : > { %2227 = vmatprep.subr.bf16.mxu0 %v2944_v59  ;;  %v3043_v59 = vld [vmem:[%s4256_s1 + $0x5d4] ss:$8 sps:$4 sm:$0xff]  }
  0x3f   : > { %2056 = vmatpush1.bf16.msra.mxu1 %v2946_v60  ;;  %v3038_v60 = vld [vmem:[%s4256_s1 + $0x1d0] ss:$8 sps:$4 sm:$0xff]  }
  0x40   : > { %2228 = vmatpush1.bf16.msra.mxu0 %v2947_v61  ;;  %2057 = vmatprep.subr.bf16.mxu1 %v2948_v62  ;;  %v3041_v61 = vld [vmem:[%s4256_s1 + $0x5d0] ss:$8 sps:$4 sm:$0xff]   ;;  %v3046_v62 = vld [vmem:[%s4256_s1 + $0x1e4] ss:$8 sps:$4 sm:$0xff]  }
  0x41   : > { %2229 = vmatprep.subr.bf16.mxu0 %v2950_v63  ;;  %v3049_v63 = vld [vmem:[%s4256_s1 + $0x5e4] ss:$8 sps:$4 sm:$0xff]  }
  0x43   : > { %2058 = vmatpush1.bf16.msra.mxu1 %v2952_v0  ;;  %v3044_v0 = vld [vmem:[%s4256_s1 + $0x1e0] ss:$8 sps:$4 sm:$0xff]  }
  0x44   : > { %2230 = vmatpush1.bf16.msra.mxu0 %v2953_v1  ;;  %2070 = vmatprep.subr.bf16.mxu1 %v2959_v2  ;;  %v3047_v1 = vld [vmem:[%s4256_s1 + $0x5e0] ss:$8 sps:$4 sm:$0xff]   ;;  %v3052_v2 = vld [vmem:[%s4256_s1 + $0x1f4] ss:$8 sps:$4 sm:$0xff]  }
  0x45   : > { %2242 = vmatprep.subr.bf16.mxu0 %v2965_v3  ;;  %v3055_v3 = vld [vmem:[%s4256_s1 + $0x5f4] ss:$8 sps:$4 sm:$0xff]  }
  0x46   : > { %2060 = vmatmul.mubr.bf16.vlgmr.msra.gmra.mrb[0].mxu1 %v2954_v4  ;;  %v3050_v4 = vld [vmem:[%s4256_s1 + $0x1f0] ss:$8 sps:$4 sm:$0xff]  }
  0x47   : > { %2232 = vmatmul.mubr.bf16.vlgmr.msra.gmra.mrb[0].mxu0 %v2960_v6  ;;  %2071 = vmatpush1.bf16.msra.mxu1 %v2957_v5  ;;  %v3053_v5 = vld [vmem:[%s4256_s1 + $0x5f0] ss:$8 sps:$4 sm:$0xff]   ;;  %v3061_v6 = vld [vmem:[%s4256_s1 + $0x204] ss:$8 sps:$4 sm:$0xff]  }
  0x48   : > { %2243 = vmatpush1.bf16.msra.mxu0 %v2963_v7  ;;  %2072 = vmatprep.subr.bf16.mxu1 %v2968_v8  ;;  %v3067_v7 = vld [vmem:[%s4256_s1 + $0x604] ss:$8 sps:$4 sm:$0xff]   ;;  %v3056_v8 = vld [vmem:[%s3496_s13 + $0x8] ss:$72 sps:$4 sm:$0xff]  }
  0x49   : > { %2244 = vmatprep.subr.bf16.mxu0 %v2971_v9  ;;  %2102 = vmatprep.mubr.bf16.mxu1 %v3058_v34  ;;  %v3059_v9 = vld [vmem:[%s4256_s1 + $0x200] ss:$8 sps:$4 sm:$0xff]   ;;  %v3100_v34 = vld [vmem:[%s4256_s1 + $0x264] ss:$8 sps:$4 sm:$0xff]  }
  0x4a   : > { %2274 = vmatprep.mubr.bf16.mxu0 %v3064_v37  ;;  %v3101_v37 = vld [vmem:[%s4256_s1 + $0x660] ss:$8 sps:$4 sm:$0xff]  }
  0x4b   : > { %2073 = vmatpush1.bf16.msra.mxu1 %v2966_v10  ;;  %v3062_v10 = vld [vmem:[%s3496_s13 + $0x28] ss:$72 sps:$4 sm:$0xff]  }
  0x4c   : > { %2245 = vmatpush1.bf16.msra.mxu0 %v2969_v11  ;;  %2074 = vmatprep.subr.bf16.mxu1 %v2974_v12  ;;  %v3065_v11 = vld [vmem:[%s4256_s1 + $0x600] ss:$8 sps:$4 sm:$0xff]   ;;  %v3070_v12 = vld [vmem:[%s4256_s1 + $0x214] ss:$8 sps:$4 sm:$0xff]  }
  0x4d   : > { %2246 = vmatprep.subr.bf16.mxu0 %v2977_v13  ;;  %v3073_v13 = vld [vmem:[%s4256_s1 + $0x614] ss:$8 sps:$4 sm:$0xff]  }
  0x4f   : > { %2075 = vmatpush1.bf16.msra.mxu1 %v2972_v14  ;;  %v3068_v14 = vld [vmem:[%s4256_s1 + $0x210] ss:$8 sps:$4 sm:$0xff]  }
  0x50   : > { %2247 = vmatpush1.bf16.msra.mxu0 %v2975_v15  ;;  %2076 = vmatprep.subr.bf16.mxu1 %v2980_v16  ;;  %v3071_v15 = vld [vmem:[%s4256_s1 + $0x610] ss:$8 sps:$4 sm:$0xff]   ;;  %v3076_v16 = vld [vmem:[%s4256_s1 + $0x224] ss:$8 sps:$4 sm:$0xff]  }
  0x51   : > { %2248 = vmatprep.subr.bf16.mxu0 %v2983_v17  ;;  %v3079_v17 = vld [vmem:[%s4256_s1 + $0x624] ss:$8 sps:$4 sm:$0xff]  }
  0x53   : > { %2077 = vmatpush1.bf16.msra.mxu1 %v2978_v18  ;;  %v3074_v18 = vld [vmem:[%s4256_s1 + $0x220] ss:$8 sps:$4 sm:$0xff]  }
  0x54   : > { %2249 = vmatpush1.bf16.msra.mxu0 %v2981_v19  ;;  %2078 = vmatprep.subr.bf16.mxu1 %v2986_v20  ;;  %v3160_v19 = vld [vmem:[%s3496_s13 + $0x14] ss:$72 sps:$4 sm:$0xff]   ;;  %v3077_v20 = vld [vmem:[%s4256_s1 + $0x620] ss:$8 sps:$4 sm:$0xff]  }
  0x55   : > { %2250 = vmatprep.subr.bf16.mxu0 %v2989_v21  ;;  %v3082_v21 = vld [vmem:[%s4256_s1 + $0x234] ss:$8 sps:$4 sm:$0xff]  }
  0x57   : > { %2079 = vmatpush1.bf16.msra.mxu1 %v2984_v22  ;;  %v3085_v22 = vld [vmem:[%s4256_s1 + $0x634] ss:$8 sps:$4 sm:$0xff]  }
  0x58   : > { %2251 = vmatpush1.bf16.msra.mxu0 %v2987_v23  ;;  %2080 = vmatprep.subr.bf16.mxu1 %v2992_v24  ;;  %v3166_v23 = vld [vmem:[%s3496_s13 + $0x34] ss:$72 sps:$4 sm:$0xff]   ;;  %v3080_v24 = vld [vmem:[%s4256_s1 + $0x230] ss:$8 sps:$4 sm:$0xff]  }
  0x59   : > { %2252 = vmatprep.subr.bf16.mxu0 %v2995_v25  ;;  %v3083_v25 = vld [vmem:[%s4256_s1 + $0x630] ss:$8 sps:$4 sm:$0xff]  }
  0x5b   : > { %2081 = vmatpush1.bf16.msra.mxu1 %v2990_v26  ;;  %v3088_v26 = vld [vmem:[%s4256_s1 + $0x244] ss:$8 sps:$4 sm:$0xff]  }
  0x5c   : > { %2253 = vmatpush1.bf16.msra.mxu0 %v2993_v27  ;;  %2082 = vmatprep.subr.bf16.mxu1 %v2998_v28  ;;  %v3091_v27 = vld [vmem:[%s4256_s1 + $0x644] ss:$8 sps:$4 sm:$0xff]   ;;  %v3086_v28 = vld [vmem:[%s4256_s1 + $0x240] ss:$8 sps:$4 sm:$0xff]  }
  0x5d   : > { %2254 = vmatprep.subr.bf16.mxu0 %v3001_v29  ;;  %v3089_v29 = vld [vmem:[%s4256_s1 + $0x640] ss:$8 sps:$4 sm:$0xff]  }
  0x5f   : > { %2083 = vmatpush1.bf16.msra.mxu1 %v2996_v30  ;;  %v3094_v30 = vld [vmem:[%s4256_s1 + $0x254] ss:$8 sps:$4 sm:$0xff]  }
  0x60   : > { %2255 = vmatpush1.bf16.msra.mxu0 %v2999_v31  ;;  %2084 = vmatprep.subr.bf16.mxu1 %v3004_v32  ;;  %v3097_v31 = vld [vmem:[%s4256_s1 + $0x654] ss:$8 sps:$4 sm:$0xff]   ;;  %v3092_v32 = vld [vmem:[%s4256_s1 + $0x250] ss:$8 sps:$4 sm:$0xff]  }
  0x61   : > { %2256 = vmatprep.subr.bf16.mxu0 %v3007_v33  ;;  %v3095_v33 = vld [vmem:[%s4256_s1 + $0x650] ss:$8 sps:$4 sm:$0xff]  }
  0x63   : > { %2085 = vmatpush1.bf16.msra.mxu1 %v3002_v35  ;;  %v3103_v35 = vld [vmem:[%s4256_s1 + $0x664] ss:$8 sps:$4 sm:$0xff]  }
  0x64   : > { %2257 = vmatpush1.bf16.msra.mxu0 %v3005_v36  ;;  %2086 = vmatprep.subr.bf16.mxu1 %v3010_v38  ;;  %v3098_v36 = vld [vmem:[%s4256_s1 + $0x260] ss:$8 sps:$4 sm:$0xff]   ;;  %v3106_v38 = vld [vmem:[%s4256_s1 + $0x274] ss:$8 sps:$4 sm:$0xff]  }
  0x65   : > { %2258 = vmatprep.subr.bf16.mxu0 %v3013_v39  ;;  %v3109_v39 = vld [vmem:[%s4256_s1 + $0x674] ss:$8 sps:$4 sm:$0xff]  }
  0x67   : > { %2087 = vmatpush1.bf16.msra.mxu1 %v3008_v40  ;;  %v3104_v40 = vld [vmem:[%s4256_s1 + $0x270] ss:$8 sps:$4 sm:$0xff]  }
  0x68   : > { %2259 = vmatpush1.bf16.msra.mxu0 %v3011_v41  ;;  %2088 = vmatprep.subr.bf16.mxu1 %v3016_v42  ;;  %v3107_v41 = vld [vmem:[%s4256_s1 + $0x670] ss:$8 sps:$4 sm:$0xff]   ;;  %v3112_v42 = vld [vmem:[%s4256_s1 + $0x284] ss:$8 sps:$4 sm:$0xff]  }
  0x69   : > { %2260 = vmatprep.subr.bf16.mxu0 %v3019_v43  ;;  %v3115_v43 = vld [vmem:[%s4256_s1 + $0x684] ss:$8 sps:$4 sm:$0xff]  }
  0x6b   : > { %2089 = vmatpush1.bf16.msra.mxu1 %v3014_v44  ;;  %v3110_v44 = vld [vmem:[%s4256_s1 + $0x280] ss:$8 sps:$4 sm:$0xff]  }
  0x6c   : > { %2261 = vmatpush1.bf16.msra.mxu0 %v3017_v45  ;;  %2090 = vmatprep.subr.bf16.mxu1 %v3022_v46  ;;  %v3113_v45 = vld [vmem:[%s4256_s1 + $0x680] ss:$8 sps:$4 sm:$0xff]   ;;  %v3118_v46 = vld [vmem:[%s4256_s1 + $0x294] ss:$8 sps:$4 sm:$0xff]  }
  0x6d   : > { %2262 = vmatprep.subr.bf16.mxu0 %v3025_v47  ;;  %v3121_v47 = vld [vmem:[%s4256_s1 + $0x694] ss:$8 sps:$4 sm:$0xff]  }
  0x6f   : > { %2091 = vmatpush1.bf16.msra.mxu1 %v3020_v48  ;;  %v3116_v48 = vld [vmem:[%s4256_s1 + $0x290] ss:$8 sps:$4 sm:$0xff]  }
  0x70   : > { %2263 = vmatpush1.bf16.msra.mxu0 %v3023_v49  ;;  %2092 = vmatprep.subr.bf16.mxu1 %v3028_v50  ;;  %v3119_v49 = vld [vmem:[%s4256_s1 + $0x690] ss:$8 sps:$4 sm:$0xff]   ;;  %v3124_v50 = vld [vmem:[%s4256_s1 + $0x2a4] ss:$8 sps:$4 sm:$0xff]  }
  0x71   : > { %2264 = vmatprep.subr.bf16.mxu0 %v3031_v51  ;;  %v3127_v51 = vld [vmem:[%s4256_s1 + $0x6a4] ss:$8 sps:$4 sm:$0xff]  }
  0x73   : > { %2093 = vmatpush1.bf16.msra.mxu1 %v3026_v52  ;;  %v3122_v52 = vld [vmem:[%s4256_s1 + $0x2a0] ss:$8 sps:$4 sm:$0xff]  }
  0x74   : > { %2265 = vmatpush1.bf16.msra.mxu0 %v3029_v53  ;;  %2094 = vmatprep.subr.bf16.mxu1 %v3034_v54  ;;  %v3125_v53 = vld [vmem:[%s4256_s1 + $0x6a0] ss:$8 sps:$4 sm:$0xff]   ;;  %v3130_v54 = vld [vmem:[%s4256_s1 + $0x2b4] ss:$8 sps:$4 sm:$0xff]  }
  0x75   : > { %2266 = vmatprep.subr.bf16.mxu0 %v3037_v55  ;;  %v3133_v55 = vld [vmem:[%s4256_s1 + $0x6b4] ss:$8 sps:$4 sm:$0xff]  }
  0x77   : > { %2095 = vmatpush1.bf16.msra.mxu1 %v3032_v56  ;;  %v3128_v56 = vld [vmem:[%s4256_s1 + $0x2b0] ss:$8 sps:$4 sm:$0xff]  }
  0x78   : > { %2267 = vmatpush1.bf16.msra.mxu0 %v3035_v57  ;;  %2096 = vmatprep.subr.bf16.mxu1 %v3040_v58  ;;  %v3131_v57 = vld [vmem:[%s4256_s1 + $0x6b0] ss:$8 sps:$4 sm:$0xff]   ;;  %v3136_v58 = vld [vmem:[%s4256_s1 + $0x2c4] ss:$8 sps:$4 sm:$0xff]  }
  0x79   : > { %2268 = vmatprep.subr.bf16.mxu0 %v3043_v59  ;;  %v3139_v59 = vld [vmem:[%s4256_s1 + $0x6c4] ss:$8 sps:$4 sm:$0xff]  }
  0x7b   : > { %2097 = vmatpush1.bf16.msra.mxu1 %v3038_v60  ;;  %v3134_v60 = vld [vmem:[%s4256_s1 + $0x2c0] ss:$8 sps:$4 sm:$0xff]  }
  0x7c   : > { %2269 = vmatpush1.bf16.msra.mxu0 %v3041_v61  ;;  %2098 = vmatprep.subr.bf16.mxu1 %v3046_v62  ;;  %v3137_v61 = vld [vmem:[%s4256_s1 + $0x6c0] ss:$8 sps:$4 sm:$0xff]   ;;  %v3142_v62 = vld [vmem:[%s4256_s1 + $0x2d4] ss:$8 sps:$4 sm:$0xff]  }
  0x7d   : > { %2270 = vmatprep.subr.bf16.mxu0 %v3049_v63  ;;  %v3145_v63 = vld [vmem:[%s4256_s1 + $0x6d4] ss:$8 sps:$4 sm:$0xff]  }
  0x7f   : > { %2099 = vmatpush1.bf16.msra.mxu1 %v3044_v0  ;;  %v3140_v0 = vld [vmem:[%s4256_s1 + $0x2d0] ss:$8 sps:$4 sm:$0xff]  }
  0x80   : > { %2271 = vmatpush1.bf16.msra.mxu0 %v3047_v1  ;;  %2100 = vmatprep.subr.bf16.mxu1 %v3052_v2  ;;  %v3143_v1 = vld [vmem:[%s4256_s1 + $0x6d0] ss:$8 sps:$4 sm:$0xff]   ;;  %v3148_v2 = vld [vmem:[%s4256_s1 + $0x2e4] ss:$8 sps:$4 sm:$0xff]  }
  0x81   : > { %2272 = vmatprep.subr.bf16.mxu0 %v3055_v3  ;;  %v3151_v3 = vld [vmem:[%s4256_s1 + $0x6e4] ss:$8 sps:$4 sm:$0xff]  }
  0x83   : > { %2101 = vmatpush1.bf16.msra.mxu1 %v3050_v4  ;;  %v3146_v4 = vld [vmem:[%s4256_s1 + $0x2e0] ss:$8 sps:$4 sm:$0xff]  }
  0x84   : > { %2273 = vmatpush1.bf16.msra.mxu0 %v3053_v5  ;;  %2113 = vmatprep.subr.bf16.mxu1 %v3061_v6  ;;  %v3149_v5 = vld [vmem:[%s4256_s1 + $0x6e0] ss:$8 sps:$4 sm:$0xff]   ;;  %v3154_v6 = vld [vmem:[%s4256_s1 + $0x2f4] ss:$8 sps:$4 sm:$0xff]  }
  0x85   : > { %2285 = vmatprep.subr.bf16.mxu0 %v3067_v7  ;;  %v3157_v7 = vld [vmem:[%s4256_s1 + $0x6f4] ss:$8 sps:$4 sm:$0xff]  }
  0x86   : > { %2103 = vmatmul.mubr.bf16.vlgmr.msra.gmra.mrb[0].mxu1 %v3056_v8  ;;  %v3152_v8 = vld [vmem:[%s4256_s1 + $0x2f0] ss:$8 sps:$4 sm:$0xff]  }
  0x87   : > { %2275 = vmatmul.mubr.bf16.vlgmr.msra.gmra.mrb[0].mxu0 %v3062_v10  ;;  %2114 = vmatpush1.bf16.msra.mxu1 %v3059_v9  ;;  %v3155_v9 = vld [vmem:[%s4256_s1 + $0x6f0] ss:$8 sps:$4 sm:$0xff]   ;;  %v3163_v10 = vld [vmem:[%s4256_s1 + $0x304] ss:$8 sps:$4 sm:$0xff]  }
  0x88   : > { %2286 = vmatpush1.bf16.msra.mxu0 %v3065_v11  ;;  %2115 = vmatprep.subr.bf16.mxu1 %v3070_v12  ;;  %v3169_v11 = vld [vmem:[%s4256_s1 + $0x704] ss:$8 sps:$4 sm:$0xff]   ;;  %v3158_v12 = vld [vmem:[%s3496_s13 + $0x10] ss:$72 sps:$4 sm:$0xff]  }
  0x89   : > { %2287 = vmatprep.subr.bf16.mxu0 %v3073_v13  ;;  %2145 = vmatprep.mubr.bf16.mxu1 %v3160_v19  ;;  %v3161_v13 = vld [vmem:[%s4256_s1 + $0x300] ss:$8 sps:$4 sm:$0xff]   ;;  %v3265_v19 = vld [vmem:[%s3496_s13 + $0x3c] ss:$72 sps:$4 sm:$0xff]  }
  0x8a   : > { %2317 = vmatprep.mubr.bf16.mxu0 %v3166_v23  ;;  %v3181_v23 = vld [vmem:[%s4256_s1 + $0x724] ss:$8 sps:$4 sm:$0xff]  }
  0x8b   : > { %2116 = vmatpush1.bf16.msra.mxu1 %v3068_v14  ;;  %v3164_v14 = vld [vmem:[%s3496_s13 + $0x30] ss:$72 sps:$4 sm:$0xff]  }
  0x8c   : > { %2288 = vmatpush1.bf16.msra.mxu0 %v3071_v15  ;;  %2117 = vmatprep.subr.bf16.mxu1 %v3076_v16  ;;  %v3167_v15 = vld [vmem:[%s4256_s1 + $0x700] ss:$8 sps:$4 sm:$0xff]   ;;  %v3172_v16 = vld [vmem:[%s4256_s1 + $0x314] ss:$8 sps:$4 sm:$0xff]  }
  0x8d   : > { %2289 = vmatprep.subr.bf16.mxu0 %v3079_v17  ;;  %v3175_v17 = vld [vmem:[%s4256_s1 + $0x714] ss:$8 sps:$4 sm:$0xff]  }
  0x8f   : > { %2118 = vmatpush1.bf16.msra.mxu1 %v3074_v18  ;;  %v3262_v18 = vld [vmem:[%s3496_s13 + $0x1c] ss:$72 sps:$4 sm:$0xff]  }
  0x90   : > { %2290 = vmatpush1.bf16.msra.mxu0 %v3077_v20  ;;  %2119 = vmatprep.subr.bf16.mxu1 %v3082_v21  ;;  %v3170_v20 = vld [vmem:[%s4256_s1 + $0x310] ss:$8 sps:$4 sm:$0xff]  }
  0x91   : > { %2291 = vmatprep.subr.bf16.mxu0 %v3085_v22  ;;  %v3173_v21 = vld [vmem:[%s4256_s1 + $0x710] ss:$8 sps:$4 sm:$0xff]   ;;  %v3178_v22 = vld [vmem:[%s4256_s1 + $0x324] ss:$8 sps:$4 sm:$0xff]  }
  0x93   : > { %2120 = vmatpush1.bf16.msra.mxu1 %v3080_v24  ;;  %v3176_v24 = vld [vmem:[%s4256_s1 + $0x320] ss:$8 sps:$4 sm:$0xff]  }
  0x94   : > { %2292 = vmatpush1.bf16.msra.mxu0 %v3083_v25  ;;  %2121 = vmatprep.subr.bf16.mxu1 %v3088_v26  ;;  %v3179_v25 = vld [vmem:[%s4256_s1 + $0x720] ss:$8 sps:$4 sm:$0xff]   ;;  %v3184_v26 = vld [vmem:[%s4256_s1 + $0x334] ss:$8 sps:$4 sm:$0xff]  }
  0x95   : > { %2293 = vmatprep.subr.bf16.mxu0 %v3091_v27  ;;  %v3187_v27 = vld [vmem:[%s4256_s1 + $0x734] ss:$8 sps:$4 sm:$0xff]  }
  0x97   : > { %2122 = vmatpush1.bf16.msra.mxu1 %v3086_v28  ;;  %v3182_v28 = vld [vmem:[%s4256_s1 + $0x330] ss:$8 sps:$4 sm:$0xff]  }
  0x98   : > { %2294 = vmatpush1.bf16.msra.mxu0 %v3089_v29  ;;  %2123 = vmatprep.subr.bf16.mxu1 %v3094_v30  ;;  %v3185_v29 = vld [vmem:[%s4256_s1 + $0x730] ss:$8 sps:$4 sm:$0xff]   ;;  %v3190_v30 = vld [vmem:[%s4256_s1 + $0x344] ss:$8 sps:$4 sm:$0xff]  }
  0x99   : > { %2295 = vmatprep.subr.bf16.mxu0 %v3097_v31  ;;  %v3193_v31 = vld [vmem:[%s4256_s1 + $0x744] ss:$8 sps:$4 sm:$0xff]  }
  0x9b   : > { %2124 = vmatpush1.bf16.msra.mxu1 %v3092_v32  ;;  %v3188_v32 = vld [vmem:[%s4256_s1 + $0x340] ss:$8 sps:$4 sm:$0xff]  }
  0x9c   : > { %2296 = vmatpush1.bf16.msra.mxu0 %v3095_v33  ;;  %2125 = vmatprep.subr.bf16.mxu1 %v3100_v34  ;;  %v3191_v33 = vld [vmem:[%s4256_s1 + $0x740] ss:$8 sps:$4 sm:$0xff]   ;;  %v3196_v34 = vld [vmem:[%s4256_s1 + $0x354] ss:$8 sps:$4 sm:$0xff]  }
  0x9d   : > { %2297 = vmatprep.subr.bf16.mxu0 %v3103_v35  ;;  %v3199_v35 = vld [vmem:[%s4256_s1 + $0x754] ss:$8 sps:$4 sm:$0xff]  }
  0x9f   : > { %2126 = vmatpush1.bf16.msra.mxu1 %v3098_v36  ;;  %v3194_v36 = vld [vmem:[%s4256_s1 + $0x350] ss:$8 sps:$4 sm:$0xff]  }
  0xa0   : > { %2298 = vmatpush1.bf16.msra.mxu0 %v3101_v37  ;;  %2127 = vmatprep.subr.bf16.mxu1 %v3106_v38  ;;  %v3197_v37 = vld [vmem:[%s4256_s1 + $0x750] ss:$8 sps:$4 sm:$0xff]   ;;  %v3202_v38 = vld [vmem:[%s4256_s1 + $0x364] ss:$8 sps:$4 sm:$0xff]  }
  0xa1   : > { %2299 = vmatprep.subr.bf16.mxu0 %v3109_v39  ;;  %v3205_v39 = vld [vmem:[%s4256_s1 + $0x764] ss:$8 sps:$4 sm:$0xff]  }
  0xa3   : > { %2128 = vmatpush1.bf16.msra.mxu1 %v3104_v40  ;;  %v3200_v40 = vld [vmem:[%s4256_s1 + $0x360] ss:$8 sps:$4 sm:$0xff]  }
  0xa4   : > { %2300 = vmatpush1.bf16.msra.mxu0 %v3107_v41  ;;  %2129 = vmatprep.subr.bf16.mxu1 %v3112_v42  ;;  %v3203_v41 = vld [vmem:[%s4256_s1 + $0x760] ss:$8 sps:$4 sm:$0xff]   ;;  %v3208_v42 = vld [vmem:[%s4256_s1 + $0x374] ss:$8 sps:$4 sm:$0xff]  }
  0xa5   : > { %2301 = vmatprep.subr.bf16.mxu0 %v3115_v43  ;;  %v3211_v43 = vld [vmem:[%s4256_s1 + $0x774] ss:$8 sps:$4 sm:$0xff]  }
  0xa7   : > { %2130 = vmatpush1.bf16.msra.mxu1 %v3110_v44  ;;  %v3206_v44 = vld [vmem:[%s4256_s1 + $0x370] ss:$8 sps:$4 sm:$0xff]  }
  0xa8   : > { %2302 = vmatpush1.bf16.msra.mxu0 %v3113_v45  ;;  %2131 = vmatprep.subr.bf16.mxu1 %v3118_v46  ;;  %v3209_v45 = vld [vmem:[%s4256_s1 + $0x770] ss:$8 sps:$4 sm:$0xff]   ;;  %v3214_v46 = vld [vmem:[%s4256_s1 + $0x384] ss:$8 sps:$4 sm:$0xff]  }
  0xa9   : > { %2303 = vmatprep.subr.bf16.mxu0 %v3121_v47  ;;  %v3217_v47 = vld [vmem:[%s4256_s1 + $0x784] ss:$8 sps:$4 sm:$0xff]  }
  0xab   : > { %2132 = vmatpush1.bf16.msra.mxu1 %v3116_v48  ;;  %v3212_v48 = vld [vmem:[%s4256_s1 + $0x380] ss:$8 sps:$4 sm:$0xff]  }
  0xac   : > { %2304 = vmatpush1.bf16.msra.mxu0 %v3119_v49  ;;  %2133 = vmatprep.subr.bf16.mxu1 %v3124_v50  ;;  %v3215_v49 = vld [vmem:[%s4256_s1 + $0x780] ss:$8 sps:$4 sm:$0xff]   ;;  %v3220_v50 = vld [vmem:[%s4256_s1 + $0x394] ss:$8 sps:$4 sm:$0xff]  }
  0xad   : > { %2305 = vmatprep.subr.bf16.mxu0 %v3127_v51  ;;  %v3223_v51 = vld [vmem:[%s4256_s1 + $0x794] ss:$8 sps:$4 sm:$0xff]  }
  0xaf   : > { %2134 = vmatpush1.bf16.msra.mxu1 %v3122_v52  ;;  %v3218_v52 = vld [vmem:[%s4256_s1 + $0x390] ss:$8 sps:$4 sm:$0xff]  }
  0xb0   : > { %2306 = vmatpush1.bf16.msra.mxu0 %v3125_v53  ;;  %2135 = vmatprep.subr.bf16.mxu1 %v3130_v54  ;;  %v3221_v53 = vld [vmem:[%s4256_s1 + $0x790] ss:$8 sps:$4 sm:$0xff]   ;;  %v3226_v54 = vld [vmem:[%s4256_s1 + $0x3a4] ss:$8 sps:$4 sm:$0xff]  }
  0xb1   : > { %2307 = vmatprep.subr.bf16.mxu0 %v3133_v55  ;;  %v3229_v55 = vld [vmem:[%s4256_s1 + $0x7a4] ss:$8 sps:$4 sm:$0xff]  }
  0xb3   : > { %2136 = vmatpush1.bf16.msra.mxu1 %v3128_v56  ;;  %v3224_v56 = vld [vmem:[%s4256_s1 + $0x3a0] ss:$8 sps:$4 sm:$0xff]  }
  0xb4   : > { %2308 = vmatpush1.bf16.msra.mxu0 %v3131_v57  ;;  %2137 = vmatprep.subr.bf16.mxu1 %v3136_v58  ;;  %v3227_v57 = vld [vmem:[%s4256_s1 + $0x7a0] ss:$8 sps:$4 sm:$0xff]   ;;  %v3232_v58 = vld [vmem:[%s4256_s1 + $0x3b4] ss:$8 sps:$4 sm:$0xff]  }
  0xb5   : > { %2309 = vmatprep.subr.bf16.mxu0 %v3139_v59  ;;  %v3235_v59 = vld [vmem:[%s4256_s1 + $0x7b4] ss:$8 sps:$4 sm:$0xff]  }
  0xb7   : > { %2138 = vmatpush1.bf16.msra.mxu1 %v3134_v60  ;;  %v3230_v60 = vld [vmem:[%s4256_s1 + $0x3b0] ss:$8 sps:$4 sm:$0xff]  }
  0xb8   : > { %2310 = vmatpush1.bf16.msra.mxu0 %v3137_v61  ;;  %2139 = vmatprep.subr.bf16.mxu1 %v3142_v62  ;;  %v3233_v61 = vld [vmem:[%s4256_s1 + $0x7b0] ss:$8 sps:$4 sm:$0xff]   ;;  %v3238_v62 = vld [vmem:[%s4256_s1 + $0x3c4] ss:$8 sps:$4 sm:$0xff]  }
  0xb9   : > { %2311 = vmatprep.subr.bf16.mxu0 %v3145_v63  ;;  %v3241_v63 = vld [vmem:[%s4256_s1 + $0x7c4] ss:$8 sps:$4 sm:$0xff]  }
  0xbb   : > { %2140 = vmatpush1.bf16.msra.mxu1 %v3140_v0  ;;  %v3236_v0 = vld [vmem:[%s4256_s1 + $0x3c0] ss:$8 sps:$4 sm:$0xff]  }
  0xbc   : > { %2312 = vmatpush1.bf16.msra.mxu0 %v3143_v1  ;;  %2141 = vmatprep.subr.bf16.mxu1 %v3148_v2  ;;  %v3239_v1 = vld [vmem:[%s4256_s1 + $0x7c0] ss:$8 sps:$4 sm:$0xff]   ;;  %v3244_v2 = vld [vmem:[%s4256_s1 + $0x3d4] ss:$8 sps:$4 sm:$0xff]  }
  0xbd   : > { %2313 = vmatprep.subr.bf16.mxu0 %v3151_v3  ;;  %v3247_v3 = vld [vmem:[%s4256_s1 + $0x7d4] ss:$8 sps:$4 sm:$0xff]  }
  0xbf   : > { %2142 = vmatpush1.bf16.msra.mxu1 %v3146_v4  ;;  %v3242_v4 = vld [vmem:[%s4256_s1 + $0x3d0] ss:$8 sps:$4 sm:$0xff]  }
  0xc0   : > { %2314 = vmatpush1.bf16.msra.mxu0 %v3149_v5  ;;  %2143 = vmatprep.subr.bf16.mxu1 %v3154_v6  ;;  %v3245_v5 = vld [vmem:[%s4256_s1 + $0x7d0] ss:$8 sps:$4 sm:$0xff]   ;;  %v3250_v6 = vld [vmem:[%s4256_s1 + $0x3e4] ss:$8 sps:$4 sm:$0xff]  }
  0xc1   : > { %2315 = vmatprep.subr.bf16.mxu0 %v3157_v7  ;;  %v3253_v7 = vld [vmem:[%s4256_s1 + $0x7e4] ss:$8 sps:$4 sm:$0xff]  }
  0xc3   : > { %2144 = vmatpush1.bf16.msra.mxu1 %v3152_v8  ;;  %v3248_v8 = vld [vmem:[%s4256_s1 + $0x3e0] ss:$8 sps:$4 sm:$0xff]  }
  0xc4   : > { %2316 = vmatpush1.bf16.msra.mxu0 %v3155_v9  ;;  %2156 = vmatprep.subr.bf16.mxu1 %v3163_v10  ;;  %v3251_v9 = vld [vmem:[%s4256_s1 + $0x7e0] ss:$8 sps:$4 sm:$0xff]   ;;  %v3256_v10 = vld [vmem:[%s4256_s1 + $0x3f4] ss:$8 sps:$4 sm:$0xff]  }
  0xc5   : > { %2328 = vmatprep.subr.bf16.mxu0 %v3169_v11  ;;  %v3259_v11 = vld [vmem:[%s4256_s1 + $0x7f4] ss:$8 sps:$4 sm:$0xff]  }
  0xc6   : > { %2146 = vmatmul.mubr.bf16.vlgmr.msra.gmra.mrb[0].mxu1 %v3158_v12  ;;  %v3254_v12 = vld [vmem:[%s4256_s1 + $0x3f0] ss:$8 sps:$4 sm:$0xff]  }
  0xc7   : > { %2318 = vmatmul.mubr.bf16.vlgmr.msra.gmra.mrb[0].mxu0 %v3164_v14  ;;  %2157 = vmatpush1.bf16.msra.mxu1 %v3161_v13  ;;  %v3257_v13 = vld [vmem:[%s4256_s1 + $0x7f0] ss:$8 sps:$4 sm:$0xff]   ;;  %v3268_v14 = vld [vmem:[%s4256_s1 + $0x804] ss:$8 sps:$4 sm:$0xff]  }
  0xc8   : > { %2329 = vmatpush1.bf16.msra.mxu0 %v3167_v15  ;;  %2158 = vmatprep.subr.bf16.mxu1 %v3172_v16  ;;  %v3260_v15 = vld [vmem:[%s3496_s13 + $0x18] ss:$72 sps:$4 sm:$0xff]  }
  0xc9   : > { %2330 = vmatprep.subr.bf16.mxu0 %v3175_v17  ;;  %2188 = vmatprep.mubr.bf16.mxu1 %v3262_v18  ;;  %v3263_v16 = vld [vmem:[%s3496_s13 + $0x38] ss:$72 sps:$4 sm:$0xff]   ;;  %v3316_v18 = vld [vmem:[%s3496_s13 + $0x44] ss:$72 sps:$4 sm:$0xff]  }
  0xca   : > { %2360 = vmatprep.mubr.bf16.mxu0 %v3265_v19  ;;  %v3266_v17 = vld [vmem:[%s4256_s1 + $0x800] ss:$8 sps:$4 sm:$0xff]   ;;  %v3271_v19 = vld [vmem:[%s4256_s1 + $0x814] ss:$8 sps:$4 sm:$0xff]  }
  0xcb   : > { %2159 = vmatpush1.bf16.msra.mxu1 %v3170_v20  ;;  %v3269_v20 = vld [vmem:[%s4256_s1 + $0x810] ss:$8 sps:$4 sm:$0xff]  }
  0xcc   : > { %2331 = vmatpush1.bf16.msra.mxu0 %v3173_v21  ;;  %2160 = vmatprep.subr.bf16.mxu1 %v3178_v22  ;;  %v3274_v21 = vld [vmem:[%s4256_s1 + $0x824] ss:$8 sps:$4 sm:$0xff]   ;;  %v3272_v22 = vld [vmem:[%s4256_s1 + $0x820] ss:$8 sps:$4 sm:$0xff]  }
  0xcd   : > { %2332 = vmatprep.subr.bf16.mxu0 %v3181_v23  ;;  %v3277_v23 = vld [vmem:[%s4256_s1 + $0x834] ss:$8 sps:$4 sm:$0xff]  }
  0xcf   : > { %2161 = vmatpush1.bf16.msra.mxu1 %v3176_v24  ;;  %v3275_v24 = vld [vmem:[%s4256_s1 + $0x830] ss:$8 sps:$4 sm:$0xff]  }
  0xd0   : > { %2333 = vmatpush1.bf16.msra.mxu0 %v3179_v25  ;;  %2162 = vmatprep.subr.bf16.mxu1 %v3184_v26  ;;  %v3280_v25 = vld [vmem:[%s4256_s1 + $0x844] ss:$8 sps:$4 sm:$0xff]   ;;  %v3278_v26 = vld [vmem:[%s4256_s1 + $0x840] ss:$8 sps:$4 sm:$0xff]  }
  0xd1   : > { %2334 = vmatprep.subr.bf16.mxu0 %v3187_v27  ;;  %v3283_v27 = vld [vmem:[%s4256_s1 + $0x854] ss:$8 sps:$4 sm:$0xff]  }
  0xd3   : > { %2163 = vmatpush1.bf16.msra.mxu1 %v3182_v28  ;;  %v3281_v28 = vld [vmem:[%s4256_s1 + $0x850] ss:$8 sps:$4 sm:$0xff]  }
  0xd4   : > { %2335 = vmatpush1.bf16.msra.mxu0 %v3185_v29  ;;  %2164 = vmatprep.subr.bf16.mxu1 %v3190_v30  ;;  %v3286_v29 = vld [vmem:[%s4256_s1 + $0x864] ss:$8 sps:$4 sm:$0xff]   ;;  %v3284_v30 = vld [vmem:[%s4256_s1 + $0x860] ss:$8 sps:$4 sm:$0xff]  }
  0xd5   : > { %2336 = vmatprep.subr.bf16.mxu0 %v3193_v31  ;;  %v3289_v31 = vld [vmem:[%s4256_s1 + $0x874] ss:$8 sps:$4 sm:$0xff]  }
  0xd7   : > { %2165 = vmatpush1.bf16.msra.mxu1 %v3188_v32  ;;  %v3287_v32 = vld [vmem:[%s4256_s1 + $0x870] ss:$8 sps:$4 sm:$0xff]  }
  0xd8   : > { %2337 = vmatpush1.bf16.msra.mxu0 %v3191_v33  ;;  %2166 = vmatprep.subr.bf16.mxu1 %v3196_v34  ;;  %v3292_v33 = vld [vmem:[%s4256_s1 + $0x884] ss:$8 sps:$4 sm:$0xff]   ;;  %v3290_v34 = vld [vmem:[%s4256_s1 + $0x880] ss:$8 sps:$4 sm:$0xff]  }
  0xd9   : > { %2338 = vmatprep.subr.bf16.mxu0 %v3199_v35  ;;  %v3295_v35 = vld [vmem:[%s4256_s1 + $0x894] ss:$8 sps:$4 sm:$0xff]  }
  0xdb   : > { %2167 = vmatpush1.bf16.msra.mxu1 %v3194_v36  ;;  %v3293_v36 = vld [vmem:[%s4256_s1 + $0x890] ss:$8 sps:$4 sm:$0xff]  }
  0xdc   : > { %2339 = vmatpush1.bf16.msra.mxu0 %v3197_v37  ;;  %2168 = vmatprep.subr.bf16.mxu1 %v3202_v38  ;;  %v3298_v37 = vld [vmem:[%s4256_s1 + $0x8a4] ss:$8 sps:$4 sm:$0xff]   ;;  %v3296_v38 = vld [vmem:[%s4256_s1 + $0x8a0] ss:$8 sps:$4 sm:$0xff]  }
  0xdd   : > { %2340 = vmatprep.subr.bf16.mxu0 %v3205_v39  ;;  %v3301_v39 = vld [vmem:[%s4256_s1 + $0x8b4] ss:$8 sps:$4 sm:$0xff]  }
  0xdf   : > { %2169 = vmatpush1.bf16.msra.mxu1 %v3200_v40  ;;  %v3299_v40 = vld [vmem:[%s4256_s1 + $0x8b0] ss:$8 sps:$4 sm:$0xff]  }
  0xe0   : > { %2341 = vmatpush1.bf16.msra.mxu0 %v3203_v41  ;;  %2170 = vmatprep.subr.bf16.mxu1 %v3208_v42  ;;  %v3304_v41 = vld [vmem:[%s4256_s1 + $0x8c4] ss:$8 sps:$4 sm:$0xff]   ;;  %v3302_v42 = vld [vmem:[%s4256_s1 + $0x8c0] ss:$8 sps:$4 sm:$0xff]  }
  0xe1   : > { %2342 = vmatprep.subr.bf16.mxu0 %v3211_v43  ;;  %v3307_v43 = vld [vmem:[%s4256_s1 + $0x8d4] ss:$8 sps:$4 sm:$0xff]  }
  0xe3   : > { %2171 = vmatpush1.bf16.msra.mxu1 %v3206_v44  ;;  %v3305_v44 = vld [vmem:[%s4256_s1 + $0x8d0] ss:$8 sps:$4 sm:$0xff]  }
  0xe4   : > { %2343 = vmatpush1.bf16.msra.mxu0 %v3209_v45  ;;  %2172 = vmatprep.subr.bf16.mxu1 %v3214_v46  ;;  %v3310_v45 = vld [vmem:[%s4256_s1 + $0x8e4] ss:$8 sps:$4 sm:$0xff]   ;;  %v3308_v46 = vld [vmem:[%s4256_s1 + $0x8e0] ss:$8 sps:$4 sm:$0xff]  }
  0xe5   : > { %2344 = vmatprep.subr.bf16.mxu0 %v3217_v47  ;;  %v3313_v47 = vld [vmem:[%s4256_s1 + $0x8f4] ss:$8 sps:$4 sm:$0xff]  }
  0xe7   : > { %2173 = vmatpush1.bf16.msra.mxu1 %v3212_v48  ;;  %v3311_v48 = vld [vmem:[%s4256_s1 + $0x8f0] ss:$8 sps:$4 sm:$0xff]  }
  0xe8   : > { %2345 = vmatpush1.bf16.msra.mxu0 %v3215_v49  ;;  %2174 = vmatprep.subr.bf16.mxu1 %v3220_v50  ;;  %v3314_v49 = vld [vmem:[%s3496_s13 + $0x40] ss:$72 sps:$4 sm:$0xff]   ;;  %s2810_s13 = sshll.u32 %s4260_s24, 3 }
  0xe9   : > { %2346 = vmatprep.subr.bf16.mxu0 %v3223_v51  ;;  %s177_s18 = scalar_lea.vmem %s4258_s3, %s2810_s13 }
  0xeb   : > { %2175 = vmatpush1.bf16.msra.mxu1 %v3218_v52 }
  0xec   : > { %2347 = vmatpush1.bf16.msra.mxu0 %v3221_v53  ;;  %2176 = vmatprep.subr.bf16.mxu1 %v3226_v54  ;;  %v487_v54 = vlaneseq }
  0xed   : > { %2348 = vmatprep.subr.bf16.mxu0 %v3229_v55 }
  0xee   : > { %v488_v55 = vshrl.u32 %v487_v54, 7 }
  0xef   : > { %2177 = vmatpush1.bf16.msra.mxu1 %v3224_v56 }
  0xf0   : > { %2349 = vmatpush1.bf16.msra.mxu0 %v3227_v57  ;;  %2178 = vmatprep.subr.bf16.mxu1 %v3232_v58  ;;  %v489_v56 = vsub.s32 0, %v488_v55  ;;  %v485_v57 = vld [vmem:[%s4257_s2] sm:$0x3]  ;;  %v493_v58 = vsub.s32 1, %v488_v55 }
  0xf1   : > { %2350 = vmatprep.subr.bf16.mxu0 %v3235_v59 }
  0xf2   : > { %v490_v59 = vrot.slane %v485_v57, %v489_v56 }
  0xf3   : > { %2179 = vmatpush1.bf16.msra.mxu1 %v3230_v60  ;;  %v494_v60 = vrot.slane %v485_v57, %v493_v58 }
  0xf4   : > { %2351 = vmatpush1.bf16.msra.mxu0 %v3233_v61  ;;  %2180 = vmatprep.subr.bf16.mxu1 %v3238_v62 }
  0xf5   : > { %2352 = vmatprep.subr.bf16.mxu0 %v3241_v63 }
  0xf7   : > { %2181 = vmatpush1.bf16.msra.mxu1 %v3236_v0 }
  0xf8   : > { %2353 = vmatpush1.bf16.msra.mxu0 %v3239_v1  ;;  %2182 = vmatprep.subr.bf16.mxu1 %v3244_v2 }
  0xf9   : > { %2354 = vmatprep.subr.bf16.mxu0 %v3247_v3 }
  0xfb   : > { %2183 = vmatpush1.bf16.msra.mxu1 %v3242_v4 }
  0xfc   : > { %2355 = vmatpush1.bf16.msra.mxu0 %v3245_v5  ;;  %2184 = vmatprep.subr.bf16.mxu1 %v3250_v6 }
  0xfd   : > { %2356 = vmatprep.subr.bf16.mxu0 %v3253_v7 }
  0xff   : > { %2185 = vmatpush1.bf16.msra.mxu1 %v3248_v8 }
 0x100   : > { %2357 = vmatpush1.bf16.msra.mxu0 %v3251_v9  ;;  %2186 = vmatprep.subr.bf16.mxu1 %v3256_v10 }
 0x101   : > { %2358 = vmatprep.subr.bf16.mxu0 %v3259_v11 }
 0x103   : > { %2187 = vmatpush1.bf16.msra.mxu1 %v3254_v12 }
 0x104   : > { %2359 = vmatpush1.bf16.msra.mxu0 %v3257_v13 }
 0x105   : > { %2371 = vmatprep.subr.bf16.mxu0 %v3268_v14 }
 0x106   : > { %2189 = vmatmul.mubr.bf16.vlgmr.msra.gmra.mrb[0].mxu1 %v3260_v15 }
 0x107   : > { %2361 = vmatmul.mubr.bf16.vlgmr.msra.gmra.mrb[0].mxu0 %v3263_v16 }
 0x108   : > { %2372 = vmatpush1.bf16.msra.mxu0 %v3266_v17  ;;  %2403 = vmatprep.mubr.bf16.mxu0 %v3316_v18 }
 0x109   : > { %2373 = vmatprep.subr.bf16.mxu0 %v3271_v19 }
 0x10c   : > { %2374 = vmatpush1.bf16.msra.mxu0 %v3269_v20 }
 0x10d   : > { %2375 = vmatprep.subr.bf16.mxu0 %v3274_v21 }
 0x110   : > { %2376 = vmatpush1.bf16.msra.mxu0 %v3272_v22 }
 0x111   : > { %2377 = vmatprep.subr.bf16.mxu0 %v3277_v23 }
 0x114   : > { %2378 = vmatpush1.bf16.msra.mxu0 %v3275_v24 }
 0x115   : > { %2379 = vmatprep.subr.bf16.mxu0 %v3280_v25 }
 0x118   : > { %2380 = vmatpush1.bf16.msra.mxu0 %v3278_v26 }
 0x119   : > { %2381 = vmatprep.subr.bf16.mxu0 %v3283_v27 }
 0x11c   : > { %2382 = vmatpush1.bf16.msra.mxu0 %v3281_v28 }
 0x11d   : > { %2383 = vmatprep.subr.bf16.mxu0 %v3286_v29 }
 0x120   : > { %2384 = vmatpush1.bf16.msra.mxu0 %v3284_v30 }
 0x121   : > { %2385 = vmatprep.subr.bf16.mxu0 %v3289_v31 }
 0x124   : > { %2386 = vmatpush1.bf16.msra.mxu0 %v3287_v32 }
 0x125   : > { %2387 = vmatprep.subr.bf16.mxu0 %v3292_v33 }
 0x128   : > { %2388 = vmatpush1.bf16.msra.mxu0 %v3290_v34 }
 0x129   : > { %2389 = vmatprep.subr.bf16.mxu0 %v3295_v35 }
 0x12c   : > { %2390 = vmatpush1.bf16.msra.mxu0 %v3293_v36 }
 0x12d   : > { %2391 = vmatprep.subr.bf16.mxu0 %v3298_v37 }
 0x130   : > { %2392 = vmatpush1.bf16.msra.mxu0 %v3296_v38 }
 0x131   : > { %2393 = vmatprep.subr.bf16.mxu0 %v3301_v39 }
 0x134   : > { %2394 = vmatpush1.bf16.msra.mxu0 %v3299_v40 }
 0x135   : > { %2395 = vmatprep.subr.bf16.mxu0 %v3304_v41 }
 0x138   : > { %2396 = vmatpush1.bf16.msra.mxu0 %v3302_v42 }
 0x139   : > { %2397 = vmatprep.subr.bf16.mxu0 %v3307_v43 }
 0x13c   : > { %2398 = vmatpush1.bf16.msra.mxu0 %v3305_v44 }
 0x13d   : > { %2399 = vmatprep.subr.bf16.mxu0 %v3310_v45 }
 0x140   : > { %2400 = vmatpush1.bf16.msra.mxu0 %v3308_v46 }
 0x141   : > { %2401 = vmatprep.subr.bf16.mxu0 %v3313_v47 }
 0x144   : > { %2402 = vmatpush1.bf16.msra.mxu0 %v3311_v48 }
 0x147   : > { %2404 = vmatmul.mubr.bf16.vlgmr.msra.gmra.mrb[0].mxu0 %v3314_v49 }
 0x1d9   : > { %v2190_v50 = vpop.f32.mrb[0].mxu1 }
 0x1da   : > { %v2192_v51 = vpop.f32.mrb[1].mxu1  ;;  %v2813_v61 = vadd.f32 %v2190_v50, %v490_v59 }
 0x1db   : > { %v2194_v52 = vpop.f32.mrb[2].mxu1  ;;  %v2815_v62 = vadd.f32 %v2192_v51, %v494_v60 }
 0x1dc   : > { %v2196_v53 = vpop.f32.mrb[3].mxu1  ;;  %v2817_v0 = vadd.f32 %v2194_v52, %v490_v59 }
 0x1dd   : > { %v2819_v3 = vadd.f32 %v2196_v53, %v494_v60 }
 0x21a   : > { %v2405_v63 = vpop.f32.mrb[0].mxu0 }
 0x21b   : > { %v2814_v1 = vadd.f32 %v2813_v61, %v2405_v63  ;;  %v2407_v2 = vpop.f32.mrb[1].mxu0 }
 0x21c   : > { %v2816_v4 = vadd.f32 %v2815_v62, %v2407_v2  ;;  %v2409_v5 = vpop.f32.mrb[2].mxu0 }
 0x21d   : > { %v2414_v6 = vmax.f32 %v2814_v1, 0.0  ;;  %v2818_v7 = vadd.f32 %v2817_v0, %v2409_v5  ;;  %v2411_v8 = vpop.f32.mrb[3].mxu0 }
 0x21e   : > { %v2415_v9 = vmax.f32 %v2816_v4, 0.0  ;;  %v2820_v10 = vadd.f32 %v2819_v3, %v2411_v8 }
 0x21f   : > { %v2416_v11 = vmax.f32 %v2818_v7, 0.0 }
 0x220   : > { %v2811_v12 = vpack.c.bf16 %v2415_v9, %v2414_v6  ;;  %v2417_v13 = vmax.f32 %v2820_v10, 0.0 }
 0x222   : > { %2430 = vst [vmem:[%s177_s18] sm:$0xff] %v2811_v12  ;;  %v2812_v14 = vpack.c.bf16 %v2417_v13, %v2416_v11 }
 0x224   : > { %2431 = vst [vmem:[%s177_s18 + $0x8] sm:$0xff] %v2812_v14 }
 0x225 PF: > { %s13_s12 = sadd.s32 1, %s3323_s12  }
 0x226   : > { %p10_p4 = scmp.ge.s32.totalorder %s13_s12, 4  }
 0x228   :  { %12 = sbr.rel (!%p10_p4) target bundleno = 1 (0x1), region = 62 }

</bundles_post_ra>
